<compile_context>
chip_gen: v6e
topology: v6e:2x2x1
jax: 0.10.0
libtpu: 0.0.40
codegen_flags: <defaults>
</compile_context>

<pallas_src>
import jax
import jax.numpy as jnp
from jax.experimental import pallas as pl
from jax.experimental.pallas import tpu as pltpu


EMBEDDING_SIZE = 512
R_H1, R_H2, R_H3 = 16, 32, 64          # reward MLP widths
H1, H2 = 1024, 512                     # main MLP widths


def ebm_kernel(emb_ref, rew_ref,
               wr1_ref, br1_ref, wr2_ref, br2_ref, wr3_ref, br3_ref,
               w1e_ref, w1r_ref, b1_ref, w2_ref, b2_ref, w3_ref, b3_ref,
               out_ref):
    f32 = jnp.float32
    bf16 = jnp.bfloat16

    # --- reward MLP:  1 -> 16 -> 32 -> 64, tanh activations (tiny, f32) ----
    r = rew_ref[...]                                        # [TB, 1] f32
    # Linear(1, 16): a [TB,1] @ [1,16] matmul is just a broadcasted multiply.
    h = jnp.tanh(r * wr1_ref[...] + br1_ref[...])           # [TB, 16]
    h = jnp.tanh(jnp.dot(h, wr2_ref[...],
                         preferred_element_type=f32) + br2_ref[...])   # [TB, 32]
    h = jnp.tanh(jnp.dot(h, wr3_ref[...],
                         preferred_element_type=f32) + br3_ref[...])   # [TB, 64]

    # --- fc1 on concat([embedding, r]) via split weights (bf16 MXU dots) ---
    x = jnp.dot(emb_ref[...], w1e_ref[...],
                preferred_element_type=f32)                 # [TB, 1024] f32 acc
    x = x + jnp.dot(h.astype(bf16), w1r_ref[...],
                    preferred_element_type=f32)
    x = jnp.tanh(x + b1_ref[...])                           # f32 tanh

    # --- fc2 (bf16 MXU dot, f32 accumulate) ---------------------------------
    x = jnp.tanh(jnp.dot(x.astype(bf16), w2_ref[...],
                         preferred_element_type=f32) + b2_ref[...])     # [TB, 512]

    # --- fc3: Linear(512, 1) as a broadcast-multiply + lane reduction -------
    score = jnp.sum(x * w3_ref[...], axis=-1, keepdims=True) + b3_ref[...]  # [TB, 1]
    out_ref[...] = score.astype(out_ref.dtype)


def ebm_dnn_forward(embedding, reward, params, *, tb=256):
    """embedding: [B, E], reward: [B] -> score [B, 1] f32.

    B is padded up to a multiple of `tb` inside the wrapper; padded rows are
    sliced off the result.
    """
    B, E = embedding.shape
    n_tiles = pl.cdiv(B, tb)
    Bp = n_tiles * tb
    pad = Bp - B

    emb = embedding.astype(jnp.bfloat16)            # bf16 feed for the MXU
    rew = reward.reshape(B, 1).astype(jnp.float32)
    if pad:
        emb = jnp.pad(emb, ((0, pad), (0, 0)))
        rew = jnp.pad(rew, ((0, pad), (0, 0)))

    (wr1, br1, wr2, br2, wr3, br3, w1e, w1r, b1, w2, b2, w3, b3) = params

    # Weights/biases never change across grid steps -> single-buffer them.
    def full(arr):
        return pl.BlockSpec(arr.shape, lambda i: (0, 0),
                            pipeline_mode=pl.Buffered(buffer_count=1))

    grid = (n_tiles,)
    in_specs = [
        pl.BlockSpec((tb, E), lambda i: (i, 0)),   # embedding tile (bf16)
        pl.BlockSpec((tb, 1), lambda i: (i, 0)),   # reward tile (f32)
        full(wr1), full(br1), full(wr2), full(br2), full(wr3), full(br3),
        full(w1e), full(w1r), full(b1), full(w2), full(b2), full(w3), full(b3),
    ]
    out_specs = pl.BlockSpec((tb, 1), lambda i: (i, 0))

    out = pl.pallas_call(
        ebm_kernel,
        out_shape=jax.ShapeDtypeStruct((Bp, 1), jnp.float32),
        grid=grid,
        in_specs=in_specs,
        out_specs=out_specs,
        compiler_params=pltpu.CompilerParams(
            dimension_semantics=("parallel",),
            vmem_limit_bytes=32 * 1024 * 1024),
    )(emb, rew,
      wr1, br1, wr2, br2, wr3, br3, w1e, w1r, b1, w2, b2, w3, b3)

    return out[:B]


def init_params(key, embedding_size=EMBEDDING_SIZE):
    """Deterministic synthetic parameters, stored as [in, out] (pre-transposed).

    Large matmul weights (fc1/fc2) are kept in bf16 (MXU-native); small reward
    MLP weights, biases and the fc3 row stay in f32.
    """
    ks = jax.random.split(key, 13)

    def lin(kw, fan_in, fan_out):
        s = 1.0 / jnp.sqrt(jnp.float32(fan_in))
        return jax.random.uniform(kw, (fan_in, fan_out), jnp.float32, -s, s)

    wr1 = lin(ks[0], 1, R_H1)              # reward_fc1
    br1 = jnp.zeros((1, R_H1), jnp.float32)
    wr2 = lin(ks[1], R_H1, R_H2)           # reward_fc2
    br2 = jnp.zeros((1, R_H2), jnp.float32)
    wr3 = lin(ks[2], R_H2, R_H3)           # reward_fc3
    br3 = jnp.zeros((1, R_H3), jnp.float32)

    # fc1: Linear(embedding_size + 64, 1024) split into embedding / reward parts
    w1_full = lin(ks[3], embedding_size + R_H3, H1)
    w1e = w1_full[:embedding_size].astype(jnp.bfloat16)   # [E, 1024] bf16
    w1r = w1_full[embedding_size:].astype(jnp.bfloat16)   # [64, 1024] bf16
    b1 = jax.random.uniform(ks[4], (1, H1), jnp.float32, -0.01, 0.01)

    w2 = lin(ks[5], H1, H2).astype(jnp.bfloat16)           # fc2 [1024, 512] bf16
    b2 = jax.random.uniform(ks[6], (1, H2), jnp.float32, -0.01, 0.01)

    w3 = lin(ks[7], H2, 1).reshape(1, H2)  # fc3 weight stored as [1, 512] f32
    b3 = jax.random.uniform(ks[8], (1, 1), jnp.float32, -0.01, 0.01)

    return (wr1, br1, wr2, br2, wr3, br3, w1e, w1r, b1, w2, b2, w3, b3)


def reference_forward(embedding, reward, params):
    """Pure-JAX f32 reference mirroring the PyTorch forward (same weights)."""
    (wr1, br1, wr2, br2, wr3, br3, w1e, w1r, b1, w2, b2, w3, b3) = params
    f32 = jnp.float32
    emb = embedding.astype(f32)
    r = reward[:, None].astype(f32)
    r = jnp.tanh(r @ wr1 + br1)
    r = jnp.tanh(r @ wr2 + br2)
    r = jnp.tanh(r @ wr3 + br3)
    combined = jnp.concatenate([emb, r], axis=-1)
    w1 = jnp.concatenate([w1e.astype(f32), w1r.astype(f32)], axis=0)
    x = jnp.tanh(combined @ w1 + b1)
    x = jnp.tanh(x @ w2.astype(f32) + b2)
    return x @ w3.T + b3


if __name__ == "__main__":
    key = jax.random.PRNGKey(0)
    k_emb, k_rew, k_par = jax.random.split(key, 3)

    # B = 300 is not a multiple of the tile -> exercises padding, and pads to
    # 512 so the grid has 2 steps (keeps both v7x TensorCores busy).
    B = 300
    embedding = jax.random.normal(k_emb, (B, EMBEDDING_SIZE), jnp.float32)
    reward = jax.random.normal(k_rew, (B,), jnp.float32)
    params = init_params(k_par)

    score = ebm_dnn_forward(embedding, reward, params, tb=256)
    score = jax.block_until_ready(score)

    ref = reference_forward(embedding, reward, params)
    assert score.shape == (B, 1)
    # bf16 matmul operands with f32 accumulation -> relaxed tolerance.
    assert jnp.allclose(score, ref, atol=5e-2, rtol=5e-2), (
        f"mismatch vs reference, max abs err {jnp.max(jnp.abs(score - ref))}")

    print("KERNEL_OK")
</pallas_src>

<mosaic_0001>
module attributes {stable_mosaic.version = 11 : i64} {
  func.func @ebm_kernel(%arg0: i32, %arg1: memref<256x512xbf16, #tpu.memory_space<vmem>>, %arg2: memref<256x1xf32, #tpu.memory_space<vmem>>, %arg3: memref<1x16xf32, #tpu.memory_space<vmem>>, %arg4: memref<1x16xf32, #tpu.memory_space<vmem>>, %arg5: memref<16x32xf32, #tpu.memory_space<vmem>>, %arg6: memref<1x32xf32, #tpu.memory_space<vmem>>, %arg7: memref<32x64xf32, #tpu.memory_space<vmem>>, %arg8: memref<1x64xf32, #tpu.memory_space<vmem>>, %arg9: memref<512x1024xbf16, #tpu.memory_space<vmem>>, %arg10: memref<64x1024xbf16, #tpu.memory_space<vmem>>, %arg11: memref<1x1024xf32, #tpu.memory_space<vmem>>, %arg12: memref<1024x512xbf16, #tpu.memory_space<vmem>>, %arg13: memref<1x512xf32, #tpu.memory_space<vmem>>, %arg14: memref<1x512xf32, #tpu.memory_space<vmem>>, %arg15: memref<1x1xf32, #tpu.memory_space<vmem>>, %arg16: memref<256x1xf32, #tpu.memory_space<vmem>>) attributes {dimension_semantics = [#tpu.dimension_semantics<parallel>], iteration_bounds = array<i64: 2>, scalar_prefetch = 0 : i64, scratch_operands = 0 : i64, tpu.core_type = #tpu.core_type<tc>, window_params = [{transform_indices = @transform_0, window_bounds = array<i64: 256, 512>}, {transform_indices = @transform_1, window_bounds = array<i64: 256, 1>}, {pipeline_mode = #tpu.pipeline_mode<synchronous>, transform_indices = @transform_2, window_bounds = array<i64: 1, 16>}, {pipeline_mode = #tpu.pipeline_mode<synchronous>, transform_indices = @transform_3, window_bounds = array<i64: 1, 16>}, {pipeline_mode = #tpu.pipeline_mode<synchronous>, transform_indices = @transform_4, window_bounds = array<i64: 16, 32>}, {pipeline_mode = #tpu.pipeline_mode<synchronous>, transform_indices = @transform_5, window_bounds = array<i64: 1, 32>}, {pipeline_mode = #tpu.pipeline_mode<synchronous>, transform_indices = @transform_6, window_bounds = array<i64: 32, 64>}, {pipeline_mode = #tpu.pipeline_mode<synchronous>, transform_indices = @transform_7, window_bounds = array<i64: 1, 64>}, {pipeline_mode = #tpu.pipeline_mode<synchronous>, transform_indices = @transform_8, window_bounds = array<i64: 512, 1024>}, {pipeline_mode = #tpu.pipeline_mode<synchronous>, transform_indices = @transform_9, window_bounds = array<i64: 64, 1024>}, {pipeline_mode = #tpu.pipeline_mode<synchronous>, transform_indices = @transform_10, window_bounds = array<i64: 1, 1024>}, {pipeline_mode = #tpu.pipeline_mode<synchronous>, transform_indices = @transform_11, window_bounds = array<i64: 1024, 512>}, {pipeline_mode = #tpu.pipeline_mode<synchronous>, transform_indices = @transform_12, window_bounds = array<i64: 1, 512>}, {pipeline_mode = #tpu.pipeline_mode<synchronous>, transform_indices = @transform_13, window_bounds = array<i64: 1, 512>}, {pipeline_mode = #tpu.pipeline_mode<synchronous>, transform_indices = @transform_14, window_bounds = array<i64: 1, 1>}, {transform_indices = @transform_15, window_bounds = array<i64: 256, 1>}]} {
    %c0 = arith.constant 0 : index
    %c0_0 = arith.constant 0 : index
    %0 = vector.load %arg2[%c0, %c0_0] : memref<256x1xf32, #tpu.memory_space<vmem>>, vector<256x1xf32>
    %c0_1 = arith.constant 0 : index
    %c0_2 = arith.constant 0 : index
    %1 = vector.load %arg3[%c0_1, %c0_2] : memref<1x16xf32, #tpu.memory_space<vmem>>, vector<1x16xf32>
    %2 = vector.broadcast %0 : vector<256x1xf32> to vector<256x16xf32>
    %3 = vector.broadcast %1 : vector<1x16xf32> to vector<256x16xf32>
    %4 = arith.mulf %2, %3 : vector<256x16xf32>
    %c0_3 = arith.constant 0 : index
    %c0_4 = arith.constant 0 : index
    %5 = vector.load %arg4[%c0_3, %c0_4] : memref<1x16xf32, #tpu.memory_space<vmem>>, vector<1x16xf32>
    %6 = vector.broadcast %5 : vector<1x16xf32> to vector<256x16xf32>
    %7 = arith.addf %4, %6 : vector<256x16xf32>
    %8 = math.tanh %7 : vector<256x16xf32>
    %c0_5 = arith.constant 0 : index
    %c0_6 = arith.constant 0 : index
    %9 = vector.load %arg5[%c0_5, %c0_6] : memref<16x32xf32, #tpu.memory_space<vmem>>, vector<16x32xf32>
    %cst = arith.constant dense<0.000000e+00> : vector<256x32xf32>
    %10 = tpu.matmul %8, %9, %cst {dimension_numbers = #tpu.dot_dimension_numbers<[1], [0], [0], [1], [0, 0, 1, 1], [], []>} : vector<256x16xf32>, vector<16x32xf32>, vector<256x32xf32> -> vector<256x32xf32>
    %c0_7 = arith.constant 0 : index
    %c0_8 = arith.constant 0 : index
    %11 = vector.load %arg6[%c0_7, %c0_8] : memref<1x32xf32, #tpu.memory_space<vmem>>, vector<1x32xf32>
    %12 = vector.broadcast %11 : vector<1x32xf32> to vector<256x32xf32>
    %13 = arith.addf %10, %12 : vector<256x32xf32>
    %14 = math.tanh %13 : vector<256x32xf32>
    %c0_9 = arith.constant 0 : index
    %c0_10 = arith.constant 0 : index
    %15 = vector.load %arg7[%c0_9, %c0_10] : memref<32x64xf32, #tpu.memory_space<vmem>>, vector<32x64xf32>
    %cst_11 = arith.constant dense<0.000000e+00> : vector<256x64xf32>
    %16 = tpu.matmul %14, %15, %cst_11 {dimension_numbers = #tpu.dot_dimension_numbers<[1], [0], [0], [1], [0, 0, 1, 1], [], []>} : vector<256x32xf32>, vector<32x64xf32>, vector<256x64xf32> -> vector<256x64xf32>
    %c0_12 = arith.constant 0 : index
    %c0_13 = arith.constant 0 : index
    %17 = vector.load %arg8[%c0_12, %c0_13] : memref<1x64xf32, #tpu.memory_space<vmem>>, vector<1x64xf32>
    %18 = vector.broadcast %17 : vector<1x64xf32> to vector<256x64xf32>
    %19 = arith.addf %16, %18 : vector<256x64xf32>
    %20 = math.tanh %19 : vector<256x64xf32>
    %c0_14 = arith.constant 0 : index
    %c0_15 = arith.constant 0 : index
    %21 = vector.load %arg1[%c0_14, %c0_15] : memref<256x512xbf16, #tpu.memory_space<vmem>>, vector<256x512xbf16>
    %c0_16 = arith.constant 0 : index
    %c0_17 = arith.constant 0 : index
    %22 = vector.load %arg9[%c0_16, %c0_17] : memref<512x1024xbf16, #tpu.memory_space<vmem>>, vector<512x1024xbf16>
    %cst_18 = arith.constant dense<0.000000e+00> : vector<256x1024xf32>
    %23 = tpu.matmul %21, %22, %cst_18 {dimension_numbers = #tpu.dot_dimension_numbers<[1], [0], [0], [1], [0, 0, 1, 1], [], []>} : vector<256x512xbf16>, vector<512x1024xbf16>, vector<256x1024xf32> -> vector<256x1024xf32>
    %24 = arith.truncf %20 : vector<256x64xf32> to vector<256x64xbf16>
    %c0_19 = arith.constant 0 : index
    %c0_20 = arith.constant 0 : index
    %25 = vector.load %arg10[%c0_19, %c0_20] : memref<64x1024xbf16, #tpu.memory_space<vmem>>, vector<64x1024xbf16>
    %cst_21 = arith.constant dense<0.000000e+00> : vector<256x1024xf32>
    %26 = tpu.matmul %24, %25, %cst_21 {dimension_numbers = #tpu.dot_dimension_numbers<[1], [0], [0], [1], [0, 0, 1, 1], [], []>} : vector<256x64xbf16>, vector<64x1024xbf16>, vector<256x1024xf32> -> vector<256x1024xf32>
    %27 = arith.addf %23, %26 : vector<256x1024xf32>
    %c0_22 = arith.constant 0 : index
    %c0_23 = arith.constant 0 : index
    %28 = vector.load %arg11[%c0_22, %c0_23] : memref<1x1024xf32, #tpu.memory_space<vmem>>, vector<1x1024xf32>
    %29 = vector.broadcast %28 : vector<1x1024xf32> to vector<256x1024xf32>
    %30 = arith.addf %27, %29 : vector<256x1024xf32>
    %31 = math.tanh %30 : vector<256x1024xf32>
    %32 = arith.truncf %31 : vector<256x1024xf32> to vector<256x1024xbf16>
    %c0_24 = arith.constant 0 : index
    %c0_25 = arith.constant 0 : index
    %33 = vector.load %arg12[%c0_24, %c0_25] : memref<1024x512xbf16, #tpu.memory_space<vmem>>, vector<1024x512xbf16>
    %cst_26 = arith.constant dense<0.000000e+00> : vector<256x512xf32>
    %34 = tpu.matmul %32, %33, %cst_26 {dimension_numbers = #tpu.dot_dimension_numbers<[1], [0], [0], [1], [0, 0, 1, 1], [], []>} : vector<256x1024xbf16>, vector<1024x512xbf16>, vector<256x512xf32> -> vector<256x512xf32>
    %c0_27 = arith.constant 0 : index
    %c0_28 = arith.constant 0 : index
    %35 = vector.load %arg13[%c0_27, %c0_28] : memref<1x512xf32, #tpu.memory_space<vmem>>, vector<1x512xf32>
    %36 = vector.broadcast %35 : vector<1x512xf32> to vector<256x512xf32>
    %37 = arith.addf %34, %36 : vector<256x512xf32>
    %38 = math.tanh %37 : vector<256x512xf32>
    %c0_29 = arith.constant 0 : index
    %c0_30 = arith.constant 0 : index
    %39 = vector.load %arg14[%c0_29, %c0_30] : memref<1x512xf32, #tpu.memory_space<vmem>>, vector<1x512xf32>
    %40 = vector.broadcast %39 : vector<1x512xf32> to vector<256x512xf32>
    %41 = arith.mulf %38, %40 : vector<256x512xf32>
    %cst_31 = arith.constant dense<0.000000e+00> : vector<256xf32>
    %42 = vector.multi_reduction <add>, %41, %cst_31 [1] : vector<256x512xf32> to vector<256xf32>
    %43 = vector.shape_cast %42 : vector<256xf32> to vector<256x1xf32>
    %c0_32 = arith.constant 0 : index
    %c0_33 = arith.constant 0 : index
    %44 = vector.load %arg15[%c0_32, %c0_33] : memref<1x1xf32, #tpu.memory_space<vmem>>, vector<1x1xf32>
    %45 = vector.broadcast %44 : vector<1x1xf32> to vector<256x1xf32>
    %46 = arith.addf %43, %45 : vector<256x1xf32>
    %c0_34 = arith.constant 0 : index
    %c0_35 = arith.constant 0 : index
    %47 = vector.load %arg16[%c0_34, %c0_35] : memref<256x1xf32, #tpu.memory_space<vmem>>, vector<256x1xf32>
    tpu.vector_store %arg16[%c0_34, %c0_35], %46 {strides = array<i32>} : memref<256x1xf32, #tpu.memory_space<vmem>>, vector<256x1xf32>,
    return
  }
  func.func @transform_0(%arg0: i32) -> (i32, i32) {
    %c0_i32 = arith.constant 0 : i32
    %c0_i32_0 = arith.constant 0 : i32
    return %arg0, %c0_i32 : i32, i32
  }
  func.func @transform_1(%arg0: i32) -> (i32, i32) {
    %c0_i32 = arith.constant 0 : i32
    %c0_i32_0 = arith.constant 0 : i32
    return %arg0, %c0_i32 : i32, i32
  }
  func.func @transform_2(%arg0: i32) -> (i32, i32) {
    %c0_i32 = arith.constant 0 : i32
    %c0_i32_0 = arith.constant 0 : i32
    %c0_i32_1 = arith.constant 0 : i32
    return %c0_i32, %c0_i32_0 : i32, i32
  }
  func.func @transform_3(%arg0: i32) -> (i32, i32) {
    %c0_i32 = arith.constant 0 : i32
    %c0_i32_0 = arith.constant 0 : i32
    %c0_i32_1 = arith.constant 0 : i32
    return %c0_i32, %c0_i32_0 : i32, i32
  }
  func.func @transform_4(%arg0: i32) -> (i32, i32) {
    %c0_i32 = arith.constant 0 : i32
    %c0_i32_0 = arith.constant 0 : i32
    %c0_i32_1 = arith.constant 0 : i32
    return %c0_i32, %c0_i32_0 : i32, i32
  }
  func.func @transform_5(%arg0: i32) -> (i32, i32) {
    %c0_i32 = arith.constant 0 : i32
    %c0_i32_0 = arith.constant 0 : i32
    %c0_i32_1 = arith.constant 0 : i32
    return %c0_i32, %c0_i32_0 : i32, i32
  }
  func.func @transform_6(%arg0: i32) -> (i32, i32) {
    %c0_i32 = arith.constant 0 : i32
    %c0_i32_0 = arith.constant 0 : i32
    %c0_i32_1 = arith.constant 0 : i32
    return %c0_i32, %c0_i32_0 : i32, i32
  }
  func.func @transform_7(%arg0: i32) -> (i32, i32) {
    %c0_i32 = arith.constant 0 : i32
    %c0_i32_0 = arith.constant 0 : i32
    %c0_i32_1 = arith.constant 0 : i32
    return %c0_i32, %c0_i32_0 : i32, i32
  }
  func.func @transform_8(%arg0: i32) -> (i32, i32) {
    %c0_i32 = arith.constant 0 : i32
    %c0_i32_0 = arith.constant 0 : i32
    %c0_i32_1 = arith.constant 0 : i32
    return %c0_i32, %c0_i32_0 : i32, i32
  }
  func.func @transform_9(%arg0: i32) -> (i32, i32) {
    %c0_i32 = arith.constant 0 : i32
    %c0_i32_0 = arith.constant 0 : i32
    %c0_i32_1 = arith.constant 0 : i32
    return %c0_i32, %c0_i32_0 : i32, i32
  }
  func.func @transform_10(%arg0: i32) -> (i32, i32) {
    %c0_i32 = arith.constant 0 : i32
    %c0_i32_0 = arith.constant 0 : i32
    %c0_i32_1 = arith.constant 0 : i32
    return %c0_i32, %c0_i32_0 : i32, i32
  }
  func.func @transform_11(%arg0: i32) -> (i32, i32) {
    %c0_i32 = arith.constant 0 : i32
    %c0_i32_0 = arith.constant 0 : i32
    %c0_i32_1 = arith.constant 0 : i32
    return %c0_i32, %c0_i32_0 : i32, i32
  }
  func.func @transform_12(%arg0: i32) -> (i32, i32) {
    %c0_i32 = arith.constant 0 : i32
    %c0_i32_0 = arith.constant 0 : i32
    %c0_i32_1 = arith.constant 0 : i32
    return %c0_i32, %c0_i32_0 : i32, i32
  }
  func.func @transform_13(%arg0: i32) -> (i32, i32) {
    %c0_i32 = arith.constant 0 : i32
    %c0_i32_0 = arith.constant 0 : i32
    %c0_i32_1 = arith.constant 0 : i32
    return %c0_i32, %c0_i32_0 : i32, i32
  }
  func.func @transform_14(%arg0: i32) -> (i32, i32) {
    %c0_i32 = arith.constant 0 : i32
    %c0_i32_0 = arith.constant 0 : i32
    %c0_i32_1 = arith.constant 0 : i32
    return %c0_i32, %c0_i32_0 : i32, i32
  }
  func.func @transform_15(%arg0: i32) -> (i32, i32) {
    %c0_i32 = arith.constant 0 : i32
    %c0_i32_0 = arith.constant 0 : i32
    return %arg0, %c0_i32 : i32, i32
  }
}

</mosaic_0001>

<bundles_post_ra>
// kernel: tpu_custom_call.1
= control target key start
LH: loop header
LB: loop body
LE: loop exit
PB: predicated region body
PF: predicated region fallthrough
CT: control target
= control target key end

     0   :  { %s17615_s0 = inlined_call_operand.hbm [shape: bf16[512,512], index: 0, kind: input, shape index: {}]   ;;  %s17616_s1 = inlined_call_operand.vmem [shape: f32[512,1], index: 1, kind: input, shape index: {}]   ;;  %s17617_s2 = inlined_call_operand.vmem [shape: f32[1,16], index: 2, kind: input, shape index: {}]   ;;  %s17618_s3 = inlined_call_operand.vmem [shape: f32[1,16], index: 3, kind: input, shape index: {}]   ;;  %s17619_s4 = inlined_call_operand.vmem [shape: f32[16,32], index: 4, kind: input, shape index: {}]   ;;  %s17620_s5 = inlined_call_operand.vmem [shape: f32[1,32], index: 5, kind: input, shape index: {}]   ;;  %s17621_s6 = inlined_call_operand.vmem [shape: f32[32,64], index: 6, kind: input, shape index: {}]   ;;  %s17622_s7 = inlined_call_operand.vmem [shape: f32[1,64], index: 7, kind: input, shape index: {}]   ;;  %s17623_s8 = inlined_call_operand.hbm [shape: bf16[512,1024], index: 8, kind: input, shape index: {}]   ;;  %s17624_s9 = inlined_call_operand.vmem [shape: bf16[64,1024], index: 9, kind: input, shape index: {}]   ;;  %s17625_s10 = inlined_call_operand.vmem [shape: f32[1,1024], index: 10, kind: input, shape index: {}]   ;;  %s17626_s11 = inlined_call_operand.hbm [shape: bf16[1024,512], index: 11, kind: input, shape index: {}]   ;;  %s17627_s12 = inlined_call_operand.vmem [shape: f32[1,512], index: 12, kind: input, shape index: {}]   ;;  %s17628_s13 = inlined_call_operand.vmem [shape: f32[1,512], index: 13, kind: input, shape index: {}]   ;;  %s17629_s14 = inlined_call_operand.<no memory space> [shape: f32[1,1], index: 14, kind: input, shape index: {}]   ;;  %s17630_s15 = inlined_call_operand.vmem [shape: f32[512,1], index: 15, kind: output, shape index: {}]  }
   0x1   :  { %17796 = sst [smem:[#allocation272_spill]] %s17623_s8  ;;  %v20_v0 = vstv %s17629_s14 }
   0x2   :  { %17797 = sst [smem:[#allocation273_spill]] %s17626_s11  ;;  %21 = vst [vmem:[#allocation2] sm:$0x1] %v20_v0 }
   0x3   :  { %17798 = sst [smem:[#allocation274_spill]] %s17627_s12 }
   0x4   :  { %17799 = sst [smem:[#allocation275_spill]] %s17628_s13 }
   0x5   :  { %17800 = sst [smem:[#allocation276_spill]] %s17630_s15 }
   0x6   :  { %22 = vsyncpa [#allocation4], 0 }
   0x7   :  { %24 = vsyncpa [#allocation4 + $0x1], 0 }
   0x8   :  { %25 = vsyncpa [#allocation6], 0  ;;  %s13283_s20 = smov 0   ;;  %s13285_s21 = smov 0  }
   0x9   :  { %s13287_s22 = smov 0   ;;  %s13289_s23 = smov 0  }
   0xa LB: > { %s17633_s14 = sadd.s32 4294967295, %s13190_s23   ;;  %p51_p0 = scmp.ne.s32.totalorder %s13182_s21, %s13178_s20  ;;  %s13190_s23 = sphi %s13289_s23, %s18816_s23   ;;  %s13186_s22 = sphi %s13287_s22, %s18815_s22   ;;  %s13182_s21 = sphi %s13285_s21, %s18814_s21   ;;  %s13178_s20 = sphi %s13283_s20, %s18813_s20  }
   0xb   : > { %p13305_p1 = scmp.eq.s32.totalorder %s17633_s14, 0  ;;  %p10489_p2 = scmp.ge.s32.totalorder %s13190_s23, 1 }
   0xc   : > { %p387_p3 = scmp.lt.s32.totalorder %s13190_s23, 3  ;;  %s13192_s27 = smov [#allocation5]  }
   0xd   : > { %s17801_s24 = scalar_select %p13305_p1, 1, 0 }
   0xe   : > { %p13313_p4 = por %p13305_p1, %p51_p0  ;;  %p13317_p5 = pnand %p10489_p2, %p387_p3 }
   0xf   : > { %s417_s28 = sshll.u32 %s13192_s27, 4  ;;  %s13193_s30 = smov [#allocation7]   ;;  %s418_s28 = int_to_ptr.vmem [resolvable:$true] %s417_s28 }
  0x10   : > { %s17802_s25 = scalar_select %p13313_p4, 1, 0 }
  0x11   : > { %s17803_s26 = scalar_select %p13317_p5, 1, 0 }
  0x12   : > { %p11438_p6 = pneg %p13317_p5  ;;  %s436_s16 = sshll.u32 %s13193_s30, 4  ;;  %s437_s16 = int_to_ptr.vmem [resolvable:$true] %s436_s16 }
  0x13   : > { %s13083_s17 = scalar_lea.vmem %s418_s28, 32768  ;;  %p13091_p12 = scmp.lt.s32.totalorder %s418_s28, %s418_s28 }
  0x14   : > { %p13325_p7 = pnand %p11438_p6, %p13305_p1  ;;  %p13084_p9 = scmp.ne.s32.totalorder %s418_s28, %s13083_s17 }
  0x15   : > { %p13092_p13 = scmp.lt.s32.totalorder %s13083_s17, %s13083_s17 }
  0x16   : > { %p13074_p8 = pneg %p13325_p7 }
  0x17   : > { %p13093_p0 = por %p13092_p13, %p13091_p12 }
  0x18   : > { %p13086_p10 = pnand %p13084_p9, %p13074_p8 }
  0x1a   : > { %p13087_p11 = pneg %p13086_p10 }
  0x1c   : > { %p13094_p2 = pnand %p13093_p0, %p13087_p11 }
  0x1e   : > { %13097 = shalt.err (!%p13094_p2)
}
  0x1f   : > { %s13194_s18 = smov 512   ;;  %s13195_s19 = smov 32  }
  0x20   : > { %s17805_s8 = sld [smem:[#allocation272_spill]]  ;;  %s13109_s30 = scalar_lea.vmem %s437_s16, 32768 }
  0x21   : > { %p13110_p3 = scmp.ne.s32.totalorder %s437_s16, %s13109_s30  ;;  %p13117_p10 = scmp.lt.s32.totalorder %s437_s16, %s437_s16 }
  0x22   : > { %p13118_p1 = scmp.lt.s32.totalorder %s13109_s30, %s13109_s30 }
  0x23   : > { %p13112_p6 = pnand %p13110_p3, %p13074_p8 }
  0x24   : > { %p13119_p12 = por %p13118_p1, %p13117_p10 }
  0x25   : > { %p13113_p9 = pneg %p13112_p6 }
  0x26   : > { %11441 = dma.hbm_to_vmem [thread:$0]  (!%p13325_p7), %s17805_s8, 32768, %s418_s28, [#allocation6], %s13194_s18, %s13194_s18, %s13195_s19  }
  0x27   : > { %p13120_p11 = pnand %p13119_p12, %p13113_p9 }
  0x29   : > { %13123 = shalt.err (!%p13120_p11)
}
  0x2a   : > { %s17636_s17 = smov 256   ;;  %s17637_s28 = smov 16  }
  0x2b   : > { %s17806_s11 = sld [smem:[#allocation273_spill]]  ;;  %s13351_s20 = sadd.s32 1, %s13190_s23  }
  0x2c   : > { %s35_s27 = ssub.s32 %s13190_s23, %s13351_s20  ;;  %s38_s30 = sadd.s32 1, %s13186_s22 }
  0x2d   : > { %p36_p1 = scmp.eq.s32.totalorder %s35_s27, 0  ;;  %p45_p8 = scmp.ne.s32.totalorder %s13186_s22, %s13182_s21 }
  0x2e   : > { %p46_p13 = scmp.eq.s32.totalorder %s13190_s23, 0  ;;  %p11451_p2 = scmp.lt.s32.totalorder %s13190_s23, 2 }
  0x2f   : > { %s13360_s14 = scalar_select %p36_p1, %s13186_s22, %s38_s30  }
  0x30   : > { %p47_p0 = por %p46_p13, %p45_p8  ;;  %s459_s29 = sand.u32 1, %s13186_s22  }
  0x31   : > { %11444 = dma.hbm_to_vmem [thread:$0]  (!%p13325_p7), %s17806_s11, 32768, %s437_s16, [#allocation6], %s17636_s17, %s17636_s17, %s17637_s28  }
  0x32   : > { %s11249_s8 = sshll.u32 %s13190_s23, 13  ;;  %s10493_s15 = sshll.u32 %s459_s29, 9 }
  0x33   : > { %s13368_s18 = scalar_lea.hbm %s17615_s0, %s11249_s8  ;;  %s463_s16 = scalar_lea.vmem [#allocation3], %s10493_s15 }
  0x34   : > { %s471_s19 = sshll.u32 %s463_s16, 4  ;;  %p13370_p7 = pnand %p11451_p2, %p47_p0  ;;  %s13374_s19 = int_to_ptr.vmem [resolvable:$true] %s471_s19 }
  0x35   : > { %s13376_s30 = scalar_lea.sflag [#allocation4], %s459_s29  ;;  %s13124_s17 = scalar_lea.hbm %s13368_s18, 8192 }
  0x36   : > { %p13125_p3 = scmp.ne.s32.totalorder %s13368_s18, %s13124_s17  ;;  %p13126_p6 = pneg %p13370_p7 }
  0x37   : > { %s13129_s13 = scalar_lea.hbm %s17615_s0, 16384  ;;  %p13130_p12 = scmp.lt.s32.totalorder %s13368_s18, %s17615_s0 }
  0x38   : > { %p13127_p9 = pnand %p13126_p6, %p13125_p3  ;;  %p13131_p11 = scmp.lt.s32.totalorder %s13129_s13, %s13124_s17 }
  0x3a   : > { %p13128_p10 = pneg %p13127_p9  ;;  %p13132_p1 = por %p13131_p11, %p13130_p12 }
  0x3c   : > { %p13133_p8 = pnand %p13132_p1, %p13128_p10 }
  0x3e   : > { %13136 = shalt.err (!%p13133_p8)
}
  0x3f   : > { %s13137_s29 = scalar_lea.vmem %s13374_s19, 8192  ;;  %s13198_s28 = smov [#allocation3]  }
  0x40   : > { %p13138_p13 = scmp.ne.s32.totalorder %s13374_s19, %s13137_s29  ;;  %s13142_s11 = sshll.u32 %s13198_s28, 4  ;;  %s13143_s11 = int_to_ptr.vmem [resolvable:$false] %s13142_s11 }
  0x41   : > { %s13144_s8 = scalar_lea.vmem %s13143_s11, 16384  ;;  %p13145_p3 = scmp.lt.s32.totalorder %s13374_s19, %s13143_s11 }
  0x42   : > { %p13140_p0 = pnand %p13138_p13, %p13126_p6  ;;  %p13146_p9 = scmp.lt.s32.totalorder %s13144_s8, %s13137_s29 }
  0x44   : > { %p13141_p2 = pneg %p13140_p0  ;;  %p13147_p4 = por %p13146_p9, %p13145_p3 }
  0x46   : > { %p13148_p5 = pnand %p13147_p4, %p13141_p2 }
  0x48   : > { %13151 = shalt.err (!%p13148_p5)
}
  0x49   : > { %s17808_s17 = smov 16   ;;  %s17809_s12 = smov 256  }
  0x4a   : > { %11448 = dma.hbm_to_vmem [thread:$0]  (!%p13370_p7), %s13368_s18, 8192, %s13374_s19, %s13376_s30, %s17809_s12, %s17809_s12, %s17808_s17  }
  0x4b   : > { %p17810_p6 = scmp.ne.s32.totalorder %s17803_s26, 0 }
  0x4d   : > { %492 = sbr.rel (%p17810_p6) target bundleno = 2308 (0x904), region = 80 }
  0x52   : > { %s494_s28 = sand.u32 1, %s13182_s21   ;;  %p17811_p4 = scmp.ne.s32.totalorder %s17802_s25, 0 }
  0x53   : > { %s10498_s11 = sshll.u32 %s494_s28, 9  ;;  %s495_s13 = scalar_lea.sflag [#allocation4], %s494_s28 }
  0x54   : > { %s13403_s15 = scalar_lea.vmem [#allocation3], %s10498_s11 }
  0x55   : > { %13169 = dma.done.wait (%p17811_p4), %s495_s13, 8192  }
  0x56   : > { %13171 = vsyncadd (%p17811_p4), %s495_s13, 4294959104  ;;  %p17812_p5 = scmp.ne.s32.totalorder %s17801_s24, 0 }
  0x58   : > { %13173 = dma.done.wait (%p17812_p5), [#allocation6], 65536  }
  0x59   : > { %13175 = vsyncadd (%p17812_p5), [#allocation6], 4294901760  ;;  %s17813_s26 = sadd.s32 4294967295, %s13190_s23   ;;  %v13199_v1 = vmov 0   ;;  %v875_v12 = vld [vmem:[%s17619_s4 + $0x8] sm:$0xff]  ;;  %v874_v15 = vld [vmem:[%s17619_s4] sm:$0xff] }
  0x5a   : > { %s10501_s18 = sshll.u32 %s17813_s26, 5  ;;  %11494 = vset.pattern.permute.xlu1 %v13199_v1  ;;  %11493 = vset.pattern.permute.xlu0 %v13199_v1  ;;  %v13468_v36 = vld [vmem:[%s17617_s2] ss:$0 sm:$0xff]  ;;  %vm883_vm0 = vcmask 130048   ;;  %vm1248_vm1 = vcmask 261120   ;;  %vm2130_vm2 = vcmask 523264  }
  0x5b   : > { %p560_p7 = scmp.lt.s32.totalorder %s10501_s18, 63  ;;  %11320 = vmatprep.subr.mxu0 %v875_v12  ;;  %v13473_v37 = vld [vmem:[%s17618_s3] ss:$0 sm:$0xff]  ;;  %s18492_s13 = sld [smem:[#allocation274_spill]]  ;;  %vm10356_vm3 = vcmask 7168  }
  0x5c   : > { %11321 = vmatpush3.msra.mxu0 %v875_v12  ;;  %s18601_s27 = sld [smem:[#allocation275_spill]] }
  0x5d   : > { %s18818_s18 = smov (!%p560_p7, %s10501_s18), 63  ;;  %11322 = vmatprep.subr.mxu0 %v874_v15  ;;  %s18811_s17 = sld [smem:[#allocation276_spill]] }
  0x5e   : > { %s10502_s25 = sshll.u32 %s18818_s18, 3  ;;  %11323 = vmatpush3.msra.mxu0 %v874_v15 }
  0x5f   : > { %s13425_s24 = scalar_lea.vmem %s17616_s1, %s10502_s25 }
  0x60   : > { %v574_v2 = vld [vmem:[%s13425_s24 + $0x10] sm:$0xff]  ;;  %v572_v3 = vld [vmem:[%s13425_s24] sm:$0xff]  ;;  %v575_v4 = vld [vmem:[%s13425_s24 + $0x18] sm:$0xff] }
  0x61   : > { %617 = vperm.xlu1 %11494, %v574_v2   ;;  %607 = vperm.xlu0 %11493, %v572_v3   ;;  %v573_v5 = vld [vmem:[%s13425_s24 + $0x8] sm:$0xff]  ;;  %v576_v7 = vld [vmem:[%s13425_s24 + $0x20] sm:$0xff]  ;;  %v579_v8 = vld [vmem:[%s13425_s24 + $0x38] sm:$0xff] }
  0x62   : > { %v577_v6 = vld [vmem:[%s13425_s24 + $0x28] sm:$0xff]  ;;  %v578_v9 = vld [vmem:[%s13425_s24 + $0x30] sm:$0xff]  ;;  %v580_v11 = vld [vmem:[%s13425_s24 + $0x40] sm:$0xff] }
  0x63   : > { %v581_v10 = vld [vmem:[%s13425_s24 + $0x48] sm:$0xff]  ;;  %v583_v13 = vld [vmem:[%s13425_s24 + $0x58] sm:$0xff]  ;;  %v582_v14 = vld [vmem:[%s13425_s24 + $0x50] sm:$0xff] }
  0x64   : > { %v585_v16 = vld [vmem:[%s13425_s24 + $0x68] sm:$0xff]  ;;  %v584_v17 = vld [vmem:[%s13425_s24 + $0x60] sm:$0xff]  ;;  %v587_v18 = vld [vmem:[%s13425_s24 + $0x78] sm:$0xff] }
  0x65   : > { %622 = vperm.xlu1 %11494, %v575_v4   ;;  %612 = vperm.xlu0 %11493, %v573_v5   ;;  %v586_v19 = vld [vmem:[%s13425_s24 + $0x70] sm:$0xff]  ;;  %v589_v20 = vld [vmem:[%s13425_s24 + $0x88] sm:$0xff]  ;;  %v588_v21 = vld [vmem:[%s13425_s24 + $0x80] sm:$0xff] }
  0x66   : > { %v591_v22 = vld [vmem:[%s13425_s24 + $0x98] sm:$0xff]  ;;  %v590_v23 = vld [vmem:[%s13425_s24 + $0x90] sm:$0xff]  ;;  %v593_v24 = vld [vmem:[%s13425_s24 + $0xa8] sm:$0xff] }
  0x67   : > { %v592_v25 = vld [vmem:[%s13425_s24 + $0xa0] sm:$0xff]  ;;  %v595_v26 = vld [vmem:[%s13425_s24 + $0xb8] sm:$0xff]  ;;  %v594_v27 = vld [vmem:[%s13425_s24 + $0xb0] sm:$0xff] }
  0x68   : > { %v597_v28 = vld [vmem:[%s13425_s24 + $0xc8] sm:$0xff]  ;;  %v596_v29 = vld [vmem:[%s13425_s24 + $0xc0] sm:$0xff]  ;;  %v599_v30 = vld [vmem:[%s13425_s24 + $0xd8] sm:$0xff] }
  0x69   : > { %632 = vperm.xlu1 %11494, %v577_v6   ;;  %627 = vperm.xlu0 %11493, %v576_v7   ;;  %v598_v31 = vld [vmem:[%s13425_s24 + $0xd0] sm:$0xff]  ;;  %v601_v32 = vld [vmem:[%s13425_s24 + $0xe8] sm:$0xff]  ;;  %v600_v33 = vld [vmem:[%s13425_s24 + $0xe0] sm:$0xff] }
  0x6a   : > { %v603_v34 = vld [vmem:[%s13425_s24 + $0xf8] sm:$0xff]  ;;  %v602_v35 = vld [vmem:[%s13425_s24 + $0xf0] sm:$0xff] }
  0x6d   : > { %642 = vperm.xlu1 %11494, %v579_v8   ;;  %637 = vperm.xlu0 %11493, %v578_v9  }
  0x71   : > { %652 = vperm.xlu1 %11494, %v581_v10   ;;  %647 = vperm.xlu0 %11493, %v580_v11  }
  0x75   : > { %662 = vperm.xlu1 %11494, %v583_v13   ;;  %657 = vperm.xlu0 %11493, %v582_v14  }
  0x79   : > { %672 = vperm.xlu1 %11494, %v585_v16   ;;  %667 = vperm.xlu0 %11493, %v584_v17  }
  0x7d   : > { %682 = vperm.xlu1 %11494, %v587_v18   ;;  %677 = vperm.xlu0 %11493, %v586_v19  }
  0x81   : > { %692 = vperm.xlu1 %11494, %v589_v20   ;;  %687 = vperm.xlu0 %11493, %v588_v21  }
  0x85   : > { %702 = vperm.xlu1 %11494, %v591_v22   ;;  %697 = vperm.xlu0 %11493, %v590_v23  }
  0x89   : > { %712 = vperm.xlu1 %11494, %v593_v24   ;;  %707 = vperm.xlu0 %11493, %v592_v25  }
  0x8d   : > { %722 = vperm.xlu1 %11494, %v595_v26   ;;  %717 = vperm.xlu0 %11493, %v594_v27  }
  0x91   : > { %732 = vperm.xlu1 %11494, %v597_v28   ;;  %727 = vperm.xlu0 %11493, %v596_v29  }
  0x95   : > { %742 = vperm.xlu1 %11494, %v599_v30   ;;  %737 = vperm.xlu0 %11493, %v598_v31  }
  0x99   : > { %752 = vperm.xlu1 %11494, %v601_v32   ;;  %747 = vperm.xlu0 %11493, %v600_v33  }
  0x9d   : > { %762 = vperm.xlu1 %11494, %v603_v34   ;;  %757 = vperm.xlu0 %11493, %v602_v35  }
  0xdc   : > { %v618_v38 = vpop.permute.xlu1 %617  ;;  %v608_v39 = vpop.permute.xlu0 %607 }
  0xdd   : > { %v773_v40 = vmul.f32 %v13468_v36, %v618_v38  ;;  %v771_v41 = vmul.f32 %v13468_v36, %v608_v39 }
  0xdf   : > { %v810_v42 = vadd.f32 %v13473_v37, %v771_v41  ;;  %v812_v45 = vadd.f32 %v13473_v37, %v773_v40 }
  0xe0   : > { %v623_v43 = vpop.permute.xlu1 %622  ;;  %v613_v44 = vpop.permute.xlu0 %612 }
  0xe1   : > { %v774_v46 = vmul.f32 %v13468_v36, %v623_v43  ;;  %v772_v47 = vmul.f32 %v13468_v36, %v613_v44  ;;  %11975 = vtanh.f32 %v810_v42 }
  0xe2   : > { %11977 = vtanh.f32 %v812_v45 }
  0xe3   : > { %v811_v48 = vadd.f32 %v13473_v37, %v772_v47  ;;  %v813_v49 = vadd.f32 %v13473_v37, %v774_v46 }
  0xe4   : > { %v633_v50 = vpop.permute.xlu1 %632  ;;  %v628_v51 = vpop.permute.xlu0 %627 }
  0xe5   : > { %v776_v52 = vmul.f32 %v13468_v36, %v633_v50  ;;  %v775_v53 = vmul.f32 %v13468_v36, %v628_v51  ;;  %11979 = vtanh.f32 %v811_v48 }
  0xe6   : > { %11981 = vtanh.f32 %v813_v49 }
  0xe7   : > { %v814_v54 = vadd.f32 %v13473_v37, %v775_v53  ;;  %v815_v57 = vadd.f32 %v13473_v37, %v776_v52 }
  0xe8   : > { %v643_v55 = vpop.permute.xlu1 %642  ;;  %v638_v56 = vpop.permute.xlu0 %637 }
  0xe9   : > { %v778_v58 = vmul.f32 %v13468_v36, %v643_v55  ;;  %v777_v59 = vmul.f32 %v13468_v36, %v638_v56  ;;  %11983 = vtanh.f32 %v814_v54 }
  0xea   : > { %11985 = vtanh.f32 %v815_v57 }
  0xeb   : > { %v816_v60 = vadd.f32 %v13473_v37, %v777_v59  ;;  %v817_v63 = vadd.f32 %v13473_v37, %v778_v58 }
  0xec   : > { %v653_v61 = vpop.permute.xlu1 %652  ;;  %v648_v62 = vpop.permute.xlu0 %647 }
  0xed   : > { %v780_v0 = vmul.f32 %v13468_v36, %v653_v61  ;;  %v779_v2 = vmul.f32 %v13468_v36, %v648_v62  ;;  %11987 = vtanh.f32 %v816_v60 }
  0xee   : > { %v11976_v3 = vpop.eup %11975  ;;  %11989 = vtanh.f32 %v817_v63 }
  0xef   : > { %v818_v4 = vadd.f32 %v13473_v37, %v779_v2  ;;  %11324 = vmatprep.mubr.msk.f32.mxu0 %vm883_vm0, %v11976_v3  ;;  %v819_v7 = vadd.f32 %v13473_v37, %v780_v0  ;;  %v11978_v10 = vpop.eup %11977 }
  0xf0   : > { %v663_v5 = vpop.permute.xlu1 %662  ;;  %v658_v6 = vpop.permute.xlu0 %657 }
  0xf1   : > { %v782_v8 = vmul.f32 %v13468_v36, %v663_v5  ;;  %v781_v9 = vmul.f32 %v13468_v36, %v658_v6  ;;  %11991 = vtanh.f32 %v818_v4 }
  0xf2   : > { %v11980_v11 = vpop.eup %11979  ;;  %11993 = vtanh.f32 %v819_v7 }
  0xf3   : > { %v820_v12 = vadd.f32 %v13473_v37, %v781_v9  ;;  %11325 = vmatmul.mubr.msk.f32.vlgmr.msra.gmra.mxu0 %vm883_vm0, %v11980_v11  ;;  %v11982_v15 = vpop.eup %11981  ;;  %v821_v16 = vadd.f32 %v13473_v37, %v782_v8 }
  0xf4   : > { %v673_v13 = vpop.permute.xlu1 %672  ;;  %v668_v14 = vpop.permute.xlu0 %667  ;;  %11327 = vmatprep.mubr.msk.f32.mxu0 %vm883_vm0, %v11978_v10 }
  0xf5   : > { %v784_v17 = vmul.f32 %v13468_v36, %v673_v13  ;;  %v783_v18 = vmul.f32 %v13468_v36, %v668_v14  ;;  %11995 = vtanh.f32 %v820_v12 }
  0xf6   : > { %v11984_v19 = vpop.eup %11983  ;;  %11997 = vtanh.f32 %v821_v16 }
  0xf7   : > { %v822_v20 = vadd.f32 %v13473_v37, %v783_v18  ;;  %11328 = vmatmul.mubr.msk.f32.gmra.mxu0 %vm883_vm0, %v11982_v15  ;;  %v823_v23 = vadd.f32 %v13473_v37, %v784_v17  ;;  %v11986_v26 = vpop.eup %11985 }
  0xf8   : > { %v683_v21 = vpop.permute.xlu1 %682  ;;  %v678_v22 = vpop.permute.xlu0 %677  ;;  %11330 = vmatprep.mubr.msk.f32.mxu0 %vm883_vm0, %v11984_v19 }
  0xf9   : > { %v786_v24 = vmul.f32 %v13468_v36, %v683_v21  ;;  %v785_v25 = vmul.f32 %v13468_v36, %v678_v22  ;;  %11999 = vtanh.f32 %v822_v20 }
  0xfa   : > { %v11988_v27 = vpop.eup %11987  ;;  %12001 = vtanh.f32 %v823_v23 }
  0xfb   : > { %v824_v28 = vadd.f32 %v13473_v37, %v785_v25  ;;  %11331 = vmatmul.mubr.msk.f32.gmra.mxu0 %vm883_vm0, %v11986_v26  ;;  %v825_v31 = vadd.f32 %v13473_v37, %v786_v24  ;;  %v11990_v34 = vpop.eup %11989 }
  0xfc   : > { %v693_v29 = vpop.permute.xlu1 %692  ;;  %v688_v30 = vpop.permute.xlu0 %687  ;;  %11333 = vmatprep.mubr.msk.f32.mxu0 %vm883_vm0, %v11988_v27 }
  0xfd   : > { %v788_v32 = vmul.f32 %v13468_v36, %v693_v29  ;;  %v787_v33 = vmul.f32 %v13468_v36, %v688_v30  ;;  %12003 = vtanh.f32 %v824_v28 }
  0xfe   : > { %v11992_v35 = vpop.eup %11991  ;;  %12005 = vtanh.f32 %v825_v31 }
  0xff   : > { %v826_v38 = vadd.f32 %v13473_v37, %v787_v33  ;;  %11334 = vmatmul.mubr.msk.f32.gmra.mxu0 %vm883_vm0, %v11990_v34  ;;  %v827_v41 = vadd.f32 %v13473_v37, %v788_v32  ;;  %v11994_v44 = vpop.eup %11993 }
 0x100   : > { %v703_v39 = vpop.permute.xlu1 %702  ;;  %v698_v40 = vpop.permute.xlu0 %697  ;;  %11336 = vmatprep.mubr.msk.f32.mxu0 %vm883_vm0, %v11992_v35 }
 0x101   : > { %v790_v42 = vmul.f32 %v13468_v36, %v703_v39  ;;  %v789_v43 = vmul.f32 %v13468_v36, %v698_v40  ;;  %12007 = vtanh.f32 %v826_v38 }
 0x102   : > { %v11996_v45 = vpop.eup %11995  ;;  %12009 = vtanh.f32 %v827_v41 }
 0x103   : > { %v828_v46 = vadd.f32 %v13473_v37, %v789_v43  ;;  %11337 = vmatmul.mubr.msk.f32.gmra.mxu0 %vm883_vm0, %v11994_v44  ;;  %v829_v49 = vadd.f32 %v13473_v37, %v790_v42  ;;  %v11998_v52 = vpop.eup %11997  ;;  %v1240_v42 = vld [vmem:[%s17621_s6 + $0x18] sm:$0xff]  ;;  %v1239_v43 = vld [vmem:[%s17621_s6 + $0x10] sm:$0xff]  ;;  %v1238_v44 = vld [vmem:[%s17621_s6 + $0x8] sm:$0xff] }
 0x104   : > { %v713_v47 = vpop.permute.xlu1 %712  ;;  %v708_v48 = vpop.permute.xlu0 %707  ;;  %11339 = vmatprep.mubr.msk.f32.mxu0 %vm883_vm0, %v11996_v45  ;;  %11372 = vmatprep.subr.mxu1 %v1240_v42  ;;  %v1237_v45 = vld [vmem:[%s17621_s6] sm:$0xff] }
 0x105   : > { %v792_v50 = vmul.f32 %v13468_v36, %v713_v47  ;;  %v791_v51 = vmul.f32 %v13468_v36, %v708_v48  ;;  %12011 = vtanh.f32 %v828_v46  ;;  %11373 = vmatpush3.msra.mxu1 %v1240_v42  ;;  %v1962_v46 = vld [vmem:[%s17624_s9 + $0xc0] sm:$0xff]  ;;  %v1963_v48 = vld [vmem:[%s17624_s9 + $0xc8] sm:$0xff] }
 0x106   : > { %v12000_v53 = vpop.eup %11999  ;;  %12013 = vtanh.f32 %v829_v49  ;;  %11374 = vmatprep.subr.mxu1 %v1239_v43  ;;  %v1966_v47 = vld [vmem:[%s17624_s9 + $0xe0] sm:$0xff] }
 0x107   : > { %v830_v54 = vadd.f32 %v13473_v37, %v791_v51  ;;  %11340 = vmatmul.mubr.msk.f32.gmra.mxu0 %vm883_vm0, %v11998_v52  ;;  %v831_v57 = vadd.f32 %v13473_v37, %v792_v50  ;;  %v12002_v60 = vpop.eup %12001  ;;  %11375 = vmatpush3.msra.mxu1 %v1239_v43  ;;  %v10597_v49 = vcombine.low %v1962_v46, %v1966_v47  ;;  %v1967_v51 = vld [vmem:[%s17624_s9 + $0xe8] sm:$0xff]  ;;  %v1954_v52 = vld [vmem:[%s17624_s9 + $0x80] sm:$0xff] }
 0x108   : > { %v723_v55 = vpop.permute.xlu1 %722  ;;  %v718_v56 = vpop.permute.xlu0 %717  ;;  %11342 = vmatprep.mubr.msk.f32.mxu0 %vm883_vm0, %v12000_v53  ;;  %11376 = vmatprep.subr.mxu1 %v1238_v44  ;;  %v10598_v50 = vcombine.high %v1962_v46, %v1966_v47  ;;  %v1958_v53 = vld [vmem:[%s17624_s9 + $0xa0] sm:$0xff] }
 0x109   : > { %v794_v58 = vmul.f32 %v13468_v36, %v723_v55  ;;  %v793_v59 = vmul.f32 %v13468_v36, %v718_v56  ;;  %12015 = vtanh.f32 %v830_v54  ;;  %11377 = vmatpush3.msra.mxu1 %v1238_v44  ;;  %v10599_v54 = vcombine.low %v1963_v48, %v1967_v51 }
 0x10a   : > { %v12004_v61 = vpop.eup %12003  ;;  %12017 = vtanh.f32 %v831_v57  ;;  %11378 = vmatprep.subr.mxu1 %v1237_v45  ;;  %v10600_v55 = vcombine.high %v1963_v48, %v1967_v51  ;;  %v10590_v56 = vcombine.high %v1954_v52, %v1958_v53  ;;  %v1946_v57 = vld [vmem:[%s17624_s9 + $0x40] sm:$0xff]  ;;  %2187 = vmatprep.subr.bf16.mxu0 %v10598_v50 }
 0x10b   : > { %v832_v62 = vadd.f32 %v13473_v37, %v793_v59  ;;  %11343 = vmatmul.mubr.msk.f32.gmra.mxu0 %vm883_vm0, %v12002_v60  ;;  %v833_v2 = vadd.f32 %v13473_v37, %v794_v58  ;;  %v12006_v5 = vpop.eup %12005  ;;  %11379 = vmatpush3.msra.mxu1 %v1237_v45  ;;  %v1950_v58 = vld [vmem:[%s17624_s9 + $0x60] sm:$0xff]  ;;  %v10589_v59 = vcombine.low %v1954_v52, %v1958_v53 }
 0x10c   : > { %v733_v63 = vpop.permute.xlu1 %732  ;;  %v728_v0 = vpop.permute.xlu0 %727  ;;  %11345 = vmatprep.mubr.msk.f32.mxu0 %vm883_vm0, %v12004_v61  ;;  %2188 = vmatpush1.bf16.msra.mxu0 %v10597_v49  ;;  %v10582_v60 = vcombine.high %v1946_v57, %v1950_v58  ;;  %v10581_v61 = vcombine.low %v1946_v57, %v1950_v58 }
 0x10d   : > { %v796_v3 = vmul.f32 %v13468_v36, %v733_v63  ;;  %v795_v4 = vmul.f32 %v13468_v36, %v728_v0  ;;  %12019 = vtanh.f32 %v832_v62  ;;  %2380 = vmatprep.subr.bf16.mxu1 %v10600_v55  ;;  %2189 = vmatprep.subr.bf16.mxu0 %v10590_v56  ;;  %v13611_v62 = vld [vmem:[%s17620_s5] ss:$0 sm:$0xff] }
 0x10e   : > { %v12008_v6 = vpop.eup %12007  ;;  %12021 = vtanh.f32 %v833_v2 }
 0x10f   : > { %v834_v7 = vadd.f32 %v13473_v37, %v795_v4  ;;  %11346 = vmatmul.mubr.msk.f32.gmra.mxu0 %vm883_vm0, %v12006_v5  ;;  %v835_v10 = vadd.f32 %v13473_v37, %v796_v3  ;;  %v12010_v13 = vpop.eup %12009 }
 0x110   : > { %v743_v8 = vpop.permute.xlu1 %742  ;;  %v738_v9 = vpop.permute.xlu0 %737  ;;  %11348 = vmatprep.mubr.msk.f32.mxu0 %vm883_vm0, %v12008_v6  ;;  %2190 = vmatpush1.bf16.msra.mxu0 %v10589_v59 }
 0x111   : > { %v798_v11 = vmul.f32 %v13468_v36, %v743_v8  ;;  %v797_v12 = vmul.f32 %v13468_v36, %v738_v9  ;;  %12023 = vtanh.f32 %v834_v7  ;;  %2191 = vmatprep.subr.bf16.mxu0 %v10582_v60 }
 0x112   : > { %v12012_v14 = vpop.eup %12011  ;;  %12025 = vtanh.f32 %v835_v10 }
 0x113   : > { %v836_v15 = vadd.f32 %v13473_v37, %v797_v12  ;;  %11349 = vmatmul.mubr.msk.f32.gmra.mxu0 %vm883_vm0, %v12010_v13  ;;  %v837_v18 = vadd.f32 %v13473_v37, %v798_v11  ;;  %v12014_v21 = vpop.eup %12013 }
 0x114   : > { %v753_v16 = vpop.permute.xlu1 %752  ;;  %v748_v17 = vpop.permute.xlu0 %747  ;;  %11351 = vmatprep.mubr.msk.f32.mxu0 %vm883_vm0, %v12012_v14  ;;  %2192 = vmatpush1.bf16.msra.mxu0 %v10581_v61 }
 0x115   : > { %v800_v19 = vmul.f32 %v13468_v36, %v753_v16  ;;  %v799_v20 = vmul.f32 %v13468_v36, %v748_v17  ;;  %12027 = vtanh.f32 %v836_v15  ;;  %v1955_v16 = vld [vmem:[%s17624_s9 + $0x88] sm:$0xff] }
 0x116   : > { %v12016_v22 = vpop.eup %12015  ;;  %12029 = vtanh.f32 %v837_v18  ;;  %v1959_v17 = vld [vmem:[%s17624_s9 + $0xa8] sm:$0xff] }
 0x117   : > { %v838_v23 = vadd.f32 %v13473_v37, %v799_v20  ;;  %11352 = vmatmul.mubr.msk.f32.gmra.mxu0 %vm883_vm0, %v12014_v21  ;;  %v839_v26 = vadd.f32 %v13473_v37, %v800_v19  ;;  %v12018_v29 = vpop.eup %12017 }
 0x118   : > { %v763_v24 = vpop.permute.xlu1 %762  ;;  %v758_v25 = vpop.permute.xlu0 %757  ;;  %11354 = vmatprep.mubr.msk.f32.mxu0 %vm883_vm0, %v12016_v22  ;;  %v10592_v22 = vcombine.high %v1955_v16, %v1959_v17 }
 0x119   : > { %v802_v27 = vmul.f32 %v13468_v36, %v763_v24  ;;  %v801_v28 = vmul.f32 %v13468_v36, %v758_v25  ;;  %12031 = vtanh.f32 %v838_v23  ;;  %v1947_v25 = vld [vmem:[%s17624_s9 + $0x48] sm:$0xff] }
 0x11a   : > { %v12020_v30 = vpop.eup %12019  ;;  %12033 = vtanh.f32 %v839_v26  ;;  %v1951_v26 = vld [vmem:[%s17624_s9 + $0x68] sm:$0xff] }
 0x11b   : > { %v841_v31 = vadd.f32 %v13473_v37, %v802_v27  ;;  %v840_v32 = vadd.f32 %v13473_v37, %v801_v28  ;;  %11355 = vmatmul.mubr.msk.f32.gmra.mxu0 %vm883_vm0, %v12018_v29  ;;  %v12022_v33 = vpop.eup %12021  ;;  %v10591_v28 = vcombine.low %v1955_v16, %v1959_v17 }
 0x11c   : > { %11357 = vmatprep.mubr.msk.f32.mxu0 %vm883_vm0, %v12020_v30 }
 0x11d   : > { %12035 = vtanh.f32 %v840_v32  ;;  %v10584_v32 = vcombine.high %v1947_v25, %v1951_v26 }
 0x11e   : > { %v12024_v34 = vpop.eup %12023  ;;  %12037 = vtanh.f32 %v841_v31 }
 0x11f   : > { %11358 = vmatmul.mubr.msk.f32.gmra.mxu0 %vm883_vm0, %v12022_v33  ;;  %v12026_v36 = vpop.eup %12025 }
 0x120   : > { %11360 = vmatprep.mubr.msk.f32.mxu0 %vm883_vm0, %v12024_v34 }
 0x122   : > { %v12028_v35 = vpop.eup %12027 }
 0x123   : > { %11361 = vmatmul.mubr.msk.f32.gmra.mxu0 %vm883_vm0, %v12026_v36  ;;  %v12030_v37 = vpop.eup %12029 }
 0x124   : > { %11363 = vmatprep.mubr.msk.f32.mxu0 %vm883_vm0, %v12028_v35  ;;  %v10583_v35 = vcombine.low %v1947_v25, %v1951_v26 }
 0x126   : > { %v12032_v38 = vpop.eup %12031 }
 0x127   : > { %11364 = vmatmul.mubr.msk.f32.gmra.mxu0 %vm883_vm0, %v12030_v37  ;;  %v12034_v39 = vpop.eup %12033 }
 0x128   : > { %11366 = vmatprep.mubr.msk.f32.mxu0 %vm883_vm0, %v12032_v38 }
 0x12a   : > { %v12036_v40 = vpop.eup %12035 }
 0x12b   : > { %11367 = vmatmul.mubr.msk.f32.gmra.mxu0 %vm883_vm0, %v12034_v39  ;;  %v12038_v41 = vpop.eup %12037 }
 0x12c   : > { %11369 = vmatprep.mubr.msk.f32.mxu0 %vm883_vm0, %v12036_v40 }
 0x12f   : > { %11370 = vmatmul.mubr.msk.f32.gmra.mxu0 %vm883_vm0, %v12038_v41 }
 0x130   : > { %2211 = vmatprep.mubr.bf16.mxu0 %v13199_v1 }
 0x1b3   : > { %v11326_v63 = vpop.f32.mrf.mxu0 }
 0x1b4   : > { %v1052_v0 = vadd.f32 %v11326_v63, %v13611_v62 }
 0x1b5   : > { %v1046_v2 = vpop.f32.mrf.mxu0 }
 0x1b6   : > { %v1047_v3 = vadd.f32 %v13611_v62, %v1046_v2 }
 0x1b7   : > { %v11329_v4 = vpop.f32.mrf.mxu0 }
 0x1b8   : > { %12039 = vtanh.f32 %v1047_v3  ;;  %v1062_v5 = vadd.f32 %v11329_v4, %v13611_v62 }
 0x1b9   : > { %12041 = vtanh.f32 %v1052_v0  ;;  %v1056_v6 = vpop.f32.mrf.mxu0 }
 0x1ba   : > { %v1057_v7 = vadd.f32 %v13611_v62, %v1056_v6 }
 0x1bb   : > { %v11332_v8 = vpop.f32.mrf.mxu0 }
 0x1bc   : > { %12043 = vtanh.f32 %v1057_v7  ;;  %v1072_v9 = vadd.f32 %v11332_v8, %v13611_v62 }
 0x1bd   : > { %12045 = vtanh.f32 %v1062_v5  ;;  %v1066_v10 = vpop.f32.mrf.mxu0 }
 0x1be   : > { %v1067_v11 = vadd.f32 %v13611_v62, %v1066_v10 }
 0x1bf   : > { %v11335_v12 = vpop.f32.mrf.mxu0 }
 0x1c0   : > { %12047 = vtanh.f32 %v1067_v11  ;;  %v1082_v13 = vadd.f32 %v11335_v12, %v13611_v62 }
 0x1c1   : > { %12049 = vtanh.f32 %v1072_v9  ;;  %v1076_v14 = vpop.f32.mrf.mxu0 }
 0x1c2   : > { %v1077_v15 = vadd.f32 %v13611_v62, %v1076_v14 }
 0x1c3   : > { %v11338_v18 = vpop.f32.mrf.mxu0 }
 0x1c4   : > { %12051 = vtanh.f32 %v1077_v15  ;;  %v1092_v20 = vadd.f32 %v11338_v18, %v13611_v62 }
 0x1c5   : > { %v12040_v19 = vpop.eup %12039  ;;  %12053 = vtanh.f32 %v1082_v13  ;;  %v1086_v21 = vpop.f32.mrf.mxu0 }
 0x1c6   : > { %v12042_v23 = vpop.eup %12041  ;;  %v1087_v24 = vadd.f32 %v13611_v62, %v1086_v21  ;;  %11380 = vmatprep.mubr.msk.f32.mxu1 %vm1248_vm1, %v12040_v19 }
 0x1c7   : > { %v11341_v27 = vpop.f32.mrf.mxu0  ;;  %11381 = vmatmul.mubr.msk.f32.vlgmr.msra.gmra.mxu1 %vm1248_vm1, %v12042_v23 }
 0x1c8   : > { %12055 = vtanh.f32 %v1087_v24  ;;  %2381 = vmatpush1.bf16.msra.mxu1 %v10599_v54  ;;  %v1102_v30 = vadd.f32 %v11341_v27, %v13611_v62 }
 0x1c9   : > { %v12044_v29 = vpop.eup %12043  ;;  %12057 = vtanh.f32 %v1092_v20  ;;  %v1096_v31 = vpop.f32.mrf.mxu0  ;;  %2382 = vmatprep.subr.bf16.mxu1 %v10592_v22 }
 0x1ca   : > { %v12046_v33 = vpop.eup %12045  ;;  %v1097_v34 = vadd.f32 %v13611_v62, %v1096_v31  ;;  %11383 = vmatprep.mubr.msk.f32.mxu1 %vm1248_vm1, %v12044_v29 }
 0x1cb   : > { %v11344_v36 = vpop.f32.mrf.mxu0  ;;  %11384 = vmatmul.mubr.msk.f32.gmra.mxu1 %vm1248_vm1, %v12046_v33 }
 0x1cc   : > { %12059 = vtanh.f32 %v1097_v34  ;;  %2383 = vmatpush1.bf16.msra.mxu1 %v10591_v28  ;;  %v1112_v38 = vadd.f32 %v11344_v36, %v13611_v62 }
 0x1cd   : > { %v12048_v37 = vpop.eup %12047  ;;  %12061 = vtanh.f32 %v1102_v30  ;;  %v1106_v39 = vpop.f32.mrf.mxu0  ;;  %2384 = vmatprep.subr.bf16.mxu1 %v10584_v32 }
 0x1ce   : > { %v12050_v40 = vpop.eup %12049  ;;  %v1107_v41 = vadd.f32 %v13611_v62, %v1106_v39  ;;  %11386 = vmatprep.mubr.msk.f32.mxu1 %vm1248_vm1, %v12048_v37 }
 0x1cf   : > { %v11347_v42 = vpop.f32.mrf.mxu0  ;;  %11387 = vmatmul.mubr.msk.f32.gmra.mxu1 %vm1248_vm1, %v12050_v40 }
 0x1d0   : > { %12063 = vtanh.f32 %v1107_v41  ;;  %2385 = vmatpush1.bf16.msra.mxu1 %v10583_v35  ;;  %v1122_v44 = vadd.f32 %v11347_v42, %v13611_v62  ;;  %v1938_v41 = vld [vmem:[%s17624_s9] sm:$0xff] }
 0x1d1   : > { %v12052_v43 = vpop.eup %12051  ;;  %12065 = vtanh.f32 %v1112_v38  ;;  %v1116_v45 = vpop.f32.mrf.mxu0  ;;  %v1942_v42 = vld [vmem:[%s17624_s9 + $0x20] sm:$0xff] }
 0x1d2   : > { %v12054_v46 = vpop.eup %12053  ;;  %v1117_v47 = vadd.f32 %v13611_v62, %v1116_v45  ;;  %11389 = vmatprep.mubr.msk.f32.mxu1 %vm1248_vm1, %v12052_v43  ;;  %v1939_v43 = vld [vmem:[%s17624_s9 + $0x8] sm:$0xff] }
 0x1d3   : > { %v11350_v48 = vpop.f32.mrf.mxu0  ;;  %11390 = vmatmul.mubr.msk.f32.gmra.mxu1 %vm1248_vm1, %v12054_v46  ;;  %v1943_v45 = vld [vmem:[%s17624_s9 + $0x28] sm:$0xff]  ;;  %v10573_v46 = vcombine.low %v1938_v41, %v1942_v42 }
 0x1d4   : > { %12067 = vtanh.f32 %v1117_v47  ;;  %v1132_v50 = vadd.f32 %v11350_v48, %v13611_v62  ;;  %v10575_v47 = vcombine.low %v1939_v43, %v1943_v45  ;;  %v10576_v48 = vcombine.high %v1939_v43, %v1943_v45 }
 0x1d5   : > { %v12056_v49 = vpop.eup %12055  ;;  %12069 = vtanh.f32 %v1122_v44  ;;  %v1126_v51 = vpop.f32.mrf.mxu0  ;;  %v10574_v44 = vcombine.high %v1938_v41, %v1942_v42 }
 0x1d6   : > { %v12058_v52 = vpop.eup %12057  ;;  %v1127_v53 = vadd.f32 %v13611_v62, %v1126_v51  ;;  %11392 = vmatprep.mubr.msk.f32.mxu1 %vm1248_vm1, %v12056_v49  ;;  %2386 = vmatprep.subr.bf16.mxu1 %v10576_v48  ;;  %v1964_v49 = vld [vmem:[%s17624_s9 + $0xd0] sm:$0xff] }
 0x1d7   : > { %v11353_v54 = vpop.f32.mrf.mxu0  ;;  %11393 = vmatmul.mubr.msk.f32.gmra.mxu1 %vm1248_vm1, %v12058_v52  ;;  %2193 = vmatprep.subr.bf16.mxu0 %v10574_v44 }
 0x1d8   : > { %12071 = vtanh.f32 %v1127_v53  ;;  %v1142_v56 = vadd.f32 %v11353_v54, %v13611_v62  ;;  %2194 = vmatpush1.bf16.msra.mxu0 %v10573_v46  ;;  %2387 = vmatpush1.bf16.msra.mxu1 %v10575_v47  ;;  %v1965_v53 = vld [vmem:[%s17624_s9 + $0xd8] sm:$0xff] }
 0x1d9   : > { %v12060_v55 = vpop.eup %12059  ;;  %12073 = vtanh.f32 %v1132_v50  ;;  %v1136_v57 = vpop.f32.mrf.mxu0  ;;  %v1968_v50 = vld [vmem:[%s17624_s9 + $0xf0] sm:$0xff]  ;;  %v1969_v54 = vld [vmem:[%s17624_s9 + $0xf8] sm:$0xff] }
 0x1da   : > { %v12062_v58 = vpop.eup %12061  ;;  %v1137_v59 = vadd.f32 %v13611_v62, %v1136_v57  ;;  %11395 = vmatprep.mubr.msk.f32.mxu1 %vm1248_vm1, %v12060_v55  ;;  %v10601_v51 = vcombine.low %v1964_v49, %v1968_v50  ;;  %v10602_v52 = vcombine.high %v1964_v49, %v1968_v50  ;;  %v10603_v55 = vcombine.low %v1965_v53, %v1969_v54  ;;  %v13717_v57 = vld [vmem:[%s17622_s7] ss:$0 sm:$0xff] }
 0x1db   : > { %v11356_v60 = vpop.f32.mrf.mxu0  ;;  %11396 = vmatmul.mubr.msk.f32.gmra.mxu1 %vm1248_vm1, %v12062_v58 }
 0x1dc   : > { %12075 = vtanh.f32 %v1137_v59  ;;  %v1152_v63 = vadd.f32 %v11356_v60, %v13611_v62  ;;  %2573 = vmatprep.subr.bf16.mxu0 %v10602_v52 }
 0x1dd   : > { %v12064_v61 = vpop.eup %12063  ;;  %12077 = vtanh.f32 %v1142_v56  ;;  %v1146_v0 = vpop.f32.mrf.mxu0  ;;  %v10604_v56 = vcombine.high %v1965_v53, %v1969_v54 }
 0x1de   : > { %v12066_v2 = vpop.eup %12065  ;;  %v1147_v3 = vadd.f32 %v13611_v62, %v1146_v0  ;;  %11398 = vmatprep.mubr.msk.f32.mxu1 %vm1248_vm1, %v12064_v61 }
 0x1df   : > { %v11359_v4 = vpop.f32.mrf.mxu0  ;;  %11399 = vmatmul.mubr.msk.f32.gmra.mxu1 %vm1248_vm1, %v12066_v2  ;;  %2766 = vmatprep.subr.bf16.mxu1 %v10604_v56 }
 0x1e0   : > { %12079 = vtanh.f32 %v1147_v3  ;;  %v1162_v6 = vadd.f32 %v11359_v4, %v13611_v62 }
 0x1e1   : > { %v12068_v5 = vpop.eup %12067  ;;  %12081 = vtanh.f32 %v1152_v63  ;;  %v1156_v7 = vpop.f32.mrf.mxu0 }
 0x1e2   : > { %v12070_v8 = vpop.eup %12069  ;;  %v1157_v9 = vadd.f32 %v13611_v62, %v1156_v7  ;;  %11401 = vmatprep.mubr.msk.f32.mxu1 %vm1248_vm1, %v12068_v5  ;;  %v13725_v7 = vld [vmem:[#allocation5 + $0x1e0] sm:$0xff] }
 0x1e3   : > { %v11362_v10 = vpop.f32.mrf.mxu0  ;;  %11402 = vmatmul.mubr.msk.f32.gmra.mxu1 %vm1248_vm1, %v12070_v8 }
 0x1e4   : > { %12083 = vtanh.f32 %v1157_v9  ;;  %v1172_v12 = vadd.f32 %v11362_v10, %v13611_v62 }
 0x1e5   : > { %v12072_v11 = vpop.eup %12071  ;;  %12085 = vtanh.f32 %v1162_v6  ;;  %v1166_v13 = vpop.f32.mrf.mxu0  ;;  %v13723_v6 = vld [vmem:[#allocation5 + $0x1c0] sm:$0xff] }
 0x1e6   : > { %v12074_v14 = vpop.eup %12073  ;;  %v1167_v15 = vadd.f32 %v13611_v62, %v1166_v13  ;;  %11404 = vmatprep.mubr.msk.f32.mxu1 %vm1248_vm1, %v12072_v11  ;;  %v10789_v9 = vcombine.low %v13723_v6, %v13725_v7  ;;  %v1956_v11 = vld [vmem:[%s17624_s9 + $0x90] sm:$0xff]  ;;  %v10790_v52 = vcombine.high %v13723_v6, %v13725_v7  ;;  %v1698_v7 = vld [vmem:[#allocation5 + $0x100] sm:$0xff] }
 0x1e7   : > { %v11365_v16 = vpop.f32.mrf.mxu0  ;;  %11405 = vmatmul.mubr.msk.f32.gmra.mxu1 %vm1248_vm1, %v12074_v14  ;;  %v1960_v14 = vld [vmem:[%s17624_s9 + $0xb0] sm:$0xff] }
 0x1e8   : > { %12087 = vtanh.f32 %v1167_v15  ;;  %v1182_v18 = vadd.f32 %v11365_v16, %v13611_v62  ;;  %v1957_v15 = vld [vmem:[%s17624_s9 + $0x98] sm:$0xff] }
 0x1e9   : > { %v12076_v17 = vpop.eup %12075  ;;  %12089 = vtanh.f32 %v1172_v12  ;;  %v1176_v19 = vpop.f32.mrf.mxu0  ;;  %v1961_v16 = vld [vmem:[%s17624_s9 + $0xb8] sm:$0xff] }
 0x1ea   : > { %v12078_v20 = vpop.eup %12077  ;;  %v1177_v21 = vadd.f32 %v13611_v62, %v1176_v19  ;;  %11407 = vmatprep.mubr.msk.f32.mxu1 %vm1248_vm1, %v12076_v17  ;;  %v1948_v19 = vld [vmem:[%s17624_s9 + $0x50] sm:$0xff] }
 0x1eb   : > { %v11368_v22 = vpop.f32.mrf.mxu0  ;;  %11408 = vmatmul.mubr.msk.f32.gmra.mxu1 %vm1248_vm1, %v12078_v20  ;;  %v1952_v20 = vld [vmem:[%s17624_s9 + $0x70] sm:$0xff] }
 0x1ec   : > { %12091 = vtanh.f32 %v1177_v21  ;;  %v1192_v24 = vadd.f32 %v11368_v22, %v13611_v62  ;;  %v10594_v22 = vcombine.high %v1956_v11, %v1960_v14  ;;  %v10585_v42 = vcombine.low %v1948_v19, %v1952_v20  ;;  %v14155_v6 = vld [vmem:[%s13403_s15 + $0xc] ss:$16 sps:$4 sm:$0xff]  }
 0x1ed   : > { %v12080_v23 = vpop.eup %12079  ;;  %12093 = vtanh.f32 %v1182_v18  ;;  %v1186_v25 = vpop.f32.mrf.mxu0 }
 0x1ee   : > { %v12082_v26 = vpop.eup %12081  ;;  %v1187_v27 = vadd.f32 %v13611_v62, %v1186_v25  ;;  %11410 = vmatprep.mubr.msk.f32.mxu1 %vm1248_vm1, %v12080_v23  ;;  %v10596_v23 = vcombine.high %v1957_v15, %v1961_v16  ;;  %v1953_v25 = vld [vmem:[%s17624_s9 + $0x78] sm:$0xff] }
 0x1ef   : > { %v11371_v28 = vpop.f32.mrf.mxu0  ;;  %11411 = vmatmul.mubr.msk.f32.gmra.mxu1 %vm1248_vm1, %v12082_v26  ;;  %v10593_v26 = vcombine.low %v1956_v11, %v1960_v14 }
 0x1f0   : > { %12095 = vtanh.f32 %v1187_v27  ;;  %v1202_v30 = vadd.f32 %v11371_v28, %v13611_v62  ;;  %v10595_v27 = vcombine.low %v1957_v15, %v1961_v16  ;;  %v10586_v28 = vcombine.high %v1948_v19, %v1952_v20 }
 0x1f1   : > { %v12084_v29 = vpop.eup %12083  ;;  %12097 = vtanh.f32 %v1192_v24  ;;  %v1196_v31 = vpop.f32.mrf.mxu0  ;;  %v1949_v24 = vld [vmem:[%s17624_s9 + $0x58] sm:$0xff] }
 0x1f2   : > { %v12086_v32 = vpop.eup %12085  ;;  %v1197_v33 = vadd.f32 %v13611_v62, %v1196_v31  ;;  %11413 = vmatprep.mubr.msk.f32.mxu1 %vm1248_vm1, %v12084_v29  ;;  %v13761_v29 = vld [vmem:[#allocation5 + $0x5c0] sm:$0xff]  ;;  %v10587_v43 = vcombine.low %v1949_v24, %v1953_v25 }
 0x1f3   : > { %11414 = vmatmul.mubr.msk.f32.gmra.mxu1 %vm1248_vm1, %v12086_v32  ;;  %v10588_v32 = vcombine.high %v1949_v24, %v1953_v25 }
 0x1f4   : > { %12099 = vtanh.f32 %v1197_v33 }
 0x1f5   : > { %v12088_v34 = vpop.eup %12087  ;;  %12101 = vtanh.f32 %v1202_v30  ;;  %v13763_v30 = vld [vmem:[#allocation5 + $0x5e0] sm:$0xff] }
 0x1f6   : > { %v12090_v36 = vpop.eup %12089  ;;  %11416 = vmatprep.mubr.msk.f32.mxu1 %vm1248_vm1, %v12088_v34  ;;  %v10917_v33 = vcombine.low %v13761_v29, %v13763_v30  ;;  %v10918_v53 = vcombine.high %v13761_v29, %v13763_v30  ;;  %v1826_v29 = vld [vmem:[#allocation5 + $0x500] sm:$0xff] }
 0x1f7   : > { %11417 = vmatmul.mubr.msk.f32.gmra.mxu1 %vm1248_vm1, %v12090_v36  ;;  %v1830_v30 = vld [vmem:[#allocation5 + $0x520] sm:$0xff] }
 0x1f9   : > { %v12092_v35 = vpop.eup %12091 }
 0x1fa   : > { %v12094_v37 = vpop.eup %12093  ;;  %11419 = vmatprep.mubr.msk.f32.mxu1 %vm1248_vm1, %v12092_v35  ;;  %v1940_v35 = vld [vmem:[%s17624_s9 + $0x10] sm:$0xff] }
 0x1fb   : > { %11420 = vmatmul.mubr.msk.f32.gmra.mxu1 %vm1248_vm1, %v12094_v37 }
 0x1fd   : > { %v12096_v38 = vpop.eup %12095 }
 0x1fe   : > { %v12098_v62 = vpop.eup %12097  ;;  %11422 = vmatprep.mubr.msk.f32.mxu1 %vm1248_vm1, %v12096_v38  ;;  %v1944_v38 = vld [vmem:[%s17624_s9 + $0x30] sm:$0xff] }
 0x1ff   : > { %11423 = vmatmul.mubr.msk.f32.gmra.mxu1 %vm1248_vm1, %v12098_v62  ;;  %v1941_v62 = vld [vmem:[%s17624_s9 + $0x18] sm:$0xff]  ;;  %v10578_v45 = vcombine.high %v1940_v35, %v1944_v38  ;;  %v10577_v48 = vcombine.low %v1940_v35, %v1944_v38 }
 0x201   : > { %v12100_v39 = vpop.eup %12099 }
 0x202   : > { %v12102_v40 = vpop.eup %12101  ;;  %11425 = vmatprep.mubr.msk.f32.mxu1 %vm1248_vm1, %v12100_v39  ;;  %v1945_v39 = vld [vmem:[%s17624_s9 + $0x38] sm:$0xff] }
 0x203   : > { %11426 = vmatmul.mubr.msk.f32.gmra.mxu1 %vm1248_vm1, %v12102_v40  ;;  %v10580_v46 = vcombine.high %v1941_v62, %v1945_v39  ;;  %v10579_v49 = vcombine.low %v1941_v62, %v1945_v39 }
 0x204   : > { %2404 = vmatprep.mubr.bf16.mxu1 %v13199_v1 }
 0x287   : > { %v11382_v58 = vpop.f32.mrf.mxu1 }
 0x288   : > { %v1417_v59 = vadd.f32 %v11382_v58, %v13717_v57 }
 0x289   : > { %v1411_v60 = vpop.f32.mrf.mxu1 }
 0x28a   : > { %v1412_v61 = vadd.f32 %v13717_v57, %v1411_v60  ;;  %12103 = vtanh.f32 %v1417_v59 }
 0x28b   : > { %v11385_v63 = vpop.f32.mrf.mxu1 }
 0x28c   : > { %12105 = vtanh.f32 %v1412_v61  ;;  %v1427_v4 = vadd.f32 %v11385_v63, %v13717_v57 }
 0x28d   : > { %v1421_v0 = vpop.f32.mrf.mxu1 }
 0x28e   : > { %v1422_v2 = vadd.f32 %v13717_v57, %v1421_v0 }
 0x28f   : > { %v11388_v3 = vpop.f32.mrf.mxu1 }
 0x290   : > { %12107 = vtanh.f32 %v1422_v2  ;;  %v1437_v13 = vadd.f32 %v11388_v3, %v13717_v57 }
 0x291   : > { %v1431_v5 = vpop.f32.mrf.mxu1  ;;  %12109 = vtanh.f32 %v1427_v4 }
 0x292   : > { %v1432_v8 = vadd.f32 %v13717_v57, %v1431_v5 }
 0x293   : > { %v11391_v10 = vpop.f32.mrf.mxu1 }
 0x294   : > { %12111 = vtanh.f32 %v1432_v8  ;;  %v1447_v37 = vadd.f32 %v11391_v10, %v13717_v57 }
 0x295   : > { %v1441_v21 = vpop.f32.mrf.mxu1  ;;  %12113 = vtanh.f32 %v1437_v13 }
 0x296   : > { %v1442_v31 = vadd.f32 %v13717_v57, %v1441_v21 }
 0x297   : > { %v12104_v12 = vpop.eup %12103  ;;  %v11394_v36 = vpop.f32.mrf.mxu1 }
 0x298   : > { %12115 = vtanh.f32 %v1442_v31  ;;  %v1457_v54 = vadd.f32 %v11394_v36, %v13717_v57 }
 0x299   : > { %v12106_v17 = vpop.eup %12105  ;;  %v1451_v44 = vpop.f32.mrf.mxu1  ;;  %12117 = vtanh.f32 %v1447_v37 }
 0x29a   : > { %v13743_v18 = vpack.c.bf16 %v12104_v12, %v12106_v17  ;;  %v1452_v47 = vadd.f32 %v13717_v57, %v1451_v44 }
 0x29c   : > { %10605 = vmatmul.mubr.msk.bf16.vlgmr.msra.gmra.mxu0 %vm2130_vm2, %v13743_v18  ;;  %10621 = vmatmul.mubr.msk.bf16.vlgmr.msra.gmra.mxu1 %vm2130_vm2, %v13743_v18  ;;  %12119 = vtanh.f32 %v1452_v47 }
 0x29d   : > { %2574 = vmatpush1.bf16.msra.mxu0 %v10601_v51  ;;  %2767 = vmatpush1.bf16.msra.mxu1 %v10603_v55  ;;  %v12108_v34 = vpop.eup %12107  ;;  %v11397_v51 = vpop.f32.mrf.mxu1  ;;  %12121 = vtanh.f32 %v1457_v54 }
 0x29e   : > { %2221 = vmatprep.mubr.bf16.mxu0 %v13199_v1  ;;  %2414 = vmatprep.mubr.bf16.mxu1 %v13199_v1  ;;  %v12110_v40 = vpop.eup %12109  ;;  %v1467_v63 = vadd.f32 %v11397_v51, %v13717_v57 }
 0x29f   : > { %2575 = vmatprep.subr.bf16.mxu0 %v10594_v22  ;;  %2768 = vmatprep.subr.bf16.mxu1 %v10596_v23  ;;  %v13783_v41 = vpack.c.bf16 %v12110_v40, %v12108_v34  ;;  %v1461_v58 = vpop.f32.mrf.mxu1 }
 0x2a0   : > { %v1462_v59 = vadd.f32 %v13717_v57, %v1461_v58 }
 0x2a1   : > { %2576 = vmatpush1.bf16.msra.mxu0 %v10593_v26  ;;  %2769 = vmatpush1.bf16.msra.mxu1 %v10595_v27  ;;  %v12112_v50 = vpop.eup %12111  ;;  %v11400_v61 = vpop.f32.mrf.mxu1 }
 0x2a2   : > { %2577 = vmatprep.subr.bf16.mxu0 %v10586_v28  ;;  %2770 = vmatprep.subr.bf16.mxu1 %v10588_v32  ;;  %v12114_v55 = vpop.eup %12113  ;;  %12123 = vtanh.f32 %v1462_v59  ;;  %v1477_v10 = vadd.f32 %v11400_v61, %v13717_v57 }
 0x2a3   : > { %v13797_v56 = vpack.c.bf16 %v12114_v55, %v12112_v50  ;;  %v1471_v3 = vpop.f32.mrf.mxu1  ;;  %12125 = vtanh.f32 %v1467_v63 }
 0x2a4   : > { %10606 = vmatmul.mubr.msk.bf16.gmra.mxu0 %vm2130_vm2, %v13783_v41  ;;  %10622 = vmatmul.mubr.msk.bf16.gmra.mxu1 %vm2130_vm2, %v13783_v41  ;;  %v1472_v4 = vadd.f32 %v13717_v57, %v1471_v3 }
 0x2a5   : > { %2231 = vmatprep.mubr.bf16.mxu0 %v13199_v1  ;;  %2424 = vmatprep.mubr.bf16.mxu1 %v13199_v1  ;;  %v12116_v60 = vpop.eup %12115  ;;  %v11403_v8 = vpop.f32.mrf.mxu1 }
 0x2a6   : > { %2578 = vmatpush1.bf16.msra.mxu0 %v10585_v42  ;;  %2771 = vmatpush1.bf16.msra.mxu1 %v10587_v43  ;;  %v12118_v0 = vpop.eup %12117  ;;  %12127 = vtanh.f32 %v1472_v4  ;;  %v1487_v17 = vadd.f32 %v11403_v8, %v13717_v57 }
 0x2a7   : > { %2579 = vmatprep.subr.bf16.mxu0 %v10578_v45  ;;  %2772 = vmatprep.subr.bf16.mxu1 %v10580_v46  ;;  %v13807_v2 = vpack.c.bf16 %v12118_v0, %v12116_v60  ;;  %v1481_v13 = vpop.f32.mrf.mxu1  ;;  %12129 = vtanh.f32 %v1477_v10 }
 0x2a8   : > { %v1482_v14 = vadd.f32 %v13717_v57, %v1481_v13 }
 0x2a9   : > { %v12120_v5 = vpop.eup %12119  ;;  %v11406_v16 = vpop.f32.mrf.mxu1 }
 0x2aa   : > { %2580 = vmatpush1.bf16.msra.mxu0 %v10577_v48  ;;  %2773 = vmatpush1.bf16.msra.mxu1 %v10579_v49  ;;  %v12122_v11 = vpop.eup %12121  ;;  %12131 = vtanh.f32 %v1482_v14  ;;  %v1497_v25 = vadd.f32 %v11406_v16, %v13717_v57 }
 0x2ab   : > { %4551 = vmatprep.subr.bf16.mxu0 %v10790_v52  ;;  %4744 = vmatprep.subr.bf16.mxu1 %v10918_v53  ;;  %v13817_v12 = vpack.c.bf16 %v12122_v11, %v12120_v5  ;;  %v1491_v21 = vpop.f32.mrf.mxu1  ;;  %12133 = vtanh.f32 %v1487_v17 }
 0x2ac   : > { %10607 = vmatmul.mubr.msk.bf16.gmra.mxu0 %vm2130_vm2, %v13797_v56  ;;  %10623 = vmatmul.mubr.msk.bf16.gmra.mxu1 %vm2130_vm2, %v13797_v56  ;;  %v1492_v22 = vadd.f32 %v13717_v57, %v1491_v21 }
 0x2ad   : > { %2241 = vmatprep.mubr.bf16.mxu0 %v13199_v1  ;;  %2434 = vmatprep.mubr.bf16.mxu1 %v13199_v1  ;;  %v11409_v24 = vpop.f32.mrf.mxu1 }
 0x2ae   : > { %12135 = vtanh.f32 %v1492_v22  ;;  %v1507_v36 = vadd.f32 %v11409_v24, %v13717_v57 }
 0x2af   : > { %v12124_v15 = vpop.eup %12123  ;;  %v1501_v28 = vpop.f32.mrf.mxu1  ;;  %12137 = vtanh.f32 %v1497_v25 }
 0x2b0   : > { %v12126_v19 = vpop.eup %12125  ;;  %v1502_v31 = vadd.f32 %v13717_v57, %v1501_v28 }
 0x2b1   : > { %v13827_v20 = vpack.c.bf16 %v12126_v19, %v12124_v15  ;;  %v11412_v34 = vpop.f32.mrf.mxu1 }
 0x2b2   : > { %12139 = vtanh.f32 %v1502_v31  ;;  %v1517_v42 = vadd.f32 %v11412_v34, %v13717_v57 }
 0x2b3   : > { %v12128_v23 = vpop.eup %12127  ;;  %v1511_v38 = vpop.f32.mrf.mxu1  ;;  %12141 = vtanh.f32 %v1507_v36  ;;  %v1714_v36 = vld [vmem:[#allocation5 + $0x180] sm:$0xff] }
 0x2b4   : > { %10608 = vmatmul.mubr.msk.bf16.gmra.mxu0 %vm2130_vm2, %v13807_v2  ;;  %10624 = vmatmul.mubr.msk.bf16.gmra.mxu1 %vm2130_vm2, %v13807_v2  ;;  %v12130_v26 = vpop.eup %12129  ;;  %v1512_v62 = vadd.f32 %v13717_v57, %v1511_v38  ;;  %v1842_v38 = vld [vmem:[#allocation5 + $0x580] sm:$0xff] }
 0x2b5   : > { %2251 = vmatprep.mubr.bf16.mxu0 %v13199_v1  ;;  %2444 = vmatprep.mubr.bf16.mxu1 %v13199_v1  ;;  %v13837_v27 = vpack.c.bf16 %v12130_v26, %v12128_v23  ;;  %v11415_v40 = vpop.f32.mrf.mxu1 }
 0x2b6   : > { %12143 = vtanh.f32 %v1512_v62  ;;  %v1527_v49 = vadd.f32 %v11415_v40, %v13717_v57  ;;  %v1846_v62 = vld [vmem:[#allocation5 + $0x5a0] sm:$0xff] }
 0x2b7   : > { %v12132_v32 = vpop.eup %12131  ;;  %v1521_v45 = vpop.f32.mrf.mxu1  ;;  %12145 = vtanh.f32 %v1517_v42  ;;  %v1710_v40 = vld [vmem:[#allocation5 + $0x160] sm:$0xff]  ;;  %v13931_v42 = vld [vmem:[#allocation5 + $0x1c8] sm:$0xff] }
 0x2b8   : > { %v12134_v35 = vpop.eup %12133  ;;  %v1522_v46 = vadd.f32 %v13717_v57, %v1521_v45  ;;  %v10910_v45 = vcombine.high %v1842_v38, %v1846_v62 }
 0x2b9   : > { %v13847_v37 = vpack.c.bf16 %v12134_v35, %v12132_v32  ;;  %v11418_v48 = vpop.f32.mrf.mxu1  ;;  %v1718_v35 = vld [vmem:[#allocation5 + $0x1a0] sm:$0xff] }
 0x2ba   : > { %12147 = vtanh.f32 %v1522_v46  ;;  %v1537_v58 = vadd.f32 %v11418_v48, %v13717_v57  ;;  %v1834_v46 = vld [vmem:[#allocation5 + $0x540] sm:$0xff]  ;;  %v13933_v48 = vld [vmem:[#allocation5 + $0x1e8] sm:$0xff] }
 0x2bb   : > { %v12136_v39 = vpop.eup %12135  ;;  %v1531_v52 = vpop.f32.mrf.mxu1  ;;  %12149 = vtanh.f32 %v1527_v49 }
 0x2bc   : > { %10609 = vmatmul.mubr.msk.bf16.gmra.mxu0 %vm2130_vm2, %v13817_v12  ;;  %10625 = vmatmul.mubr.msk.bf16.gmra.mxu1 %vm2130_vm2, %v13817_v12  ;;  %v12138_v43 = vpop.eup %12137  ;;  %v1532_v53 = vadd.f32 %v13717_v57, %v1531_v52  ;;  %v10909_v52 = vcombine.low %v1842_v38, %v1846_v62  ;;  %v1666_v62 = vld [vmem:[#allocation5] sm:$0xff] }
 0x2bd   : > { %2261 = vmatprep.mubr.bf16.mxu0 %v13199_v1  ;;  %2454 = vmatprep.mubr.bf16.mxu1 %v13199_v1  ;;  %v13857_v44 = vpack.c.bf16 %v12138_v43, %v12136_v39  ;;  %v11421_v55 = vpop.f32.mrf.mxu1  ;;  %v1706_v39 = vld [vmem:[#allocation5 + $0x140] sm:$0xff]  ;;  %v10782_v43 = vcombine.high %v1714_v36, %v1718_v35 }
 0x2be   : > { %12151 = vtanh.f32 %v1532_v53  ;;  %v1547_v4 = vadd.f32 %v11421_v55, %v13717_v57  ;;  %v13947_v53 = vld [vmem:[#allocation5 + $0x5c8] sm:$0xff] }
 0x2bf   : > { %v12140_v47 = vpop.eup %12139  ;;  %v1541_v61 = vpop.f32.mrf.mxu1  ;;  %12153 = vtanh.f32 %v1537_v58 }
 0x2c0   : > { %v12142_v50 = vpop.eup %12141  ;;  %v1542_v63 = vadd.f32 %v13717_v57, %v1541_v61  ;;  %v10894_v61 = vcombine.high %v1826_v29, %v1830_v30 }
 0x2c1   : > { %v13867_v51 = vpack.c.bf16 %v12142_v50, %v12140_v47  ;;  %v11424_v3 = vpop.f32.mrf.mxu1  ;;  %v1838_v47 = vld [vmem:[#allocation5 + $0x560] sm:$0xff]  ;;  %v10781_v50 = vcombine.low %v1714_v36, %v1718_v35 }
 0x2c2   : > { %12155 = vtanh.f32 %v1542_v63  ;;  %v1557_v15 = vadd.f32 %v11424_v3, %v13717_v57  ;;  %v10902_v55 = vcombine.high %v1834_v46, %v1838_v47  ;;  %v10901_v58 = vcombine.low %v1834_v46, %v1838_v47  ;;  %v1690_v63 = vld [vmem:[#allocation5 + $0xc0] sm:$0xff] }
 0x2c3   : > { %v12144_v54 = vpop.eup %12143  ;;  %v1551_v10 = vpop.f32.mrf.mxu1  ;;  %12157 = vtanh.f32 %v1547_v4  ;;  %v1818_v3 = vld [vmem:[#allocation5 + $0x4c0] sm:$0xff] }
 0x2c4   : > { %10610 = vmatmul.mubr.msk.bf16.gmra.mxu0 %vm2130_vm2, %v13827_v20  ;;  %10626 = vmatmul.mubr.msk.bf16.gmra.mxu1 %vm2130_vm2, %v13827_v20  ;;  %v12146_v59 = vpop.eup %12145  ;;  %v1552_v11 = vadd.f32 %v13717_v57, %v1551_v10  ;;  %v1822_v4 = vld [vmem:[#allocation5 + $0x4e0] sm:$0xff]  ;;  %v10893_v10 = vcombine.low %v1826_v29, %v1830_v30 }
 0x2c5   : > { %2271 = vmatprep.mubr.bf16.mxu0 %v13199_v1  ;;  %2464 = vmatprep.mubr.bf16.mxu1 %v13199_v1  ;;  %v13877_v60 = vpack.c.bf16 %v12146_v59, %v12144_v54  ;;  %v11427_v14 = vpop.f32.mrf.mxu1  ;;  %v13949_v54 = vld [vmem:[#allocation5 + $0x5e8] sm:$0xff] }
 0x2c6   : > { %12159 = vtanh.f32 %v1552_v11  ;;  %v1567_v23 = vadd.f32 %v11427_v14, %v13717_v57  ;;  %v1682_v14 = vld [vmem:[#allocation5 + $0x80] sm:$0xff] }
 0x2c7   : > { %v12148_v0 = vpop.eup %12147  ;;  %v1561_v19 = vpop.f32.mrf.mxu1  ;;  %12161 = vtanh.f32 %v1557_v15  ;;  %v1686_v15 = vld [vmem:[#allocation5 + $0xa0] sm:$0xff] }
 0x2c8   : > { %v12150_v5 = vpop.eup %12149  ;;  %v1562_v21 = vadd.f32 %v13717_v57, %v1561_v19  ;;  %v1814_v19 = vld [vmem:[#allocation5 + $0x4a0] sm:$0xff] }
 0x2c9   : > { %v13887_v8 = vpack.c.bf16 %v12150_v5, %v12148_v0  ;;  %v1694_v0 = vld [vmem:[#allocation5 + $0xe0] sm:$0xff] }
 0x2ca   : > { %12163 = vtanh.f32 %v1562_v21  ;;  %v10758_v11 = vcombine.high %v1690_v63, %v1694_v0  ;;  %v10885_v21 = vcombine.low %v1818_v3, %v1822_v4 }
 0x2cb   : > { %v12152_v13 = vpop.eup %12151  ;;  %12165 = vtanh.f32 %v1567_v23 }
 0x2cc   : > { %10611 = vmatmul.mubr.msk.bf16.gmra.mxu0 %vm2130_vm2, %v13837_v27  ;;  %10627 = vmatmul.mubr.msk.bf16.gmra.mxu1 %vm2130_vm2, %v13837_v27  ;;  %v12154_v16 = vpop.eup %12153 }
 0x2cd   : > { %2281 = vmatprep.mubr.bf16.mxu0 %v13199_v1  ;;  %2474 = vmatprep.mubr.bf16.mxu1 %v13199_v1  ;;  %v13897_v17 = vpack.c.bf16 %v12154_v16, %v12152_v13  ;;  %v10886_v13 = vcombine.high %v1818_v3, %v1822_v4  ;;  %v1810_v16 = vld [vmem:[#allocation5 + $0x480] sm:$0xff] }
 0x2ce   : > { %v10878_v23 = vcombine.high %v1810_v16, %v1814_v19  ;;  %v10877_v36 = vcombine.low %v1810_v16, %v1814_v19  ;;  %v1770_v4 = vld [vmem:[#allocation5 + $0x340] sm:$0xff] }
 0x2cf   : > { %v12156_v22 = vpop.eup %12155  ;;  %v1762_v19 = vld [vmem:[#allocation5 + $0x300] sm:$0xff] }
 0x2d0   : > { %v12158_v24 = vpop.eup %12157 }
 0x2d1   : > { %v13907_v25 = vpack.c.bf16 %v12158_v24, %v12156_v22  ;;  %v10750_v22 = vcombine.high %v1682_v14, %v1686_v15  ;;  %v1674_v24 = vld [vmem:[#allocation5 + $0x40] sm:$0xff] }
 0x2d3   : > { %v12160_v26 = vpop.eup %12159 }
 0x2d4   : > { %10612 = vmatmul.mubr.msk.bf16.gmra.mxu0 %vm2130_vm2, %v13847_v37  ;;  %10628 = vmatmul.mubr.msk.bf16.gmra.mxu1 %vm2130_vm2, %v13847_v37  ;;  %v12162_v28 = vpop.eup %12161 }
 0x2d5   : > { %2291 = vmatprep.mubr.bf16.mxu0 %v13199_v1  ;;  %2484 = vmatprep.mubr.bf16.mxu1 %v13199_v1  ;;  %v13915_v31 = vpack.c.bf16 %v12162_v28, %v12160_v26  ;;  %v1678_v26 = vld [vmem:[#allocation5 + $0x60] sm:$0xff] }
 0x2d6   : > { %v1802_v28 = vld [vmem:[#allocation5 + $0x440] sm:$0xff]  ;;  %v10742_v35 = vcombine.high %v1674_v24, %v1678_v26 }
 0x2d7   : > { %v12164_v57 = vpop.eup %12163 }
 0x2d8   : > { %v12166_v32 = vpop.eup %12165 }
 0x2d9   : > { %v13923_v34 = vpack.c.bf16 %v12166_v32, %v12164_v57  ;;  %v1806_v57 = vld [vmem:[#allocation5 + $0x460] sm:$0xff]  ;;  %v10749_v32 = vcombine.low %v1682_v14, %v1686_v15 }
 0x2da   : > { %v10870_v38 = vcombine.high %v1802_v28, %v1806_v57 }
 0x2dc   : > { %10613 = vmatmul.mubr.msk.bf16.gmra.mxu0 %vm2130_vm2, %v13857_v44  ;;  %10629 = vmatmul.mubr.msk.bf16.gmra.mxu1 %vm2130_vm2, %v13857_v44 }
 0x2dd   : > { %2301 = vmatprep.mubr.bf16.mxu0 %v13199_v1  ;;  %2494 = vmatprep.mubr.bf16.mxu1 %v13199_v1 }
 0x2e4   : > { %10614 = vmatmul.mubr.msk.bf16.gmra.mxu0 %vm2130_vm2, %v13867_v51  ;;  %10630 = vmatmul.mubr.msk.bf16.gmra.mxu1 %vm2130_vm2, %v13867_v51 }
 0x2e5   : > { %2311 = vmatprep.mubr.bf16.mxu0 %v13199_v1  ;;  %2504 = vmatprep.mubr.bf16.mxu1 %v13199_v1 }
 0x2ec   : > { %10615 = vmatmul.mubr.msk.bf16.gmra.mxu0 %vm2130_vm2, %v13877_v60  ;;  %10631 = vmatmul.mubr.msk.bf16.gmra.mxu1 %vm2130_vm2, %v13877_v60 }
 0x2ed   : > { %2321 = vmatprep.mubr.bf16.mxu0 %v13199_v1  ;;  %2514 = vmatprep.mubr.bf16.mxu1 %v13199_v1 }
 0x2f4   : > { %10616 = vmatmul.mubr.msk.bf16.gmra.mxu0 %vm2130_vm2, %v13887_v8  ;;  %10632 = vmatmul.mubr.msk.bf16.gmra.mxu1 %vm2130_vm2, %v13887_v8 }
 0x2f5   : > { %2331 = vmatprep.mubr.bf16.mxu0 %v13199_v1  ;;  %2524 = vmatprep.mubr.bf16.mxu1 %v13199_v1 }
 0x2fc   : > { %10617 = vmatmul.mubr.msk.bf16.gmra.mxu0 %vm2130_vm2, %v13897_v17  ;;  %10633 = vmatmul.mubr.msk.bf16.gmra.mxu1 %vm2130_vm2, %v13897_v17 }
 0x2fd   : > { %2341 = vmatprep.mubr.bf16.mxu0 %v13199_v1  ;;  %2534 = vmatprep.mubr.bf16.mxu1 %v13199_v1 }
 0x304   : > { %10618 = vmatmul.mubr.msk.bf16.gmra.mxu0 %vm2130_vm2, %v13907_v25  ;;  %10634 = vmatmul.mubr.msk.bf16.gmra.mxu1 %vm2130_vm2, %v13907_v25 }
 0x305   : > { %2351 = vmatprep.mubr.bf16.mxu0 %v13199_v1  ;;  %2544 = vmatprep.mubr.bf16.mxu1 %v13199_v1 }
 0x30c   : > { %10619 = vmatmul.mubr.msk.bf16.gmra.mxu0 %vm2130_vm2, %v13915_v31  ;;  %10635 = vmatmul.mubr.msk.bf16.gmra.mxu1 %vm2130_vm2, %v13915_v31 }
 0x30d   : > { %2361 = vmatprep.mubr.bf16.mxu0 %v13199_v1  ;;  %2554 = vmatprep.mubr.bf16.mxu1 %v13199_v1 }
 0x314   : > { %10620 = vmatmul.mubr.msk.bf16.gmra.mxu0 %vm2130_vm2, %v13923_v34  ;;  %10636 = vmatmul.mubr.msk.bf16.gmra.mxu1 %vm2130_vm2, %v13923_v34 }
 0x315   : > { %2597 = vmatprep.mubr.bf16.mxu0 %v13199_v1  ;;  %2790 = vmatprep.mubr.bf16.mxu1 %v13199_v1 }
 0x31c   : > { %10637 = vmatmul.mubr.msk.bf16.vlgmr.msra.gmra.mxu0 %vm2130_vm2, %v13743_v18  ;;  %10653 = vmatmul.mubr.msk.bf16.vlgmr.msra.gmra.mxu1 %vm2130_vm2, %v13743_v18  ;;  %v10774_v18 = vcombine.high %v1706_v39, %v1710_v40 }
 0x31d   : > { %4552 = vmatpush1.bf16.msra.mxu0 %v10789_v9  ;;  %4745 = vmatpush1.bf16.msra.mxu1 %v10917_v33  ;;  %v1702_v9 = vld [vmem:[#allocation5 + $0x120] sm:$0xff]  ;;  %v10773_v33 = vcombine.low %v1706_v39, %v1710_v40 }
 0x31e   : > { %2607 = vmatprep.mubr.bf16.mxu0 %v13199_v1  ;;  %2800 = vmatprep.mubr.bf16.mxu1 %v13199_v1  ;;  %v10766_v59 = vcombine.high %v1698_v7, %v1702_v9  ;;  %v10765_v5 = vcombine.low %v1698_v7, %v1702_v9  ;;  %v1670_v39 = vld [vmem:[#allocation5 + $0x20] sm:$0xff] }
 0x31f   : > { %4553 = vmatprep.subr.bf16.mxu0 %v10782_v43  ;;  %4746 = vmatprep.subr.bf16.mxu1 %v10910_v45  ;;  %v1794_v40 = vld [vmem:[#allocation5 + $0x400] sm:$0xff]  ;;  %v10869_v45 = vcombine.low %v1802_v28, %v1806_v57  ;;  %v10734_v46 = vcombine.high %v1666_v62, %v1670_v39  ;;  %v10733_v7 = vcombine.low %v1666_v62, %v1670_v39 }
 0x320   : > { %v1798_v43 = vld [vmem:[#allocation5 + $0x420] sm:$0xff] }
 0x321   : > { %4554 = vmatpush1.bf16.msra.mxu0 %v10781_v50  ;;  %4747 = vmatpush1.bf16.msra.mxu1 %v10909_v52  ;;  %v10862_v47 = vcombine.high %v1794_v40, %v1798_v43  ;;  %v1786_v50 = vld [vmem:[#allocation5 + $0x3c0] sm:$0xff]  ;;  %v10861_v9 = vcombine.low %v1794_v40, %v1798_v43 }
 0x322   : > { %4555 = vmatprep.subr.bf16.mxu0 %v10774_v18  ;;  %4748 = vmatprep.subr.bf16.mxu1 %v10902_v55  ;;  %v1790_v52 = vld [vmem:[#allocation5 + $0x3e0] sm:$0xff] }
 0x323   : > { %v1914_v18 = vld [vmem:[#allocation5 + $0x7c0] sm:$0xff]  ;;  %v10854_v29 = vcombine.high %v1786_v50, %v1790_v52 }
 0x324   : > { %10638 = vmatmul.mubr.msk.bf16.gmra.mxu0 %vm2130_vm2, %v13783_v41  ;;  %10654 = vmatmul.mubr.msk.bf16.gmra.mxu1 %vm2130_vm2, %v13783_v41  ;;  %v10757_v41 = vcombine.low %v1690_v63, %v1694_v0  ;;  %v1918_v55 = vld [vmem:[#allocation5 + $0x7e0] sm:$0xff] }
 0x325   : > { %2617 = vmatprep.mubr.bf16.mxu0 %v13199_v1  ;;  %2810 = vmatprep.mubr.bf16.mxu1 %v13199_v1  ;;  %v10982_v30 = vcombine.high %v1914_v18, %v1918_v55  ;;  %v10981_v63 = vcombine.low %v1914_v18, %v1918_v55  ;;  %v1754_v28 = vld [vmem:[#allocation5 + $0x2c0] sm:$0xff] }
 0x326   : > { %4556 = vmatpush1.bf16.msra.mxu0 %v10773_v33  ;;  %4749 = vmatpush1.bf16.msra.mxu1 %v10901_v58  ;;  %v1778_v33 = vld [vmem:[#allocation5 + $0x380] sm:$0xff] }
 0x327   : > { %4557 = vmatprep.subr.bf16.mxu0 %v10766_v59  ;;  %4750 = vmatprep.subr.bf16.mxu1 %v10894_v61  ;;  %v1782_v58 = vld [vmem:[#allocation5 + $0x3a0] sm:$0xff] }
 0x328   : > { %v1906_v59 = vld [vmem:[#allocation5 + $0x780] sm:$0xff]  ;;  %v10846_v0 = vcombine.high %v1778_v33, %v1782_v58 }
 0x329   : > { %v1910_v61 = vld [vmem:[#allocation5 + $0x7a0] sm:$0xff] }
 0x32a   : > { %4558 = vmatpush1.bf16.msra.mxu0 %v10765_v5  ;;  %4751 = vmatpush1.bf16.msra.mxu1 %v10893_v10  ;;  %v10974_v3 = vcombine.high %v1906_v59, %v1910_v61  ;;  %v1774_v5 = vld [vmem:[#allocation5 + $0x360] sm:$0xff]  ;;  %v10973_v14 = vcombine.low %v1906_v59, %v1910_v61 }
 0x32b   : > { %4559 = vmatprep.subr.bf16.mxu0 %v10758_v11  ;;  %4752 = vmatprep.subr.bf16.mxu1 %v10886_v13  ;;  %v1898_v10 = vld [vmem:[#allocation5 + $0x740] sm:$0xff]  ;;  %v10845_v13 = vcombine.low %v1778_v33, %v1782_v58  ;;  %v10838_v15 = vcombine.high %v1770_v4, %v1774_v5 }
 0x32c   : > { %10639 = vmatmul.mubr.msk.bf16.gmra.mxu0 %vm2130_vm2, %v13797_v56  ;;  %10655 = vmatmul.mubr.msk.bf16.gmra.mxu1 %vm2130_vm2, %v13797_v56  ;;  %v10741_v56 = vcombine.low %v1674_v24, %v1678_v26  ;;  %v1902_v11 = vld [vmem:[#allocation5 + $0x760] sm:$0xff] }
 0x32d   : > { %2627 = vmatprep.mubr.bf16.mxu0 %v13199_v1  ;;  %2820 = vmatprep.mubr.bf16.mxu1 %v13199_v1  ;;  %v10966_v16 = vcombine.high %v1898_v10, %v1902_v11  ;;  %v1758_v57 = vld [vmem:[#allocation5 + $0x2e0] sm:$0xff] }
 0x32e   : > { %4560 = vmatpush1.bf16.msra.mxu0 %v10757_v41  ;;  %4753 = vmatpush1.bf16.msra.mxu1 %v10885_v21  ;;  %v1766_v41 = vld [vmem:[#allocation5 + $0x320] sm:$0xff]  ;;  %v10822_v62 = vcombine.high %v1754_v28, %v1758_v57 }
 0x32f   : > { %4561 = vmatprep.subr.bf16.mxu0 %v10750_v22  ;;  %4754 = vmatprep.subr.bf16.mxu1 %v10878_v23  ;;  %v1890_v21 = vld [vmem:[#allocation5 + $0x700] sm:$0xff]  ;;  %v10965_v23 = vcombine.low %v1898_v10, %v1902_v11  ;;  %v10830_v24 = vcombine.high %v1762_v19, %v1766_v41  ;;  %v10792_v10 = vcombine.high %v13931_v42, %v13933_v48 }
 0x330   : > { %v1894_v22 = vld [vmem:[#allocation5 + $0x720] sm:$0xff]  ;;  %v10920_v11 = vcombine.high %v13947_v53, %v13949_v54 }
 0x331   : > { %v10958_v26 = vcombine.high %v1890_v21, %v1894_v22  ;;  %v1746_v40 = vld [vmem:[#allocation5 + $0x280] sm:$0xff] }
 0x332   : > { %4562 = vmatpush1.bf16.msra.mxu0 %v10749_v32  ;;  %4755 = vmatpush1.bf16.msra.mxu1 %v10877_v36  ;;  %v1882_v32 = vld [vmem:[#allocation5 + $0x6c0] sm:$0xff] }
 0x333   : > { %4563 = vmatprep.subr.bf16.mxu0 %v10742_v35  ;;  %4756 = vmatprep.subr.bf16.mxu1 %v10870_v38  ;;  %v1886_v36 = vld [vmem:[#allocation5 + $0x6e0] sm:$0xff]  ;;  %v10829_v35 = vcombine.low %v1762_v19, %v1766_v41  ;;  %v10957_v38 = vcombine.low %v1890_v21, %v1894_v22 }
 0x334   : > { %10640 = vmatmul.mubr.msk.bf16.gmra.mxu0 %vm2130_vm2, %v13807_v2  ;;  %10656 = vmatmul.mubr.msk.bf16.gmra.mxu1 %vm2130_vm2, %v13807_v2  ;;  %v10853_v2 = vcombine.low %v1786_v50, %v1790_v52  ;;  %v10950_v39 = vcombine.high %v1882_v32, %v1886_v36  ;;  %v1750_v43 = vld [vmem:[#allocation5 + $0x2a0] sm:$0xff] }
 0x335   : > { %2637 = vmatprep.mubr.bf16.mxu0 %v13199_v1  ;;  %2830 = vmatprep.mubr.bf16.mxu1 %v13199_v1  ;;  %v1738_v52 = vld [vmem:[#allocation5 + $0x240] sm:$0xff] }
 0x336   : > { %4564 = vmatpush1.bf16.msra.mxu0 %v10741_v56  ;;  %4757 = vmatpush1.bf16.msra.mxu1 %v10869_v45  ;;  %v1874_v56 = vld [vmem:[#allocation5 + $0x680] sm:$0xff] }
 0x337   : > { %4565 = vmatprep.subr.bf16.mxu0 %v10734_v46  ;;  %4758 = vmatprep.subr.bf16.mxu1 %v10862_v47  ;;  %v1878_v45 = vld [vmem:[#allocation5 + $0x6a0] sm:$0xff]  ;;  %v10949_v46 = vcombine.low %v1882_v32, %v1886_v36  ;;  %v10814_v47 = vcombine.high %v1746_v40, %v1750_v43 }
 0x338   : > { %v10942_v50 = vcombine.high %v1874_v56, %v1878_v45  ;;  %v1742_v18 = vld [vmem:[#allocation5 + $0x260] sm:$0xff] }
 0x339   : > { %v1866_v55 = vld [vmem:[#allocation5 + $0x640] sm:$0xff] }
 0x33a   : > { %4566 = vmatpush1.bf16.msra.mxu0 %v10733_v7  ;;  %4759 = vmatpush1.bf16.msra.mxu1 %v10861_v9  ;;  %v1870_v7 = vld [vmem:[#allocation5 + $0x660] sm:$0xff]  ;;  %v10813_v9 = vcombine.low %v1746_v40, %v1750_v43 }
 0x33b   : > { %4567 = vmatprep.subr.bf16.mxu0 %v10854_v29  ;;  %4760 = vmatprep.subr.bf16.mxu1 %v10982_v30  ;;  %v10941_v29 = vcombine.low %v1874_v56, %v1878_v45  ;;  %v10806_v30 = vcombine.high %v1738_v52, %v1742_v18  ;;  %v10934_v33 = vcombine.high %v1866_v55, %v1870_v7  ;;  %v1730_v58 = vld [vmem:[#allocation5 + $0x200] sm:$0xff] }
 0x33c   : > { %10641 = vmatmul.mubr.msk.bf16.gmra.mxu0 %vm2130_vm2, %v13817_v12  ;;  %10657 = vmatmul.mubr.msk.bf16.gmra.mxu1 %vm2130_vm2, %v13817_v12  ;;  %v10837_v12 = vcombine.low %v1770_v4, %v1774_v5  ;;  %v1734_v59 = vld [vmem:[#allocation5 + $0x220] sm:$0xff] }
 0x33d   : > { %2647 = vmatprep.mubr.bf16.mxu0 %v13199_v1  ;;  %2840 = vmatprep.mubr.bf16.mxu1 %v13199_v1  ;;  %v1858_v61 = vld [vmem:[#allocation5 + $0x600] sm:$0xff]  ;;  %v10797_v4 = vcombine.low %v1730_v58, %v1734_v59 }
 0x33e   : > { %4568 = vmatpush2.bf16.msra.mxu0 %v10853_v2  ;;  %4761 = vmatpush2.bf16.msra.mxu1 %v10981_v63  ;;  %v1862_v2 = vld [vmem:[#allocation5 + $0x620] sm:$0xff]  ;;  %v10933_v63 = vcombine.low %v1866_v55, %v1870_v7 }
 0x33f   : > { %4569 = vmatprep.subr.bf16.mxu0 %v10846_v0  ;;  %4762 = vmatprep.subr.bf16.mxu1 %v10974_v3  ;;  %v10798_v0 = vcombine.high %v1730_v58, %v1734_v59  ;;  %v10926_v3 = vcombine.high %v1858_v61, %v1862_v2  ;;  %v10925_v5 = vcombine.low %v1858_v61, %v1862_v2 }
 0x342   : > { %4570 = vmatpush2.bf16.msra.mxu0 %v10845_v13  ;;  %4763 = vmatpush2.bf16.msra.mxu1 %v10973_v14 }
 0x343   : > { %4571 = vmatprep.subr.bf16.mxu0 %v10838_v15  ;;  %4764 = vmatprep.subr.bf16.mxu1 %v10966_v16 }
 0x344   : > { %10642 = vmatmul.mubr.msk.bf16.gmra.mxu0 %vm2130_vm2, %v13827_v20  ;;  %10658 = vmatmul.mubr.msk.bf16.gmra.mxu1 %vm2130_vm2, %v13827_v20  ;;  %v10821_v20 = vcombine.low %v1754_v28, %v1758_v57 }
 0x345   : > { %2657 = vmatprep.mubr.bf16.mxu0 %v13199_v1  ;;  %2850 = vmatprep.mubr.bf16.mxu1 %v13199_v1 }
 0x346   : > { %4572 = vmatpush2.bf16.msra.mxu0 %v10837_v12  ;;  %4765 = vmatpush2.bf16.msra.mxu1 %v10965_v23 }
 0x347   : > { %4573 = vmatprep.subr.bf16.mxu0 %v10830_v24  ;;  %4766 = vmatprep.subr.bf16.mxu1 %v10958_v26 }
 0x34a   : > { %4574 = vmatpush2.bf16.msra.mxu0 %v10829_v35  ;;  %4767 = vmatpush2.bf16.msra.mxu1 %v10957_v38 }
 0x34b   : > { %4575 = vmatprep.subr.bf16.mxu0 %v10822_v62  ;;  %4768 = vmatprep.subr.bf16.mxu1 %v10950_v39 }
 0x34c   : > { %10643 = vmatmul.mubr.msk.bf16.gmra.mxu0 %vm2130_vm2, %v13837_v27  ;;  %10659 = vmatmul.mubr.msk.bf16.gmra.mxu1 %vm2130_vm2, %v13837_v27  ;;  %v10805_v27 = vcombine.low %v1738_v52, %v1742_v18 }
 0x34d   : > { %2667 = vmatprep.mubr.bf16.mxu0 %v13199_v1  ;;  %2860 = vmatprep.mubr.bf16.mxu1 %v13199_v1 }
 0x34e   : > { %4576 = vmatpush2.bf16.msra.mxu0 %v10821_v20  ;;  %4769 = vmatpush2.bf16.msra.mxu1 %v10949_v46 }
 0x34f   : > { %4577 = vmatprep.subr.bf16.mxu0 %v10814_v47  ;;  %4770 = vmatprep.subr.bf16.mxu1 %v10942_v50 }
 0x352   : > { %4578 = vmatpush2.bf16.msra.mxu0 %v10813_v9  ;;  %4771 = vmatpush2.bf16.msra.mxu1 %v10941_v29 }
 0x353   : > { %4579 = vmatprep.subr.bf16.mxu0 %v10806_v30  ;;  %4772 = vmatprep.subr.bf16.mxu1 %v10934_v33 }
 0x354   : > { %10644 = vmatmul.mubr.msk.bf16.gmra.mxu0 %vm2130_vm2, %v13847_v37  ;;  %10660 = vmatmul.mubr.msk.bf16.gmra.mxu1 %vm2130_vm2, %v13847_v37 }
 0x355   : > { %2677 = vmatprep.mubr.bf16.mxu0 %v13199_v1  ;;  %2870 = vmatprep.mubr.bf16.mxu1 %v13199_v1 }
 0x356   : > { %4580 = vmatpush2.bf16.msra.mxu0 %v10805_v27  ;;  %4773 = vmatpush2.bf16.msra.mxu1 %v10933_v63 }
 0x357   : > { %4581 = vmatprep.subr.bf16.mxu0 %v10798_v0  ;;  %4774 = vmatprep.subr.bf16.mxu1 %v10926_v3 }
 0x35a   : > { %4582 = vmatpush2.bf16.msra.mxu0 %v10797_v4  ;;  %4775 = vmatpush2.bf16.msra.mxu1 %v10925_v5 }
 0x35b   : > { %4937 = vmatprep.subr.bf16.mxu0 %v10792_v10  ;;  %5130 = vmatprep.subr.bf16.mxu1 %v10920_v11  ;;  %v14152_v11 = vld [vmem:[%s13403_s15 + $0x4] ss:$16 sps:$4 sm:$0xff]  }
 0x35c   : > { %v14001_v37 = vpop.f32.mrf.mxu0  ;;  %v14003_v13 = vpop.f32.mrf.mxu1  ;;  %10645 = vmatmul.mubr.msk.bf16.gmra.mxu0 %vm2130_vm2, %v13857_v44  ;;  %10661 = vmatmul.mubr.msk.bf16.gmra.mxu1 %vm2130_vm2, %v13857_v44 }
 0x35d   : > { %17814 = vst [vmem:[#allocation10_spill] sm:$0xff] %v14003_v13  ;;  %2687 = vmatprep.mubr.bf16.mxu0 %v13199_v1  ;;  %2880 = vmatprep.mubr.bf16.mxu1 %v13199_v1  ;;  %v14236_v13 = vld [vmem:[%s13403_s15 + $0x44] ss:$16 sps:$4 sm:$0xff]  }
 0x35e   : > { %v14011_v14 = vpop.f32.mrf.mxu0  ;;  %v14013_v15 = vpop.f32.mrf.mxu1 }
 0x35f   : > { %17815 = vst [vmem:[#allocation11_spill] sm:$0xff] %v14013_v15 }
 0x360   : > { %v14015_v16 = vpop.f32.mrf.mxu0  ;;  %v14017_v19 = vpop.f32.mrf.mxu1 }
 0x361   : > { %17816 = vst [vmem:[#allocation12_spill] sm:$0xff] %v14017_v19  ;;  %v14215_v19 = vld [vmem:[#allocation5 + $0x5f0] sm:$0xff] }
 0x362   : > { %v14019_v41 = vpop.f32.mrf.mxu0  ;;  %v14021_v21 = vpop.f32.mrf.mxu1 }
 0x363   : > { %17817 = vst [vmem:[#allocation13_spill] sm:$0xff] %v14021_v21  ;;  %v14213_v21 = vld [vmem:[#allocation5 + $0x5d0] sm:$0xff] }
 0x364   : > { %v14023_v22 = vpop.f32.mrf.mxu0  ;;  %v14025_v12 = vpop.f32.mrf.mxu1  ;;  %10646 = vmatmul.mubr.msk.bf16.gmra.mxu0 %vm2130_vm2, %v13867_v51  ;;  %10662 = vmatmul.mubr.msk.bf16.gmra.mxu1 %vm2130_vm2, %v13867_v51 }
 0x365   : > { %17818 = vst [vmem:[#allocation14_spill] sm:$0xff] %v14023_v22  ;;  %17819 = vst [vmem:[#allocation15_spill] sm:$0xff] %v14025_v12  ;;  %2697 = vmatprep.mubr.bf16.mxu0 %v13199_v1  ;;  %2890 = vmatprep.mubr.bf16.mxu1 %v13199_v1 }
 0x366   : > { %v14033_v44 = vpop.f32.mrf.mxu0  ;;  %v14035_v23 = vpop.f32.mrf.mxu1 }
 0x367   : > { %17820 = vst [vmem:[#allocation16_spill] sm:$0xff] %v14033_v44  ;;  %17821 = vst [vmem:[#allocation17_spill] sm:$0xff] %v14035_v23  ;;  %v17877_v23 = vcombine.low %v13947_v53, %v13949_v54  ;;  %v14226_v54 = vld [vmem:[%s13403_s15 + $0x20] ss:$16 sps:$4 sm:$0xff]  }
 0x368   : > { %v14037_v24 = vpop.f32.mrf.mxu0  ;;  %v14039_v26 = vpop.f32.mrf.mxu1 }
 0x369   : > { %17822 = vst [vmem:[#allocation18_spill] sm:$0xff] %v14037_v24  ;;  %17823 = vst [vmem:[#allocation19_spill] sm:$0xff] %v14039_v26 }
 0x36a   : > { %v14041_v28 = vpop.f32.mrf.mxu0  ;;  %v14043_v57 = vpop.f32.mrf.mxu1 }
 0x36b   : > { %17824 = vst [vmem:[#allocation20_spill] sm:$0xff] %v14041_v28  ;;  %17825 = vst [vmem:[#allocation21_spill] sm:$0xff] %v14043_v57  ;;  %v1863_v28 = vld [vmem:[#allocation5 + $0x628] sm:$0xff] }
 0x36c   : > { %v14045_v32 = vpop.f32.mrf.mxu0  ;;  %v14047_v36 = vpop.f32.mrf.mxu1  ;;  %10647 = vmatmul.mubr.msk.bf16.gmra.mxu0 %vm2130_vm2, %v13877_v60  ;;  %10663 = vmatmul.mubr.msk.bf16.gmra.mxu1 %vm2130_vm2, %v13877_v60 }
 0x36d   : > { %17826 = vst [vmem:[#allocation22_spill] sm:$0xff] %v14045_v32  ;;  %17827 = vst [vmem:[#allocation23_spill] sm:$0xff] %v14047_v36  ;;  %2707 = vmatprep.mubr.bf16.mxu0 %v13199_v1  ;;  %2900 = vmatprep.mubr.bf16.mxu1 %v13199_v1 }
 0x36e   : > { %v14055_v51 = vpop.f32.mrf.mxu0  ;;  %v14057_v35 = vpop.f32.mrf.mxu1 }
 0x36f   : > { %17828 = vst [vmem:[#allocation24_spill] sm:$0xff] %v14055_v51  ;;  %17829 = vst [vmem:[#allocation25_spill] sm:$0xff] %v14057_v35  ;;  %v1839_v35 = vld [vmem:[#allocation5 + $0x568] sm:$0xff] }
 0x370   : > { %v14059_v38 = vpop.f32.mrf.mxu0  ;;  %v14061_v62 = vpop.f32.mrf.mxu1 }
 0x371   : > { %17830 = vst [vmem:[#allocation26_spill] sm:$0xff] %v14059_v38  ;;  %17831 = vst [vmem:[#allocation27_spill] sm:$0xff] %v14061_v62  ;;  %v1711_v62 = vld [vmem:[#allocation5 + $0x168] sm:$0xff] }
 0x372   : > { %v14063_v39 = vpop.f32.mrf.mxu0  ;;  %v14065_v40 = vpop.f32.mrf.mxu1 }
 0x373   : > { %17832 = vst [vmem:[#allocation28_spill] sm:$0xff] %v14063_v39  ;;  %17833 = vst [vmem:[#allocation29_spill] sm:$0xff] %v14065_v40  ;;  %v1879_v39 = vld [vmem:[#allocation5 + $0x6a8] sm:$0xff] }
 0x374   : > { %v14067_v43 = vpop.f32.mrf.mxu0  ;;  %v14069_v56 = vpop.f32.mrf.mxu1  ;;  %10648 = vmatmul.mubr.msk.bf16.gmra.mxu0 %vm2130_vm2, %v13887_v8  ;;  %10664 = vmatmul.mubr.msk.bf16.gmra.mxu1 %vm2130_vm2, %v13887_v8 }
 0x375   : > { %17834 = vst [vmem:[#allocation30_spill] sm:$0xff] %v14067_v43  ;;  %17835 = vst [vmem:[#allocation31_spill] sm:$0xff] %v14069_v56  ;;  %2717 = vmatprep.mubr.bf16.mxu0 %v13199_v1  ;;  %2910 = vmatprep.mubr.bf16.mxu1 %v13199_v1 }
 0x376   : > { %v14077_v60 = vpop.f32.mrf.mxu0  ;;  %v14079_v45 = vpop.f32.mrf.mxu1 }
 0x377   : > { %17836 = vst [vmem:[#allocation32_spill] sm:$0xff] %v14077_v60  ;;  %17837 = vst [vmem:[#allocation33_spill] sm:$0xff] %v14079_v45  ;;  %v14197_v45 = vld [vmem:[#allocation5 + $0x1f0] sm:$0xff] }
 0x378   : > { %v14081_v20 = vpop.f32.mrf.mxu0  ;;  %v14083_v46 = vpop.f32.mrf.mxu1 }
 0x379   : > { %17838 = vst [vmem:[#allocation34_spill] sm:$0xff] %v14081_v20  ;;  %17839 = vst [vmem:[#allocation35_spill] sm:$0xff] %v14083_v46  ;;  %v14195_v46 = vld [vmem:[#allocation5 + $0x1d0] sm:$0xff] }
 0x37a   : > { %v14085_v47 = vpop.f32.mrf.mxu0  ;;  %v14087_v50 = vpop.f32.mrf.mxu1 }
 0x37b   : > { %17840 = vst [vmem:[#allocation36_spill] sm:$0xff] %v14085_v47  ;;  %17841 = vst [vmem:[#allocation37_spill] sm:$0xff] %v14087_v50  ;;  %v1895_v47 = vld [vmem:[#allocation5 + $0x728] sm:$0xff] }
 0x37c   : > { %v14089_v52 = vpop.f32.mrf.mxu0  ;;  %v14091_v18 = vpop.f32.mrf.mxu1  ;;  %10649 = vmatmul.mubr.msk.bf16.gmra.mxu0 %vm2130_vm2, %v13897_v17  ;;  %10665 = vmatmul.mubr.msk.bf16.gmra.mxu1 %vm2130_vm2, %v13897_v17 }
 0x37d   : > { %17842 = vst [vmem:[#allocation38_spill] sm:$0xff] %v14089_v52  ;;  %17843 = vst [vmem:[#allocation39_spill] sm:$0xff] %v14091_v18  ;;  %2727 = vmatprep.mubr.bf16.mxu0 %v13199_v1  ;;  %2920 = vmatprep.mubr.bf16.mxu1 %v13199_v1 }
 0x37e   : > { %v14099_v8 = vpop.f32.mrf.mxu0  ;;  %v14101_v55 = vpop.f32.mrf.mxu1 }
 0x37f   : > { %17844 = vst [vmem:[#allocation40_spill] sm:$0xff] %v14099_v8  ;;  %17845 = vst [vmem:[#allocation41_spill] sm:$0xff] %v14101_v55  ;;  %v14189_v55 = vld [vmem:[%s13403_s15 + $0x2c] ss:$16 sps:$4 sm:$0xff]  }
 0x380   : > { %v14103_v7 = vpop.f32.mrf.mxu0  ;;  %v14105_v9 = vpop.f32.mrf.mxu1 }
 0x381   : > { %17846 = vst [vmem:[#allocation42_spill] sm:$0xff] %v14103_v7  ;;  %17847 = vst [vmem:[#allocation43_spill] sm:$0xff] %v14105_v9  ;;  %v14186_v9 = vld [vmem:[%s13403_s15 + $0x24] ss:$16 sps:$4 sm:$0xff]  }
 0x382   : > { %v14107_v29 = vpop.f32.mrf.mxu0  ;;  %v14109_v30 = vpop.f32.mrf.mxu1 }
 0x383   : > { %17848 = vst [vmem:[#allocation44_spill] sm:$0xff] %v14107_v29  ;;  %17849 = vst [vmem:[#allocation45_spill] sm:$0xff] %v14109_v30  ;;  %v1843_v30 = vld [vmem:[#allocation5 + $0x588] sm:$0xff] }
 0x384   : > { %v14111_v33 = vpop.f32.mrf.mxu0  ;;  %v14113_v58 = vpop.f32.mrf.mxu1  ;;  %10650 = vmatmul.mubr.msk.bf16.gmra.mxu0 %vm2130_vm2, %v13907_v25  ;;  %10666 = vmatmul.mubr.msk.bf16.gmra.mxu1 %vm2130_vm2, %v13907_v25  ;;  %v1911_v29 = vld [vmem:[#allocation5 + $0x7a8] sm:$0xff] }
 0x385   : > { %17850 = vst [vmem:[#allocation46_spill] sm:$0xff] %v14111_v33  ;;  %17851 = vst [vmem:[#allocation47_spill] sm:$0xff] %v14113_v58  ;;  %2737 = vmatprep.mubr.bf16.mxu0 %v13199_v1  ;;  %2930 = vmatprep.mubr.bf16.mxu1 %v13199_v1  ;;  %v1719_v58 = vld [vmem:[#allocation5 + $0x1a8] sm:$0xff] }
 0x386   : > { %v14121_v17 = vpop.f32.mrf.mxu0  ;;  %v14123_v59 = vpop.f32.mrf.mxu1 }
 0x387   : > { %17852 = vst [vmem:[#allocation48_spill] sm:$0xff] %v14121_v17  ;;  %17853 = vst [vmem:[#allocation49_spill] sm:$0xff] %v14123_v59 }
 0x388   : > { %v14125_v61 = vpop.f32.mrf.mxu0  ;;  %v14127_v2 = vpop.f32.mrf.mxu1 }
 0x389   : > { %17854 = vst [vmem:[#allocation50_spill] sm:$0xff] %v14125_v61  ;;  %17855 = vst [vmem:[#allocation51_spill] sm:$0xff] %v14127_v2 }
 0x38a   : > { %v14129_v27 = vpop.f32.mrf.mxu0  ;;  %v14131_v63 = vpop.f32.mrf.mxu1 }
 0x38b   : > { %17856 = vst [vmem:[#allocation52_spill] sm:$0xff] %v14129_v27  ;;  %17857 = vst [vmem:[#allocation53_spill] sm:$0xff] %v14131_v63  ;;  %v14179_v63 = vld [vmem:[%s13403_s15 + $0x8] ss:$16 sps:$4 sm:$0xff]  }
 0x38c   : > { %v14133_v0 = vpop.f32.mrf.mxu0  ;;  %v14135_v25 = vpop.f32.mrf.mxu1  ;;  %10651 = vmatmul.mubr.msk.bf16.gmra.mxu0 %vm2130_vm2, %v13915_v31  ;;  %10667 = vmatmul.mubr.msk.bf16.gmra.mxu1 %vm2130_vm2, %v13915_v31  ;;  %v1799_v27 = vld [vmem:[#allocation5 + $0x428] sm:$0xff] }
 0x38d   : > { %17858 = vst [vmem:[#allocation54_spill] sm:$0xff] %v14133_v0  ;;  %17859 = vst [vmem:[#allocation55_spill] sm:$0xff] %v14135_v25  ;;  %2747 = vmatprep.mubr.bf16.mxu0 %v13199_v1  ;;  %2940 = vmatprep.mubr.bf16.mxu1 %v13199_v1 }
 0x38e   : > { %v14143_v3 = vpop.f32.mrf.mxu0  ;;  %v14145_v4 = vpop.f32.mrf.mxu1 }
 0x38f   : > { %17860 = vst [vmem:[#allocation56_spill] sm:$0xff] %v14143_v3  ;;  %17861 = vst [vmem:[#allocation57_spill] sm:$0xff] %v14145_v4 }
 0x390   : > { %v14147_v5 = vpop.f32.mrf.mxu0  ;;  %v14149_v10 = vpop.f32.mrf.mxu1 }
 0x391   : > { %17862 = vst [vmem:[#allocation58_spill] sm:$0xff] %v14147_v5  ;;  %17863 = vst [vmem:[#allocation59_spill] sm:$0xff] %v14149_v10 }
 0x392   : > { %v14157_v49 = vpop.f32.mrf.mxu0  ;;  %v14159_v31 = vpop.f32.mrf.mxu1 }
 0x393   : > { %17864 = vst [vmem:[#allocation60_spill] sm:$0xff] %v14157_v49  ;;  %17865 = vst [vmem:[#allocation61_spill] sm:$0xff] %v14159_v31  ;;  %v14176_v31 = vld [vmem:[%s13403_s15] ss:$16 sps:$4 sm:$0xff]   ;;  %v1815_v49 = vld [vmem:[#allocation5 + $0x4a8] sm:$0xff] }
 0x394   : > { %v14161_v25 = vpop.f32.mrf.mxu0  ;;  %v14163_v1 = vpop.f32.mrf.mxu1  ;;  %10652 = vmatmul.mubr.msk.bf16.gmra.mxu0 %vm2130_vm2, %v13923_v34  ;;  %10668 = vmatmul.mubr.msk.bf16.gmra.mxu1 %vm2130_vm2, %v13923_v34  ;;  %v1847_v34 = vld [vmem:[#allocation5 + $0x5a8] sm:$0xff] }
 0x395   : > { %17866 = vst [vmem:[#allocation62_spill] sm:$0xff] %v14161_v25  ;;  %17867 = vst [vmem:[#allocation63_spill] sm:$0xff] %v14163_v1  ;;  %4583 = vmatprep.mubr.bf16.mxu0 %v14152_v11  ;;  %4776 = vmatprep.mubr.bf16.mxu1 %v14155_v6  ;;  %v1715_v1 = vld [vmem:[#allocation5 + $0x188] sm:$0xff]  ;;  %v10912_v40 = vcombine.high %v1843_v30, %v1847_v34  ;;  %v10911_v36 = vcombine.low %v1843_v30, %v1847_v34 }
 0x396   : > { %v14171_v10 = vpop.f32.mrf.mxu0  ;;  %v14173_v4 = vpop.f32.mrf.mxu1  ;;  %v10784_v56 = vcombine.high %v1715_v1, %v1719_v58  ;;  %v10783_v12 = vcombine.low %v1715_v1, %v1719_v58  ;;  %v1703_v1 = vld [vmem:[#allocation5 + $0x128] sm:$0xff] }
 0x397   : > { %17868 = vst [vmem:[#allocation64_spill] sm:$0xff] %v14171_v10  ;;  %17869 = vst [vmem:[#allocation65_spill] sm:$0xff] %v14173_v4  ;;  %v1707_v4 = vld [vmem:[#allocation5 + $0x148] sm:$0xff] }
 0x398   : > { %v14181_v2 = vpop.f32.mrf.mxu0  ;;  %v14183_v59 = vpop.f32.mrf.mxu1  ;;  %v1827_v34 = vld [vmem:[#allocation5 + $0x508] sm:$0xff] }
 0x399   : > { %17870 = vst [vmem:[#allocation66_spill] sm:$0xff] %v14181_v2  ;;  %17871 = vst [vmem:[#allocation67_spill] sm:$0xff] %v14183_v59  ;;  %v1835_v59 = vld [vmem:[#allocation5 + $0x548] sm:$0xff] }
 0x39a   : > { %v14191_v18 = vpop.f32.mrf.mxu0  ;;  %v14193_v50 = vpop.f32.mrf.mxu1  ;;  %v1683_v10 = vld [vmem:[#allocation5 + $0x88] sm:$0xff] }
 0x39b   : > { %17872 = vst [vmem:[#allocation68_spill] sm:$0xff] %v14191_v18  ;;  %17873 = vst [vmem:[#allocation69_spill] sm:$0xff] %v14193_v50  ;;  %v17876_v50 = vcombine.low %v13931_v42, %v13933_v48  ;;  %v10776_v42 = vcombine.high %v1707_v4, %v1711_v62  ;;  %v10904_v48 = vcombine.high %v1835_v59, %v1839_v35 }
 0x39c   : > { %v14201_v57 = vpop.f32.mrf.mxu0  ;;  %v14203_v26 = vpop.f32.mrf.mxu1  ;;  %4584 = vmatmul.mubr.bf16.vlgmr.msra.gmra.mxu0 %v14176_v31  ;;  %4777 = vmatmul.mubr.bf16.vlgmr.msra.gmra.mxu1 %v14179_v63 }
 0x39d   : > { %17874 = vst [vmem:[#allocation70_spill] sm:$0xff] %v14201_v57  ;;  %17875 = vst [vmem:[#allocation71_spill] sm:$0xff] %v14203_v26  ;;  %4938 = vmatpush1.bf16.msra.mxu0 %v17876_v50  ;;  %5131 = vmatpush1.bf16.msra.mxu1 %v17877_v23  ;;  %v14229_v23 = vld [vmem:[%s13403_s15 + $0x28] ss:$16 sps:$4 sm:$0xff]   ;;  %v10775_v57 = vcombine.low %v1707_v4, %v1711_v62 }
 0x39e   : > { %v14217_v26 = vpop.f32.mrf.mxu0  ;;  %v14219_v15 = vpop.f32.mrf.mxu1  ;;  %4593 = vmatprep.mubr.bf16.mxu0 %v14186_v9  ;;  %4786 = vmatprep.mubr.bf16.mxu1 %v14189_v55  ;;  %v1699_v50 = vld [vmem:[#allocation5 + $0x108] sm:$0xff] }
 0x39f   : > { %17878 = vst [vmem:[#allocation72_spill] sm:$0xff] %v14217_v26  ;;  %17879 = vst [vmem:[#allocation73_spill] sm:$0xff] %v14219_v15  ;;  %4939 = vmatprep.subr.bf16.mxu0 %v10784_v56  ;;  %5132 = vmatprep.subr.bf16.mxu1 %v10912_v40  ;;  %v1831_v15 = vld [vmem:[#allocation5 + $0x528] sm:$0xff]  ;;  %v10903_v40 = vcombine.low %v1835_v59, %v1839_v35  ;;  %v10767_v59 = vcombine.low %v1699_v50, %v1703_v1 }
 0x3a0   : > { %v14231_v30 = vpop.f32.mrf.mxu0  ;;  %v14233_v58 = vpop.f32.mrf.mxu1  ;;  %v14239_v26 = vld [vmem:[%s13403_s15 + $0x4c] ss:$16 sps:$4 sm:$0xff]   ;;  %v10896_v18 = vcombine.high %v1827_v34, %v1831_v15  ;;  %v10895_v4 = vcombine.low %v1827_v34, %v1831_v15 }
 0x3a1   : > { %17880 = vst [vmem:[#allocation74_spill] sm:$0xff] %v14231_v30  ;;  %17881 = vst [vmem:[#allocation75_spill] sm:$0xff] %v14233_v58  ;;  %4940 = vmatpush1.bf16.msra.mxu0 %v10783_v12  ;;  %5133 = vmatpush1.bf16.msra.mxu1 %v10911_v36  ;;  %v10768_v30 = vcombine.high %v1699_v50, %v1703_v1  ;;  %v1691_v58 = vld [vmem:[#allocation5 + $0xc8] sm:$0xff] }
 0x3a2   : > { %v14241_v56 = vpop.f32.mrf.mxu0  ;;  %v14243_v53 = vpop.f32.mrf.mxu1  ;;  %4941 = vmatprep.subr.bf16.mxu0 %v10776_v42  ;;  %5134 = vmatprep.subr.bf16.mxu1 %v10904_v48  ;;  %v1695_v36 = vld [vmem:[#allocation5 + $0xe8] sm:$0xff]  ;;  %v14258_v42 = vld [vmem:[%s13403_s15 + $0x40] ss:$16 sps:$4 sm:$0xff]  }
 0x3a3   : > { %17882 = vst [vmem:[#allocation76_spill] sm:$0xff] %v14241_v56  ;;  %17883 = vst [vmem:[#allocation77_spill] sm:$0xff] %v14243_v53  ;;  %v1819_v56 = vld [vmem:[#allocation5 + $0x4c8] sm:$0xff] }
 0x3a4   : > { %v14245_v2 = vpop.f32.mrf.mxu0  ;;  %v14247_v12 = vpop.f32.mrf.mxu1  ;;  %4594 = vmatmul.mubr.bf16.gmra.mxu0 %v14226_v54  ;;  %4787 = vmatmul.mubr.bf16.gmra.mxu1 %v14229_v23  ;;  %v1823_v53 = vld [vmem:[#allocation5 + $0x4e8] sm:$0xff] }
 0x3a5   : > { %17884 = vst [vmem:[#allocation78_spill] sm:$0xff] %v14245_v2  ;;  %17885 = vst [vmem:[#allocation79_spill] sm:$0xff] %v14247_v12  ;;  %4603 = vmatprep.mubr.bf16.mxu0 %v14236_v13  ;;  %4796 = vmatprep.mubr.bf16.mxu1 %v14239_v26  ;;  %v14261_v48 = vld [vmem:[%s13403_s15 + $0x48] ss:$16 sps:$4 sm:$0xff]   ;;  %v10760_v12 = vcombine.high %v1691_v58, %v1695_v36  ;;  %v10888_v2 = vcombine.high %v1819_v56, %v1823_v53  ;;  %v14271_v50 = vld [vmem:[%s13403_s15 + $0x6c] ss:$16 sps:$4 sm:$0xff]  }
 0x3a6   : > { %v14253_v35 = vpop.f32.mrf.mxu0  ;;  %v14255_v62 = vpop.f32.mrf.mxu1  ;;  %4942 = vmatpush1.bf16.msra.mxu0 %v10775_v57  ;;  %5135 = vmatpush1.bf16.msra.mxu1 %v10903_v40  ;;  %v1811_v57 = vld [vmem:[#allocation5 + $0x488] sm:$0xff]  ;;  %v14268_v40 = vld [vmem:[%s13403_s15 + $0x64] ss:$16 sps:$4 sm:$0xff]  }
 0x3a7   : > { %17886 = vst [vmem:[#allocation80_spill] sm:$0xff] %v14253_v35  ;;  %17887 = vst [vmem:[#allocation81_spill] sm:$0xff] %v14255_v62  ;;  %4943 = vmatprep.subr.bf16.mxu0 %v10768_v30  ;;  %5136 = vmatprep.subr.bf16.mxu1 %v10896_v18  ;;  %v1687_v62 = vld [vmem:[#allocation5 + $0xa8] sm:$0xff]  ;;  %v10759_v18 = vcombine.low %v1691_v58, %v1695_v36  ;;  %v10887_v30 = vcombine.low %v1819_v56, %v1823_v53 }
 0x3a8   : > { %v14263_v25 = vpop.f32.mrf.mxu0  ;;  %v14265_v35 = vpop.f32.mrf.mxu1  ;;  %v10752_v34 = vcombine.high %v1683_v10, %v1687_v62  ;;  %v10751_v58 = vcombine.low %v1683_v10, %v1687_v62  ;;  %v10879_v56 = vcombine.low %v1811_v57, %v1815_v49  ;;  %v14293_v36 = vld [vmem:[%s13403_s15 + $0x68] ss:$16 sps:$4 sm:$0xff]   ;;  %v14303_v10 = vld [vmem:[%s13403_s15 + $0x8c] ss:$16 sps:$4 sm:$0xff]  }
 0x3a9   : > { %17888 = vst [vmem:[#allocation82_spill] sm:$0xff] %v14263_v25  ;;  %17889 = vst [vmem:[#allocation83_spill] sm:$0xff] %v14265_v35  ;;  %v10880_v25 = vcombine.high %v1811_v57, %v1815_v49  ;;  %v1675_v35 = vld [vmem:[#allocation5 + $0x48] sm:$0xff] }
 0x3aa   : > { %v14273_v15 = vpop.f32.mrf.mxu0  ;;  %v14275_v1 = vpop.f32.mrf.mxu1  ;;  %4944 = vmatpush1.bf16.msra.mxu0 %v10767_v59  ;;  %5137 = vmatpush1.bf16.msra.mxu1 %v10895_v4  ;;  %v1803_v59 = vld [vmem:[#allocation5 + $0x448] sm:$0xff] }
 0x3ab   : > { %17890 = vst [vmem:[#allocation84_spill] sm:$0xff] %v14273_v15  ;;  %17891 = vst [vmem:[#allocation85_spill] sm:$0xff] %v14275_v1  ;;  %4945 = vmatprep.subr.bf16.mxu0 %v10760_v12  ;;  %5138 = vmatprep.subr.bf16.mxu1 %v10888_v2  ;;  %v1679_v1 = vld [vmem:[#allocation5 + $0x68] sm:$0xff]  ;;  %v14290_v12 = vld [vmem:[%s13403_s15 + $0x60] ss:$16 sps:$4 sm:$0xff]  }
 0x3ac   : > { %v14277_v5 = vpop.f32.mrf.mxu0  ;;  %v14279_v3 = vpop.f32.mrf.mxu1  ;;  %4604 = vmatmul.mubr.bf16.gmra.mxu0 %v14258_v42  ;;  %4797 = vmatmul.mubr.bf16.gmra.mxu1 %v14261_v48  ;;  %v1807_v4 = vld [vmem:[#allocation5 + $0x468] sm:$0xff] }
 0x3ad   : > { %17892 = vst [vmem:[#allocation86_spill] sm:$0xff] %v14277_v5  ;;  %17893 = vst [vmem:[#allocation87_spill] sm:$0xff] %v14279_v3  ;;  %4613 = vmatprep.mubr.bf16.mxu0 %v14268_v40  ;;  %4806 = vmatprep.mubr.bf16.mxu1 %v14271_v50  ;;  %v10744_v3 = vcombine.high %v1675_v35, %v1679_v1  ;;  %v10872_v5 = vcombine.high %v1803_v59, %v1807_v4  ;;  %v1667_v15 = vld [vmem:[#allocation5 + $0x8] sm:$0xff] }
 0x3ae   : > { %v14285_v2 = vpop.f32.mrf.mxu0  ;;  %v14287_v53 = vpop.f32.mrf.mxu1  ;;  %4946 = vmatpush1.bf16.msra.mxu0 %v10759_v18  ;;  %5139 = vmatpush1.bf16.msra.mxu1 %v10887_v30  ;;  %v1795_v18 = vld [vmem:[#allocation5 + $0x408] sm:$0xff]  ;;  %v14300_v30 = vld [vmem:[%s13403_s15 + $0x84] ss:$16 sps:$4 sm:$0xff]   ;;  %v10871_v57 = vcombine.low %v1803_v59, %v1807_v4  ;;  %v14322_v59 = vld [vmem:[%s13403_s15 + $0x80] ss:$16 sps:$4 sm:$0xff]  }
 0x3af   : > { %17894 = vst [vmem:[#allocation88_spill] sm:$0xff] %v14285_v2  ;;  %17895 = vst [vmem:[#allocation89_spill] sm:$0xff] %v14287_v53  ;;  %4947 = vmatprep.subr.bf16.mxu0 %v10752_v34  ;;  %5140 = vmatprep.subr.bf16.mxu1 %v10880_v25  ;;  %v1671_v53 = vld [vmem:[#allocation5 + $0x28] sm:$0xff]  ;;  %v10743_v25 = vcombine.low %v1675_v35, %v1679_v1  ;;  %v10863_v1 = vcombine.low %v1795_v18, %v1799_v27 }
 0x3b0   : > { %v14295_v0 = vpop.f32.mrf.mxu0  ;;  %v14297_v2 = vpop.f32.mrf.mxu1  ;;  %v10736_v34 = vcombine.high %v1667_v15, %v1671_v53  ;;  %v10735_v35 = vcombine.low %v1667_v15, %v1671_v53  ;;  %v14325_v4 = vld [vmem:[%s13403_s15 + $0x88] ss:$16 sps:$4 sm:$0xff]   ;;  %v14335_v15 = vld [vmem:[%s13403_s15 + $0xac] ss:$16 sps:$4 sm:$0xff]  }
 0x3b1   : > { %17896 = vst [vmem:[#allocation90_spill] sm:$0xff] %v14295_v0  ;;  %17897 = vst [vmem:[#allocation91_spill] sm:$0xff] %v14297_v2  ;;  %v10864_v0 = vcombine.high %v1795_v18, %v1799_v27  ;;  %v1787_v2 = vld [vmem:[#allocation5 + $0x3c8] sm:$0xff] }
 0x3b2   : > { %v14305_v49 = vpop.f32.mrf.mxu0  ;;  %v14307_v62 = vpop.f32.mrf.mxu1  ;;  %4948 = vmatpush1.bf16.msra.mxu0 %v10751_v58  ;;  %5141 = vmatpush1.bf16.msra.mxu1 %v10879_v56  ;;  %v1915_v58 = vld [vmem:[#allocation5 + $0x7c8] sm:$0xff] }
 0x3b3   : > { %17898 = vst [vmem:[#allocation92_spill] sm:$0xff] %v14305_v49  ;;  %17899 = vst [vmem:[#allocation93_spill] sm:$0xff] %v14307_v62  ;;  %4949 = vmatprep.subr.bf16.mxu0 %v10744_v3  ;;  %5142 = vmatprep.subr.bf16.mxu1 %v10872_v5  ;;  %v1791_v62 = vld [vmem:[#allocation5 + $0x3e8] sm:$0xff] }
 0x3b4   : > { %v14309_v61 = vpop.f32.mrf.mxu0  ;;  %v14311_v17 = vpop.f32.mrf.mxu1  ;;  %4614 = vmatmul.mubr.bf16.gmra.mxu0 %v14290_v12  ;;  %4807 = vmatmul.mubr.bf16.gmra.mxu1 %v14293_v36  ;;  %v1919_v56 = vld [vmem:[#allocation5 + $0x7e8] sm:$0xff] }
 0x3b5   : > { %17900 = vst [vmem:[#allocation94_spill] sm:$0xff] %v14309_v61  ;;  %17901 = vst [vmem:[#allocation95_spill] sm:$0xff] %v14311_v17  ;;  %4623 = vmatprep.mubr.bf16.mxu0 %v14300_v30  ;;  %4816 = vmatprep.mubr.bf16.mxu1 %v14303_v10  ;;  %v10856_v17 = vcombine.high %v1787_v2, %v1791_v62  ;;  %v10984_v61 = vcombine.high %v1915_v58, %v1919_v56  ;;  %v1779_v49 = vld [vmem:[#allocation5 + $0x388] sm:$0xff] }
 0x3b6   : > { %v14317_v3 = vpop.f32.mrf.mxu0  ;;  %v14319_v5 = vpop.f32.mrf.mxu1  ;;  %4950 = vmatpush1.bf16.msra.mxu0 %v10743_v25  ;;  %5143 = vmatpush1.bf16.msra.mxu1 %v10871_v57  ;;  %v1907_v25 = vld [vmem:[#allocation5 + $0x788] sm:$0xff]  ;;  %v14332_v57 = vld [vmem:[%s13403_s15 + $0xa4] ss:$16 sps:$4 sm:$0xff]   ;;  %v10983_v18 = vcombine.low %v1915_v58, %v1919_v56  ;;  %v14354_v58 = vld [vmem:[%s13403_s15 + $0xa0] ss:$16 sps:$4 sm:$0xff]  }
 0x3b7   : > { %17902 = vst [vmem:[#allocation96_spill] sm:$0xff] %v14317_v3  ;;  %17903 = vst [vmem:[#allocation97_spill] sm:$0xff] %v14319_v5  ;;  %4951 = vmatprep.subr.bf16.mxu0 %v10736_v34  ;;  %5144 = vmatprep.subr.bf16.mxu1 %v10864_v0  ;;  %v1783_v5 = vld [vmem:[#allocation5 + $0x3a8] sm:$0xff]  ;;  %v10855_v0 = vcombine.low %v1787_v2, %v1791_v62  ;;  %v10975_v62 = vcombine.low %v1907_v25, %v1911_v29 }
 0x3b8   : > { %v14327_v33 = vpop.f32.mrf.mxu0  ;;  %v14329_v3 = vpop.f32.mrf.mxu1  ;;  %v10848_v34 = vcombine.high %v1779_v49, %v1783_v5  ;;  %v10847_v2 = vcombine.low %v1779_v49, %v1783_v5  ;;  %v14357_v56 = vld [vmem:[%s13403_s15 + $0xa8] ss:$16 sps:$4 sm:$0xff]   ;;  %v14367_v49 = vld [vmem:[%s13403_s15 + $0xcc] ss:$16 sps:$4 sm:$0xff]  }
 0x3b9   : > { %17904 = vst [vmem:[#allocation98_spill] sm:$0xff] %v14327_v33  ;;  %17905 = vst [vmem:[#allocation99_spill] sm:$0xff] %v14329_v3  ;;  %v10976_v33 = vcombine.high %v1907_v25, %v1911_v29  ;;  %v1771_v3 = vld [vmem:[#allocation5 + $0x348] sm:$0xff] }
 0x3ba   : > { %v14337_v27 = vpop.f32.mrf.mxu0  ;;  %v14339_v53 = vpop.f32.mrf.mxu1  ;;  %4952 = vmatpush1.bf16.msra.mxu0 %v10735_v35  ;;  %5145 = vmatpush1.bf16.msra.mxu1 %v10863_v1  ;;  %v1899_v35 = vld [vmem:[#allocation5 + $0x748] sm:$0xff] }
 0x3bb   : > { %17906 = vst [vmem:[#allocation100_spill] sm:$0xff] %v14337_v27  ;;  %17907 = vst [vmem:[#allocation101_spill] sm:$0xff] %v14339_v53  ;;  %4953 = vmatprep.subr.bf16.mxu0 %v10856_v17  ;;  %5146 = vmatprep.subr.bf16.mxu1 %v10984_v61  ;;  %v1775_v53 = vld [vmem:[#allocation5 + $0x368] sm:$0xff] }
 0x3bc   : > { %v14341_v7 = vpop.f32.mrf.mxu0  ;;  %v14343_v8 = vpop.f32.mrf.mxu1  ;;  %4624 = vmatmul.mubr.bf16.gmra.mxu0 %v14322_v59  ;;  %4817 = vmatmul.mubr.bf16.gmra.mxu1 %v14325_v4  ;;  %v1903_v1 = vld [vmem:[#allocation5 + $0x768] sm:$0xff] }
 0x3bd   : > { %17908 = vst [vmem:[#allocation102_spill] sm:$0xff] %v14341_v7  ;;  %17909 = vst [vmem:[#allocation103_spill] sm:$0xff] %v14343_v8  ;;  %4633 = vmatprep.mubr.bf16.mxu0 %v14332_v57  ;;  %4826 = vmatprep.mubr.bf16.mxu1 %v14335_v15  ;;  %v10840_v8 = vcombine.high %v1771_v3, %v1775_v53  ;;  %v10968_v7 = vcombine.high %v1899_v35, %v1903_v1  ;;  %v1763_v27 = vld [vmem:[#allocation5 + $0x308] sm:$0xff] }
 0x3be   : > { %v14349_v17 = vpop.f32.mrf.mxu0  ;;  %v14351_v61 = vpop.f32.mrf.mxu1  ;;  %4954 = vmatpush2.bf16.msra.mxu0 %v10855_v0  ;;  %5147 = vmatpush2.bf16.msra.mxu1 %v10983_v18  ;;  %v1891_v0 = vld [vmem:[#allocation5 + $0x708] sm:$0xff]  ;;  %v14364_v18 = vld [vmem:[%s13403_s15 + $0xc4] ss:$16 sps:$4 sm:$0xff]   ;;  %v10967_v25 = vcombine.low %v1899_v35, %v1903_v1  ;;  %v14386_v35 = vld [vmem:[%s13403_s15 + $0xc0] ss:$16 sps:$4 sm:$0xff]  }
 0x3bf   : > { %17910 = vst [vmem:[#allocation104_spill] sm:$0xff] %v14349_v17  ;;  %17911 = vst [vmem:[#allocation105_spill] sm:$0xff] %v14351_v61  ;;  %4955 = vmatprep.subr.bf16.mxu0 %v10848_v34  ;;  %5148 = vmatprep.subr.bf16.mxu1 %v10976_v33  ;;  %v1767_v61 = vld [vmem:[#allocation5 + $0x328] sm:$0xff]  ;;  %v10839_v33 = vcombine.low %v1771_v3, %v1775_v53  ;;  %v10959_v53 = vcombine.low %v1891_v0, %v1895_v47 }
 0x3c0   : > { %v14359_v52 = vpop.f32.mrf.mxu0  ;;  %v14361_v17 = vpop.f32.mrf.mxu1  ;;  %v10832_v34 = vcombine.high %v1763_v27, %v1767_v61  ;;  %v10831_v3 = vcombine.low %v1763_v27, %v1767_v61  ;;  %v14389_v1 = vld [vmem:[%s13403_s15 + $0xc8] ss:$16 sps:$4 sm:$0xff]   ;;  %v14399_v27 = vld [vmem:[%s13403_s15 + $0xec] ss:$16 sps:$4 sm:$0xff]  }
 0x3c1   : > { %17912 = vst [vmem:[#allocation106_spill] sm:$0xff] %v14359_v52  ;;  %17913 = vst [vmem:[#allocation107_spill] sm:$0xff] %v14361_v17  ;;  %v10960_v52 = vcombine.high %v1891_v0, %v1895_v47  ;;  %v1755_v17 = vld [vmem:[#allocation5 + $0x2c8] sm:$0xff] }
 0x3c2   : > { %v14369_v29 = vpop.f32.mrf.mxu0  ;;  %v14371_v5 = vpop.f32.mrf.mxu1  ;;  %4956 = vmatpush2.bf16.msra.mxu0 %v10847_v2  ;;  %5149 = vmatpush2.bf16.msra.mxu1 %v10975_v62  ;;  %v1883_v2 = vld [vmem:[#allocation5 + $0x6c8] sm:$0xff] }
 0x3c3   : > { %17914 = vst [vmem:[#allocation108_spill] sm:$0xff] %v14369_v29  ;;  %17915 = vst [vmem:[#allocation109_spill] sm:$0xff] %v14371_v5  ;;  %4957 = vmatprep.subr.bf16.mxu0 %v10840_v8  ;;  %5150 = vmatprep.subr.bf16.mxu1 %v10968_v7  ;;  %v1759_v5 = vld [vmem:[#allocation5 + $0x2e8] sm:$0xff] }
 0x3c4   : > { %v14373_v20 = vpop.f32.mrf.mxu0  ;;  %v14375_v60 = vpop.f32.mrf.mxu1  ;;  %4634 = vmatmul.mubr.bf16.gmra.mxu0 %v14354_v58  ;;  %4827 = vmatmul.mubr.bf16.gmra.mxu1 %v14357_v56  ;;  %v1887_v62 = vld [vmem:[#allocation5 + $0x6e8] sm:$0xff] }
 0x3c5   : > { %17916 = vst [vmem:[#allocation110_spill] sm:$0xff] %v14373_v20  ;;  %17917 = vst [vmem:[#allocation111_spill] sm:$0xff] %v14375_v60  ;;  %4643 = vmatprep.mubr.bf16.mxu0 %v14364_v18  ;;  %4836 = vmatprep.mubr.bf16.mxu1 %v14367_v49  ;;  %v10824_v60 = vcombine.high %v1755_v17, %v1759_v5  ;;  %v10952_v20 = vcombine.high %v1883_v2, %v1887_v62  ;;  %v1747_v29 = vld [vmem:[#allocation5 + $0x288] sm:$0xff] }
 0x3c6   : > { %v14381_v8 = vpop.f32.mrf.mxu0  ;;  %v14383_v7 = vpop.f32.mrf.mxu1  ;;  %4958 = vmatpush2.bf16.msra.mxu0 %v10839_v33  ;;  %5151 = vmatpush2.bf16.msra.mxu1 %v10967_v25  ;;  %v1875_v33 = vld [vmem:[#allocation5 + $0x688] sm:$0xff]  ;;  %v14396_v25 = vld [vmem:[%s13403_s15 + $0xe4] ss:$16 sps:$4 sm:$0xff]   ;;  %v10951_v0 = vcombine.low %v1883_v2, %v1887_v62  ;;  %v14418_v2 = vld [vmem:[%s13403_s15 + $0xe0] ss:$16 sps:$4 sm:$0xff]  }
 0x3c7   : > { %17918 = vst [vmem:[#allocation112_spill] sm:$0xff] %v14381_v8  ;;  %17919 = vst [vmem:[#allocation113_spill] sm:$0xff] %v14383_v7  ;;  %4959 = vmatprep.subr.bf16.mxu0 %v10832_v34  ;;  %5152 = vmatprep.subr.bf16.mxu1 %v10960_v52  ;;  %v1751_v7 = vld [vmem:[#allocation5 + $0x2a8] sm:$0xff]  ;;  %v10823_v52 = vcombine.low %v1755_v17, %v1759_v5  ;;  %v10943_v5 = vcombine.low %v1875_v33, %v1879_v39 }
 0x3c8   : > { %v14391_v43 = vpop.f32.mrf.mxu0  ;;  %v14393_v8 = vpop.f32.mrf.mxu1  ;;  %v10816_v34 = vcombine.high %v1747_v29, %v1751_v7  ;;  %v10815_v17 = vcombine.low %v1747_v29, %v1751_v7  ;;  %v14421_v62 = vld [vmem:[%s13403_s15 + $0xe8] ss:$16 sps:$4 sm:$0xff]   ;;  %v14431_v29 = vld [vmem:[%s13403_s15 + $0x10c] ss:$16 sps:$4 sm:$0xff]  }
 0x3c9   : > { %17920 = vst [vmem:[#allocation114_spill] sm:$0xff] %v14391_v43  ;;  %17921 = vst [vmem:[#allocation115_spill] sm:$0xff] %v14393_v8  ;;  %v10944_v43 = vcombine.high %v1875_v33, %v1879_v39  ;;  %v1739_v8 = vld [vmem:[#allocation5 + $0x248] sm:$0xff] }
 0x3ca   : > { %v14401_v47 = vpop.f32.mrf.mxu0  ;;  %v14403_v61 = vpop.f32.mrf.mxu1  ;;  %4960 = vmatpush2.bf16.msra.mxu0 %v10831_v3  ;;  %5153 = vmatpush2.bf16.msra.mxu1 %v10959_v53  ;;  %v1867_v3 = vld [vmem:[#allocation5 + $0x648] sm:$0xff] }
 0x3cb   : > { %17922 = vst [vmem:[#allocation116_spill] sm:$0xff] %v14401_v47  ;;  %17923 = vst [vmem:[#allocation117_spill] sm:$0xff] %v14403_v61  ;;  %4961 = vmatprep.subr.bf16.mxu0 %v10824_v60  ;;  %5154 = vmatprep.subr.bf16.mxu1 %v10952_v20  ;;  %v1743_v61 = vld [vmem:[#allocation5 + $0x268] sm:$0xff] }
 0x3cc   : > { %v14405_v38 = vpop.f32.mrf.mxu0  ;;  %v14407_v51 = vpop.f32.mrf.mxu1  ;;  %4644 = vmatmul.mubr.bf16.gmra.mxu0 %v14386_v35  ;;  %4837 = vmatmul.mubr.bf16.gmra.mxu1 %v14389_v1  ;;  %v1871_v53 = vld [vmem:[#allocation5 + $0x668] sm:$0xff] }
 0x3cd   : > { %17924 = vst [vmem:[#allocation118_spill] sm:$0xff] %v14405_v38  ;;  %17925 = vst [vmem:[#allocation119_spill] sm:$0xff] %v14407_v51  ;;  %4653 = vmatprep.mubr.bf16.mxu0 %v14396_v25  ;;  %4846 = vmatprep.mubr.bf16.mxu1 %v14399_v27  ;;  %v10808_v51 = vcombine.high %v1739_v8, %v1743_v61  ;;  %v10936_v38 = vcombine.high %v1867_v3, %v1871_v53  ;;  %v1731_v47 = vld [vmem:[#allocation5 + $0x208] sm:$0xff] }
 0x3ce   : > { %v14413_v60 = vpop.f32.mrf.mxu0  ;;  %v14415_v20 = vpop.f32.mrf.mxu1  ;;  %4962 = vmatpush2.bf16.msra.mxu0 %v10823_v52  ;;  %5155 = vmatpush2.bf16.msra.mxu1 %v10951_v0  ;;  %v1859_v52 = vld [vmem:[#allocation5 + $0x608] sm:$0xff]  ;;  %v14428_v0 = vld [vmem:[%s13403_s15 + $0x104] ss:$16 sps:$4 sm:$0xff]   ;;  %v10935_v33 = vcombine.low %v1867_v3, %v1871_v53  ;;  %v10794_v3 = vcombine.high %v14195_v46, %v14197_v45  ;;  %v10922_v53 = vcombine.high %v14213_v21, %v14215_v19 }
 0x3cf   : > { %17926 = vst [vmem:[#allocation120_spill] sm:$0xff] %v14413_v60  ;;  %17927 = vst [vmem:[#allocation121_spill] sm:$0xff] %v14415_v20  ;;  %4963 = vmatprep.subr.bf16.mxu0 %v10816_v34  ;;  %5156 = vmatprep.subr.bf16.mxu1 %v10944_v43  ;;  %v1735_v20 = vld [vmem:[#allocation5 + $0x228] sm:$0xff]  ;;  %v10807_v43 = vcombine.low %v1739_v8, %v1743_v61  ;;  %v10927_v61 = vcombine.low %v1859_v52, %v1863_v28 }
 0x3d0   : > { %v14423_v32 = vpop.f32.mrf.mxu0  ;;  %v14425_v60 = vpop.f32.mrf.mxu1  ;;  %v10800_v34 = vcombine.high %v1731_v47, %v1735_v20  ;;  %v10799_v8 = vcombine.low %v1731_v47, %v1735_v20  ;;  %v14467_v47 = vld [vmem:[%s13403_s15 + $0x12c] ss:$16 sps:$4 sm:$0xff]  }
 0x3d1   : > { %17928 = vst [vmem:[#allocation122_spill] sm:$0xff] %v14423_v32  ;;  %17929 = vst [vmem:[#allocation123_spill] sm:$0xff] %v14425_v60  ;;  %v10928_v32 = vcombine.high %v1859_v52, %v1863_v28 }
 0x3d2   : > { %v14433_v39 = vpop.f32.mrf.mxu0  ;;  %v14435_v7 = vpop.f32.mrf.mxu1  ;;  %4964 = vmatpush2.bf16.msra.mxu0 %v10815_v17  ;;  %5157 = vmatpush2.bf16.msra.mxu1 %v10943_v5 }
 0x3d3   : > { %17930 = vst [vmem:[#allocation124_spill] sm:$0xff] %v14433_v39  ;;  %17931 = vst [vmem:[#allocation125_spill] sm:$0xff] %v14435_v7  ;;  %4965 = vmatprep.subr.bf16.mxu0 %v10808_v51  ;;  %5158 = vmatprep.subr.bf16.mxu1 %v10936_v38  ;;  %v14461_v7 = vld [vmem:[%s13403_s15 + $0x108] ss:$16 sps:$4 sm:$0xff]   ;;  %v14563_v39 = vld [vmem:[%s13403_s15 + $0x18c] ss:$16 sps:$4 sm:$0xff]  }
 0x3d4   : > { %v14437_v60 = vpop.f32.mrf.mxu0  ;;  %v14439_v24 = vpop.f32.mrf.mxu1  ;;  %4654 = vmatmul.mubr.bf16.gmra.mxu0 %v14418_v2  ;;  %4847 = vmatmul.mubr.bf16.gmra.mxu1 %v14421_v62  ;;  %17971 = vst [vmem:[#allocation165_spill] sm:$0xff] %v14563_v39 }
 0x3d5   : > { %17932 = vst [vmem:[#allocation126_spill] sm:$0xff] %v14437_v60  ;;  %17933 = vst [vmem:[#allocation127_spill] sm:$0xff] %v14439_v24  ;;  %4663 = vmatprep.mubr.bf16.mxu0 %v14428_v0  ;;  %4856 = vmatprep.mubr.bf16.mxu1 %v14431_v29  ;;  %v14458_v24 = vld [vmem:[%s13403_s15 + $0x100] ss:$16 sps:$4 sm:$0xff]  }
 0x3d6   : > { %v14445_v51 = vpop.f32.mrf.mxu0  ;;  %v14447_v38 = vpop.f32.mrf.mxu1  ;;  %4966 = vmatpush2.bf16.msra.mxu0 %v10807_v43  ;;  %5159 = vmatpush2.bf16.msra.mxu1 %v10935_v33  ;;  %v14464_v43 = vld [vmem:[%s13403_s15 + $0x124] ss:$16 sps:$4 sm:$0xff]  }
 0x3d7   : > { %17934 = vst [vmem:[#allocation128_spill] sm:$0xff] %v14445_v51  ;;  %17935 = vst [vmem:[#allocation129_spill] sm:$0xff] %v14447_v38  ;;  %4967 = vmatprep.subr.bf16.mxu0 %v10800_v34  ;;  %5160 = vmatprep.subr.bf16.mxu1 %v10928_v32 }
 0x3d8   : > { %v14453_v17 = vpop.f32.mrf.mxu0  ;;  %v14455_v5 = vpop.f32.mrf.mxu1 }
 0x3d9   : > { %17936 = vst [vmem:[#allocation130_spill] sm:$0xff] %v14453_v17  ;;  %17937 = vst [vmem:[#allocation131_spill] sm:$0xff] %v14455_v5 }
 0x3da   : > { %v14469_v28 = vpop.f32.mrf.mxu0  ;;  %v14471_v32 = vpop.f32.mrf.mxu1  ;;  %4968 = vmatpush2.bf16.msra.mxu0 %v10799_v8  ;;  %5161 = vmatpush2.bf16.msra.mxu1 %v10927_v61 }
 0x3db   : > { %17938 = vst [vmem:[#allocation132_spill] sm:$0xff] %v14469_v28  ;;  %17939 = vst [vmem:[#allocation133_spill] sm:$0xff] %v14471_v32  ;;  %5323 = vmatprep.subr.bf16.mxu0 %v10794_v3  ;;  %5516 = vmatprep.subr.bf16.mxu1 %v10922_v53  ;;  %v14490_v3 = vld [vmem:[%s13403_s15 + $0x120] ss:$16 sps:$4 sm:$0xff]   ;;  %v14493_v53 = vld [vmem:[%s13403_s15 + $0x128] ss:$16 sps:$4 sm:$0xff]  }
 0x3dc   : > { %v14473_v20 = vpop.f32.mrf.mxu0  ;;  %v14475_v52 = vpop.f32.mrf.mxu1  ;;  %4664 = vmatmul.mubr.bf16.gmra.mxu0 %v14458_v24  ;;  %4857 = vmatmul.mubr.bf16.gmra.mxu1 %v14461_v7  ;;  %v14531_v28 = vld [vmem:[%s13403_s15 + $0x16c] ss:$16 sps:$4 sm:$0xff]  }
 0x3dd   : > { %17940 = vst [vmem:[#allocation134_spill] sm:$0xff] %v14473_v20  ;;  %17941 = vst [vmem:[#allocation135_spill] sm:$0xff] %v14475_v52  ;;  %4673 = vmatprep.mubr.bf16.mxu0 %v14464_v43  ;;  %4866 = vmatprep.mubr.bf16.mxu1 %v14467_v47  ;;  %v14496_v52 = vld [vmem:[%s13403_s15 + $0x144] ss:$16 sps:$4 sm:$0xff]   ;;  %v14499_v20 = vld [vmem:[%s13403_s15 + $0x14c] ss:$16 sps:$4 sm:$0xff]  }
 0x3de   : > { %v14481_v33 = vpop.f32.mrf.mxu0  ;;  %v14483_v34 = vpop.f32.mrf.mxu1  ;;  %17946 = vst [vmem:[#allocation140_spill] sm:$0xff] %v14496_v52  ;;  %17947 = vst [vmem:[#allocation141_spill] sm:$0xff] %v14499_v20 }
 0x3df   : > { %17942 = vst [vmem:[#allocation136_spill] sm:$0xff] %v14481_v33  ;;  %17943 = vst [vmem:[#allocation137_spill] sm:$0xff] %v14483_v34 }
 0x3e0   : > { %v14485_v8 = vpop.f32.mrf.mxu0  ;;  %v14487_v61 = vpop.f32.mrf.mxu1  ;;  %17959 = vst [vmem:[#allocation153_spill] sm:$0xff] %v14531_v28 }
 0x3e1   : > { %17944 = vst [vmem:[#allocation138_spill] sm:$0xff] %v14485_v8  ;;  %17945 = vst [vmem:[#allocation139_spill] sm:$0xff] %v14487_v61 }
 0x3e2   : > { %v14501_v32 = vpop.f32.mrf.mxu0  ;;  %v14503_v33 = vpop.f32.mrf.mxu1 }
 0x3e3   : > { %17948 = vst [vmem:[#allocation142_spill] sm:$0xff] %v14501_v32  ;;  %17949 = vst [vmem:[#allocation143_spill] sm:$0xff] %v14503_v33  ;;  %v14522_v33 = vld [vmem:[%s13403_s15 + $0x140] ss:$16 sps:$4 sm:$0xff]  }
 0x3e4   : > { %v14505_v34 = vpop.f32.mrf.mxu0  ;;  %v14507_v8 = vpop.f32.mrf.mxu1  ;;  %4674 = vmatmul.mubr.bf16.gmra.mxu0 %v14490_v3  ;;  %4867 = vmatmul.mubr.bf16.gmra.mxu1 %v14493_v53  ;;  %17956 = vst [vmem:[#allocation150_spill] sm:$0xff] %v14522_v33 }
 0x3e5   : > { %17950 = vst [vmem:[#allocation144_spill] sm:$0xff] %v14505_v34  ;;  %17951 = vst [vmem:[#allocation145_spill] sm:$0xff] %v14507_v8  ;;  %4683 = vmatprep.mubr.bf16.mxu0 %v14496_v52  ;;  %4876 = vmatprep.mubr.bf16.mxu1 %v14499_v20  ;;  %v14525_v8 = vld [vmem:[%s13403_s15 + $0x148] ss:$16 sps:$4 sm:$0xff]   ;;  %v14528_v34 = vld [vmem:[%s13403_s15 + $0x164] ss:$16 sps:$4 sm:$0xff]  }
 0x3e6   : > { %v14513_v61 = vpop.f32.mrf.mxu0  ;;  %v14515_v5 = vpop.f32.mrf.mxu1  ;;  %17957 = vst [vmem:[#allocation151_spill] sm:$0xff] %v14525_v8  ;;  %17958 = vst [vmem:[#allocation152_spill] sm:$0xff] %v14528_v34 }
 0x3e7   : > { %17952 = vst [vmem:[#allocation146_spill] sm:$0xff] %v14513_v61  ;;  %17953 = vst [vmem:[#allocation147_spill] sm:$0xff] %v14515_v5 }
 0x3e8   : > { %v14517_v38 = vpop.f32.mrf.mxu0  ;;  %v14519_v32 = vpop.f32.mrf.mxu1 }
 0x3e9   : > { %17954 = vst [vmem:[#allocation148_spill] sm:$0xff] %v14517_v38  ;;  %17955 = vst [vmem:[#allocation149_spill] sm:$0xff] %v14519_v32 }
 0x3ea   : > { %v14533_v17 = vpop.f32.mrf.mxu0  ;;  %v14535_v61 = vpop.f32.mrf.mxu1 }
 0x3eb   : > { %17960 = vst [vmem:[#allocation154_spill] sm:$0xff] %v14533_v17  ;;  %17961 = vst [vmem:[#allocation155_spill] sm:$0xff] %v14535_v61  ;;  %v14554_v61 = vld [vmem:[%s13403_s15 + $0x160] ss:$16 sps:$4 sm:$0xff]  }
 0x3ec   : > { %v14537_v5 = vpop.f32.mrf.mxu0  ;;  %v14539_v38 = vpop.f32.mrf.mxu1  ;;  %4684 = vmatmul.mubr.bf16.gmra.mxu0 %v14522_v33  ;;  %4877 = vmatmul.mubr.bf16.gmra.mxu1 %v14525_v8  ;;  %17968 = vst [vmem:[#allocation162_spill] sm:$0xff] %v14554_v61 }
 0x3ed   : > { %17962 = vst [vmem:[#allocation156_spill] sm:$0xff] %v14537_v5  ;;  %17963 = vst [vmem:[#allocation157_spill] sm:$0xff] %v14539_v38  ;;  %4693 = vmatprep.mubr.bf16.mxu0 %v14528_v34  ;;  %4886 = vmatprep.mubr.bf16.mxu1 %v14531_v28  ;;  %v14557_v38 = vld [vmem:[%s13403_s15 + $0x168] ss:$16 sps:$4 sm:$0xff]   ;;  %v14560_v5 = vld [vmem:[%s13403_s15 + $0x184] ss:$16 sps:$4 sm:$0xff]  }
 0x3ee   : > { %v14545_v32 = vpop.f32.mrf.mxu0  ;;  %v14547_v51 = vpop.f32.mrf.mxu1  ;;  %17969 = vst [vmem:[#allocation163_spill] sm:$0xff] %v14557_v38  ;;  %17970 = vst [vmem:[#allocation164_spill] sm:$0xff] %v14560_v5 }
 0x3ef   : > { %17964 = vst [vmem:[#allocation158_spill] sm:$0xff] %v14545_v32  ;;  %17965 = vst [vmem:[#allocation159_spill] sm:$0xff] %v14547_v51 }
 0x3f0   : > { %v14549_v60 = vpop.f32.mrf.mxu0  ;;  %v14551_v17 = vpop.f32.mrf.mxu1 }
 0x3f1   : > { %17966 = vst [vmem:[#allocation160_spill] sm:$0xff] %v14549_v60  ;;  %17967 = vst [vmem:[#allocation161_spill] sm:$0xff] %v14551_v17 }
 0x3f2   : > { %v14565_v28 = vpop.f32.mrf.mxu0  ;;  %v14567_v32 = vpop.f32.mrf.mxu1 }
 0x3f3   : > { %17972 = vst [vmem:[#allocation166_spill] sm:$0xff] %v14565_v28  ;;  %17973 = vst [vmem:[#allocation167_spill] sm:$0xff] %v14567_v32  ;;  %v14586_v32 = vld [vmem:[%s13403_s15 + $0x180] ss:$16 sps:$4 sm:$0xff]  }
 0x3f4   : > { %v14569_v51 = vpop.f32.mrf.mxu0  ;;  %v14571_v60 = vpop.f32.mrf.mxu1  ;;  %4694 = vmatmul.mubr.bf16.gmra.mxu0 %v14554_v61  ;;  %4887 = vmatmul.mubr.bf16.gmra.mxu1 %v14557_v38  ;;  %17980 = vst [vmem:[#allocation174_spill] sm:$0xff] %v14586_v32 }
 0x3f5   : > { %17974 = vst [vmem:[#allocation168_spill] sm:$0xff] %v14569_v51  ;;  %17975 = vst [vmem:[#allocation169_spill] sm:$0xff] %v14571_v60  ;;  %4703 = vmatprep.mubr.bf16.mxu0 %v14560_v5  ;;  %4896 = vmatprep.mubr.bf16.mxu1 %v14563_v39  ;;  %v14589_v60 = vld [vmem:[%s13403_s15 + $0x188] ss:$16 sps:$4 sm:$0xff]   ;;  %v14592_v51 = vld [vmem:[%s13403_s15 + $0x1a4] ss:$16 sps:$4 sm:$0xff]  }
 0x3f6   : > { %v14577_v17 = vpop.f32.mrf.mxu0  ;;  %v14579_v34 = vpop.f32.mrf.mxu1  ;;  %17981 = vst [vmem:[#allocation175_spill] sm:$0xff] %v14589_v60  ;;  %17982 = vst [vmem:[#allocation176_spill] sm:$0xff] %v14592_v51  ;;  %v14595_v5 = vld [vmem:[%s13403_s15 + $0x1ac] ss:$16 sps:$4 sm:$0xff]  }
 0x3f7   : > { %17976 = vst [vmem:[#allocation170_spill] sm:$0xff] %v14577_v17  ;;  %17977 = vst [vmem:[#allocation171_spill] sm:$0xff] %v14579_v34 }
 0x3f8   : > { %v14581_v8 = vpop.f32.mrf.mxu0  ;;  %v14583_v28 = vpop.f32.mrf.mxu1  ;;  %17983 = vst [vmem:[#allocation177_spill] sm:$0xff] %v14595_v5 }
 0x3f9   : > { %17978 = vst [vmem:[#allocation172_spill] sm:$0xff] %v14581_v8  ;;  %17979 = vst [vmem:[#allocation173_spill] sm:$0xff] %v14583_v28 }
 0x3fa   : > { %v14597_v39 = vpop.f32.mrf.mxu0  ;;  %v14599_v17 = vpop.f32.mrf.mxu1 }
 0x3fb   : > { %17984 = vst [vmem:[#allocation178_spill] sm:$0xff] %v14597_v39  ;;  %17985 = vst [vmem:[#allocation179_spill] sm:$0xff] %v14599_v17  ;;  %v14618_v17 = vld [vmem:[%s13403_s15 + $0x1a0] ss:$16 sps:$4 sm:$0xff]  }
 0x3fc   : > { %v14601_v34 = vpop.f32.mrf.mxu0  ;;  %v14603_v8 = vpop.f32.mrf.mxu1  ;;  %4704 = vmatmul.mubr.bf16.gmra.mxu0 %v14586_v32  ;;  %4897 = vmatmul.mubr.bf16.gmra.mxu1 %v14589_v60  ;;  %17992 = vst [vmem:[#allocation186_spill] sm:$0xff] %v14618_v17 }
 0x3fd   : > { %17986 = vst [vmem:[#allocation180_spill] sm:$0xff] %v14601_v34  ;;  %17987 = vst [vmem:[#allocation181_spill] sm:$0xff] %v14603_v8  ;;  %4713 = vmatprep.mubr.bf16.mxu0 %v14592_v51  ;;  %4906 = vmatprep.mubr.bf16.mxu1 %v14595_v5  ;;  %v14621_v8 = vld [vmem:[%s13403_s15 + $0x1a8] ss:$16 sps:$4 sm:$0xff]   ;;  %v14624_v34 = vld [vmem:[%s13403_s15 + $0x1c4] ss:$16 sps:$4 sm:$0xff]  }
 0x3fe   : > { %v14609_v28 = vpop.f32.mrf.mxu0  ;;  %v14611_v38 = vpop.f32.mrf.mxu1  ;;  %17993 = vst [vmem:[#allocation187_spill] sm:$0xff] %v14621_v8  ;;  %17994 = vst [vmem:[#allocation188_spill] sm:$0xff] %v14624_v34  ;;  %v14627_v51 = vld [vmem:[%s13403_s15 + $0x1cc] ss:$16 sps:$4 sm:$0xff]  }
 0x3ff   : > { %17988 = vst [vmem:[#allocation182_spill] sm:$0xff] %v14609_v28  ;;  %17989 = vst [vmem:[#allocation183_spill] sm:$0xff] %v14611_v38 }
 0x400   : > { %v14613_v61 = vpop.f32.mrf.mxu0  ;;  %v14615_v39 = vpop.f32.mrf.mxu1  ;;  %17995 = vst [vmem:[#allocation189_spill] sm:$0xff] %v14627_v51 }
 0x401   : > { %17990 = vst [vmem:[#allocation184_spill] sm:$0xff] %v14613_v61  ;;  %17991 = vst [vmem:[#allocation185_spill] sm:$0xff] %v14615_v39 }
 0x402   : > { %v14629_v5 = vpop.f32.mrf.mxu0  ;;  %v14631_v28 = vpop.f32.mrf.mxu1 }
 0x403   : > { %17996 = vst [vmem:[#allocation190_spill] sm:$0xff] %v14629_v5  ;;  %17997 = vst [vmem:[#allocation191_spill] sm:$0xff] %v14631_v28  ;;  %v14650_v28 = vld [vmem:[%s13403_s15 + $0x1c0] ss:$16 sps:$4 sm:$0xff]  }
 0x404   : > { %v14633_v38 = vpop.f32.mrf.mxu0  ;;  %v14635_v61 = vpop.f32.mrf.mxu1  ;;  %4714 = vmatmul.mubr.bf16.gmra.mxu0 %v14618_v17  ;;  %4907 = vmatmul.mubr.bf16.gmra.mxu1 %v14621_v8  ;;  %18004 = vst [vmem:[#allocation198_spill] sm:$0xff] %v14650_v28  ;;  %v11587_v8 = vld [vmem:[%s13403_s15 + $0x1ec] ss:$16 sps:$4 sm:$0xff]  }
 0x405   : > { %17998 = vst [vmem:[#allocation192_spill] sm:$0xff] %v14633_v38  ;;  %17999 = vst [vmem:[#allocation193_spill] sm:$0xff] %v14635_v61  ;;  %4723 = vmatprep.mubr.bf16.mxu0 %v14624_v34  ;;  %4916 = vmatprep.mubr.bf16.mxu1 %v14627_v51  ;;  %v14653_v61 = vld [vmem:[%s13403_s15 + $0x1c8] ss:$16 sps:$4 sm:$0xff]   ;;  %v11585_v38 = vld [vmem:[%s13403_s15 + $0x1e4] ss:$16 sps:$4 sm:$0xff]  }
 0x406   : > { %v14641_v39 = vpop.f32.mrf.mxu0  ;;  %v14643_v60 = vpop.f32.mrf.mxu1  ;;  %18005 = vst [vmem:[#allocation199_spill] sm:$0xff] %v14653_v61 }
 0x407   : > { %18000 = vst [vmem:[#allocation194_spill] sm:$0xff] %v14641_v39  ;;  %18001 = vst [vmem:[#allocation195_spill] sm:$0xff] %v14643_v60 }
 0x408   : > { %v14645_v32 = vpop.f32.mrf.mxu0  ;;  %v14647_v5 = vpop.f32.mrf.mxu1 }
 0x409   : > { %18002 = vst [vmem:[#allocation196_spill] sm:$0xff] %v14645_v32  ;;  %18003 = vst [vmem:[#allocation197_spill] sm:$0xff] %v14647_v5 }
 0x40a   : > { %v14657_v17 = vpop.f32.mrf.mxu0  ;;  %v14659_v34 = vpop.f32.mrf.mxu1 }
 0x40b   : > { %18006 = vst [vmem:[#allocation200_spill] sm:$0xff] %v14657_v17  ;;  %18007 = vst [vmem:[#allocation201_spill] sm:$0xff] %v14659_v34  ;;  %v11589_v17 = vld [vmem:[%s13403_s15 + $0x1e0] ss:$16 sps:$4 sm:$0xff]   ;;  %v11590_v34 = vld [vmem:[%s13403_s15 + $0x1e8] ss:$16 sps:$4 sm:$0xff]  }
 0x40c   : > { %v14661_v51 = vpop.f32.mrf.mxu0  ;;  %v14663_v39 = vpop.f32.mrf.mxu1  ;;  %4724 = vmatmul.mubr.bf16.gmra.mxu0 %v14650_v28  ;;  %4917 = vmatmul.mubr.bf16.gmra.mxu1 %v14653_v61  ;;  %v1836_v61 = vld [vmem:[#allocation5 + $0x550] sm:$0xff] }
 0x40d   : > { %18008 = vst [vmem:[#allocation202_spill] sm:$0xff] %v14661_v51  ;;  %18009 = vst [vmem:[#allocation203_spill] sm:$0xff] %v14663_v39  ;;  %4733 = vmatprep.mubr.bf16.mxu0 %v11585_v38  ;;  %4926 = vmatprep.mubr.bf16.mxu1 %v11587_v8 }
 0x40e   : > { %v14667_v5 = vpop.f32.mrf.mxu0  ;;  %v14669_v60 = vpop.f32.mrf.mxu1 }
 0x40f   : > { %18010 = vst [vmem:[#allocation204_spill] sm:$0xff] %v14667_v5  ;;  %18011 = vst [vmem:[#allocation205_spill] sm:$0xff] %v14669_v60 }
 0x410   : > { %v14671_v32 = vpop.f32.mrf.mxu0  ;;  %v14673_v33 = vpop.f32.mrf.mxu1 }
 0x411   : > { %18012 = vst [vmem:[#allocation206_spill] sm:$0xff] %v14671_v32  ;;  %18013 = vst [vmem:[#allocation207_spill] sm:$0xff] %v14673_v33  ;;  %v1716_v33 = vld [vmem:[#allocation5 + $0x190] sm:$0xff] }
 0x412   : > { %v14677_v44 = vpop.f32.mrf.mxu0  ;;  %v14679_v51 = vpop.f32.mrf.mxu1  ;;  %v1844_v32 = vld [vmem:[#allocation5 + $0x590] sm:$0xff] }
 0x413   : > { %18014 = vst [vmem:[#allocation208_spill] sm:$0xff] %v14677_v44  ;;  %18015 = vst [vmem:[#allocation209_spill] sm:$0xff] %v14679_v51  ;;  %v1720_v51 = vld [vmem:[#allocation5 + $0x1b0] sm:$0xff] }
 0x414   : > { %v14681_v39 = vpop.f32.mrf.mxu0  ;;  %v14683_v28 = vpop.f32.mrf.mxu1  ;;  %4734 = vmatmul.mubr.bf16.gmra.mxu0 %v11589_v17  ;;  %4927 = vmatmul.mubr.bf16.gmra.mxu1 %v11590_v34  ;;  %v1708_v34 = vld [vmem:[#allocation5 + $0x150] sm:$0xff] }
 0x415   : > { %18016 = vst [vmem:[#allocation210_spill] sm:$0xff] %v14681_v39  ;;  %18017 = vst [vmem:[#allocation211_spill] sm:$0xff] %v14683_v28  ;;  %4969 = vmatprep.mubr.bf16.mxu0 %v14152_v11  ;;  %5162 = vmatprep.mubr.bf16.mxu1 %v14155_v6  ;;  %v1848_v39 = vld [vmem:[#allocation5 + $0x5b0] sm:$0xff]  ;;  %v10786_v11 = vcombine.high %v1716_v33, %v1720_v51 }
 0x416   : > { %v14687_v38 = vpop.f32.mrf.mxu0  ;;  %v14689_v8 = vpop.f32.mrf.mxu1  ;;  %v10914_v28 = vcombine.high %v1844_v32, %v1848_v39  ;;  %v1712_v6 = vld [vmem:[#allocation5 + $0x170] sm:$0xff] }
 0x417   : > { %18018 = vst [vmem:[#allocation212_spill] sm:$0xff] %v14687_v38  ;;  %18019 = vst [vmem:[#allocation213_spill] sm:$0xff] %v14689_v8  ;;  %v1840_v38 = vld [vmem:[#allocation5 + $0x570] sm:$0xff] }
 0x418   : > { %v14691_v60 = vpop.f32.mrf.mxu0  ;;  %v14693_v44 = vpop.f32.mrf.mxu1 }
 0x419   : > { %18020 = vst [vmem:[#allocation214_spill] sm:$0xff] %v14691_v60  ;;  %18021 = vst [vmem:[#allocation215_spill] sm:$0xff] %v14693_v44  ;;  %v18025_v44 = vcombine.low %v14195_v46, %v14197_v45  ;;  %v10913_v60 = vcombine.low %v1844_v32, %v1848_v39  ;;  %v1700_v45 = vld [vmem:[#allocation5 + $0x110] sm:$0xff]  ;;  %v14723_v32 = vld [vmem:[#allocation5 + $0x1f8] sm:$0xff] }
 0x41a   : > { %v14695_v5 = vpop.f32.mrf.mxu0  ;;  %v14697_v17 = vpop.f32.mrf.mxu1  ;;  %v1832_v39 = vld [vmem:[#allocation5 + $0x530] sm:$0xff] }
 0x41b   : > { %18022 = vst [vmem:[#allocation216_spill] sm:$0xff] %v14695_v5  ;;  %18023 = vst [vmem:[#allocation217_spill] sm:$0xff] %v14697_v17  ;;  %v18026_v17 = vcombine.low %v14213_v21, %v14215_v19  ;;  %v10785_v5 = vcombine.low %v1716_v33, %v1720_v51  ;;  %v1704_v19 = vld [vmem:[#allocation5 + $0x130] sm:$0xff]  ;;  %v14721_v51 = vld [vmem:[#allocation5 + $0x1d8] sm:$0xff]  ;;  %v10777_v33 = vcombine.low %v1708_v34, %v1712_v6 }
 0x41c   : > { %v14699_v20 = vpop.f32.mrf.mxu0  ;;  %v14701_v8 = vpop.f32.mrf.mxu1  ;;  %4970 = vmatmul.mubr.bf16.vlgmr.msra.gmra.mxu0 %v14176_v31  ;;  %5163 = vmatmul.mubr.bf16.vlgmr.msra.gmra.mxu1 %v14179_v63  ;;  %v10778_v31 = vcombine.high %v1708_v34, %v1712_v6  ;;  %v10906_v63 = vcombine.high %v1836_v61, %v1840_v38  ;;  %v1828_v21 = vld [vmem:[#allocation5 + $0x510] sm:$0xff] }
 0x41d   : > { %18024 = vst [vmem:[#allocation218_spill] sm:$0xff] %v14701_v8  ;;  %5324 = vmatpush1.bf16.msra.mxu0 %v18025_v44  ;;  %5517 = vmatpush1.bf16.msra.mxu1 %v18026_v17  ;;  %v10898_v8 = vcombine.high %v1828_v21, %v1832_v39  ;;  %v1824_v34 = vld [vmem:[#allocation5 + $0x4f0] sm:$0xff]  ;;  %v10769_v17 = vcombine.low %v1700_v45, %v1704_v19 }
 0x41e   : > { %v14711_v52 = vpop.f32.mrf.mxu0  ;;  %v14713_v22 = vpop.f32.mrf.mxu1  ;;  %4979 = vmatprep.mubr.bf16.mxu0 %v14186_v9  ;;  %5172 = vmatprep.mubr.bf16.mxu1 %v14189_v55 }
 0x41f   : > { %18027 = vst [vmem:[#allocation219_spill] sm:$0xff] %v14711_v52  ;;  %18028 = vst [vmem:[#allocation220_spill] sm:$0xff] %v14713_v22  ;;  %5325 = vmatprep.subr.bf16.mxu0 %v10786_v11  ;;  %5518 = vmatprep.subr.bf16.mxu1 %v10914_v28  ;;  %v10905_v28 = vcombine.low %v1836_v61, %v1840_v38  ;;  %v10770_v11 = vcombine.high %v1700_v45, %v1704_v19  ;;  %v1696_v61 = vld [vmem:[#allocation5 + $0xf0] sm:$0xff] }
 0x420   : > { %v14717_v44 = vpop.f32.mrf.mxu0  ;;  %v14719_v46 = vpop.f32.mrf.mxu1  ;;  %v1820_v38 = vld [vmem:[#allocation5 + $0x4d0] sm:$0xff] }
 0x421   : > { %18029 = vst [vmem:[#allocation221_spill] sm:$0xff] %v14717_v44  ;;  %18030 = vst [vmem:[#allocation222_spill] sm:$0xff] %v14719_v46  ;;  %5326 = vmatpush1.bf16.msra.mxu0 %v10785_v5  ;;  %5519 = vmatpush1.bf16.msra.mxu1 %v10913_v60  ;;  %v1692_v46 = vld [vmem:[#allocation5 + $0xd0] sm:$0xff]  ;;  %v14731_v5 = vld [vmem:[#allocation5 + $0x5d8] sm:$0xff]  ;;  %v10889_v19 = vcombine.low %v1820_v38, %v1824_v34 }
 0x422   : > { %v14725_v9 = vpop.f32.mrf.mxu0  ;;  %v14727_v55 = vpop.f32.mrf.mxu1  ;;  %5327 = vmatprep.subr.bf16.mxu0 %v10778_v31  ;;  %5520 = vmatprep.subr.bf16.mxu1 %v10906_v63  ;;  %v14733_v60 = vld [vmem:[#allocation5 + $0x5f8] sm:$0xff]  ;;  %v10761_v45 = vcombine.low %v1692_v46, %v1696_v61 }
 0x423   : > { %18031 = vst [vmem:[#allocation223_spill] sm:$0xff] %v14725_v9  ;;  %18032 = vst [vmem:[#allocation224_spill] sm:$0xff] %v14727_v55  ;;  %v1684_v55 = vld [vmem:[#allocation5 + $0x90] sm:$0xff] }
 0x424   : > { %v14735_v22 = vpop.f32.mrf.mxu0  ;;  %v14737_v44 = vpop.f32.mrf.mxu1  ;;  %4980 = vmatmul.mubr.bf16.gmra.mxu0 %v14226_v54  ;;  %5173 = vmatmul.mubr.bf16.gmra.mxu1 %v14229_v23  ;;  %v10897_v54 = vcombine.low %v1828_v21, %v1832_v39  ;;  %v10762_v23 = vcombine.high %v1692_v46, %v1696_v61  ;;  %v1812_v9 = vld [vmem:[#allocation5 + $0x490] sm:$0xff] }
 0x425   : > { %18033 = vst [vmem:[#allocation225_spill] sm:$0xff] %v14735_v22  ;;  %18034 = vst [vmem:[#allocation226_spill] sm:$0xff] %v14737_v44  ;;  %4989 = vmatprep.mubr.bf16.mxu0 %v14236_v13  ;;  %5182 = vmatprep.mubr.bf16.mxu1 %v14239_v26  ;;  %v10890_v44 = vcombine.high %v1820_v38, %v1824_v34  ;;  %v1688_v13 = vld [vmem:[#allocation5 + $0xb0] sm:$0xff] }
 0x426   : > { %v14745_v31 = vpop.f32.mrf.mxu0  ;;  %v14747_v63 = vpop.f32.mrf.mxu1  ;;  %5328 = vmatpush1.bf16.msra.mxu0 %v10777_v33  ;;  %5521 = vmatpush1.bf16.msra.mxu1 %v10905_v28  ;;  %v1816_v26 = vld [vmem:[#allocation5 + $0x4b0] sm:$0xff] }
 0x427   : > { %18035 = vst [vmem:[#allocation227_spill] sm:$0xff] %v14745_v31  ;;  %18036 = vst [vmem:[#allocation228_spill] sm:$0xff] %v14747_v63  ;;  %5329 = vmatprep.subr.bf16.mxu0 %v10770_v11  ;;  %5522 = vmatprep.subr.bf16.mxu1 %v10898_v8  ;;  %v10754_v8 = vcombine.high %v1684_v55, %v1688_v13  ;;  %v10882_v21 = vcombine.high %v1812_v9, %v1816_v26  ;;  %v1676_v39 = vld [vmem:[#allocation5 + $0x50] sm:$0xff] }
 0x428   : > { %v14749_v22 = vpop.f32.mrf.mxu0  ;;  %v14751_v6 = vpop.f32.mrf.mxu1  ;;  %v1680_v11 = vld [vmem:[#allocation5 + $0x70] sm:$0xff]  ;;  %v10881_v61 = vcombine.low %v1812_v9, %v1816_v26 }
 0x429   : > { %18037 = vst [vmem:[#allocation229_spill] sm:$0xff] %v14751_v6  ;;  %v1804_v6 = vld [vmem:[#allocation5 + $0x450] sm:$0xff] }
 0x42a   : > { %v14753_v52 = vpop.f32.mrf.mxu0  ;;  %v14755_v31 = vpop.f32.mrf.mxu1  ;;  %5330 = vmatpush1.bf16.msra.mxu0 %v10769_v17  ;;  %5523 = vmatpush1.bf16.msra.mxu1 %v10897_v54  ;;  %v1808_v63 = vld [vmem:[#allocation5 + $0x470] sm:$0xff]  ;;  %v10753_v17 = vcombine.low %v1684_v55, %v1688_v13  ;;  %v10745_v55 = vcombine.low %v1676_v39, %v1680_v11 }
 0x42b   : > { %18038 = vst [vmem:[#allocation230_spill] sm:$0xff] %v14755_v31  ;;  %5331 = vmatprep.subr.bf16.mxu0 %v10762_v23  ;;  %5524 = vmatprep.subr.bf16.mxu1 %v10890_v44  ;;  %v10874_v38 = vcombine.high %v1804_v6, %v1808_v63  ;;  %v1796_v23 = vld [vmem:[#allocation5 + $0x410] sm:$0xff]  ;;  %v10873_v9 = vcombine.low %v1804_v6, %v1808_v63 }
 0x42c   : > { %v14757_v33 = vpop.f32.mrf.mxu0  ;;  %v14759_v28 = vpop.f32.mrf.mxu1  ;;  %4990 = vmatmul.mubr.bf16.gmra.mxu0 %v14258_v42  ;;  %5183 = vmatmul.mubr.bf16.gmra.mxu1 %v14261_v48  ;;  %v10746_v42 = vcombine.high %v1676_v39, %v1680_v11  ;;  %v1668_v48 = vld [vmem:[#allocation5 + $0x10] sm:$0xff] }
 0x42d   : > { %18039 = vst [vmem:[#allocation231_spill] sm:$0xff] %v14759_v28  ;;  %4999 = vmatprep.mubr.bf16.mxu0 %v14268_v40  ;;  %5192 = vmatprep.mubr.bf16.mxu1 %v14271_v50  ;;  %v1672_v40 = vld [vmem:[#allocation5 + $0x30] sm:$0xff] }
 0x42e   : > { %v14765_v46 = vpop.f32.mrf.mxu0  ;;  %v14767_v44 = vpop.f32.mrf.mxu1  ;;  %5332 = vmatpush1.bf16.msra.mxu0 %v10761_v45  ;;  %5525 = vmatpush1.bf16.msra.mxu1 %v10889_v19  ;;  %v1800_v50 = vld [vmem:[#allocation5 + $0x430] sm:$0xff]  ;;  %v10738_v13 = vcombine.high %v1668_v48, %v1672_v40  ;;  %v10737_v39 = vcombine.low %v1668_v48, %v1672_v40 }
 0x42f   : > { %18040 = vst [vmem:[#allocation232_spill] sm:$0xff] %v14767_v44  ;;  %5333 = vmatprep.subr.bf16.mxu0 %v10754_v8  ;;  %5526 = vmatprep.subr.bf16.mxu1 %v10882_v21  ;;  %v10866_v26 = vcombine.high %v1796_v23, %v1800_v50  ;;  %v1788_v45 = vld [vmem:[#allocation5 + $0x3d0] sm:$0xff]  ;;  %v10865_v11 = vcombine.low %v1796_v23, %v1800_v50 }
 0x430   : > { %v14769_v34 = vpop.f32.mrf.mxu0  ;;  %v14771_v54 = vpop.f32.mrf.mxu1  ;;  %v1792_v21 = vld [vmem:[#allocation5 + $0x3f0] sm:$0xff] }
 0x431   : > { %18041 = vst [vmem:[#allocation233_spill] sm:$0xff] %v14771_v54  ;;  %v1916_v54 = vld [vmem:[#allocation5 + $0x7d0] sm:$0xff]  ;;  %v10857_v48 = vcombine.low %v1788_v45, %v1792_v21 }
 0x432   : > { %v14773_v28 = vpop.f32.mrf.mxu0  ;;  %v14775_v31 = vpop.f32.mrf.mxu1  ;;  %5334 = vmatpush1.bf16.msra.mxu0 %v10753_v17  ;;  %5527 = vmatpush1.bf16.msra.mxu1 %v10881_v61  ;;  %v1920_v44 = vld [vmem:[#allocation5 + $0x7f0] sm:$0xff] }
 0x433   : > { %18042 = vst [vmem:[#allocation234_spill] sm:$0xff] %v14775_v31  ;;  %5335 = vmatprep.subr.bf16.mxu0 %v10746_v42  ;;  %5528 = vmatprep.subr.bf16.mxu1 %v10874_v38  ;;  %v10986_v17 = vcombine.high %v1916_v54, %v1920_v44  ;;  %v1908_v38 = vld [vmem:[#allocation5 + $0x790] sm:$0xff]  ;;  %v10985_v40 = vcombine.low %v1916_v54, %v1920_v44 }
 0x434   : > { %v14777_v19 = vpop.f32.mrf.mxu0  ;;  %v14779_v8 = vpop.f32.mrf.mxu1  ;;  %5000 = vmatmul.mubr.bf16.gmra.mxu0 %v14290_v12  ;;  %5193 = vmatmul.mubr.bf16.gmra.mxu1 %v14293_v36  ;;  %v10858_v12 = vcombine.high %v1788_v45, %v1792_v21  ;;  %v1780_v36 = vld [vmem:[#allocation5 + $0x390] sm:$0xff] }
 0x435   : > { %18043 = vst [vmem:[#allocation235_spill] sm:$0xff] %v14779_v8  ;;  %5009 = vmatprep.mubr.bf16.mxu0 %v14300_v30  ;;  %5202 = vmatprep.mubr.bf16.mxu1 %v14303_v10  ;;  %v1784_v30 = vld [vmem:[#allocation5 + $0x3b0] sm:$0xff] }
 0x436   : > { %v14785_v6 = vpop.f32.mrf.mxu0  ;;  %v14787_v63 = vpop.f32.mrf.mxu1  ;;  %5336 = vmatpush1.bf16.msra.mxu0 %v10745_v55  ;;  %5529 = vmatpush1.bf16.msra.mxu1 %v10873_v9  ;;  %v1912_v10 = vld [vmem:[#allocation5 + $0x7b0] sm:$0xff]  ;;  %v10850_v23 = vcombine.high %v1780_v36, %v1784_v30  ;;  %v10849_v45 = vcombine.low %v1780_v36, %v1784_v30 }
 0x437   : > { %18044 = vst [vmem:[#allocation236_spill] sm:$0xff] %v14787_v63  ;;  %5337 = vmatprep.subr.bf16.mxu0 %v10738_v13  ;;  %5530 = vmatprep.subr.bf16.mxu1 %v10866_v26  ;;  %v10978_v50 = vcombine.high %v1908_v38, %v1912_v10  ;;  %v1772_v55 = vld [vmem:[#allocation5 + $0x350] sm:$0xff]  ;;  %v10977_v21 = vcombine.low %v1908_v38, %v1912_v10 }
 0x438   : > { %v14789_v61 = vpop.f32.mrf.mxu0  ;;  %v14791_v42 = vpop.f32.mrf.mxu1  ;;  %v1776_v26 = vld [vmem:[#allocation5 + $0x370] sm:$0xff] }
 0x439   : > { %18045 = vst [vmem:[#allocation237_spill] sm:$0xff] %v14791_v42  ;;  %v1900_v42 = vld [vmem:[#allocation5 + $0x750] sm:$0xff]  ;;  %v10841_v36 = vcombine.low %v1772_v55, %v1776_v26 }
 0x43a   : > { %v14793_v8 = vpop.f32.mrf.mxu0  ;;  %v14795_v31 = vpop.f32.mrf.mxu1  ;;  %5338 = vmatpush1.bf16.msra.mxu0 %v10737_v39  ;;  %5531 = vmatpush1.bf16.msra.mxu1 %v10865_v11  ;;  %v1904_v63 = vld [vmem:[#allocation5 + $0x770] sm:$0xff] }
 0x43b   : > { %18046 = vst [vmem:[#allocation238_spill] sm:$0xff] %v14795_v31  ;;  %5339 = vmatprep.subr.bf16.mxu0 %v10858_v12  ;;  %5532 = vmatprep.subr.bf16.mxu1 %v10986_v17  ;;  %v10970_v39 = vcombine.high %v1900_v42, %v1904_v63  ;;  %v1892_v17 = vld [vmem:[#allocation5 + $0x710] sm:$0xff]  ;;  %v10969_v30 = vcombine.low %v1900_v42, %v1904_v63 }
 0x43c   : > { %v14797_v9 = vpop.f32.mrf.mxu0  ;;  %v14799_v13 = vpop.f32.mrf.mxu1  ;;  %5010 = vmatmul.mubr.bf16.gmra.mxu0 %v14322_v59  ;;  %5203 = vmatmul.mubr.bf16.gmra.mxu1 %v14325_v4  ;;  %v10842_v59 = vcombine.high %v1772_v55, %v1776_v26  ;;  %v1764_v4 = vld [vmem:[#allocation5 + $0x310] sm:$0xff] }
 0x43d   : > { %18047 = vst [vmem:[#allocation239_spill] sm:$0xff] %v14799_v13  ;;  %5019 = vmatprep.mubr.bf16.mxu0 %v14332_v57  ;;  %5212 = vmatprep.mubr.bf16.mxu1 %v14335_v15  ;;  %v1768_v57 = vld [vmem:[#allocation5 + $0x330] sm:$0xff] }
 0x43e   : > { %v14805_v44 = vpop.f32.mrf.mxu0  ;;  %v14807_v54 = vpop.f32.mrf.mxu1  ;;  %5340 = vmatpush2.bf16.msra.mxu0 %v10857_v48  ;;  %5533 = vmatpush2.bf16.msra.mxu1 %v10985_v40  ;;  %v1896_v15 = vld [vmem:[#allocation5 + $0x730] sm:$0xff]  ;;  %v10834_v38 = vcombine.high %v1764_v4, %v1768_v57  ;;  %v10833_v55 = vcombine.low %v1764_v4, %v1768_v57 }
 0x43f   : > { %18048 = vst [vmem:[#allocation240_spill] sm:$0xff] %v14805_v44  ;;  %18049 = vst [vmem:[#allocation241_spill] sm:$0xff] %v14807_v54  ;;  %5341 = vmatprep.subr.bf16.mxu0 %v10850_v23  ;;  %5534 = vmatprep.subr.bf16.mxu1 %v10978_v50  ;;  %v10962_v10 = vcombine.high %v1892_v17, %v1896_v15  ;;  %v1756_v48 = vld [vmem:[#allocation5 + $0x2d0] sm:$0xff]  ;;  %v10961_v26 = vcombine.low %v1892_v17, %v1896_v15 }
 0x440   : > { %v14809_v11 = vpop.f32.mrf.mxu0  ;;  %v14811_v12 = vpop.f32.mrf.mxu1  ;;  %v1760_v50 = vld [vmem:[#allocation5 + $0x2f0] sm:$0xff] }
 0x441   : > { %18050 = vst [vmem:[#allocation242_spill] sm:$0xff] %v14809_v11  ;;  %18051 = vst [vmem:[#allocation243_spill] sm:$0xff] %v14811_v12  ;;  %v1884_v12 = vld [vmem:[#allocation5 + $0x6d0] sm:$0xff]  ;;  %v10825_v4 = vcombine.low %v1756_v48, %v1760_v50 }
 0x442   : > { %v14813_v13 = vpop.f32.mrf.mxu0  ;;  %v14815_v31 = vpop.f32.mrf.mxu1  ;;  %5342 = vmatpush2.bf16.msra.mxu0 %v10849_v45  ;;  %5535 = vmatpush2.bf16.msra.mxu1 %v10977_v21  ;;  %v1888_v54 = vld [vmem:[#allocation5 + $0x6f0] sm:$0xff] }
 0x443   : > { %18052 = vst [vmem:[#allocation244_spill] sm:$0xff] %v14813_v13  ;;  %18053 = vst [vmem:[#allocation245_spill] sm:$0xff] %v14815_v31  ;;  %5343 = vmatprep.subr.bf16.mxu0 %v10842_v59  ;;  %5536 = vmatprep.subr.bf16.mxu1 %v10970_v39  ;;  %v10954_v45 = vcombine.high %v1884_v12, %v1888_v54  ;;  %v1876_v39 = vld [vmem:[#allocation5 + $0x690] sm:$0xff]  ;;  %v10953_v57 = vcombine.low %v1884_v12, %v1888_v54 }
 0x444   : > { %v14817_v40 = vpop.f32.mrf.mxu0  ;;  %v14819_v23 = vpop.f32.mrf.mxu1  ;;  %5020 = vmatmul.mubr.bf16.gmra.mxu0 %v14354_v58  ;;  %5213 = vmatmul.mubr.bf16.gmra.mxu1 %v14357_v56  ;;  %v10826_v58 = vcombine.high %v1756_v48, %v1760_v50  ;;  %v1748_v56 = vld [vmem:[#allocation5 + $0x290] sm:$0xff] }
 0x445   : > { %18054 = vst [vmem:[#allocation246_spill] sm:$0xff] %v14817_v40  ;;  %18055 = vst [vmem:[#allocation247_spill] sm:$0xff] %v14819_v23  ;;  %5029 = vmatprep.mubr.bf16.mxu0 %v14364_v18  ;;  %5222 = vmatprep.mubr.bf16.mxu1 %v14367_v49  ;;  %v1752_v18 = vld [vmem:[#allocation5 + $0x2b0] sm:$0xff] }
 0x446   : > { %v14825_v63 = vpop.f32.mrf.mxu0  ;;  %v14827_v42 = vpop.f32.mrf.mxu1  ;;  %5344 = vmatpush2.bf16.msra.mxu0 %v10841_v36  ;;  %5537 = vmatpush2.bf16.msra.mxu1 %v10969_v30  ;;  %v1880_v49 = vld [vmem:[#allocation5 + $0x6b0] sm:$0xff]  ;;  %v10818_v17 = vcombine.high %v1748_v56, %v1752_v18  ;;  %v10817_v48 = vcombine.low %v1748_v56, %v1752_v18 }
 0x447   : > { %18056 = vst [vmem:[#allocation248_spill] sm:$0xff] %v14825_v63  ;;  %18057 = vst [vmem:[#allocation249_spill] sm:$0xff] %v14827_v42  ;;  %5345 = vmatprep.subr.bf16.mxu0 %v10834_v38  ;;  %5538 = vmatprep.subr.bf16.mxu1 %v10962_v10  ;;  %v10946_v15 = vcombine.high %v1876_v39, %v1880_v49  ;;  %v1740_v36 = vld [vmem:[#allocation5 + $0x250] sm:$0xff]  ;;  %v10945_v50 = vcombine.low %v1876_v39, %v1880_v49 }
 0x448   : > { %v14829_v21 = vpop.f32.mrf.mxu0  ;;  %v14831_v59 = vpop.f32.mrf.mxu1  ;;  %v1744_v10 = vld [vmem:[#allocation5 + $0x270] sm:$0xff] }
 0x449   : > { %18058 = vst [vmem:[#allocation250_spill] sm:$0xff] %v14829_v21  ;;  %18059 = vst [vmem:[#allocation251_spill] sm:$0xff] %v14831_v59  ;;  %v1868_v59 = vld [vmem:[#allocation5 + $0x650] sm:$0xff]  ;;  %v10809_v56 = vcombine.low %v1740_v36, %v1744_v10  ;;  %v12944_v21 = vld [vmem:[%s13403_s15 + $0x2c] ss:$16 sps:$4 sm:$0xff]  }
 0x44a   : > { %v14833_v23 = vpop.f32.mrf.mxu0  ;;  %v14835_v31 = vpop.f32.mrf.mxu1  ;;  %5346 = vmatpush2.bf16.msra.mxu0 %v10833_v55  ;;  %5539 = vmatpush2.bf16.msra.mxu1 %v10961_v26  ;;  %v1872_v42 = vld [vmem:[#allocation5 + $0x670] sm:$0xff] }
 0x44b   : > { %18060 = vst [vmem:[#allocation252_spill] sm:$0xff] %v14833_v23  ;;  %18061 = vst [vmem:[#allocation253_spill] sm:$0xff] %v14835_v31  ;;  %5347 = vmatprep.subr.bf16.mxu0 %v10826_v58  ;;  %5540 = vmatprep.subr.bf16.mxu1 %v10954_v45  ;;  %v10938_v55 = vcombine.high %v1868_v59, %v1872_v42  ;;  %v1860_v45 = vld [vmem:[#allocation5 + $0x610] sm:$0xff]  ;;  %v10937_v18 = vcombine.low %v1868_v59, %v1872_v42 }
 0x44c   : > { %v14837_v30 = vpop.f32.mrf.mxu0  ;;  %v14839_v38 = vpop.f32.mrf.mxu1  ;;  %5030 = vmatmul.mubr.bf16.gmra.mxu0 %v14386_v35  ;;  %5223 = vmatmul.mubr.bf16.gmra.mxu1 %v14389_v1  ;;  %v10810_v35 = vcombine.high %v1740_v36, %v1744_v10  ;;  %v1732_v1 = vld [vmem:[#allocation5 + $0x210] sm:$0xff] }
 0x44d   : > { %18062 = vst [vmem:[#allocation254_spill] sm:$0xff] %v14837_v30  ;;  %18063 = vst [vmem:[#allocation255_spill] sm:$0xff] %v14839_v38  ;;  %5039 = vmatprep.mubr.bf16.mxu0 %v14396_v25  ;;  %5232 = vmatprep.mubr.bf16.mxu1 %v14399_v27  ;;  %v1736_v25 = vld [vmem:[#allocation5 + $0x230] sm:$0xff] }
 0x44e   : > { %v14845_v54 = vpop.f32.mrf.mxu0  ;;  %v14847_v12 = vpop.f32.mrf.mxu1  ;;  %5348 = vmatpush2.bf16.msra.mxu0 %v10825_v4  ;;  %5541 = vmatpush2.bf16.msra.mxu1 %v10953_v57  ;;  %v1864_v27 = vld [vmem:[#allocation5 + $0x630] sm:$0xff]  ;;  %v6097_v4 = vlaneseq  ;;  %v10802_v39 = vcombine.high %v1732_v1, %v1736_v25  ;;  %v10801_v59 = vcombine.low %v1732_v1, %v1736_v25 }
 0x44f   : > { %18064 = vst [vmem:[#allocation256_spill] sm:$0xff] %v14845_v54  ;;  %18065 = vst [vmem:[#allocation257_spill] sm:$0xff] %v14847_v12  ;;  %5349 = vmatprep.subr.bf16.mxu0 %v10818_v17  ;;  %5542 = vmatprep.subr.bf16.mxu1 %v10946_v15  ;;  %v10930_v49 = vcombine.high %v1860_v45, %v1864_v27  ;;  %v10929_v10 = vcombine.low %v1860_v45, %v1864_v27  ;;  %v18113_v12 = vld [vmem:[#allocation44_spill] sm:$0xff] }
 0x450   : > { %v14849_v26 = vpop.f32.mrf.mxu0  ;;  %v14851_v58 = vpop.f32.mrf.mxu1  ;;  %v14869_v42 = vshrl.u32 %v6097_v4, 7  ;;  %v18139_v54 = vcombine.low %v14721_v51, %v14723_v32  ;;  %v12943_v23 = vld [vmem:[%s13403_s15 + $0x24] ss:$16 sps:$4 sm:$0xff]  }
 0x451   : > { %18066 = vst [vmem:[#allocation258_spill] sm:$0xff] %v14849_v26  ;;  %18067 = vst [vmem:[#allocation259_spill] sm:$0xff] %v14851_v58  ;;  %v13008_v13 = vld [vmem:[%s13403_s15 + $0x24] ss:$16 sps:$4 sm:$0xff]  }
 0x452   : > { %v14853_v38 = vpop.f32.mrf.mxu0  ;;  %v14855_v31 = vpop.f32.mrf.mxu1  ;;  %5350 = vmatpush2.bf16.msra.mxu0 %v10817_v48  ;;  %5543 = vmatpush2.bf16.msra.mxu1 %v10945_v50  ;;  %v11608_v11 = vld [vmem:[#allocation7 + $0x2a4] ss:$16 sps:$4 sm:$0xff]  }
 0x453   : > { %18068 = vst [vmem:[#allocation260_spill] sm:$0xff] %v14853_v38  ;;  %18069 = vst [vmem:[#allocation261_spill] sm:$0xff] %v14855_v31  ;;  %5351 = vmatprep.subr.bf16.mxu0 %v10810_v35  ;;  %5544 = vmatprep.subr.bf16.mxu1 %v10938_v55  ;;  %v14884_v35 = vsub.s32 0, %v14869_v42  ;;  %v6095_v55 = vld [vmem:[%s17625_s10] sm:$0xff] }
 0x454   : > { %v14857_v57 = vpop.f32.mrf.mxu0  ;;  %v14859_v17 = vpop.f32.mrf.mxu1  ;;  %5040 = vmatmul.mubr.bf16.gmra.mxu0 %v14418_v2  ;;  %5233 = vmatmul.mubr.bf16.gmra.mxu1 %v14421_v62  ;;  %v10796_v2 = vcombine.high %v14721_v51, %v14723_v32  ;;  %v10924_v62 = vcombine.high %v14731_v5, %v14733_v60 }
 0x455   : > { %18070 = vst [vmem:[#allocation262_spill] sm:$0xff] %v14857_v57  ;;  %18071 = vst [vmem:[#allocation263_spill] sm:$0xff] %v14859_v17  ;;  %5049 = vmatprep.mubr.bf16.mxu0 %v14428_v0  ;;  %5242 = vmatprep.mubr.bf16.mxu1 %v14431_v29  ;;  %v14895_v27 = vrot.slane %v6095_v55, %v14884_v35 }
 0x456   : > { %v14865_v15 = vpop.f32.mrf.mxu0  ;;  %v14867_v36 = vpop.f32.mrf.mxu1  ;;  %5352 = vmatpush2.bf16.msra.mxu0 %v10809_v56  ;;  %5545 = vmatpush2.bf16.msra.mxu1 %v10937_v18  ;;  %18078 = vst [vmem:[#allocation270_spill] sm:$0xff] %v14884_v35  ;;  %v12937_v35 = vld [vmem:[%s13403_s15 + $0x1e0] ss:$16 sps:$4 sm:$0xff]  }
 0x457   : > { %18072 = vst [vmem:[#allocation264_spill] sm:$0xff] %v14865_v15  ;;  %18073 = vst [vmem:[#allocation265_spill] sm:$0xff] %v14867_v36  ;;  %5353 = vmatprep.subr.bf16.mxu0 %v10802_v39  ;;  %5546 = vmatprep.subr.bf16.mxu1 %v10930_v49  ;;  %v14899_v49 = vsub.s32 1, %v14869_v42  ;;  %v18102_v36 = vld [vmem:[#allocation36_spill] sm:$0xff] }
 0x458   : > { %v14875_v0 = vpop.f32.mrf.mxu0  ;;  %v14877_v29 = vpop.f32.mrf.mxu1  ;;  %v18137_v15 = vld [vmem:[#allocation68_spill] sm:$0xff] }
 0x459   : > { %18074 = vst [vmem:[#allocation266_spill] sm:$0xff] %v14875_v0  ;;  %18075 = vst [vmem:[#allocation267_spill] sm:$0xff] %v14877_v29 }
 0x45a   : > { %v14879_v48 = vpop.f32.mrf.mxu0  ;;  %v14881_v50 = vpop.f32.mrf.mxu1  ;;  %5354 = vmatpush2.bf16.msra.mxu0 %v10801_v59  ;;  %5547 = vmatpush2.bf16.msra.mxu1 %v10929_v10  ;;  %18079 = vst [vmem:[#allocation271_spill] sm:$0xff] %v14899_v49 }
 0x45b   : > { %18076 = vst [vmem:[#allocation268_spill] sm:$0xff] %v14879_v48  ;;  %18077 = vst [vmem:[#allocation269_spill] sm:$0xff] %v14881_v50  ;;  %5709 = vmatprep.subr.bf16.mxu0 %v10796_v2  ;;  %5902 = vmatprep.subr.bf16.mxu1 %v10924_v62  ;;  %v18134_v48 = vld [vmem:[#allocation64_spill] sm:$0xff] }
 0x45c   : > { %v4585_v1 = vpop.f32.mrf.mxu0  ;;  %v4778_v25 = vpop.f32.mrf.mxu1  ;;  %5050 = vmatmul.mubr.bf16.gmra.mxu0 %v14458_v24  ;;  %5243 = vmatmul.mubr.bf16.gmra.mxu1 %v14461_v7 }
 0x45d   : > { %v4586_v45 = vadd.f32 %v4585_v1, %v14001_v37  ;;  %5059 = vmatprep.mubr.bf16.mxu0 %v14464_v43  ;;  %5252 = vmatprep.mubr.bf16.mxu1 %v14467_v47  ;;  %v14905_v1 = vrot.slane %v6095_v55, %v14899_v49 }
 0x45e   : > { %v4587_v4 = vpop.f32.mrf.mxu0  ;;  %v4780_v56 = vpop.f32.mrf.mxu1 }
 0x45f   : > { %v4779_v18 = vadd.f32 %v4778_v25, %v4586_v45  ;;  %v4588_v39 = vadd.f32 %v4587_v4, %v14011_v14 }
 0x460   : > { %v4589_v24 = vpop.f32.mrf.mxu0  ;;  %v4782_v59 = vpop.f32.mrf.mxu1 }
 0x461   : > { %v4781_v7 = vadd.f32 %v4780_v56, %v4588_v39  ;;  %v4590_v37 = vadd.f32 %v4589_v24, %v14015_v16  ;;  %v6137_v43 = vadd.f32 %v14895_v27, %v4779_v18  ;;  %v18080_v16 = vld [vmem:[#allocation14_spill] sm:$0xff]  ;;  %v18081_v18 = vld [vmem:[#allocation140_spill] sm:$0xff]  ;;  %v18082_v39 = vld [vmem:[#allocation141_spill] sm:$0xff] }
 0x462   : > { %v4591_v10 = vpop.f32.mrf.mxu0  ;;  %v4784_v47 = vpop.f32.mrf.mxu1 }
 0x463   : > { %v4783_v2 = vadd.f32 %v4782_v59, %v4590_v37  ;;  %v4592_v62 = vadd.f32 %v4591_v10, %v14019_v41  ;;  %12167 = vtanh.f32 %v6137_v43  ;;  %v18083_v37 = vld [vmem:[#allocation16_spill] sm:$0xff] }
 0x464   : > { %v4595_v25 = vpop.f32.mrf.mxu0  ;;  %v4788_v14 = vpop.f32.mrf.mxu1  ;;  %5060 = vmatmul.mubr.bf16.gmra.mxu0 %v14490_v3  ;;  %5253 = vmatmul.mubr.bf16.gmra.mxu1 %v14493_v53  ;;  %v18085_v43 = vld [vmem:[#allocation20_spill] sm:$0xff] }
 0x465   : > { %v6145_v45 = vadd.f32 %v14895_v27, %v4783_v2  ;;  %v4785_v4 = vadd.f32 %v4784_v47, %v4592_v62  ;;  %v4596_v56 = vadd.f32 %v4595_v25, %v18080_v16  ;;  %5069 = vmatprep.mubr.bf16.mxu0 %v18081_v18  ;;  %5262 = vmatprep.mubr.bf16.mxu1 %v18082_v39  ;;  %v18084_v62 = vld [vmem:[#allocation18_spill] sm:$0xff] }
 0x466   : > { %v4597_v41 = vpop.f32.mrf.mxu0  ;;  %v4790_v24 = vpop.f32.mrf.mxu1  ;;  %v6138_v2 = vadd.f32 %v14905_v1, %v4781_v7 }
 0x467   : > { %12169 = vtanh.f32 %v6145_v45  ;;  %v6146_v55 = vadd.f32 %v14905_v1, %v4785_v4  ;;  %v4789_v59 = vadd.f32 %v4788_v14, %v4596_v56  ;;  %v4598_v3 = vadd.f32 %v4597_v41, %v18083_v37  ;;  %v18086_v14 = vld [vmem:[#allocation150_spill] sm:$0xff]  ;;  %v18087_v56 = vld [vmem:[#allocation151_spill] sm:$0xff] }
 0x468   : > { %v4599_v10 = vpop.f32.mrf.mxu0  ;;  %v4792_v53 = vpop.f32.mrf.mxu1 }
 0x469   : > { %v4791_v47 = vadd.f32 %v4790_v24, %v4598_v3  ;;  %v4600_v25 = vadd.f32 %v4599_v10, %v18084_v62  ;;  %12171 = vtanh.f32 %v6146_v55  ;;  %v6153_v45 = vadd.f32 %v14895_v27, %v4789_v59  ;;  %v18088_v24 = vld [vmem:[#allocation22_spill] sm:$0xff]  ;;  %v18089_v3 = vld [vmem:[#allocation152_spill] sm:$0xff]  ;;  %v18090_v55 = vld [vmem:[#allocation153_spill] sm:$0xff] }
 0x46a   : > { %v4601_v16 = vpop.f32.mrf.mxu0  ;;  %v4794_v18 = vpop.f32.mrf.mxu1  ;;  %12173 = vtanh.f32 %v6138_v2 }
 0x46b   : > { %v4793_v39 = vadd.f32 %v4792_v53, %v4600_v25  ;;  %v4602_v17 = vadd.f32 %v4601_v16, %v18085_v43  ;;  %v6154_v10 = vadd.f32 %v14905_v1, %v4791_v47  ;;  %v18091_v16 = vld [vmem:[#allocation24_spill] sm:$0xff] }
 0x46c   : > { %v4605_v29 = vpop.f32.mrf.mxu0  ;;  %v4798_v4 = vpop.f32.mrf.mxu1  ;;  %5070 = vmatmul.mubr.bf16.gmra.mxu0 %v18086_v14  ;;  %5263 = vmatmul.mubr.bf16.gmra.mxu1 %v18087_v56 }
 0x46d   : > { %v6161_v7 = vadd.f32 %v14895_v27, %v4793_v39  ;;  %v4795_v41 = vadd.f32 %v4794_v18, %v4602_v17  ;;  %v4606_v37 = vadd.f32 %v4605_v29, %v18088_v24  ;;  %5079 = vmatprep.mubr.bf16.mxu0 %v18089_v3  ;;  %5272 = vmatprep.mubr.bf16.mxu1 %v18090_v55  ;;  %v18092_v29 = vld [vmem:[#allocation26_spill] sm:$0xff]  ;;  %v18093_v3 = vld [vmem:[#allocation28_spill] sm:$0xff] }
 0x46e   : > { %v4607_v53 = vpop.f32.mrf.mxu0  ;;  %v4800_v59 = vpop.f32.mrf.mxu1 }
 0x46f   : > { %12175 = vtanh.f32 %v6161_v7  ;;  %v6162_v62 = vadd.f32 %v14905_v1, %v4795_v41  ;;  %v4799_v25 = vadd.f32 %v4798_v4, %v4606_v37  ;;  %v4608_v43 = vadd.f32 %v4607_v53, %v18091_v16  ;;  %v18094_v53 = vld [vmem:[#allocation162_spill] sm:$0xff]  ;;  %v18097_v16 = vld [vmem:[#allocation164_spill] sm:$0xff] }
 0x470   : > { %12177 = vtanh.f32 %v6153_v45  ;;  %v4609_v2 = vpop.f32.mrf.mxu0  ;;  %v4802_v39 = vpop.f32.mrf.mxu1  ;;  %v18095_v45 = vld [vmem:[#allocation163_spill] sm:$0xff] }
 0x471   : > { %12179 = vtanh.f32 %v6162_v62  ;;  %v4801_v17 = vadd.f32 %v4800_v59, %v4608_v43  ;;  %v4610_v18 = vadd.f32 %v4609_v2, %v18092_v29  ;;  %v12168_v24 = vpop.eup %12167  ;;  %v6169_v41 = vadd.f32 %v14895_v27, %v4799_v25  ;;  %v18098_v43 = vld [vmem:[#allocation165_spill] sm:$0xff] }
 0x472   : > { %12181 = vtanh.f32 %v6154_v10  ;;  %v4611_v14 = vpop.f32.mrf.mxu0  ;;  %v4804_v56 = vpop.f32.mrf.mxu1 }
 0x473   : > { %v4803_v47 = vadd.f32 %v4802_v39, %v4610_v18  ;;  %v4612_v55 = vadd.f32 %v4611_v14, %v18093_v3  ;;  %v6170_v2 = vadd.f32 %v14905_v1, %v4801_v17  ;;  %v18099_v39 = vld [vmem:[#allocation30_spill] sm:$0xff]  ;;  %v18100_v3 = vld [vmem:[#allocation32_spill] sm:$0xff] }
 0x474   : > { %v12170_v7 = vpop.eup %12169  ;;  %v4615_v4 = vpop.f32.mrf.mxu0  ;;  %5080 = vmatmul.mubr.bf16.gmra.mxu0 %v18094_v53  ;;  %5273 = vmatmul.mubr.bf16.gmra.mxu1 %v18095_v45  ;;  %v18101_v45 = vld [vmem:[#allocation34_spill] sm:$0xff] }
 0x475   : > { %v4808_v37 = vpop.f32.mrf.mxu1  ;;  %v14933_v62 = vpack.c.bf16 %v12170_v7, %v12168_v24  ;;  %v6177_v59 = vadd.f32 %v14895_v27, %v4803_v47  ;;  %v4805_v10 = vadd.f32 %v4804_v56, %v4612_v55  ;;  %5089 = vmatprep.mubr.bf16.mxu0 %v18097_v16  ;;  %5282 = vmatprep.mubr.bf16.mxu1 %v18098_v43 }
 0x476   : > { %v4616_v29 = vadd.f32 %v4615_v4, %v18099_v39  ;;  %v4617_v25 = vpop.f32.mrf.mxu0  ;;  %v12172_v24 = vpop.eup %12171 }
 0x477   : > { %18096 = vst [vmem:[#allocation14_spill] sm:$0xff] %v14933_v62  ;;  %v4810_v18 = vpop.f32.mrf.mxu1  ;;  %12183 = vtanh.f32 %v6177_v59  ;;  %v6178_v14 = vadd.f32 %v14905_v1, %v4805_v10  ;;  %v4618_v53 = vadd.f32 %v4617_v25, %v18100_v3  ;;  %v12174_v43 = vpop.eup %12173 }
 0x478   : > { %12185 = vtanh.f32 %v6169_v41  ;;  %v4809_v7 = vadd.f32 %v4808_v37, %v4616_v29  ;;  %v4619_v47 = vpop.f32.mrf.mxu0  ;;  %v14944_v50 = vpack.c.bf16 %v12172_v24, %v12174_v43  ;;  %v18104_v29 = vld [vmem:[#allocation174_spill] sm:$0xff] }
 0x479   : > { %v4812_v56 = vpop.f32.mrf.mxu1  ;;  %12187 = vtanh.f32 %v6178_v14  ;;  %v4811_v55 = vadd.f32 %v4810_v18, %v4618_v53  ;;  %v4620_v16 = vadd.f32 %v4619_v47, %v18101_v45  ;;  %v18105_v14 = vld [vmem:[#allocation175_spill] sm:$0xff]  ;;  %v18106_v53 = vld [vmem:[#allocation38_spill] sm:$0xff] }
 0x47a   : > { %12189 = vtanh.f32 %v6170_v2  ;;  %v4621_v17 = vpop.f32.mrf.mxu0  ;;  %18103 = vst [vmem:[#allocation140_spill] sm:$0xff] %v14944_v50  ;;  %v6185_v25 = vadd.f32 %v14895_v27, %v4809_v7 }
 0x47b   : > { %v4814_v4 = vpop.f32.mrf.mxu1  ;;  %v4813_v39 = vadd.f32 %v4812_v56, %v4620_v16  ;;  %v4622_v59 = vadd.f32 %v4621_v17, %v18102_v36  ;;  %v18107_v56 = vld [vmem:[#allocation176_spill] sm:$0xff]  ;;  %v18108_v36 = vld [vmem:[#allocation177_spill] sm:$0xff]  ;;  %v6186_v45 = vadd.f32 %v14905_v1, %v4811_v55 }
 0x47c   : > { %v12176_v10 = vpop.eup %12175  ;;  %v4625_v41 = vpop.f32.mrf.mxu0  ;;  %5090 = vmatmul.mubr.bf16.gmra.mxu0 %v18104_v29  ;;  %5283 = vmatmul.mubr.bf16.gmra.mxu1 %v18105_v14 }
 0x47d   : > { %v4818_v37 = vpop.f32.mrf.mxu1  ;;  %v12178_v18 = vpop.eup %12177  ;;  %v6193_v3 = vadd.f32 %v14895_v27, %v4813_v39  ;;  %v4815_v2 = vadd.f32 %v4814_v4, %v4622_v59  ;;  %v4626_v47 = vadd.f32 %v4625_v41, %v18106_v53  ;;  %5099 = vmatprep.mubr.bf16.mxu0 %v18107_v56  ;;  %5292 = vmatprep.mubr.bf16.mxu1 %v18108_v36  ;;  %v18110_v39 = vld [vmem:[#allocation40_spill] sm:$0xff]  ;;  %v18112_v36 = vld [vmem:[#allocation42_spill] sm:$0xff] }
 0x47e   : > { %v12180_v24 = vpop.eup %12179  ;;  %v4627_v7 = vpop.f32.mrf.mxu0  ;;  %v14954_v43 = vpack.c.bf16 %v12176_v10, %v12178_v18 }
 0x47f   : > { %v4820_v16 = vpop.f32.mrf.mxu1  ;;  %v12182_v17 = vpop.eup %12181  ;;  %12191 = vtanh.f32 %v6193_v3  ;;  %v6194_v29 = vadd.f32 %v14905_v1, %v4815_v2  ;;  %v4819_v14 = vadd.f32 %v4818_v37, %v4626_v47  ;;  %v4628_v4 = vadd.f32 %v4627_v7, %v18110_v39  ;;  %v18115_v7 = vld [vmem:[#allocation187_spill] sm:$0xff]  ;;  %v18117_v39 = vld [vmem:[#allocation188_spill] sm:$0xff] }
 0x480   : > { %18109 = vst [vmem:[#allocation141_spill] sm:$0xff] %v14954_v43  ;;  %12193 = vtanh.f32 %v6185_v25  ;;  %v4629_v59 = vpop.f32.mrf.mxu0  ;;  %v14958_v53 = vpack.c.bf16 %v12180_v24, %v12182_v17  ;;  %v18114_v25 = vld [vmem:[#allocation186_spill] sm:$0xff] }
 0x481   : > { %v4822_v41 = vpop.f32.mrf.mxu1  ;;  %12195 = vtanh.f32 %v6194_v29  ;;  %v4821_v56 = vadd.f32 %v4820_v16, %v4628_v4  ;;  %v4630_v55 = vadd.f32 %v4629_v59, %v18112_v36  ;;  %v6201_v37 = vadd.f32 %v14895_v27, %v4819_v14  ;;  %v18116_v29 = vld [vmem:[#allocation46_spill] sm:$0xff]  ;;  %v18118_v4 = vld [vmem:[#allocation189_spill] sm:$0xff] }
 0x482   : > { %18111 = vst [vmem:[#allocation16_spill] sm:$0xff] %v14958_v53  ;;  %12197 = vtanh.f32 %v6186_v45  ;;  %v4631_v58 = vpop.f32.mrf.mxu0 }
 0x483   : > { %v4824_v10 = vpop.f32.mrf.mxu1  ;;  %v4823_v18 = vadd.f32 %v4822_v41, %v4630_v55  ;;  %v4632_v3 = vadd.f32 %v4631_v58, %v18113_v12 }
 0x484   : > { %v12184_v31 = vpop.eup %12183  ;;  %v4635_v2 = vpop.f32.mrf.mxu0  ;;  %5100 = vmatmul.mubr.bf16.gmra.mxu0 %v18114_v25  ;;  %5293 = vmatmul.mubr.bf16.gmra.mxu1 %v18115_v7  ;;  %v18120_v25 = vld [vmem:[#allocation48_spill] sm:$0xff] }
 0x485   : > { %v4828_v47 = vpop.f32.mrf.mxu1  ;;  %v12186_v24 = vpop.eup %12185  ;;  %v6209_v16 = vadd.f32 %v14895_v27, %v4823_v18  ;;  %v4825_v17 = vadd.f32 %v4824_v10, %v4632_v3  ;;  %v4636_v45 = vadd.f32 %v4635_v2, %v18116_v29  ;;  %5109 = vmatprep.mubr.bf16.mxu0 %v18117_v39  ;;  %5302 = vmatprep.mubr.bf16.mxu1 %v18118_v4  ;;  %v18122_v39 = vld [vmem:[#allocation50_spill] sm:$0xff] }
 0x486   : > { %v12188_v12 = vpop.eup %12187  ;;  %v4637_v58 = vpop.f32.mrf.mxu0  ;;  %v14969_v14 = vpack.c.bf16 %v12184_v31, %v12186_v24  ;;  %v6202_v10 = vadd.f32 %v14905_v1, %v4821_v56 }
 0x487   : > { %v4830_v59 = vpop.f32.mrf.mxu1  ;;  %v12190_v41 = vpop.eup %12189  ;;  %12199 = vtanh.f32 %v6209_v16  ;;  %v6210_v36 = vadd.f32 %v14905_v1, %v4825_v17  ;;  %v4829_v55 = vadd.f32 %v4828_v47, %v4636_v45  ;;  %v4638_v7 = vadd.f32 %v4637_v58, %v18120_v25  ;;  %v18123_v17 = vld [vmem:[#allocation52_spill] sm:$0xff]  ;;  %v18124_v25 = vld [vmem:[#allocation198_spill] sm:$0xff] }
 0x488   : > { %18119 = vst [vmem:[#allocation18_spill] sm:$0xff] %v14969_v14  ;;  %12201 = vtanh.f32 %v6201_v37  ;;  %v4639_v18 = vpop.f32.mrf.mxu0  ;;  %v14974_v2 = vpack.c.bf16 %v12188_v12, %v12190_v41  ;;  %v18125_v12 = vld [vmem:[#allocation199_spill] sm:$0xff] }
 0x489   : > { %v4832_v3 = vpop.f32.mrf.mxu1  ;;  %v4831_v29 = vadd.f32 %v4830_v59, %v4638_v7  ;;  %v4640_v4 = vadd.f32 %v4639_v18, %v18122_v39  ;;  %12203 = vtanh.f32 %v6210_v36  ;;  %v6217_v37 = vadd.f32 %v14895_v27, %v4829_v55  ;;  %v18126_v7 = vld [vmem:[#allocation54_spill] sm:$0xff] }
 0x48a   : > { %18121 = vst [vmem:[#allocation20_spill] sm:$0xff] %v14974_v2  ;;  %v4641_v31 = vpop.f32.mrf.mxu0  ;;  %12205 = vtanh.f32 %v6202_v10  ;;  %v12935_v39 = vld [vmem:[%s13403_s15 + $0x1e4] ss:$16 sps:$4 sm:$0xff]  }
 0x48b   : > { %v4834_v24 = vpop.f32.mrf.mxu1  ;;  %v4833_v16 = vadd.f32 %v4832_v3, %v4640_v4  ;;  %v4642_v47 = vadd.f32 %v4641_v31, %v18123_v17  ;;  %v12936_v3 = vld [vmem:[%s13403_s15 + $0x1ec] ss:$16 sps:$4 sm:$0xff]   ;;  %v6218_v10 = vadd.f32 %v14905_v1, %v4831_v29 }
 0x48c   : > { %v12192_v45 = vpop.eup %12191  ;;  %v4645_v56 = vpop.f32.mrf.mxu0  ;;  %5110 = vmatmul.mubr.bf16.gmra.mxu0 %v18124_v25  ;;  %5303 = vmatmul.mubr.bf16.gmra.mxu1 %v18125_v12 }
 0x48d   : > { %v4838_v58 = vpop.f32.mrf.mxu1  ;;  %v12194_v59 = vpop.eup %12193  ;;  %v6225_v41 = vadd.f32 %v14895_v27, %v4833_v16  ;;  %v4835_v36 = vadd.f32 %v4834_v24, %v4642_v47  ;;  %v4646_v18 = vadd.f32 %v4645_v56, %v18126_v7  ;;  %5119 = vmatprep.mubr.bf16.mxu0 %v12935_v39  ;;  %5312 = vmatprep.mubr.bf16.mxu1 %v12936_v3  ;;  %v18128_v16 = vld [vmem:[#allocation56_spill] sm:$0xff]  ;;  %v18130_v39 = vld [vmem:[#allocation58_spill] sm:$0xff] }
 0x48e   : > { %v12196_v4 = vpop.eup %12195  ;;  %v4647_v55 = vpop.f32.mrf.mxu0  ;;  %v14986_v17 = vpack.c.bf16 %v12192_v45, %v12194_v59 }
 0x48f   : > { %v4840_v31 = vpop.f32.mrf.mxu1  ;;  %v12198_v25 = vpop.eup %12197  ;;  %12207 = vtanh.f32 %v6225_v41  ;;  %v6226_v12 = vadd.f32 %v14905_v1, %v4835_v36  ;;  %v4839_v49 = vadd.f32 %v4838_v58, %v4646_v18  ;;  %v4648_v24 = vadd.f32 %v4647_v55, %v18128_v16  ;;  %v18131_v36 = vld [vmem:[#allocation60_spill] sm:$0xff] }
 0x490   : > { %18127 = vst [vmem:[#allocation150_spill] sm:$0xff] %v14986_v17  ;;  %12209 = vtanh.f32 %v6217_v37  ;;  %v4649_v47 = vpop.f32.mrf.mxu0  ;;  %v14990_v7 = vpack.c.bf16 %v12196_v4, %v12198_v25  ;;  %v12938_v4 = vld [vmem:[%s13403_s15 + $0x1e8] ss:$16 sps:$4 sm:$0xff]  }
 0x491   : > { %v4842_v56 = vpop.f32.mrf.mxu1  ;;  %12211 = vtanh.f32 %v6226_v12  ;;  %v4841_v29 = vadd.f32 %v4840_v31, %v4648_v24  ;;  %v4650_v3 = vadd.f32 %v4649_v47, %v18130_v39  ;;  %v6233_v37 = vadd.f32 %v14895_v27, %v4839_v49  ;;  %v18132_v12 = vld [vmem:[#allocation62_spill] sm:$0xff] }
 0x492   : > { %18129 = vst [vmem:[#allocation151_spill] sm:$0xff] %v14990_v7  ;;  %12213 = vtanh.f32 %v6218_v10  ;;  %v4651_v45 = vpop.f32.mrf.mxu0  ;;  %v12939_v47 = vld [vmem:[%s13403_s15 + $0x4] ss:$16 sps:$4 sm:$0xff]  }
 0x493   : > { %v4844_v59 = vpop.f32.mrf.mxu1  ;;  %v4843_v41 = vadd.f32 %v4842_v56, %v4650_v3  ;;  %v4652_v58 = vadd.f32 %v4651_v45, %v18131_v36  ;;  %v12940_v56 = vld [vmem:[%s13403_s15 + $0xc] ss:$16 sps:$4 sm:$0xff]   ;;  %v6234_v39 = vadd.f32 %v14905_v1, %v4841_v29 }
 0x494   : > { %v12200_v18 = vpop.eup %12199  ;;  %v4655_v55 = vpop.f32.mrf.mxu0  ;;  %5120 = vmatmul.mubr.bf16.gmra.mxu0 %v12937_v35  ;;  %5313 = vmatmul.mubr.bf16.gmra.mxu1 %v12938_v4  ;;  %v15012_v29 = vld [vmem:[#allocation5 + $0x5b8] sm:$0xff] }
 0x495   : > { %v4848_v16 = vpop.f32.mrf.mxu1  ;;  %v12202_v31 = vpop.eup %12201  ;;  %v6241_v25 = vadd.f32 %v14895_v27, %v4843_v41  ;;  %v4845_v10 = vadd.f32 %v4844_v59, %v4652_v58  ;;  %v4656_v24 = vadd.f32 %v4655_v55, %v18132_v12  ;;  %5355 = vmatprep.mubr.bf16.mxu0 %v12939_v47  ;;  %5548 = vmatprep.mubr.bf16.mxu1 %v12940_v56  ;;  %v15006_v59 = vld [vmem:[#allocation5 + $0x198] sm:$0xff] }
 0x496   : > { %v4657_v3 = vpop.f32.mrf.mxu0  ;;  %v15002_v45 = vpack.c.bf16 %v12200_v18, %v12202_v31  ;;  %v12204_v36 = vpop.eup %12203  ;;  %v15008_v58 = vld [vmem:[#allocation5 + $0x1b8] sm:$0xff] }
 0x497   : > { %v4850_v49 = vpop.f32.mrf.mxu1  ;;  %12215 = vtanh.f32 %v6241_v25  ;;  %v6242_v35 = vadd.f32 %v14905_v1, %v4845_v10  ;;  %v4849_v4 = vadd.f32 %v4848_v16, %v4656_v24  ;;  %v4658_v41 = vadd.f32 %v4657_v3, %v18134_v48  ;;  %v15010_v47 = vld [vmem:[#allocation5 + $0x598] sm:$0xff]  ;;  %v12206_v18 = vpop.eup %12205  ;;  %v18135_v25 = vld [vmem:[#allocation66_spill] sm:$0xff] }
 0x498   : > { %18133 = vst [vmem:[#allocation22_spill] sm:$0xff] %v15002_v45  ;;  %12217 = vtanh.f32 %v6233_v37  ;;  %v4659_v55 = vpop.f32.mrf.mxu0  ;;  %v15015_v10 = vld [vmem:[#allocation5 + $0x158] sm:$0xff]  ;;  %v10787_v24 = vcombine.low %v15006_v59, %v15008_v58  ;;  %v15021_v3 = vpack.c.bf16 %v12204_v36, %v12206_v18  ;;  %v12941_v36 = vld [vmem:[%s13403_s15] ss:$16 sps:$4 sm:$0xff]  }
 0x499   : > { %v4852_v12 = vpop.f32.mrf.mxu1  ;;  %12219 = vtanh.f32 %v6242_v35  ;;  %v4851_v31 = vadd.f32 %v4850_v49, %v4658_v41  ;;  %v4660_v56 = vadd.f32 %v4659_v55, %v18135_v25  ;;  %v15017_v16 = vld [vmem:[#allocation5 + $0x178] sm:$0xff]  ;;  %v10788_v49 = vcombine.high %v15006_v59, %v15008_v58 }
 0x49a   : > { %12221 = vtanh.f32 %v6234_v39  ;;  %v4661_v48 = vpop.f32.mrf.mxu0  ;;  %18136 = vst [vmem:[#allocation152_spill] sm:$0xff] %v15021_v3  ;;  %v10916_v41 = vcombine.high %v15010_v47, %v15012_v29  ;;  %v15028_v55 = vld [vmem:[#allocation5 + $0x558] sm:$0xff]  ;;  %v6249_v57 = vadd.f32 %v14895_v27, %v4849_v4  ;;  %v10780_v59 = vcombine.high %v15015_v10, %v15017_v16 }
 0x49b   : > { %v4854_v37 = vpop.f32.mrf.mxu1  ;;  %v4853_v0 = vadd.f32 %v4852_v12, %v4660_v56  ;;  %v4662_v35 = vadd.f32 %v4661_v48, %v18137_v15  ;;  %v15030_v39 = vld [vmem:[#allocation5 + $0x578] sm:$0xff]  ;;  %v10915_v15 = vcombine.low %v15010_v47, %v15012_v29  ;;  %v18138_v48 = vld [vmem:[#allocation70_spill] sm:$0xff]  ;;  %v6250_v47 = vadd.f32 %v14905_v1, %v4851_v31 }
 0x49c   : > { %v12208_v25 = vpop.eup %12207  ;;  %v4665_v38 = vpop.f32.mrf.mxu0  ;;  %5356 = vmatmul.mubr.bf16.vlgmr.msra.gmra.mxu0 %v12941_v36  ;;  %v12942_v12 = vld [vmem:[%s13403_s15 + $0x8] ss:$16 sps:$4 sm:$0xff]   ;;  %v18140_v36 = vcombine.low %v14731_v5, %v14733_v60  ;;  %v18142_v60 = vld [vmem:[#allocation72_spill] sm:$0xff] }
 0x49d   : > { %v4858_v26 = vpop.f32.mrf.mxu1  ;;  %5549 = vmatmul.mubr.bf16.vlgmr.msra.gmra.mxu1 %v12942_v12  ;;  %v12210_v58 = vpop.eup %12209  ;;  %v6257_v18 = vadd.f32 %v14895_v27, %v4853_v0  ;;  %v4855_v56 = vadd.f32 %v4854_v37, %v4662_v35  ;;  %v4666_v4 = vadd.f32 %v4665_v38, %v18138_v48  ;;  %5710 = vmatpush1.bf16.msra.mxu0 %v18139_v54  ;;  %v15056_v31 = vld [vmem:[#allocation5 + $0x118] sm:$0xff] }
 0x49e   : > { %5903 = vmatpush1.bf16.msra.mxu1 %v18140_v36  ;;  %v12212_v12 = vpop.eup %12211  ;;  %v4667_v29 = vpop.f32.mrf.mxu0  ;;  %5365 = vmatprep.mubr.bf16.mxu0 %v12943_v23  ;;  %v10908_v38 = vcombine.high %v15028_v55, %v15030_v39  ;;  %v15052_v0 = vpack.c.bf16 %v12208_v25, %v12210_v58  ;;  %v15058_v37 = vld [vmem:[#allocation5 + $0x138] sm:$0xff]  ;;  %v18145_v36 = vld [vmem:[#allocation76_spill] sm:$0xff] }
 0x49f   : > { %v4860_v30 = vpop.f32.mrf.mxu1  ;;  %5558 = vmatprep.mubr.bf16.mxu1 %v12944_v21  ;;  %v12214_v51 = vpop.eup %12213  ;;  %12223 = vtanh.f32 %v6257_v18  ;;  %v6258_v32 = vadd.f32 %v14905_v1, %v4855_v56  ;;  %v4859_v5 = vadd.f32 %v4858_v26, %v4666_v4  ;;  %v4668_v54 = vadd.f32 %v4667_v29, %v18142_v60  ;;  %5711 = vmatprep.subr.bf16.mxu0 %v10788_v49  ;;  %v15060_v35 = vld [vmem:[#allocation5 + $0x518] sm:$0xff]  ;;  %v18144_v26 = vld [vmem:[#allocation74_spill] sm:$0xff] }
 0x4a0   : > { %18141 = vst [vmem:[#allocation153_spill] sm:$0xff] %v15052_v0  ;;  %5904 = vmatprep.subr.bf16.mxu1 %v10916_v41  ;;  %12225 = vtanh.f32 %v6249_v57  ;;  %v4669_v23 = vpop.f32.mrf.mxu0  ;;  %v15062_v25 = vld [vmem:[#allocation5 + $0x538] sm:$0xff]  ;;  %v15064_v58 = vpack.c.bf16 %v12212_v12, %v12214_v51  ;;  %v10779_v4 = vcombine.low %v15015_v10, %v15017_v16 }
 0x4a1   : > { %v4862_v21 = vpop.f32.mrf.mxu1  ;;  %12227 = vtanh.f32 %v6258_v32  ;;  %v4861_v18 = vadd.f32 %v4860_v30, %v4668_v54  ;;  %v4670_v56 = vadd.f32 %v4669_v23, %v18144_v26  ;;  %5712 = vmatpush1.bf16.msra.mxu0 %v10787_v24  ;;  %v15067_v49 = vld [vmem:[#allocation5 + $0xd8] sm:$0xff]  ;;  %v10907_v30 = vcombine.low %v15028_v55, %v15030_v39 }
 0x4a2   : > { %18143 = vst [vmem:[#allocation24_spill] sm:$0xff] %v15064_v58  ;;  %5905 = vmatpush1.bf16.msra.mxu1 %v10915_v15  ;;  %v15069_v41 = vld [vmem:[#allocation5 + $0xf8] sm:$0xff]  ;;  %12229 = vtanh.f32 %v6250_v47  ;;  %v4671_v57 = vpop.f32.mrf.mxu0  ;;  %5713 = vmatprep.subr.bf16.mxu0 %v10780_v59  ;;  %v10771_v24 = vcombine.low %v15056_v31, %v15058_v37  ;;  %v10772_v47 = vcombine.high %v15056_v31, %v15058_v37 }
 0x4a3   : > { %v4864_v48 = vpop.f32.mrf.mxu1  ;;  %5906 = vmatprep.subr.bf16.mxu1 %v10908_v38  ;;  %v4863_v15 = vadd.f32 %v4862_v21, %v4670_v56  ;;  %v4672_v12 = vadd.f32 %v4671_v57, %v18145_v36  ;;  %v10900_v29 = vcombine.high %v15060_v35, %v15062_v25  ;;  %v15082_v51 = vld [vmem:[#allocation5 + $0x4d8] sm:$0xff]  ;;  %v6265_v55 = vadd.f32 %v14895_v27, %v4859_v5  ;;  %v12945_v38 = vld [vmem:[%s13403_s15 + $0x20] ss:$16 sps:$4 sm:$0xff]   ;;  %v12947_v56 = vld [vmem:[%s13403_s15 + $0x44] ss:$16 sps:$4 sm:$0xff]  }
 0x4a4   : > { %v15084_v10 = vld [vmem:[#allocation5 + $0x4f8] sm:$0xff]  ;;  %v12216_v16 = vpop.eup %12215  ;;  %v4675_v39 = vpop.f32.mrf.mxu0  ;;  %5366 = vmatmul.mubr.bf16.gmra.mxu0 %v12945_v38  ;;  %v10899_v60 = vcombine.low %v15060_v35, %v15062_v25  ;;  %v10764_v54 = vcombine.high %v15067_v49, %v15069_v41  ;;  %v18146_v21 = vld [vmem:[#allocation78_spill] sm:$0xff]  ;;  %v6266_v36 = vadd.f32 %v14905_v1, %v4861_v18 }
 0x4a5   : > { %v4868_v59 = vpop.f32.mrf.mxu1  ;;  %v12946_v32 = vld [vmem:[%s13403_s15 + $0x28] ss:$16 sps:$4 sm:$0xff]   ;;  %v12218_v31 = vpop.eup %12217  ;;  %v6273_v37 = vadd.f32 %v14895_v27, %v4863_v15  ;;  %v4865_v23 = vadd.f32 %v4864_v48, %v4672_v12  ;;  %v4676_v26 = vadd.f32 %v4675_v39, %v18146_v21  ;;  %5375 = vmatprep.mubr.bf16.mxu0 %v12947_v56  ;;  %v12948_v5 = vld [vmem:[%s13403_s15 + $0x4c] ss:$16 sps:$4 sm:$0xff]   ;;  %5714 = vmatpush1.bf16.msra.mxu0 %v10779_v4  ;;  %v18148_v39 = vld [vmem:[#allocation80_spill] sm:$0xff] }
 0x4a6   : > { %5559 = vmatmul.mubr.bf16.gmra.mxu1 %v12946_v32  ;;  %v12220_v57 = vpop.eup %12219  ;;  %v4677_v38 = vpop.f32.mrf.mxu0  ;;  %v10892_v35 = vcombine.high %v15082_v51, %v15084_v10  ;;  %v15100_v25 = vpack.c.bf16 %v12216_v16, %v12218_v31  ;;  %5715 = vmatprep.subr.bf16.mxu0 %v10772_v47  ;;  %v15104_v56 = vld [vmem:[#allocation5 + $0x98] sm:$0xff]  ;;  %v10763_v47 = vcombine.low %v15067_v49, %v15069_v41 }
 0x4a7   : > { %5568 = vmatprep.mubr.bf16.mxu1 %v12948_v5  ;;  %v4870_v32 = vpop.f32.mrf.mxu1  ;;  %5907 = vmatpush1.bf16.msra.mxu1 %v10907_v30  ;;  %v12222_v15 = vpop.eup %12221  ;;  %12231 = vtanh.f32 %v6273_v37  ;;  %v6274_v48 = vadd.f32 %v14905_v1, %v4865_v23  ;;  %v4869_v12 = vadd.f32 %v4868_v59, %v4676_v26  ;;  %v4678_v21 = vadd.f32 %v4677_v38, %v18148_v39  ;;  %v15106_v18 = vld [vmem:[#allocation5 + $0xb8] sm:$0xff]  ;;  %v18150_v59 = vld [vmem:[#allocation82_spill] sm:$0xff] }
 0x4a8   : > { %18147 = vst [vmem:[#allocation26_spill] sm:$0xff] %v15100_v25  ;;  %5908 = vmatprep.subr.bf16.mxu1 %v10900_v29  ;;  %12233 = vtanh.f32 %v6265_v55  ;;  %v4679_v4 = vpop.f32.mrf.mxu0  ;;  %v15108_v5 = vld [vmem:[#allocation5 + $0x498] sm:$0xff]  ;;  %v15112_v31 = vpack.c.bf16 %v12220_v57, %v12222_v15  ;;  %v10891_v57 = vcombine.low %v15082_v51, %v15084_v10  ;;  %v10756_v49 = vcombine.high %v15104_v56, %v15106_v18  ;;  %v18151_v15 = vld [vmem:[#allocation84_spill] sm:$0xff] }
 0x4a9   : > { %v4872_v30 = vpop.f32.mrf.mxu1  ;;  %v15110_v16 = vld [vmem:[#allocation5 + $0x4b8] sm:$0xff]  ;;  %12235 = vtanh.f32 %v6274_v48  ;;  %v4871_v37 = vadd.f32 %v4870_v32, %v4678_v21  ;;  %v4680_v23 = vadd.f32 %v4679_v4, %v18150_v59  ;;  %5716 = vmatpush1.bf16.msra.mxu0 %v10771_v24  ;;  %v10755_v32 = vcombine.low %v15104_v56, %v15106_v18  ;;  %v12949_v56 = vld [vmem:[%s13403_s15 + $0x40] ss:$16 sps:$4 sm:$0xff]  }
 0x4aa   : > { %18149 = vst [vmem:[#allocation28_spill] sm:$0xff] %v15112_v31  ;;  %v15117_v29 = vld [vmem:[#allocation5 + $0x58] sm:$0xff]  ;;  %12237 = vtanh.f32 %v6266_v36  ;;  %v4681_v55 = vpop.f32.mrf.mxu0  ;;  %5717 = vmatprep.subr.bf16.mxu0 %v10764_v54  ;;  %v10884_v24 = vcombine.high %v15108_v5, %v15110_v16  ;;  %v6281_v10 = vadd.f32 %v14895_v27, %v4869_v12  ;;  %v10883_v54 = vcombine.low %v15108_v5, %v15110_v16  ;;  %v13006_v31 = vld [vmem:[%s13403_s15] ss:$16 sps:$4 sm:$0xff]  }
 0x4ab   : > { %v15119_v26 = vld [vmem:[#allocation5 + $0x78] sm:$0xff]  ;;  %v4874_v38 = vpop.f32.mrf.mxu1  ;;  %5909 = vmatpush1.bf16.msra.mxu1 %v10899_v60  ;;  %v4873_v41 = vadd.f32 %v4872_v30, %v4680_v23  ;;  %v4682_v48 = vadd.f32 %v4681_v55, %v18151_v15  ;;  %v18152_v23 = vld [vmem:[#allocation86_spill] sm:$0xff] }
 0x4ac   : > { %5910 = vmatprep.subr.bf16.mxu1 %v10892_v35  ;;  %v15130_v36 = vld [vmem:[#allocation5 + $0x458] sm:$0xff]  ;;  %v12224_v51 = vpop.eup %12223  ;;  %v4685_v39 = vpop.f32.mrf.mxu0  ;;  %5376 = vmatmul.mubr.bf16.gmra.mxu0 %v12949_v56  ;;  %v10748_v35 = vcombine.high %v15117_v29, %v15119_v26  ;;  %v12951_v15 = vld [vmem:[%s13403_s15 + $0x64] ss:$16 sps:$4 sm:$0xff]   ;;  %v6282_v56 = vadd.f32 %v14905_v1, %v4871_v37 }
 0x4ad   : > { %v15132_v60 = vld [vmem:[#allocation5 + $0x478] sm:$0xff]  ;;  %v4878_v21 = vpop.f32.mrf.mxu1  ;;  %v12226_v4 = vpop.eup %12225  ;;  %v6289_v30 = vadd.f32 %v14895_v27, %v4873_v41  ;;  %v4875_v59 = vadd.f32 %v4874_v38, %v4682_v48  ;;  %v4686_v55 = vadd.f32 %v4685_v39, %v18152_v23  ;;  %5385 = vmatprep.mubr.bf16.mxu0 %v12951_v15  ;;  %5718 = vmatpush1.bf16.msra.mxu0 %v10763_v47  ;;  %v18154_v39 = vld [vmem:[#allocation88_spill] sm:$0xff] }
 0x4ae   : > { %v12950_v18 = vld [vmem:[%s13403_s15 + $0x48] ss:$16 sps:$4 sm:$0xff]   ;;  %v12952_v12 = vld [vmem:[%s13403_s15 + $0x6c] ss:$16 sps:$4 sm:$0xff]   ;;  %v12228_v25 = vpop.eup %12227  ;;  %v10876_v5 = vcombine.high %v15130_v36, %v15132_v60  ;;  %v15148_v16 = vpack.c.bf16 %v12224_v51, %v12226_v4  ;;  %5719 = vmatprep.subr.bf16.mxu0 %v10756_v49  ;;  %v10747_v49 = vcombine.low %v15117_v29, %v15119_v26 }
 0x4af   : > { %5569 = vmatmul.mubr.bf16.gmra.mxu1 %v12950_v18  ;;  %v4687_v18 = vpop.f32.mrf.mxu0  ;;  %v4880_v63 = vpop.f32.mrf.mxu1  ;;  %12239 = vtanh.f32 %v6289_v30  ;;  %v6290_v38 = vadd.f32 %v14905_v1, %v4875_v59  ;;  %v4879_v48 = vadd.f32 %v4878_v21, %v4686_v55  ;;  %v15152_v15 = vld [vmem:[#allocation5 + $0x18] sm:$0xff]  ;;  %v18156_v21 = vld [vmem:[#allocation90_spill] sm:$0xff] }
 0x4b0   : > { %5578 = vmatprep.mubr.bf16.mxu1 %v12952_v12  ;;  %5911 = vmatpush1.bf16.msra.mxu1 %v10891_v57  ;;  %18153 = vst [vmem:[#allocation162_spill] sm:$0xff] %v15148_v16  ;;  %v12230_v41 = vpop.eup %12229  ;;  %v4688_v23 = vadd.f32 %v4687_v18, %v18154_v39  ;;  %v15154_v37 = vld [vmem:[#allocation5 + $0x38] sm:$0xff]  ;;  %12241 = vtanh.f32 %v6281_v10 }
 0x4b1   : > { %5912 = vmatprep.subr.bf16.mxu1 %v10884_v24  ;;  %v4689_v47 = vpop.f32.mrf.mxu0  ;;  %v4882_v57 = vpop.f32.mrf.mxu1  ;;  %v15156_v12 = vld [vmem:[#allocation5 + $0x418] sm:$0xff]  ;;  %v15160_v4 = vpack.c.bf16 %v12228_v25, %v12230_v41  ;;  %12243 = vtanh.f32 %v6290_v38  ;;  %5720 = vmatpush1.bf16.msra.mxu0 %v10755_v32  ;;  %v10875_v25 = vcombine.low %v15130_v36, %v15132_v60  ;;  %v10740_v29 = vcombine.high %v15152_v15, %v15154_v37  ;;  %v18157_v41 = vld [vmem:[#allocation92_spill] sm:$0xff] }
 0x4b2   : > { %v15158_v51 = vld [vmem:[#allocation5 + $0x438] sm:$0xff]  ;;  %v4881_v30 = vadd.f32 %v4880_v63, %v4688_v23  ;;  %v4690_v59 = vadd.f32 %v4689_v47, %v18156_v21  ;;  %12245 = vtanh.f32 %v6282_v56  ;;  %v10739_v63 = vcombine.low %v15152_v15, %v15154_v37  ;;  %5721 = vmatprep.subr.bf16.mxu0 %v10748_v35  ;;  %v12953_v15 = vld [vmem:[%s13403_s15 + $0x60] ss:$16 sps:$4 sm:$0xff]  }
 0x4b3   : > { %18155 = vst [vmem:[#allocation163_spill] sm:$0xff] %v15160_v4  ;;  %v15165_v24 = vld [vmem:[#allocation5 + $0x3d8] sm:$0xff]  ;;  %v4691_v10 = vpop.f32.mrf.mxu0  ;;  %v4884_v18 = vpop.f32.mrf.mxu1  ;;  %v10868_v32 = vcombine.high %v15156_v12, %v15158_v51  ;;  %v6297_v60 = vadd.f32 %v14895_v27, %v4879_v48  ;;  %v10867_v35 = vcombine.low %v15156_v12, %v15158_v51 }
 0x4b4   : > { %v15167_v55 = vld [vmem:[#allocation5 + $0x3f8] sm:$0xff]  ;;  %5913 = vmatpush1.bf16.msra.mxu1 %v10883_v54  ;;  %v4883_v26 = vadd.f32 %v4882_v57, %v4690_v59  ;;  %v4692_v38 = vadd.f32 %v4691_v10, %v18157_v41  ;;  %v12232_v36 = vpop.eup %12231  ;;  %5386 = vmatmul.mubr.bf16.gmra.mxu0 %v12953_v15  ;;  %v18158_v59 = vld [vmem:[#allocation94_spill] sm:$0xff]  ;;  %v6298_v15 = vadd.f32 %v14905_v1, %v4881_v30 }
 0x4b5   : > { %5914 = vmatprep.subr.bf16.mxu1 %v10876_v5  ;;  %v15178_v56 = vld [vmem:[#allocation5 + $0x7d8] sm:$0xff]  ;;  %v4695_v39 = vpop.f32.mrf.mxu0  ;;  %v4888_v23 = vpop.f32.mrf.mxu1  ;;  %v10860_v5 = vcombine.high %v15165_v24, %v15167_v55  ;;  %v12955_v41 = vld [vmem:[%s13403_s15 + $0x84] ss:$16 sps:$4 sm:$0xff]   ;;  %5722 = vmatpush1.bf16.msra.mxu0 %v10747_v49 }
 0x4b6   : > { %v15180_v54 = vld [vmem:[#allocation5 + $0x7f8] sm:$0xff]  ;;  %v12234_v47 = vpop.eup %12233  ;;  %v6305_v57 = vadd.f32 %v14895_v27, %v4883_v26  ;;  %v4885_v21 = vadd.f32 %v4884_v18, %v4692_v38  ;;  %v4696_v10 = vadd.f32 %v4695_v39, %v18158_v59  ;;  %5395 = vmatprep.mubr.bf16.mxu0 %v12955_v41  ;;  %v18160_v39 = vld [vmem:[#allocation96_spill] sm:$0xff]  ;;  %5723 = vmatprep.subr.bf16.mxu0 %v10740_v29 }
 0x4b7   : > { %v12954_v37 = vld [vmem:[%s13403_s15 + $0x68] ss:$16 sps:$4 sm:$0xff]   ;;  %v12956_v48 = vld [vmem:[%s13403_s15 + $0x8c] ss:$16 sps:$4 sm:$0xff]   ;;  %v12236_v16 = vpop.eup %12235  ;;  %v4890_v4 = vpop.f32.mrf.mxu1  ;;  %v10988_v12 = vcombine.high %v15178_v56, %v15180_v54  ;;  %v15196_v51 = vpack.c.bf16 %v12232_v36, %v12234_v47  ;;  %v10859_v29 = vcombine.low %v15165_v24, %v15167_v55 }
 0x4b8   : > { %5579 = vmatmul.mubr.bf16.gmra.mxu1 %v12954_v37  ;;  %v4697_v37 = vpop.f32.mrf.mxu0  ;;  %v12238_v26 = vpop.eup %12237  ;;  %12247 = vtanh.f32 %v6305_v57  ;;  %v6306_v18 = vadd.f32 %v14905_v1, %v4885_v21  ;;  %v4889_v38 = vadd.f32 %v4888_v23, %v4696_v10  ;;  %v15200_v41 = vld [vmem:[#allocation5 + $0x398] sm:$0xff]  ;;  %v18162_v23 = vld [vmem:[#allocation98_spill] sm:$0xff] }
 0x4b9   : > { %5588 = vmatprep.mubr.bf16.mxu1 %v12956_v48  ;;  %5915 = vmatpush1.bf16.msra.mxu1 %v10875_v25  ;;  %18159 = vst [vmem:[#allocation164_spill] sm:$0xff] %v15196_v51  ;;  %v4698_v59 = vadd.f32 %v4697_v37, %v18160_v39  ;;  %v15202_v30 = vld [vmem:[#allocation5 + $0x3b8] sm:$0xff]  ;;  %12249 = vtanh.f32 %v6297_v60  ;;  %v4892_v25 = vpop.f32.mrf.mxu1  ;;  %v15208_v47 = vpack.c.bf16 %v12236_v16, %v12238_v26  ;;  %v18163_v26 = vld [vmem:[#allocation100_spill] sm:$0xff] }
 0x4ba   : > { %5916 = vmatprep.subr.bf16.mxu1 %v10868_v32  ;;  %v4699_v49 = vpop.f32.mrf.mxu0  ;;  %v15204_v48 = vld [vmem:[#allocation5 + $0x798] sm:$0xff]  ;;  %12251 = vtanh.f32 %v6306_v18  ;;  %5724 = vmatpush1.bf16.msra.mxu0 %v10739_v63  ;;  %v10987_v16 = vcombine.low %v15178_v56, %v15180_v54  ;;  %v10852_v24 = vcombine.high %v15200_v41, %v15202_v30  ;;  %v6313_v54 = vadd.f32 %v14895_v27, %v4889_v38 }
 0x4bb   : > { %v15206_v36 = vld [vmem:[#allocation5 + $0x7b8] sm:$0xff]  ;;  %18161 = vst [vmem:[#allocation165_spill] sm:$0xff] %v15208_v47  ;;  %v4891_v57 = vadd.f32 %v4890_v4, %v4698_v59  ;;  %v4700_v21 = vadd.f32 %v4699_v49, %v18162_v23  ;;  %12253 = vtanh.f32 %v6298_v15  ;;  %v4894_v37 = vpop.f32.mrf.mxu1  ;;  %v10851_v4 = vcombine.low %v15200_v41, %v15202_v30  ;;  %5725 = vmatprep.subr.bf16.mxu0 %v10860_v5  ;;  %v12957_v41 = vld [vmem:[%s13403_s15 + $0x80] ss:$16 sps:$4 sm:$0xff]  }
 0x4bc   : > { %v15213_v32 = vld [vmem:[#allocation5 + $0x358] sm:$0xff]  ;;  %v4701_v60 = vpop.f32.mrf.mxu0  ;;  %v10980_v63 = vcombine.high %v15204_v48, %v15206_v36  ;;  %v12240_v56 = vpop.eup %12239  ;;  %5396 = vmatmul.mubr.bf16.gmra.mxu0 %v12957_v41  ;;  %v10979_v5 = vcombine.low %v15204_v48, %v15206_v36 }
 0x4bd   : > { %v15215_v10 = vld [vmem:[#allocation5 + $0x378] sm:$0xff]  ;;  %5917 = vmatpush1.bf16.msra.mxu1 %v10867_v35  ;;  %v4893_v55 = vadd.f32 %v4892_v25, %v4700_v21  ;;  %v4702_v18 = vadd.f32 %v4701_v60, %v18163_v26  ;;  %v4898_v59 = vpop.f32.mrf.mxu1  ;;  %v12242_v49 = vpop.eup %12241  ;;  %v18164_v21 = vld [vmem:[#allocation102_spill] sm:$0xff]  ;;  %v6314_v41 = vadd.f32 %v14905_v1, %v4891_v57 }
 0x4be   : > { %5918 = vmatprep.subr.bf16.mxu1 %v10988_v12  ;;  %v15226_v15 = vld [vmem:[#allocation5 + $0x758] sm:$0xff]  ;;  %v4705_v39 = vpop.f32.mrf.mxu0  ;;  %v10844_v12 = vcombine.high %v15213_v32, %v15215_v10  ;;  %v12959_v26 = vld [vmem:[%s13403_s15 + $0xa4] ss:$16 sps:$4 sm:$0xff]   ;;  %v12244_v51 = vpop.eup %12243  ;;  %5726 = vmatpush2.bf16.msra.mxu0 %v10859_v29  ;;  %v15244_v36 = vpack.c.bf16 %v12240_v56, %v12242_v49 }
 0x4bf   : > { %v15228_v35 = vld [vmem:[#allocation5 + $0x778] sm:$0xff]  ;;  %v6321_v25 = vadd.f32 %v14895_v27, %v4893_v55  ;;  %v4895_v23 = vadd.f32 %v4894_v37, %v4702_v18  ;;  %v4706_v60 = vadd.f32 %v4705_v39, %v18164_v21  ;;  %5405 = vmatprep.mubr.bf16.mxu0 %v12959_v26  ;;  %v4900_v47 = vpop.f32.mrf.mxu1  ;;  %v12246_v55 = vpop.eup %12245  ;;  %v18166_v39 = vld [vmem:[#allocation104_spill] sm:$0xff]  ;;  %5727 = vmatprep.subr.bf16.mxu0 %v10852_v24 }
 0x4c0   : > { %v12958_v30 = vld [vmem:[%s13403_s15 + $0x88] ss:$16 sps:$4 sm:$0xff]   ;;  %v12960_v38 = vld [vmem:[%s13403_s15 + $0xac] ss:$16 sps:$4 sm:$0xff]   ;;  %v10972_v48 = vcombine.high %v15226_v15, %v15228_v35  ;;  %18165 = vst [vmem:[#allocation30_spill] sm:$0xff] %v15244_v36  ;;  %v15256_v49 = vpack.c.bf16 %v12244_v51, %v12246_v55  ;;  %v10843_v24 = vcombine.low %v15213_v32, %v15215_v10  ;;  %v10971_v51 = vcombine.low %v15226_v15, %v15228_v35  ;;  %v18169_v55 = vld [vmem:[#allocation108_spill] sm:$0xff] }
 0x4c1   : > { %5589 = vmatmul.mubr.bf16.gmra.mxu1 %v12958_v30  ;;  %v4707_v30 = vpop.f32.mrf.mxu0  ;;  %12255 = vtanh.f32 %v6321_v25  ;;  %v6322_v37 = vadd.f32 %v14905_v1, %v4895_v23  ;;  %v4899_v18 = vadd.f32 %v4898_v59, %v4706_v60  ;;  %v15248_v26 = vld [vmem:[#allocation5 + $0x318] sm:$0xff]  ;;  %v18168_v59 = vld [vmem:[#allocation106_spill] sm:$0xff] }
 0x4c2   : > { %5598 = vmatprep.mubr.bf16.mxu1 %v12960_v38  ;;  %5919 = vmatpush2.bf16.msra.mxu1 %v10987_v16  ;;  %v4708_v21 = vadd.f32 %v4707_v30, %v18166_v39  ;;  %v15250_v57 = vld [vmem:[#allocation5 + $0x338] sm:$0xff]  ;;  %12257 = vtanh.f32 %v6313_v54  ;;  %v4902_v16 = vpop.f32.mrf.mxu1  ;;  %18167 = vst [vmem:[#allocation32_spill] sm:$0xff] %v15256_v49 }
 0x4c3   : > { %5920 = vmatprep.subr.bf16.mxu1 %v10980_v63  ;;  %v4709_v29 = vpop.f32.mrf.mxu0  ;;  %v15252_v38 = vld [vmem:[#allocation5 + $0x718] sm:$0xff]  ;;  %12259 = vtanh.f32 %v6322_v37  ;;  %5728 = vmatpush2.bf16.msra.mxu0 %v10851_v4  ;;  %v10836_v32 = vcombine.high %v15248_v26, %v15250_v57  ;;  %v6329_v35 = vadd.f32 %v14895_v27, %v4899_v18 }
 0x4c4   : > { %v15254_v56 = vld [vmem:[#allocation5 + $0x738] sm:$0xff]  ;;  %v4901_v25 = vadd.f32 %v4900_v47, %v4708_v21  ;;  %v4710_v23 = vadd.f32 %v4709_v29, %v18168_v59  ;;  %12261 = vtanh.f32 %v6314_v41  ;;  %v4904_v30 = vpop.f32.mrf.mxu1  ;;  %v10835_v47 = vcombine.low %v15248_v26, %v15250_v57  ;;  %5729 = vmatprep.subr.bf16.mxu0 %v10844_v12  ;;  %v12961_v26 = vld [vmem:[%s13403_s15 + $0xa0] ss:$16 sps:$4 sm:$0xff]  }
 0x4c5   : > { %v15261_v63 = vld [vmem:[#allocation5 + $0x2d8] sm:$0xff]  ;;  %v4711_v54 = vpop.f32.mrf.mxu0  ;;  %v10964_v4 = vcombine.high %v15252_v38, %v15254_v56  ;;  %v12248_v15 = vpop.eup %12247  ;;  %5406 = vmatmul.mubr.bf16.gmra.mxu0 %v12961_v26  ;;  %v10963_v12 = vcombine.low %v15252_v38, %v15254_v56 }
 0x4c6   : > { %v15263_v60 = vld [vmem:[#allocation5 + $0x2f8] sm:$0xff]  ;;  %5921 = vmatpush2.bf16.msra.mxu1 %v10979_v5  ;;  %v4903_v10 = vadd.f32 %v4902_v16, %v4710_v23  ;;  %v4712_v37 = vadd.f32 %v4711_v54, %v18169_v55  ;;  %v4908_v21 = vpop.f32.mrf.mxu1  ;;  %v12250_v29 = vpop.eup %12249  ;;  %v18170_v23 = vld [vmem:[#allocation110_spill] sm:$0xff]  ;;  %v6330_v26 = vadd.f32 %v14905_v1, %v4901_v25 }
 0x4c7   : > { %5922 = vmatprep.subr.bf16.mxu1 %v10972_v48  ;;  %v15274_v41 = vld [vmem:[#allocation5 + $0x6d8] sm:$0xff]  ;;  %v4715_v39 = vpop.f32.mrf.mxu0  ;;  %v10828_v48 = vcombine.high %v15261_v63, %v15263_v60  ;;  %v12963_v55 = vld [vmem:[%s13403_s15 + $0xc4] ss:$16 sps:$4 sm:$0xff]   ;;  %v12252_v36 = vpop.eup %12251  ;;  %5730 = vmatpush2.bf16.msra.mxu0 %v10843_v24  ;;  %v15292_v56 = vpack.c.bf16 %v12248_v15, %v12250_v29 }
 0x4c8   : > { %v15276_v5 = vld [vmem:[#allocation5 + $0x6f8] sm:$0xff]  ;;  %v6337_v16 = vadd.f32 %v14895_v27, %v4903_v10  ;;  %v4905_v59 = vadd.f32 %v4904_v30, %v4712_v37  ;;  %v4716_v54 = vadd.f32 %v4715_v39, %v18170_v23  ;;  %5415 = vmatprep.mubr.bf16.mxu0 %v12963_v55  ;;  %v4910_v49 = vpop.f32.mrf.mxu1  ;;  %v12254_v10 = vpop.eup %12253  ;;  %v18172_v39 = vld [vmem:[#allocation112_spill] sm:$0xff]  ;;  %5731 = vmatprep.subr.bf16.mxu0 %v10836_v32 }
 0x4c9   : > { %v12962_v57 = vld [vmem:[%s13403_s15 + $0xa8] ss:$16 sps:$4 sm:$0xff]   ;;  %v12964_v18 = vld [vmem:[%s13403_s15 + $0xcc] ss:$16 sps:$4 sm:$0xff]   ;;  %v10956_v38 = vcombine.high %v15274_v41, %v15276_v5  ;;  %18171 = vst [vmem:[#allocation34_spill] sm:$0xff] %v15292_v56  ;;  %v15304_v29 = vpack.c.bf16 %v12252_v36, %v12254_v10  ;;  %v10827_v32 = vcombine.low %v15261_v63, %v15263_v60  ;;  %v10955_v36 = vcombine.low %v15274_v41, %v15276_v5  ;;  %v18175_v10 = vld [vmem:[#allocation116_spill] sm:$0xff] }
 0x4ca   : > { %5599 = vmatmul.mubr.bf16.gmra.mxu1 %v12962_v57  ;;  %v4717_v57 = vpop.f32.mrf.mxu0  ;;  %12263 = vtanh.f32 %v6337_v16  ;;  %v6338_v30 = vadd.f32 %v14905_v1, %v4905_v59  ;;  %v4909_v37 = vadd.f32 %v4908_v21, %v4716_v54  ;;  %v15296_v55 = vld [vmem:[#allocation5 + $0x298] sm:$0xff]  ;;  %v18174_v21 = vld [vmem:[#allocation114_spill] sm:$0xff] }
 0x4cb   : > { %5608 = vmatprep.mubr.bf16.mxu1 %v12964_v18  ;;  %5923 = vmatpush2.bf16.msra.mxu1 %v10971_v51  ;;  %v4718_v23 = vadd.f32 %v4717_v57, %v18172_v39  ;;  %v15298_v25 = vld [vmem:[#allocation5 + $0x2b8] sm:$0xff]  ;;  %12265 = vtanh.f32 %v6329_v35  ;;  %v4912_v51 = vpop.f32.mrf.mxu1  ;;  %18173 = vst [vmem:[#allocation36_spill] sm:$0xff] %v15304_v29 }
 0x4cc   : > { %5924 = vmatprep.subr.bf16.mxu1 %v10964_v4  ;;  %v4719_v24 = vpop.f32.mrf.mxu0  ;;  %v15300_v18 = vld [vmem:[#allocation5 + $0x698] sm:$0xff]  ;;  %12267 = vtanh.f32 %v6338_v30  ;;  %5732 = vmatpush2.bf16.msra.mxu0 %v10835_v47  ;;  %v10820_v63 = vcombine.high %v15296_v55, %v15298_v25  ;;  %v6345_v5 = vadd.f32 %v14895_v27, %v4909_v37 }
 0x4cd   : > { %v15302_v15 = vld [vmem:[#allocation5 + $0x6b8] sm:$0xff]  ;;  %v4911_v16 = vadd.f32 %v4910_v49, %v4718_v23  ;;  %v4720_v59 = vadd.f32 %v4719_v24, %v18174_v21  ;;  %12269 = vtanh.f32 %v6330_v26  ;;  %v4914_v57 = vpop.f32.mrf.mxu1  ;;  %v10819_v49 = vcombine.low %v15296_v55, %v15298_v25  ;;  %5733 = vmatprep.subr.bf16.mxu0 %v10828_v48  ;;  %v12965_v55 = vld [vmem:[%s13403_s15 + $0xc0] ss:$16 sps:$4 sm:$0xff]  }
 0x4ce   : > { %v15309_v4 = vld [vmem:[#allocation5 + $0x258] sm:$0xff]  ;;  %v4721_v35 = vpop.f32.mrf.mxu0  ;;  %v10948_v47 = vcombine.high %v15300_v18, %v15302_v15  ;;  %v12256_v41 = vpop.eup %12255  ;;  %5416 = vmatmul.mubr.bf16.gmra.mxu0 %v12965_v55  ;;  %v10947_v48 = vcombine.low %v15300_v18, %v15302_v15 }
 0x4cf   : > { %v15311_v54 = vld [vmem:[#allocation5 + $0x278] sm:$0xff]  ;;  %5925 = vmatpush2.bf16.msra.mxu1 %v10963_v12  ;;  %v4913_v60 = vadd.f32 %v4912_v51, %v4720_v59  ;;  %v4722_v30 = vadd.f32 %v4721_v35, %v18175_v10  ;;  %v4918_v23 = vpop.f32.mrf.mxu1  ;;  %v12258_v24 = vpop.eup %12257  ;;  %v18176_v59 = vld [vmem:[#allocation118_spill] sm:$0xff]  ;;  %v6346_v55 = vadd.f32 %v14905_v1, %v4911_v16 }
 0x4d0   : > { %5926 = vmatprep.subr.bf16.mxu1 %v10956_v38  ;;  %v15322_v26 = vld [vmem:[#allocation5 + $0x658] sm:$0xff]  ;;  %v4725_v39 = vpop.f32.mrf.mxu0  ;;  %v10812_v38 = vcombine.high %v15309_v4, %v15311_v54  ;;  %v12967_v10 = vld [vmem:[%s13403_s15 + $0xe4] ss:$16 sps:$4 sm:$0xff]   ;;  %v12260_v56 = vpop.eup %12259  ;;  %5734 = vmatpush2.bf16.msra.mxu0 %v10827_v32  ;;  %v15340_v15 = vpack.c.bf16 %v12256_v41, %v12258_v24 }
 0x4d1   : > { %v15324_v12 = vld [vmem:[#allocation5 + $0x678] sm:$0xff]  ;;  %v6353_v51 = vadd.f32 %v14895_v27, %v4913_v60  ;;  %v4915_v21 = vadd.f32 %v4914_v57, %v4722_v30  ;;  %v4726_v35 = vadd.f32 %v4725_v39, %v18176_v59  ;;  %5425 = vmatprep.mubr.bf16.mxu0 %v12967_v10  ;;  %v4920_v29 = vpop.f32.mrf.mxu1  ;;  %v12262_v60 = vpop.eup %12261  ;;  %v18178_v39 = vld [vmem:[#allocation120_spill] sm:$0xff]  ;;  %5735 = vmatprep.subr.bf16.mxu0 %v10820_v63 }
 0x4d2   : > { %v12966_v25 = vld [vmem:[%s13403_s15 + $0xc8] ss:$16 sps:$4 sm:$0xff]   ;;  %v12968_v37 = vld [vmem:[%s13403_s15 + $0xec] ss:$16 sps:$4 sm:$0xff]   ;;  %v10940_v18 = vcombine.high %v15322_v26, %v15324_v12  ;;  %18177 = vst [vmem:[#allocation174_spill] sm:$0xff] %v15340_v15  ;;  %v15352_v24 = vpack.c.bf16 %v12260_v56, %v12262_v60 }
 0x4d3   : > { %5609 = vmatmul.mubr.bf16.gmra.mxu1 %v12966_v25  ;;  %v4727_v25 = vpop.f32.mrf.mxu0  ;;  %12271 = vtanh.f32 %v6353_v51  ;;  %v6354_v57 = vadd.f32 %v14905_v1, %v4915_v21  ;;  %v4919_v30 = vadd.f32 %v4918_v23, %v4726_v35  ;;  %v15344_v10 = vld [vmem:[#allocation5 + $0x218] sm:$0xff]  ;;  %v18180_v23 = vld [vmem:[#allocation122_spill] sm:$0xff]  ;;  %v10939_v35 = vcombine.low %v15322_v26, %v15324_v12 }
 0x4d4   : > { %5618 = vmatprep.mubr.bf16.mxu1 %v12968_v37  ;;  %5927 = vmatpush2.bf16.msra.mxu1 %v10955_v36  ;;  %v4728_v59 = vadd.f32 %v4727_v25, %v18178_v39  ;;  %v15346_v16 = vld [vmem:[#allocation5 + $0x238] sm:$0xff]  ;;  %12273 = vtanh.f32 %v6345_v5  ;;  %v4922_v36 = vpop.f32.mrf.mxu1  ;;  %18179 = vst [vmem:[#allocation175_spill] sm:$0xff] %v15352_v24  ;;  %v10811_v5 = vcombine.low %v15309_v4, %v15311_v54 }
 0x4d5   : > { %5928 = vmatprep.subr.bf16.mxu1 %v10948_v47  ;;  %v4729_v32 = vpop.f32.mrf.mxu0  ;;  %v15348_v37 = vld [vmem:[#allocation5 + $0x618] sm:$0xff]  ;;  %12275 = vtanh.f32 %v6354_v57  ;;  %5736 = vmatpush2.bf16.msra.mxu0 %v10819_v49  ;;  %v10804_v56 = vcombine.high %v15344_v10, %v15346_v16  ;;  %v12969_v57 = vld [vmem:[%s13403_s15 + $0xe0] ss:$16 sps:$4 sm:$0xff]   ;;  %v10803_v12 = vcombine.low %v15344_v10, %v15346_v16 }
 0x4d6   : > { %v15350_v41 = vld [vmem:[#allocation5 + $0x638] sm:$0xff]  ;;  %v4921_v51 = vadd.f32 %v4920_v29, %v4728_v59  ;;  %v4730_v21 = vadd.f32 %v4729_v32, %v18180_v23  ;;  %12277 = vtanh.f32 %v6346_v55  ;;  %v4924_v47 = vpop.f32.mrf.mxu1  ;;  %v18181_v29 = vld [vmem:[#allocation124_spill] sm:$0xff]  ;;  %5737 = vmatprep.subr.bf16.mxu0 %v10812_v38  ;;  %v6361_v55 = vadd.f32 %v14895_v27, %v4919_v30  ;;  %5426 = vmatmul.mubr.bf16.gmra.mxu0 %v12969_v57  ;;  %v18182_v59 = vld [vmem:[#allocation126_spill] sm:$0xff] }
 0x4d7   : > { %v4731_v63 = vpop.f32.mrf.mxu0  ;;  %v10932_v49 = vcombine.high %v15348_v37, %v15350_v41  ;;  %v12970_v26 = vld [vmem:[%s13403_s15 + $0xe8] ss:$16 sps:$4 sm:$0xff]   ;;  %v12972_v23 = vld [vmem:[%s13403_s15 + $0x10c] ss:$16 sps:$4 sm:$0xff]   ;;  %v10931_v10 = vcombine.low %v15348_v37, %v15350_v41  ;;  %v18186_v41 = vld [vmem:[#allocation130_spill] sm:$0xff] }
 0x4d8   : > { %5929 = vmatpush2.bf16.msra.mxu1 %v10947_v48  ;;  %v4923_v25 = vadd.f32 %v4922_v36, %v4730_v21  ;;  %v4732_v60 = vadd.f32 %v4731_v63, %v18181_v29  ;;  %v12264_v48 = vpop.eup %12263  ;;  %v4928_v54 = vpop.f32.mrf.mxu1  ;;  %v12971_v36 = vld [vmem:[%s13403_s15 + $0x104] ss:$16 sps:$4 sm:$0xff]   ;;  %v6362_v21 = vadd.f32 %v14905_v1, %v4921_v51 }
 0x4d9   : > { %5930 = vmatprep.subr.bf16.mxu1 %v10940_v18  ;;  %v4735_v4 = vpop.f32.mrf.mxu0  ;;  %v12266_v39 = vpop.eup %12265  ;;  %5435 = vmatprep.mubr.bf16.mxu0 %v12971_v36  ;;  %v11596_v51 = vld [vmem:[#allocation7 + $0x2e4] ss:$16 sps:$4 sm:$0xff]  }
 0x4da   : > { %v6369_v38 = vadd.f32 %v14895_v27, %v4923_v25  ;;  %v4925_v18 = vadd.f32 %v4924_v47, %v4732_v60  ;;  %v4736_v32 = vadd.f32 %v4735_v4, %v18182_v59  ;;  %v12268_v30 = vpop.eup %12267  ;;  %v4930_v29 = vpop.f32.mrf.mxu1  ;;  %5738 = vmatpush2.bf16.msra.mxu0 %v10811_v5  ;;  %v15376_v16 = vpack.c.bf16 %v12264_v48, %v12266_v39  ;;  %v18184_v4 = vld [vmem:[#allocation128_spill] sm:$0xff] }
 0x4db   : > { %5619 = vmatmul.mubr.bf16.gmra.mxu1 %v12970_v26  ;;  %v4737_v63 = vpop.f32.mrf.mxu0  ;;  %v12270_v25 = vpop.eup %12269  ;;  %5739 = vmatprep.subr.bf16.mxu0 %v10804_v56  ;;  %v11593_v26 = vld [vmem:[#allocation7 + $0xe4] ss:$16 sps:$4 sm:$0xff]  }
 0x4dc   : > { %5628 = vmatprep.mubr.bf16.mxu1 %v12972_v23  ;;  %5931 = vmatpush2.bf16.msra.mxu1 %v10939_v35  ;;  %18183 = vst [vmem:[#allocation38_spill] sm:$0xff] %v15376_v16  ;;  %12279 = vtanh.f32 %v6369_v38  ;;  %v6370_v47 = vadd.f32 %v14905_v1, %v4925_v18  ;;  %v4929_v60 = vadd.f32 %v4928_v54, %v4736_v32  ;;  %v4932_v5 = vpop.f32.mrf.mxu1  ;;  %v15384_v38 = vsub.s32 2, %v14869_v42 }
 0x4dd   : > { %v4738_v57 = vadd.f32 %v4737_v63, %v18184_v4  ;;  %5932 = vmatprep.subr.bf16.mxu1 %v10932_v49  ;;  %12281 = vtanh.f32 %v6361_v55  ;;  %v4739_v59 = vpop.f32.mrf.mxu0  ;;  %v15380_v35 = vpack.c.bf16 %v12268_v30, %v12270_v25  ;;  %v18188_v49 = vld [vmem:[#allocation132_spill] sm:$0xff]  ;;  %v15391_v63 = vsub.s32 3, %v14869_v42  ;;  %v18190_v25 = vld [vmem:[#allocation10_spill] sm:$0xff] }
 0x4de   : > { %12283 = vtanh.f32 %v6370_v47  ;;  %v4740_v48 = vadd.f32 %v4739_v59, %v18186_v41  ;;  %v4934_v54 = vpop.f32.mrf.mxu1  ;;  %18187 = vst [vmem:[#allocation177_spill] sm:$0xff] %v15384_v38  ;;  %5740 = vmatpush2.bf16.msra.mxu0 %v10803_v12  ;;  %v6377_v32 = vadd.f32 %v14895_v27, %v4929_v60  ;;  %v12973_v30 = vld [vmem:[%s13403_s15 + $0x100] ss:$16 sps:$4 sm:$0xff]   ;;  %v12975_v4 = vld [vmem:[%s13403_s15 + $0x124] ss:$16 sps:$4 sm:$0xff]  }
 0x4df   : > { %18185 = vst [vmem:[#allocation176_spill] sm:$0xff] %v15380_v35  ;;  %v4931_v37 = vadd.f32 %v4930_v29, %v4738_v57  ;;  %12285 = vtanh.f32 %v6362_v21  ;;  %v4741_v39 = vpop.f32.mrf.mxu0  ;;  %8335 = vmatprep.subr.bf16.mxu0 %v11593_v26  ;;  %5436 = vmatmul.mubr.bf16.gmra.mxu0 %v12973_v30  ;;  %v12974_v21 = vld [vmem:[%s13403_s15 + $0x108] ss:$16 sps:$4 sm:$0xff]   ;;  %18189 = vst [vmem:[#allocation40_spill] sm:$0xff] %v15391_v63  ;;  %v12976_v57 = vld [vmem:[%s13403_s15 + $0x12c] ss:$16 sps:$4 sm:$0xff]  }
 0x4e0   : > { %5933 = vmatpush2.bf16.msra.mxu1 %v10931_v10  ;;  %v4933_v56 = vadd.f32 %v4932_v5, %v4740_v48  ;;  %v4742_v55 = vadd.f32 %v4741_v39, %v18188_v49  ;;  %v12272_v18 = vpop.eup %12271  ;;  %v5164_v23 = vpop.f32.mrf.mxu1  ;;  %5445 = vmatprep.mubr.bf16.mxu0 %v12975_v4  ;;  %v13002_v35 = vld [vmem:[%s13403_s15 + $0x1e0] ss:$16 sps:$4 sm:$0xff]  }
 0x4e1   : > { %8528 = vmatprep.subr.bf16.mxu1 %v11596_v51  ;;  %v4971_v36 = vpop.f32.mrf.mxu0  ;;  %v12274_v12 = vpop.eup %12273  ;;  %v6378_v26 = vadd.f32 %v14905_v1, %v4931_v37  ;;  %v12977_v51 = vld [vmem:[%s17625_s10] sm:$0xff] }
 0x4e2   : > { %v6385_v29 = vadd.f32 %v14895_v27, %v4933_v56  ;;  %v4935_v10 = vadd.f32 %v4934_v54, %v4742_v55  ;;  %v4972_v47 = vadd.f32 %v4971_v36, %v18190_v25  ;;  %v12276_v60 = vpop.eup %12275  ;;  %v15402_v59 = vrot.slane %v12977_v51, %v15384_v38  ;;  %v5166_v41 = vpop.f32.mrf.mxu1  ;;  %v18192_v56 = vld [vmem:[#allocation11_spill] sm:$0xff] }
 0x4e3   : > { %5629 = vmatmul.mubr.bf16.gmra.mxu1 %v12974_v21  ;;  %v4973_v5 = vpop.f32.mrf.mxu0  ;;  %v15404_v27 = vpack.c.bf16 %v12272_v18, %v12274_v12  ;;  %v12278_v48 = vpop.eup %12277  ;;  %v15409_v37 = vrot.slane %v12977_v51, %v15391_v63  ;;  %v18194_v21 = vld [vmem:[#allocation12_spill] sm:$0xff] }
 0x4e4   : > { %5638 = vmatprep.mubr.bf16.mxu1 %v12976_v57  ;;  %12287 = vtanh.f32 %v6385_v29  ;;  %v6386_v39 = vadd.f32 %v14905_v1, %v4935_v10  ;;  %v5165_v54 = vadd.f32 %v5164_v23, %v4972_v47  ;;  %v4974_v49 = vadd.f32 %v4973_v5, %v18192_v56  ;;  %v5168_v36 = vpop.f32.mrf.mxu1  ;;  %v18195_v10 = vld [vmem:[#allocation13_spill] sm:$0xff]  ;;  %v12978_v51 = vld [vmem:[%s13403_s15 + $0x120] ss:$16 sps:$4 sm:$0xff]   ;;  %v12980_v56 = vld [vmem:[%s13403_s15 + $0x144] ss:$16 sps:$4 sm:$0xff]  }
 0x4e5   : > { %18191 = vst [vmem:[#allocation42_spill] sm:$0xff] %v15404_v27  ;;  %12289 = vtanh.f32 %v6377_v32  ;;  %v4975_v55 = vpop.f32.mrf.mxu0  ;;  %v15411_v30 = vpack.c.bf16 %v12276_v60, %v12278_v48  ;;  %v12979_v5 = vld [vmem:[%s13403_s15 + $0x128] ss:$16 sps:$4 sm:$0xff]  }
 0x4e6   : > { %12291 = vtanh.f32 %v6386_v39  ;;  %v5167_v18 = vadd.f32 %v5166_v41, %v4974_v49  ;;  %v4976_v12 = vadd.f32 %v4975_v55, %v18194_v21  ;;  %v6139_v1 = vadd.f32 %v15402_v59, %v5165_v54  ;;  %v5170_v29 = vpop.f32.mrf.mxu1  ;;  %v18196_v39 = vld [vmem:[#allocation15_spill] sm:$0xff] }
 0x4e7   : > { %18193 = vst [vmem:[#allocation44_spill] sm:$0xff] %v15411_v30  ;;  %12293 = vtanh.f32 %v6378_v26  ;;  %v4977_v23 = vpop.f32.mrf.mxu0  ;;  %5446 = vmatmul.mubr.bf16.gmra.mxu0 %v12978_v51  ;;  %v12981_v49 = vld [vmem:[%s13403_s15 + $0x14c] ss:$16 sps:$4 sm:$0xff]   ;;  %v12998_v30 = vld [vmem:[%s13403_s15 + $0x1c0] ss:$16 sps:$4 sm:$0xff]  }
 0x4e8   : > { %v5169_v32 = vadd.f32 %v5168_v36, %v4976_v12  ;;  %v4978_v25 = vadd.f32 %v4977_v23, %v18195_v10  ;;  %v6140_v4 = vadd.f32 %v15409_v37, %v5167_v18  ;;  %v5174_v60 = vpop.f32.mrf.mxu1  ;;  %5455 = vmatprep.mubr.bf16.mxu0 %v12980_v56  ;;  %12295 = vtanh.f32 %v6139_v1  ;;  %v18198_v51 = vld [vmem:[#allocation17_spill] sm:$0xff] }
 0x4e9   : > { %v12280_v47 = vpop.eup %12279  ;;  %v4981_v57 = vpop.f32.mrf.mxu0  ;;  %v18201_v56 = vld [vmem:[#allocation21_spill] sm:$0xff] }
 0x4ea   : > { %v12282_v41 = vpop.eup %12281  ;;  %v6147_v26 = vadd.f32 %v15402_v59, %v5169_v32  ;;  %v5171_v48 = vadd.f32 %v5170_v29, %v4978_v25  ;;  %v4982_v54 = vadd.f32 %v4981_v57, %v18196_v39  ;;  %v5176_v18 = vpop.f32.mrf.mxu1 }
 0x4eb   : > { %5639 = vmatmul.mubr.bf16.gmra.mxu1 %v12979_v5  ;;  %v12284_v55 = vpop.eup %12283  ;;  %v4983_v36 = vpop.f32.mrf.mxu0  ;;  %v15423_v21 = vpack.c.bf16 %v12280_v47, %v12282_v41  ;;  %v18200_v5 = vld [vmem:[#allocation19_spill] sm:$0xff] }
 0x4ec   : > { %5648 = vmatprep.mubr.bf16.mxu1 %v12981_v49  ;;  %v12286_v12 = vpop.eup %12285  ;;  %12297 = vtanh.f32 %v6147_v26  ;;  %v6148_v23 = vadd.f32 %v15409_v37, %v5171_v48  ;;  %v5175_v10 = vadd.f32 %v5174_v60, %v4982_v54  ;;  %v4984_v32 = vadd.f32 %v4983_v36, %v18198_v51  ;;  %v5178_v25 = vpop.f32.mrf.mxu1  ;;  %v12982_v36 = vld [vmem:[%s13403_s15 + $0x140] ss:$16 sps:$4 sm:$0xff]   ;;  %v18202_v51 = vld [vmem:[#allocation23_spill] sm:$0xff] }
 0x4ed   : > { %18197 = vst [vmem:[#allocation186_spill] sm:$0xff] %v15423_v21  ;;  %12299 = vtanh.f32 %v6140_v4  ;;  %v4985_v29 = vpop.f32.mrf.mxu0  ;;  %v15427_v57 = vpack.c.bf16 %v12284_v55, %v12286_v12  ;;  %v12983_v55 = vld [vmem:[%s13403_s15 + $0x148] ss:$16 sps:$4 sm:$0xff]  }
 0x4ee   : > { %12301 = vtanh.f32 %v6148_v23  ;;  %v5177_v1 = vadd.f32 %v5176_v18, %v4984_v32  ;;  %v4986_v39 = vadd.f32 %v4985_v29, %v18200_v5  ;;  %v5180_v41 = vpop.f32.mrf.mxu1  ;;  %v6155_v54 = vadd.f32 %v15402_v59, %v5175_v10  ;;  %v12984_v29 = vld [vmem:[%s13403_s15 + $0x164] ss:$16 sps:$4 sm:$0xff]  }
 0x4ef   : > { %18199 = vst [vmem:[#allocation187_spill] sm:$0xff] %v15427_v57  ;;  %v4987_v47 = vpop.f32.mrf.mxu0  ;;  %5456 = vmatmul.mubr.bf16.gmra.mxu0 %v12982_v36  ;;  %v12994_v57 = vld [vmem:[%s13403_s15 + $0x1a0] ss:$16 sps:$4 sm:$0xff]  }
 0x4f0   : > { %v5179_v26 = vadd.f32 %v5178_v25, %v4986_v39  ;;  %v4988_v60 = vadd.f32 %v4987_v47, %v18201_v56  ;;  %v5184_v49 = vpop.f32.mrf.mxu1  ;;  %5465 = vmatprep.mubr.bf16.mxu0 %v12984_v29  ;;  %v12985_v25 = vld [vmem:[%s13403_s15 + $0x16c] ss:$16 sps:$4 sm:$0xff]   ;;  %v6156_v39 = vadd.f32 %v15409_v37, %v5177_v1 }
 0x4f1   : > { %v12288_v48 = vpop.eup %12287  ;;  %v4991_v4 = vpop.f32.mrf.mxu0  ;;  %v18206_v29 = vld [vmem:[#allocation27_spill] sm:$0xff] }
 0x4f2   : > { %v12290_v12 = vpop.eup %12289  ;;  %v6163_v18 = vadd.f32 %v15402_v59, %v5179_v26  ;;  %v5181_v23 = vadd.f32 %v5180_v41, %v4988_v60  ;;  %v4992_v32 = vadd.f32 %v4991_v4, %v18202_v51  ;;  %v5186_v47 = vpop.f32.mrf.mxu1  ;;  %v18204_v26 = vld [vmem:[#allocation25_spill] sm:$0xff] }
 0x4f3   : > { %5649 = vmatmul.mubr.bf16.gmra.mxu1 %v12983_v55  ;;  %v12292_v5 = vpop.eup %12291  ;;  %v4993_v10 = vpop.f32.mrf.mxu0  ;;  %v15439_v56 = vpack.c.bf16 %v12288_v48, %v12290_v12 }
 0x4f4   : > { %5658 = vmatprep.mubr.bf16.mxu1 %v12985_v25  ;;  %v12294_v36 = vpop.eup %12293  ;;  %12303 = vtanh.f32 %v6163_v18  ;;  %v6164_v55 = vadd.f32 %v15409_v37, %v5181_v23  ;;  %v5185_v63 = vadd.f32 %v5184_v49, %v4992_v32  ;;  %v4994_v41 = vadd.f32 %v4993_v10, %v18204_v26  ;;  %v5188_v4 = vpop.f32.mrf.mxu1  ;;  %v18207_v49 = vld [vmem:[#allocation29_spill] sm:$0xff] }
 0x4f5   : > { %18203 = vst [vmem:[#allocation46_spill] sm:$0xff] %v15439_v56  ;;  %12305 = vtanh.f32 %v6155_v54  ;;  %v4995_v60 = vpop.f32.mrf.mxu0  ;;  %v15443_v51 = vpack.c.bf16 %v12292_v5, %v12294_v36  ;;  %v12296_v18 = vpop.eup %12295  ;;  %v12986_v36 = vld [vmem:[%s13403_s15 + $0x160] ss:$16 sps:$4 sm:$0xff]  }
 0x4f6   : > { %12307 = vtanh.f32 %v6164_v55  ;;  %v5187_v1 = vadd.f32 %v5186_v47, %v4994_v41  ;;  %v4996_v25 = vadd.f32 %v4995_v60, %v18206_v29  ;;  %v5190_v12 = vpop.f32.mrf.mxu1  ;;  %v6171_v10 = vadd.f32 %v15402_v59, %v5185_v63  ;;  %v12987_v55 = vld [vmem:[%s13403_s15 + $0x168] ss:$16 sps:$4 sm:$0xff]   ;;  %v12988_v29 = vld [vmem:[%s13403_s15 + $0x184] ss:$16 sps:$4 sm:$0xff]  }
 0x4f7   : > { %18205 = vst [vmem:[#allocation188_spill] sm:$0xff] %v15443_v51  ;;  %12309 = vtanh.f32 %v6156_v39  ;;  %v4997_v48 = vpop.f32.mrf.mxu0  ;;  %5466 = vmatmul.mubr.bf16.gmra.mxu0 %v12986_v36  ;;  %v18209_v63 = vld [vmem:[#allocation31_spill] sm:$0xff] }
 0x4f8   : > { %v5189_v23 = vadd.f32 %v5188_v4, %v4996_v25  ;;  %v4998_v32 = vadd.f32 %v4997_v48, %v18207_v49  ;;  %v5194_v5 = vpop.f32.mrf.mxu1  ;;  %5475 = vmatprep.mubr.bf16.mxu0 %v12988_v29  ;;  %v12989_v4 = vld [vmem:[%s13403_s15 + $0x18c] ss:$16 sps:$4 sm:$0xff]   ;;  %v6172_v48 = vadd.f32 %v15409_v37, %v5187_v1 }
 0x4f9   : > { %v12298_v54 = vpop.eup %12297  ;;  %v5001_v26 = vpop.f32.mrf.mxu0  ;;  %v18212_v1 = vld [vmem:[#allocation35_spill] sm:$0xff] }
 0x4fa   : > { %v12300_v47 = vpop.eup %12299  ;;  %v15450_v41 = vpack.c.bf16 %v12298_v54, %v12296_v18  ;;  %v6179_v39 = vadd.f32 %v15402_v59, %v5189_v23  ;;  %v5191_v60 = vadd.f32 %v5190_v12, %v4998_v32  ;;  %v5002_v49 = vadd.f32 %v5001_v26, %v18209_v63  ;;  %v5196_v56 = vpop.f32.mrf.mxu1 }
 0x4fb   : > { %5659 = vmatmul.mubr.bf16.gmra.mxu1 %v12987_v55  ;;  %v12302_v25 = vpop.eup %12301  ;;  %v5003_v38 = vpop.f32.mrf.mxu0  ;;  %v18210_v55 = vld [vmem:[#allocation33_spill] sm:$0xff] }
 0x4fc   : > { %18208 = vst [vmem:[#allocation189_spill] sm:$0xff] %v15450_v41  ;;  %5668 = vmatprep.mubr.bf16.mxu1 %v12989_v4  ;;  %12311 = vtanh.f32 %v6179_v39  ;;  %v6180_v36 = vadd.f32 %v15409_v37, %v5191_v60  ;;  %v5004_v18 = vadd.f32 %v5003_v38, %v18210_v55  ;;  %v15459_v54 = vpack.c.bf16 %v12302_v25, %v12300_v47  ;;  %v5198_v32 = vpop.f32.mrf.mxu1  ;;  %v18213_v60 = vld [vmem:[#allocation37_spill] sm:$0xff] }
 0x4fd   : > { %12313 = vtanh.f32 %v6171_v10  ;;  %v5195_v12 = vadd.f32 %v5194_v5, %v5002_v49  ;;  %v5005_v23 = vpop.f32.mrf.mxu0  ;;  %v12990_v49 = vld [vmem:[%s13403_s15 + $0x180] ss:$16 sps:$4 sm:$0xff]   ;;  %v12991_v55 = vld [vmem:[%s13403_s15 + $0x188] ss:$16 sps:$4 sm:$0xff]  }
 0x4fe   : > { %18211 = vst [vmem:[#allocation48_spill] sm:$0xff] %v15459_v54  ;;  %12315 = vtanh.f32 %v6180_v36  ;;  %v5197_v29 = vadd.f32 %v5196_v56, %v5004_v18  ;;  %v5006_v4 = vadd.f32 %v5005_v23, %v18212_v1  ;;  %v5200_v39 = vpop.f32.mrf.mxu1  ;;  %v18214_v18 = vld [vmem:[#allocation39_spill] sm:$0xff]  ;;  %v12992_v1 = vld [vmem:[%s13403_s15 + $0x1a4] ss:$16 sps:$4 sm:$0xff]  }
 0x4ff   : > { %12317 = vtanh.f32 %v6172_v48  ;;  %v5007_v26 = vpop.f32.mrf.mxu0  ;;  %v6187_v10 = vadd.f32 %v15402_v59, %v5195_v12  ;;  %5476 = vmatmul.mubr.bf16.gmra.mxu0 %v12990_v49 }
 0x500   : > { %v5199_v63 = vadd.f32 %v5198_v32, %v5006_v4  ;;  %v5008_v38 = vadd.f32 %v5007_v26, %v18213_v60  ;;  %v5204_v5 = vpop.f32.mrf.mxu1  ;;  %5485 = vmatprep.mubr.bf16.mxu0 %v12992_v1  ;;  %v12993_v32 = vld [vmem:[%s13403_s15 + $0x1ac] ss:$16 sps:$4 sm:$0xff]   ;;  %v6188_v26 = vadd.f32 %v15409_v37, %v5197_v29 }
 0x501   : > { %v12304_v47 = vpop.eup %12303  ;;  %v5011_v25 = vpop.f32.mrf.mxu0  ;;  %v18218_v1 = vld [vmem:[#allocation43_spill] sm:$0xff] }
 0x502   : > { %v12306_v56 = vpop.eup %12305  ;;  %v6195_v36 = vadd.f32 %v15402_v59, %v5199_v63  ;;  %v5201_v48 = vadd.f32 %v5200_v39, %v5008_v38  ;;  %v5012_v23 = vadd.f32 %v5011_v25, %v18214_v18  ;;  %v5206_v60 = vpop.f32.mrf.mxu1  ;;  %v18216_v63 = vld [vmem:[#allocation41_spill] sm:$0xff] }
 0x503   : > { %5669 = vmatmul.mubr.bf16.gmra.mxu1 %v12991_v55  ;;  %v12308_v4 = vpop.eup %12307  ;;  %v5013_v12 = vpop.f32.mrf.mxu0  ;;  %v15471_v51 = vpack.c.bf16 %v12304_v47, %v12306_v56 }
 0x504   : > { %5678 = vmatprep.mubr.bf16.mxu1 %v12993_v32  ;;  %v12310_v49 = vpop.eup %12309  ;;  %12319 = vtanh.f32 %v6195_v36  ;;  %v6196_v55 = vadd.f32 %v15409_v37, %v5201_v48  ;;  %v5205_v21 = vadd.f32 %v5204_v5, %v5012_v23  ;;  %v5014_v39 = vadd.f32 %v5013_v12, %v18216_v63  ;;  %v5208_v25 = vpop.f32.mrf.mxu1  ;;  %v18219_v48 = vld [vmem:[#allocation45_spill] sm:$0xff] }
 0x505   : > { %18215 = vst [vmem:[#allocation50_spill] sm:$0xff] %v15471_v51  ;;  %12321 = vtanh.f32 %v6187_v10  ;;  %v5015_v38 = vpop.f32.mrf.mxu0  ;;  %v15475_v18 = vpack.c.bf16 %v12308_v4, %v12310_v49  ;;  %v12995_v4 = vld [vmem:[%s13403_s15 + $0x1a8] ss:$16 sps:$4 sm:$0xff]  }
 0x506   : > { %12323 = vtanh.f32 %v6196_v55  ;;  %v5207_v29 = vadd.f32 %v5206_v60, %v5014_v39  ;;  %v5016_v32 = vadd.f32 %v5015_v38, %v18218_v1  ;;  %v5210_v56 = vpop.f32.mrf.mxu1  ;;  %v6203_v10 = vadd.f32 %v15402_v59, %v5205_v21  ;;  %v18220_v55 = vld [vmem:[#allocation47_spill] sm:$0xff]  ;;  %v12996_v38 = vld [vmem:[%s13403_s15 + $0x1c4] ss:$16 sps:$4 sm:$0xff]  }
 0x507   : > { %18217 = vst [vmem:[#allocation52_spill] sm:$0xff] %v15475_v18  ;;  %12325 = vtanh.f32 %v6188_v26  ;;  %v5017_v47 = vpop.f32.mrf.mxu0  ;;  %5486 = vmatmul.mubr.bf16.gmra.mxu0 %v12994_v57 }
 0x508   : > { %v5209_v36 = vadd.f32 %v5208_v25, %v5016_v32  ;;  %v5018_v5 = vadd.f32 %v5017_v47, %v18219_v48  ;;  %v5214_v63 = vpop.f32.mrf.mxu1  ;;  %5495 = vmatprep.mubr.bf16.mxu0 %v12996_v38  ;;  %v12997_v25 = vld [vmem:[%s13403_s15 + $0x1cc] ss:$16 sps:$4 sm:$0xff]   ;;  %v6204_v32 = vadd.f32 %v15409_v37, %v5207_v29 }
 0x509   : > { %v12312_v23 = vpop.eup %12311  ;;  %v5021_v12 = vpop.f32.mrf.mxu0  ;;  %v18224_v38 = vld [vmem:[#allocation51_spill] sm:$0xff] }
 0x50a   : > { %v12314_v60 = vpop.eup %12313  ;;  %v6211_v49 = vadd.f32 %v15402_v59, %v5209_v36  ;;  %v5211_v26 = vadd.f32 %v5210_v56, %v5018_v5  ;;  %v5022_v39 = vadd.f32 %v5021_v12, %v18220_v55  ;;  %v5216_v47 = vpop.f32.mrf.mxu1  ;;  %v18222_v36 = vld [vmem:[#allocation49_spill] sm:$0xff] }
 0x50b   : > { %5679 = vmatmul.mubr.bf16.gmra.mxu1 %v12995_v4  ;;  %v12316_v1 = vpop.eup %12315  ;;  %v5023_v21 = vpop.f32.mrf.mxu0  ;;  %v15487_v48 = vpack.c.bf16 %v12312_v23, %v12314_v60 }
 0x50c   : > { %5688 = vmatprep.mubr.bf16.mxu1 %v12997_v25  ;;  %v12318_v57 = vpop.eup %12317  ;;  %12327 = vtanh.f32 %v6211_v49  ;;  %v6212_v4 = vadd.f32 %v15409_v37, %v5211_v26  ;;  %v5215_v27 = vadd.f32 %v5214_v63, %v5022_v39  ;;  %v5024_v56 = vadd.f32 %v5023_v21, %v18222_v36  ;;  %v5218_v12 = vpop.f32.mrf.mxu1  ;;  %v18225_v26 = vld [vmem:[#allocation53_spill] sm:$0xff] }
 0x50d   : > { %18221 = vst [vmem:[#allocation198_spill] sm:$0xff] %v15487_v48  ;;  %12329 = vtanh.f32 %v6203_v10  ;;  %v5025_v5 = vpop.f32.mrf.mxu0  ;;  %v15491_v55 = vpack.c.bf16 %v12316_v1, %v12318_v57  ;;  %v12999_v1 = vld [vmem:[%s13403_s15 + $0x1c8] ss:$16 sps:$4 sm:$0xff]  }
 0x50e   : > { %12331 = vtanh.f32 %v6212_v4  ;;  %v5217_v29 = vadd.f32 %v5216_v47, %v5024_v56  ;;  %v5026_v25 = vadd.f32 %v5025_v5, %v18224_v38  ;;  %v5220_v60 = vpop.f32.mrf.mxu1  ;;  %v6219_v10 = vadd.f32 %v15402_v59, %v5215_v27  ;;  %v18226_v4 = vld [vmem:[#allocation55_spill] sm:$0xff]  ;;  %v13000_v5 = vld [vmem:[%s13403_s15 + $0x1e4] ss:$16 sps:$4 sm:$0xff]  }
 0x50f   : > { %18223 = vst [vmem:[#allocation199_spill] sm:$0xff] %v15491_v55  ;;  %12333 = vtanh.f32 %v6204_v32  ;;  %v5027_v23 = vpop.f32.mrf.mxu0  ;;  %5496 = vmatmul.mubr.bf16.gmra.mxu0 %v12998_v30 }
 0x510   : > { %v5219_v49 = vadd.f32 %v5218_v12, %v5026_v25  ;;  %v5028_v63 = vadd.f32 %v5027_v23, %v18225_v26  ;;  %v5224_v36 = vpop.f32.mrf.mxu1  ;;  %5505 = vmatprep.mubr.bf16.mxu0 %v13000_v5  ;;  %v13001_v12 = vld [vmem:[%s13403_s15 + $0x1ec] ss:$16 sps:$4 sm:$0xff]   ;;  %v6220_v25 = vadd.f32 %v15409_v37, %v5217_v29 }
 0x511   : > { %v12320_v39 = vpop.eup %12319  ;;  %v5031_v21 = vpop.f32.mrf.mxu0  ;;  %v18230_v5 = vld [vmem:[#allocation59_spill] sm:$0xff] }
 0x512   : > { %v12322_v47 = vpop.eup %12321  ;;  %v6227_v57 = vadd.f32 %v15402_v59, %v5219_v49  ;;  %v5221_v32 = vadd.f32 %v5220_v60, %v5028_v63  ;;  %v5032_v56 = vadd.f32 %v5031_v21, %v18226_v4  ;;  %v5226_v23 = vpop.f32.mrf.mxu1  ;;  %v18228_v49 = vld [vmem:[#allocation57_spill] sm:$0xff] }
 0x513   : > { %5689 = vmatmul.mubr.bf16.gmra.mxu1 %v12999_v1  ;;  %v12324_v38 = vpop.eup %12323  ;;  %v5033_v27 = vpop.f32.mrf.mxu0  ;;  %v15503_v26 = vpack.c.bf16 %v12320_v39, %v12322_v47 }
 0x514   : > { %5698 = vmatprep.mubr.bf16.mxu1 %v13001_v12  ;;  %v12326_v30 = vpop.eup %12325  ;;  %12335 = vtanh.f32 %v6227_v57  ;;  %v6228_v1 = vadd.f32 %v15409_v37, %v5221_v32  ;;  %v5225_v16 = vadd.f32 %v5224_v36, %v5032_v56  ;;  %v5034_v60 = vadd.f32 %v5033_v27, %v18228_v49  ;;  %v5228_v21 = vpop.f32.mrf.mxu1  ;;  %v18231_v32 = vld [vmem:[#allocation61_spill] sm:$0xff] }
 0x515   : > { %18227 = vst [vmem:[#allocation54_spill] sm:$0xff] %v15503_v26  ;;  %12337 = vtanh.f32 %v6219_v10  ;;  %v5035_v63 = vpop.f32.mrf.mxu0  ;;  %v15507_v4 = vpack.c.bf16 %v12324_v38, %v12326_v30  ;;  %v13003_v38 = vld [vmem:[%s13403_s15 + $0x1e8] ss:$16 sps:$4 sm:$0xff]  }
 0x516   : > { %12339 = vtanh.f32 %v6228_v1  ;;  %v5227_v29 = vadd.f32 %v5226_v23, %v5034_v60  ;;  %v5036_v12 = vadd.f32 %v5035_v63, %v18230_v5  ;;  %v5230_v47 = vpop.f32.mrf.mxu1  ;;  %v6235_v10 = vadd.f32 %v15402_v59, %v5225_v16  ;;  %v18232_v1 = vld [vmem:[#allocation63_spill] sm:$0xff]  ;;  %v13004_v63 = vld [vmem:[%s13403_s15 + $0x4] ss:$16 sps:$4 sm:$0xff]  }
 0x517   : > { %18229 = vst [vmem:[#allocation56_spill] sm:$0xff] %v15507_v4  ;;  %12341 = vtanh.f32 %v6220_v25  ;;  %v5037_v39 = vpop.f32.mrf.mxu0  ;;  %5506 = vmatmul.mubr.bf16.gmra.mxu0 %v13002_v35 }
 0x518   : > { %v5229_v57 = vadd.f32 %v5228_v21, %v5036_v12  ;;  %v5038_v36 = vadd.f32 %v5037_v39, %v18231_v32  ;;  %v5234_v49 = vpop.f32.mrf.mxu1  ;;  %5741 = vmatprep.mubr.bf16.mxu0 %v13004_v63  ;;  %v13005_v21 = vld [vmem:[%s13403_s15 + $0xc] ss:$16 sps:$4 sm:$0xff]   ;;  %v6236_v12 = vadd.f32 %v15409_v37, %v5227_v29 }
 0x519   : > { %v12328_v56 = vpop.eup %12327  ;;  %v5041_v27 = vpop.f32.mrf.mxu0  ;;  %v18236_v29 = vld [vmem:[#allocation67_spill] sm:$0xff] }
 0x51a   : > { %v12330_v23 = vpop.eup %12329  ;;  %v6243_v30 = vadd.f32 %v15402_v59, %v5229_v57  ;;  %v5231_v25 = vadd.f32 %v5230_v47, %v5038_v36  ;;  %v5042_v60 = vadd.f32 %v5041_v27, %v18232_v1  ;;  %v5236_v39 = vpop.f32.mrf.mxu1  ;;  %v18234_v57 = vld [vmem:[#allocation65_spill] sm:$0xff] }
 0x51b   : > { %5699 = vmatmul.mubr.bf16.gmra.mxu1 %v13003_v38  ;;  %v12332_v5 = vpop.eup %12331  ;;  %v5043_v16 = vpop.f32.mrf.mxu0  ;;  %v15519_v32 = vpack.c.bf16 %v12328_v56, %v12330_v23  ;;  %v11591_v56 = vld [vmem:[#allocation7 + $0xe0] ss:$16 sps:$4 sm:$0xff]  }
 0x51c   : > { %5934 = vmatprep.mubr.bf16.mxu1 %v13005_v21  ;;  %v12334_v35 = vpop.eup %12333  ;;  %12343 = vtanh.f32 %v6243_v30  ;;  %v6244_v38 = vadd.f32 %v15409_v37, %v5231_v25  ;;  %v5235_v15 = vadd.f32 %v5234_v49, %v5042_v60  ;;  %v5044_v47 = vadd.f32 %v5043_v16, %v18234_v57  ;;  %v5238_v27 = vpop.f32.mrf.mxu1  ;;  %v11594_v23 = vld [vmem:[#allocation7 + $0x2e0] ss:$16 sps:$4 sm:$0xff]   ;;  %v18237_v49 = vld [vmem:[#allocation69_spill] sm:$0xff]  ;;  %v11599_v16 = vld [vmem:[#allocation7 + $0xc4] ss:$16 sps:$4 sm:$0xff]  }
 0x51d   : > { %18233 = vst [vmem:[#allocation58_spill] sm:$0xff] %v15519_v32  ;;  %12345 = vtanh.f32 %v6235_v10  ;;  %v5045_v36 = vpop.f32.mrf.mxu0  ;;  %v15523_v1 = vpack.c.bf16 %v12332_v5, %v12334_v35  ;;  %v11602_v10 = vld [vmem:[#allocation7 + $0x2c4] ss:$16 sps:$4 sm:$0xff]  }
 0x51e   : > { %12347 = vtanh.f32 %v6244_v38  ;;  %v5237_v63 = vadd.f32 %v5236_v39, %v5044_v47  ;;  %v5046_v21 = vadd.f32 %v5045_v36, %v18236_v29  ;;  %v5240_v24 = vpop.f32.mrf.mxu1  ;;  %v6251_v5 = vadd.f32 %v15402_v59, %v5235_v15  ;;  %v13007_v39 = vld [vmem:[%s13403_s15 + $0x8] ss:$16 sps:$4 sm:$0xff]  }
 0x51f   : > { %18235 = vst [vmem:[#allocation60_spill] sm:$0xff] %v15523_v1  ;;  %12349 = vtanh.f32 %v6236_v12  ;;  %v5047_v30 = vpop.f32.mrf.mxu0  ;;  %5742 = vmatmul.mubr.bf16.vlgmr.msra.gmra.mxu0 %v13006_v31  ;;  %v13009_v31 = vld [vmem:[%s13403_s15 + $0x2c] ss:$16 sps:$4 sm:$0xff]  }
 0x520   : > { %v5239_v25 = vadd.f32 %v5238_v27, %v5046_v21  ;;  %v5048_v60 = vadd.f32 %v5047_v30, %v18237_v49  ;;  %v5244_v38 = vpop.f32.mrf.mxu1  ;;  %v18238_v27 = vld [vmem:[#allocation71_spill] sm:$0xff]  ;;  %8336 = vmatpush1.bf16.msra.mxu0 %v11591_v56  ;;  %v11597_v21 = vld [vmem:[#allocation7 + $0xc0] ss:$16 sps:$4 sm:$0xff]   ;;  %v6252_v15 = vadd.f32 %v15409_v37, %v5237_v63  ;;  %5751 = vmatprep.mubr.bf16.mxu0 %v13008_v13 }
 0x521   : > { %v12336_v57 = vpop.eup %12335  ;;  %v5051_v35 = vpop.f32.mrf.mxu0  ;;  %v11600_v30 = vld [vmem:[#allocation7 + $0x2c0] ss:$16 sps:$4 sm:$0xff]   ;;  %8337 = vmatprep.subr.bf16.mxu0 %v11599_v16 }
 0x522   : > { %v12338_v47 = vpop.eup %12337  ;;  %v6259_v12 = vadd.f32 %v15402_v59, %v5239_v25  ;;  %v5241_v36 = vadd.f32 %v5240_v24, %v5048_v60  ;;  %v5052_v29 = vadd.f32 %v5051_v35, %v18238_v27  ;;  %v5246_v0 = vpop.f32.mrf.mxu1  ;;  %v18240_v25 = vld [vmem:[#allocation73_spill] sm:$0xff] }
 0x523   : > { %5935 = vmatmul.mubr.bf16.vlgmr.msra.gmra.mxu1 %v13007_v39  ;;  %v12340_v49 = vpop.eup %12339  ;;  %v5053_v40 = vpop.f32.mrf.mxu0  ;;  %v11605_v39 = vld [vmem:[#allocation7 + $0xa4] ss:$16 sps:$4 sm:$0xff]   ;;  %v15535_v44 = vpack.c.bf16 %v12336_v57, %v12338_v47  ;;  %v11603_v47 = vld [vmem:[#allocation7 + $0xa0] ss:$16 sps:$4 sm:$0xff]  }
 0x524   : > { %8529 = vmatpush1.bf16.msra.mxu1 %v11594_v23  ;;  %5944 = vmatprep.mubr.bf16.mxu1 %v13009_v31  ;;  %v12342_v24 = vpop.eup %12341  ;;  %12351 = vtanh.f32 %v6259_v12  ;;  %v6260_v56 = vadd.f32 %v15409_v37, %v5241_v36  ;;  %v5245_v23 = vadd.f32 %v5244_v38, %v5052_v29  ;;  %v5054_v60 = vadd.f32 %v5053_v40, %v18240_v25  ;;  %v5248_v35 = vpop.f32.mrf.mxu1  ;;  %v18242_v31 = vld [vmem:[#allocation75_spill] sm:$0xff]  ;;  %v11606_v40 = vld [vmem:[#allocation7 + $0x2a0] ss:$16 sps:$4 sm:$0xff]   ;;  %v11611_v12 = vld [vmem:[#allocation7 + $0x84] ss:$16 sps:$4 sm:$0xff]  }
 0x525   : > { %18239 = vst [vmem:[#allocation62_spill] sm:$0xff] %v15535_v44  ;;  %8530 = vmatprep.subr.bf16.mxu1 %v11602_v10  ;;  %12353 = vtanh.f32 %v6251_v5  ;;  %v5055_v63 = vpop.f32.mrf.mxu0  ;;  %v15539_v27 = vpack.c.bf16 %v12340_v49, %v12342_v24  ;;  %8338 = vmatpush1.bf16.msra.mxu0 %v11597_v21  ;;  %v18243_v10 = vld [vmem:[#allocation77_spill] sm:$0xff]  ;;  %v13010_v49 = vld [vmem:[%s13403_s15 + $0x20] ss:$16 sps:$4 sm:$0xff]   ;;  %v13012_v25 = vld [vmem:[%s13403_s15 + $0x44] ss:$16 sps:$4 sm:$0xff]  }
 0x526   : > { %12355 = vtanh.f32 %v6260_v56  ;;  %v5247_v13 = vadd.f32 %v5246_v0, %v5054_v60  ;;  %v5056_v58 = vadd.f32 %v5055_v63, %v18242_v31  ;;  %v5250_v38 = vpop.f32.mrf.mxu1  ;;  %8339 = vmatprep.subr.bf16.mxu0 %v11605_v39  ;;  %v11614_v0 = vld [vmem:[#allocation7 + $0x284] ss:$16 sps:$4 sm:$0xff]   ;;  %v6267_v29 = vadd.f32 %v15402_v59, %v5245_v23  ;;  %v13013_v60 = vld [vmem:[%s13403_s15 + $0x4c] ss:$16 sps:$4 sm:$0xff]  }
 0x527   : > { %18241 = vst [vmem:[#allocation64_spill] sm:$0xff] %v15539_v27  ;;  %12357 = vtanh.f32 %v6252_v15  ;;  %v5057_v57 = vpop.f32.mrf.mxu0  ;;  %5752 = vmatmul.mubr.bf16.gmra.mxu0 %v13010_v49  ;;  %v13011_v15 = vld [vmem:[%s13403_s15 + $0x28] ss:$16 sps:$4 sm:$0xff]  }
 0x528   : > { %8531 = vmatpush1.bf16.msra.mxu1 %v11600_v30  ;;  %v5249_v16 = vadd.f32 %v5248_v35, %v5056_v58  ;;  %v5058_v5 = vadd.f32 %v5057_v57, %v18243_v10  ;;  %v5254_v30 = vpop.f32.mrf.mxu1  ;;  %v18244_v58 = vld [vmem:[#allocation79_spill] sm:$0xff]  ;;  %5761 = vmatprep.mubr.bf16.mxu0 %v13012_v25  ;;  %v6268_v35 = vadd.f32 %v15409_v37, %v5247_v13  ;;  %v11609_v57 = vld [vmem:[#allocation7 + $0x80] ss:$16 sps:$4 sm:$0xff]   ;;  %v11620_v25 = vld [vmem:[#allocation7 + $0x264] ss:$16 sps:$4 sm:$0xff]  }
 0x529   : > { %8532 = vmatprep.subr.bf16.mxu1 %v11608_v11  ;;  %v12344_v36 = vpop.eup %12343  ;;  %v5061_v21 = vpop.f32.mrf.mxu0  ;;  %8340 = vmatpush1.bf16.msra.mxu0 %v11603_v47  ;;  %v11612_v10 = vld [vmem:[#allocation7 + $0x280] ss:$16 sps:$4 sm:$0xff]  }
 0x52a   : > { %v12346_v24 = vpop.eup %12345  ;;  %v6275_v39 = vadd.f32 %v15402_v59, %v5249_v16  ;;  %v5251_v11 = vadd.f32 %v5250_v38, %v5058_v5  ;;  %v5062_v56 = vadd.f32 %v5061_v21, %v18244_v58  ;;  %v5256_v31 = vpop.f32.mrf.mxu1  ;;  %v18246_v5 = vld [vmem:[#allocation81_spill] sm:$0xff]  ;;  %8341 = vmatprep.subr.bf16.mxu0 %v11611_v12  ;;  %v11617_v58 = vld [vmem:[#allocation7 + $0x64] ss:$16 sps:$4 sm:$0xff]   ;;  %v11615_v12 = vld [vmem:[#allocation7 + $0x60] ss:$16 sps:$4 sm:$0xff]  }
 0x52b   : > { %5945 = vmatmul.mubr.bf16.gmra.mxu1 %v13011_v15  ;;  %v12348_v63 = vpop.eup %12347  ;;  %v5063_v23 = vpop.f32.mrf.mxu0  ;;  %v15551_v49 = vpack.c.bf16 %v12344_v36, %v12346_v24  ;;  %v18248_v36 = vld [vmem:[#allocation83_spill] sm:$0xff] }
 0x52c   : > { %5954 = vmatprep.mubr.bf16.mxu1 %v13013_v60  ;;  %8533 = vmatpush1.bf16.msra.mxu1 %v11606_v40  ;;  %v12350_v15 = vpop.eup %12349  ;;  %12359 = vtanh.f32 %v6275_v39  ;;  %v6276_v38 = vadd.f32 %v15409_v37, %v5251_v11  ;;  %v5255_v16 = vadd.f32 %v5254_v30, %v5062_v56  ;;  %v5064_v21 = vadd.f32 %v5063_v23, %v18246_v5  ;;  %v5258_v60 = vpop.f32.mrf.mxu1  ;;  %v18249_v56 = vld [vmem:[#allocation85_spill] sm:$0xff]  ;;  %v11626_v23 = vld [vmem:[#allocation7 + $0x244] ss:$16 sps:$4 sm:$0xff]   ;;  %v13014_v5 = vld [vmem:[%s13403_s15 + $0x40] ss:$16 sps:$4 sm:$0xff]  }
 0x52d   : > { %18245 = vst [vmem:[#allocation66_spill] sm:$0xff] %v15551_v49  ;;  %8534 = vmatprep.subr.bf16.mxu1 %v11614_v0  ;;  %12361 = vtanh.f32 %v6267_v29  ;;  %v5065_v13 = vpop.f32.mrf.mxu0  ;;  %v15555_v47 = vpack.c.bf16 %v12348_v63, %v12350_v15  ;;  %8342 = vmatpush1.bf16.msra.mxu0 %v11609_v57  ;;  %v11618_v0 = vld [vmem:[#allocation7 + $0x260] ss:$16 sps:$4 sm:$0xff]   ;;  %v11623_v63 = vld [vmem:[#allocation7 + $0x44] ss:$16 sps:$4 sm:$0xff]  }
 0x52e   : > { %12363 = vtanh.f32 %v6276_v38  ;;  %v5257_v40 = vadd.f32 %v5256_v31, %v5064_v21  ;;  %v5066_v24 = vadd.f32 %v5065_v13, %v18248_v36  ;;  %v5260_v11 = vpop.f32.mrf.mxu1  ;;  %8343 = vmatprep.subr.bf16.mxu0 %v11617_v58  ;;  %v13015_v57 = vld [vmem:[%s13403_s15 + $0x48] ss:$16 sps:$4 sm:$0xff]   ;;  %v13016_v36 = vld [vmem:[%s13403_s15 + $0x64] ss:$16 sps:$4 sm:$0xff]   ;;  %v11624_v49 = vld [vmem:[#allocation7 + $0x240] ss:$16 sps:$4 sm:$0xff]  }
 0x52f   : > { %18247 = vst [vmem:[#allocation68_spill] sm:$0xff] %v15555_v47  ;;  %12365 = vtanh.f32 %v6268_v35  ;;  %v5067_v39 = vpop.f32.mrf.mxu0  ;;  %v6283_v35 = vadd.f32 %v15402_v59, %v5255_v16  ;;  %5762 = vmatmul.mubr.bf16.gmra.mxu0 %v13014_v5  ;;  %v11621_v5 = vld [vmem:[#allocation7 + $0x40] ss:$16 sps:$4 sm:$0xff]  }
 0x530   : > { %8535 = vmatpush1.bf16.msra.mxu1 %v11612_v10  ;;  %v5259_v30 = vadd.f32 %v5258_v60, %v5066_v24  ;;  %v5068_v29 = vadd.f32 %v5067_v39, %v18249_v56  ;;  %v5264_v38 = vpop.f32.mrf.mxu1  ;;  %v18250_v60 = vld [vmem:[#allocation87_spill] sm:$0xff]  ;;  %5771 = vmatprep.mubr.bf16.mxu0 %v13016_v36  ;;  %v6284_v39 = vadd.f32 %v15409_v37, %v5257_v40  ;;  %v11632_v36 = vld [vmem:[#allocation7 + $0x224] ss:$16 sps:$4 sm:$0xff]  }
 0x531   : > { %8536 = vmatprep.subr.bf16.mxu1 %v11620_v25  ;;  %v12352_v31 = vpop.eup %12351  ;;  %v5071_v15 = vpop.f32.mrf.mxu0  ;;  %v13017_v25 = vld [vmem:[%s13403_s15 + $0x6c] ss:$16 sps:$4 sm:$0xff]   ;;  %8344 = vmatpush1.bf16.msra.mxu0 %v11615_v12 }
 0x532   : > { %v12354_v10 = vpop.eup %12353  ;;  %v6291_v21 = vadd.f32 %v15402_v59, %v5259_v30  ;;  %v5261_v13 = vadd.f32 %v5260_v11, %v5068_v29  ;;  %v5072_v58 = vadd.f32 %v5071_v15, %v18250_v60  ;;  %v5266_v56 = vpop.f32.mrf.mxu1  ;;  %v18252_v29 = vld [vmem:[#allocation89_spill] sm:$0xff]  ;;  %8345 = vmatprep.subr.bf16.mxu0 %v11623_v63  ;;  %v11629_v60 = vld [vmem:[#allocation7 + $0x24] ss:$16 sps:$4 sm:$0xff]   ;;  %v11627_v63 = vld [vmem:[#allocation7 + $0x20] ss:$16 sps:$4 sm:$0xff]  }
 0x533   : > { %5955 = vmatmul.mubr.bf16.gmra.mxu1 %v13015_v57  ;;  %v12356_v24 = vpop.eup %12355  ;;  %v5073_v16 = vpop.f32.mrf.mxu0  ;;  %v15567_v57 = vpack.c.bf16 %v12352_v31, %v12354_v10  ;;  %v18254_v31 = vld [vmem:[#allocation91_spill] sm:$0xff] }
 0x534   : > { %5964 = vmatprep.mubr.bf16.mxu1 %v13017_v25  ;;  %8537 = vmatpush1.bf16.msra.mxu1 %v11618_v0  ;;  %v12358_v47 = vpop.eup %12357  ;;  %12367 = vtanh.f32 %v6291_v21  ;;  %v6292_v11 = vadd.f32 %v15409_v37, %v5261_v13  ;;  %v5265_v30 = vadd.f32 %v5264_v38, %v5072_v58  ;;  %v5074_v15 = vadd.f32 %v5073_v16, %v18252_v29  ;;  %v5268_v25 = vpop.f32.mrf.mxu1  ;;  %v18255_v58 = vld [vmem:[#allocation93_spill] sm:$0xff]  ;;  %v13018_v29 = vld [vmem:[%s13403_s15 + $0x60] ss:$16 sps:$4 sm:$0xff]  }
 0x535   : > { %18251 = vst [vmem:[#allocation70_spill] sm:$0xff] %v15567_v57  ;;  %8538 = vmatprep.subr.bf16.mxu1 %v11626_v23  ;;  %12369 = vtanh.f32 %v6283_v35  ;;  %v5075_v40 = vpop.f32.mrf.mxu0  ;;  %v15571_v12 = vpack.c.bf16 %v12356_v24, %v12358_v47  ;;  %8346 = vmatpush1.bf16.msra.mxu0 %v11621_v5  ;;  %v11630_v23 = vld [vmem:[#allocation7 + $0x220] ss:$16 sps:$4 sm:$0xff]   ;;  %v11635_v47 = vld [vmem:[#allocation7 + $0x4] ss:$16 sps:$4 sm:$0xff]  }
 0x536   : > { %12371 = vtanh.f32 %v6292_v11  ;;  %v5267_v0 = vadd.f32 %v5266_v56, %v5074_v15  ;;  %v5076_v10 = vadd.f32 %v5075_v40, %v18254_v31  ;;  %v5270_v13 = vpop.f32.mrf.mxu1  ;;  %8347 = vmatprep.subr.bf16.mxu0 %v11629_v60  ;;  %v11638_v24 = vld [vmem:[#allocation7 + $0x204] ss:$16 sps:$4 sm:$0xff]   ;;  %v13019_v5 = vld [vmem:[%s13403_s15 + $0x68] ss:$16 sps:$4 sm:$0xff]   ;;  %v11636_v57 = vld [vmem:[#allocation7 + $0x200] ss:$16 sps:$4 sm:$0xff]  }
 0x537   : > { %18253 = vst [vmem:[#allocation72_spill] sm:$0xff] %v15571_v12  ;;  %12373 = vtanh.f32 %v6284_v39  ;;  %v5077_v21 = vpop.f32.mrf.mxu0  ;;  %v6299_v39 = vadd.f32 %v15402_v59, %v5265_v30  ;;  %5772 = vmatmul.mubr.bf16.gmra.mxu0 %v13018_v29  ;;  %v13020_v31 = vld [vmem:[%s13403_s15 + $0x84] ss:$16 sps:$4 sm:$0xff]   ;;  %v11633_v29 = vld [vmem:[#allocation7] ss:$16 sps:$4 sm:$0xff]  }
 0x538   : > { %8539 = vmatpush1.bf16.msra.mxu1 %v11624_v49  ;;  %v5269_v38 = vadd.f32 %v5268_v25, %v5076_v10  ;;  %v5078_v35 = vadd.f32 %v5077_v21, %v18255_v58  ;;  %v5274_v11 = vpop.f32.mrf.mxu1  ;;  %v18256_v25 = vld [vmem:[#allocation95_spill] sm:$0xff]  ;;  %5781 = vmatprep.mubr.bf16.mxu0 %v13020_v31  ;;  %v6300_v21 = vadd.f32 %v15409_v37, %v5267_v0  ;;  %v11644_v31 = vld [vmem:[#allocation7 + $0x3e4] ss:$16 sps:$4 sm:$0xff]  }
 0x539   : > { %8540 = vmatprep.subr.bf16.mxu1 %v11632_v36  ;;  %v12360_v16 = vpop.eup %12359  ;;  %v5081_v56 = vpop.f32.mrf.mxu0  ;;  %v13021_v36 = vld [vmem:[%s13403_s15 + $0x8c] ss:$16 sps:$4 sm:$0xff]   ;;  %8348 = vmatpush1.bf16.msra.mxu0 %v11627_v63 }
 0x53a   : > { %v12362_v49 = vpop.eup %12361  ;;  %v6307_v15 = vadd.f32 %v15402_v59, %v5269_v38  ;;  %v5271_v40 = vadd.f32 %v5270_v13, %v5078_v35  ;;  %v5082_v60 = vadd.f32 %v5081_v56, %v18256_v25  ;;  %v5276_v58 = vpop.f32.mrf.mxu1  ;;  %v18258_v35 = vld [vmem:[#allocation97_spill] sm:$0xff]  ;;  %8349 = vmatprep.subr.bf16.mxu0 %v11635_v47  ;;  %v11641_v25 = vld [vmem:[#allocation7 + $0x1e4] ss:$16 sps:$4 sm:$0xff]   ;;  %v11639_v47 = vld [vmem:[#allocation7 + $0x1e0] ss:$16 sps:$4 sm:$0xff]  }
 0x53b   : > { %5965 = vmatmul.mubr.bf16.gmra.mxu1 %v13019_v5  ;;  %v12364_v10 = vpop.eup %12363  ;;  %v5083_v30 = vpop.f32.mrf.mxu0  ;;  %v15583_v5 = vpack.c.bf16 %v12360_v16, %v12362_v49  ;;  %v18260_v16 = vld [vmem:[#allocation99_spill] sm:$0xff] }
 0x53c   : > { %5974 = vmatprep.mubr.bf16.mxu1 %v13021_v36  ;;  %8541 = vmatpush1.bf16.msra.mxu1 %v11630_v23  ;;  %v12366_v12 = vpop.eup %12365  ;;  %12375 = vtanh.f32 %v6307_v15  ;;  %v6308_v13 = vadd.f32 %v15409_v37, %v5271_v40  ;;  %v5275_v38 = vadd.f32 %v5274_v11, %v5082_v60  ;;  %v5084_v56 = vadd.f32 %v5083_v30, %v18258_v35  ;;  %v5278_v36 = vpop.f32.mrf.mxu1  ;;  %v18261_v60 = vld [vmem:[#allocation101_spill] sm:$0xff]  ;;  %v13022_v35 = vld [vmem:[%s13403_s15 + $0x80] ss:$16 sps:$4 sm:$0xff]  }
 0x53d   : > { %18257 = vst [vmem:[#allocation74_spill] sm:$0xff] %v15583_v5  ;;  %8542 = vmatprep.subr.bf16.mxu1 %v11638_v24  ;;  %12377 = vtanh.f32 %v6299_v39  ;;  %v5085_v0 = vpop.f32.mrf.mxu0  ;;  %v15587_v63 = vpack.c.bf16 %v12364_v10, %v12366_v12  ;;  %8350 = vmatpush1.bf16.msra.mxu0 %v11633_v29  ;;  %v11642_v24 = vld [vmem:[#allocation7 + $0x3e0] ss:$16 sps:$4 sm:$0xff]   ;;  %v11647_v12 = vld [vmem:[#allocation7 + $0x1c4] ss:$16 sps:$4 sm:$0xff]  }
 0x53e   : > { %12379 = vtanh.f32 %v6308_v13  ;;  %v5277_v23 = vadd.f32 %v5276_v58, %v5084_v56  ;;  %v5086_v49 = vadd.f32 %v5085_v0, %v18260_v16  ;;  %v5280_v40 = vpop.f32.mrf.mxu1  ;;  %8351 = vmatprep.subr.bf16.mxu0 %v11641_v25  ;;  %v11650_v10 = vld [vmem:[#allocation7 + $0x3c4] ss:$16 sps:$4 sm:$0xff]   ;;  %v13023_v29 = vld [vmem:[%s13403_s15 + $0x88] ss:$16 sps:$4 sm:$0xff]   ;;  %v11648_v5 = vld [vmem:[#allocation7 + $0x3c0] ss:$16 sps:$4 sm:$0xff]  }
 0x53f   : > { %18259 = vst [vmem:[#allocation76_spill] sm:$0xff] %v15587_v63  ;;  %12381 = vtanh.f32 %v6300_v21  ;;  %v5087_v15 = vpop.f32.mrf.mxu0  ;;  %v6315_v21 = vadd.f32 %v15402_v59, %v5275_v38  ;;  %5782 = vmatmul.mubr.bf16.gmra.mxu0 %v13022_v35  ;;  %v13024_v16 = vld [vmem:[%s13403_s15 + $0xa4] ss:$16 sps:$4 sm:$0xff]   ;;  %v11645_v35 = vld [vmem:[#allocation7 + $0x1c0] ss:$16 sps:$4 sm:$0xff]  }
 0x540   : > { %8543 = vmatpush1.bf16.msra.mxu1 %v11636_v57  ;;  %v5279_v11 = vadd.f32 %v5278_v36, %v5086_v49  ;;  %v5088_v39 = vadd.f32 %v5087_v15, %v18261_v60  ;;  %v5284_v13 = vpop.f32.mrf.mxu1  ;;  %v18262_v36 = vld [vmem:[#allocation103_spill] sm:$0xff]  ;;  %5791 = vmatprep.mubr.bf16.mxu0 %v13024_v16  ;;  %v6316_v15 = vadd.f32 %v15409_v37, %v5277_v23  ;;  %v11656_v16 = vld [vmem:[#allocation7 + $0x3a4] ss:$16 sps:$4 sm:$0xff]  }
 0x541   : > { %8544 = vmatprep.subr.bf16.mxu1 %v11644_v31  ;;  %v12368_v30 = vpop.eup %12367  ;;  %v5091_v58 = vpop.f32.mrf.mxu0  ;;  %v13025_v31 = vld [vmem:[%s13403_s15 + $0xac] ss:$16 sps:$4 sm:$0xff]   ;;  %8352 = vmatpush2.bf16.msra.mxu0 %v11639_v47 }
 0x542   : > { %v12370_v57 = vpop.eup %12369  ;;  %v6323_v56 = vadd.f32 %v15402_v59, %v5279_v11  ;;  %v5281_v0 = vadd.f32 %v5280_v40, %v5088_v39  ;;  %v5092_v25 = vadd.f32 %v5091_v58, %v18262_v36  ;;  %v5286_v60 = vpop.f32.mrf.mxu1  ;;  %v18264_v39 = vld [vmem:[#allocation105_spill] sm:$0xff]  ;;  %8353 = vmatprep.subr.bf16.mxu0 %v11647_v12  ;;  %v11653_v36 = vld [vmem:[#allocation7 + $0x1a4] ss:$16 sps:$4 sm:$0xff]   ;;  %v11651_v12 = vld [vmem:[#allocation7 + $0x1a0] ss:$16 sps:$4 sm:$0xff]  }
 0x543   : > { %5975 = vmatmul.mubr.bf16.gmra.mxu1 %v13023_v29  ;;  %v12372_v49 = vpop.eup %12371  ;;  %v5093_v38 = vpop.f32.mrf.mxu0  ;;  %v15599_v29 = vpack.c.bf16 %v12368_v30, %v12370_v57  ;;  %v18266_v30 = vld [vmem:[#allocation107_spill] sm:$0xff] }
 0x544   : > { %5984 = vmatprep.mubr.bf16.mxu1 %v13025_v31  ;;  %8545 = vmatpush2.bf16.msra.mxu1 %v11642_v24  ;;  %v12374_v63 = vpop.eup %12373  ;;  %12383 = vtanh.f32 %v6323_v56  ;;  %v6324_v40 = vadd.f32 %v15409_v37, %v5281_v0  ;;  %v5285_v11 = vadd.f32 %v5284_v13, %v5092_v25  ;;  %v5094_v58 = vadd.f32 %v5093_v38, %v18264_v39  ;;  %v5288_v31 = vpop.f32.mrf.mxu1  ;;  %v18267_v25 = vld [vmem:[#allocation109_spill] sm:$0xff]  ;;  %v13026_v39 = vld [vmem:[%s13403_s15 + $0xa0] ss:$16 sps:$4 sm:$0xff]  }
 0x545   : > { %18263 = vst [vmem:[#allocation78_spill] sm:$0xff] %v15599_v29  ;;  %8546 = vmatprep.subr.bf16.mxu1 %v11650_v10  ;;  %12385 = vtanh.f32 %v6315_v21  ;;  %v5095_v23 = vpop.f32.mrf.mxu0  ;;  %v15603_v47 = vpack.c.bf16 %v12372_v49, %v12374_v63  ;;  %8354 = vmatpush2.bf16.msra.mxu0 %v11645_v35  ;;  %v11654_v10 = vld [vmem:[#allocation7 + $0x3a0] ss:$16 sps:$4 sm:$0xff]   ;;  %v11659_v63 = vld [vmem:[#allocation7 + $0x184] ss:$16 sps:$4 sm:$0xff]  }
 0x546   : > { %12387 = vtanh.f32 %v6324_v40  ;;  %v5287_v24 = vadd.f32 %v5286_v60, %v5094_v58  ;;  %v5096_v57 = vadd.f32 %v5095_v23, %v18266_v30  ;;  %v5290_v0 = vpop.f32.mrf.mxu1  ;;  %8355 = vmatprep.subr.bf16.mxu0 %v11653_v36  ;;  %v11662_v49 = vld [vmem:[#allocation7 + $0x384] ss:$16 sps:$4 sm:$0xff]   ;;  %v13027_v35 = vld [vmem:[%s13403_s15 + $0xa8] ss:$16 sps:$4 sm:$0xff]   ;;  %v11660_v29 = vld [vmem:[#allocation7 + $0x380] ss:$16 sps:$4 sm:$0xff]  }
 0x547   : > { %18265 = vst [vmem:[#allocation80_spill] sm:$0xff] %v15603_v47  ;;  %12389 = vtanh.f32 %v6316_v15  ;;  %v5097_v56 = vpop.f32.mrf.mxu0  ;;  %v6331_v15 = vadd.f32 %v15402_v59, %v5285_v11  ;;  %5792 = vmatmul.mubr.bf16.gmra.mxu0 %v13026_v39  ;;  %v13028_v30 = vld [vmem:[%s13403_s15 + $0xc4] ss:$16 sps:$4 sm:$0xff]   ;;  %v11657_v39 = vld [vmem:[#allocation7 + $0x180] ss:$16 sps:$4 sm:$0xff]  }
 0x548   : > { %8547 = vmatpush2.bf16.msra.mxu1 %v11648_v5  ;;  %v5289_v13 = vadd.f32 %v5288_v31, %v5096_v57  ;;  %v5098_v21 = vadd.f32 %v5097_v56, %v18267_v25  ;;  %v5294_v40 = vpop.f32.mrf.mxu1  ;;  %v18268_v31 = vld [vmem:[#allocation111_spill] sm:$0xff]  ;;  %5801 = vmatprep.mubr.bf16.mxu0 %v13028_v30  ;;  %v6332_v56 = vadd.f32 %v15409_v37, %v5287_v24  ;;  %v11668_v30 = vld [vmem:[#allocation7 + $0x364] ss:$16 sps:$4 sm:$0xff]  }
 0x549   : > { %8548 = vmatprep.subr.bf16.mxu1 %v11656_v16  ;;  %v12376_v38 = vpop.eup %12375  ;;  %v5101_v60 = vpop.f32.mrf.mxu0  ;;  %v13029_v16 = vld [vmem:[%s13403_s15 + $0xcc] ss:$16 sps:$4 sm:$0xff]   ;;  %8356 = vmatpush2.bf16.msra.mxu0 %v11651_v12 }
 0x54a   : > { %v12378_v5 = vpop.eup %12377  ;;  %v6339_v58 = vadd.f32 %v15402_v59, %v5289_v13  ;;  %v5291_v23 = vadd.f32 %v5290_v0, %v5098_v21  ;;  %v5102_v36 = vadd.f32 %v5101_v60, %v18268_v31  ;;  %v5296_v25 = vpop.f32.mrf.mxu1  ;;  %v18270_v21 = vld [vmem:[#allocation113_spill] sm:$0xff]  ;;  %8357 = vmatprep.subr.bf16.mxu0 %v11659_v63  ;;  %v11665_v31 = vld [vmem:[#allocation7 + $0x164] ss:$16 sps:$4 sm:$0xff]   ;;  %v11663_v63 = vld [vmem:[#allocation7 + $0x160] ss:$16 sps:$4 sm:$0xff]  }
 0x54b   : > { %5985 = vmatmul.mubr.bf16.gmra.mxu1 %v13027_v35  ;;  %v12380_v57 = vpop.eup %12379  ;;  %v5103_v11 = vpop.f32.mrf.mxu0  ;;  %v15615_v35 = vpack.c.bf16 %v12376_v38, %v12378_v5  ;;  %v18272_v38 = vld [vmem:[#allocation115_spill] sm:$0xff] }
 0x54c   : > { %5994 = vmatprep.mubr.bf16.mxu1 %v13029_v16  ;;  %8549 = vmatpush2.bf16.msra.mxu1 %v11654_v10  ;;  %v12382_v47 = vpop.eup %12381  ;;  %12391 = vtanh.f32 %v6339_v58  ;;  %v6340_v0 = vadd.f32 %v15409_v37, %v5291_v23  ;;  %v5295_v13 = vadd.f32 %v5294_v40, %v5102_v36  ;;  %v5104_v60 = vadd.f32 %v5103_v11, %v18270_v21  ;;  %v5298_v16 = vpop.f32.mrf.mxu1  ;;  %v18273_v36 = vld [vmem:[#allocation117_spill] sm:$0xff]  ;;  %v13030_v21 = vld [vmem:[%s13403_s15 + $0xc0] ss:$16 sps:$4 sm:$0xff]  }
 0x54d   : > { %18269 = vst [vmem:[#allocation82_spill] sm:$0xff] %v15615_v35  ;;  %8550 = vmatprep.subr.bf16.mxu1 %v11662_v49  ;;  %12393 = vtanh.f32 %v6331_v15  ;;  %v5105_v24 = vpop.f32.mrf.mxu0  ;;  %v15619_v12 = vpack.c.bf16 %v12380_v57, %v12382_v47  ;;  %8358 = vmatpush2.bf16.msra.mxu0 %v11657_v39  ;;  %v11666_v49 = vld [vmem:[#allocation7 + $0x360] ss:$16 sps:$4 sm:$0xff]   ;;  %v11671_v47 = vld [vmem:[#allocation7 + $0x144] ss:$16 sps:$4 sm:$0xff]  }
 0x54e   : > { %12395 = vtanh.f32 %v6340_v0  ;;  %v5297_v10 = vadd.f32 %v5296_v25, %v5104_v60  ;;  %v5106_v5 = vadd.f32 %v5105_v24, %v18272_v38  ;;  %v5300_v23 = vpop.f32.mrf.mxu1  ;;  %8359 = vmatprep.subr.bf16.mxu0 %v11665_v31  ;;  %v11674_v57 = vld [vmem:[#allocation7 + $0x344] ss:$16 sps:$4 sm:$0xff]   ;;  %v13031_v39 = vld [vmem:[%s13403_s15 + $0xc8] ss:$16 sps:$4 sm:$0xff]   ;;  %v11672_v35 = vld [vmem:[#allocation7 + $0x340] ss:$16 sps:$4 sm:$0xff]  }
 0x54f   : > { %18271 = vst [vmem:[#allocation84_spill] sm:$0xff] %v15619_v12  ;;  %12397 = vtanh.f32 %v6332_v56  ;;  %v5107_v58 = vpop.f32.mrf.mxu0  ;;  %v6347_v56 = vadd.f32 %v15402_v59, %v5295_v13  ;;  %5802 = vmatmul.mubr.bf16.gmra.mxu0 %v13030_v21  ;;  %v13032_v38 = vld [vmem:[%s13403_s15 + $0xe4] ss:$16 sps:$4 sm:$0xff]   ;;  %v11669_v21 = vld [vmem:[#allocation7 + $0x140] ss:$16 sps:$4 sm:$0xff]  }
 0x550   : > { %8551 = vmatpush2.bf16.msra.mxu1 %v11660_v29  ;;  %v5299_v40 = vadd.f32 %v5298_v16, %v5106_v5  ;;  %v5108_v15 = vadd.f32 %v5107_v58, %v18273_v36  ;;  %v5304_v0 = vpop.f32.mrf.mxu1  ;;  %v18274_v16 = vld [vmem:[#allocation119_spill] sm:$0xff]  ;;  %5811 = vmatprep.mubr.bf16.mxu0 %v13032_v38  ;;  %v6348_v58 = vadd.f32 %v15409_v37, %v5297_v10  ;;  %v11680_v38 = vld [vmem:[#allocation7 + $0x324] ss:$16 sps:$4 sm:$0xff]  }
 0x551   : > { %8552 = vmatprep.subr.bf16.mxu1 %v11668_v30  ;;  %v12384_v11 = vpop.eup %12383  ;;  %v5111_v25 = vpop.f32.mrf.mxu0  ;;  %v13033_v30 = vld [vmem:[%s13403_s15 + $0xec] ss:$16 sps:$4 sm:$0xff]   ;;  %8360 = vmatpush2.bf16.msra.mxu0 %v11663_v63 }
 0x552   : > { %v12386_v29 = vpop.eup %12385  ;;  %v6355_v60 = vadd.f32 %v15402_v59, %v5299_v40  ;;  %v5301_v24 = vadd.f32 %v5300_v23, %v5108_v15  ;;  %v5112_v31 = vadd.f32 %v5111_v25, %v18274_v16  ;;  %v5306_v36 = vpop.f32.mrf.mxu1  ;;  %v18276_v15 = vld [vmem:[#allocation121_spill] sm:$0xff]  ;;  %8361 = vmatprep.subr.bf16.mxu0 %v11671_v47  ;;  %v11677_v16 = vld [vmem:[#allocation7 + $0x124] ss:$16 sps:$4 sm:$0xff]   ;;  %v11675_v47 = vld [vmem:[#allocation7 + $0x120] ss:$16 sps:$4 sm:$0xff]  }
 0x553   : > { %5995 = vmatmul.mubr.bf16.gmra.mxu1 %v13031_v39  ;;  %v12388_v5 = vpop.eup %12387  ;;  %v5113_v13 = vpop.f32.mrf.mxu0  ;;  %v15631_v39 = vpack.c.bf16 %v12384_v11, %v12386_v29  ;;  %v18278_v11 = vld [vmem:[#allocation123_spill] sm:$0xff] }
 0x554   : > { %6004 = vmatprep.mubr.bf16.mxu1 %v13033_v30  ;;  %8553 = vmatpush2.bf16.msra.mxu1 %v11666_v49  ;;  %v12390_v12 = vpop.eup %12389  ;;  %12399 = vtanh.f32 %v6355_v60  ;;  %v6356_v23 = vadd.f32 %v15409_v37, %v5301_v24  ;;  %v5305_v40 = vadd.f32 %v5304_v0, %v5112_v31  ;;  %v5114_v25 = vadd.f32 %v5113_v13, %v18276_v15  ;;  %v5308_v30 = vpop.f32.mrf.mxu1  ;;  %v18279_v31 = vld [vmem:[#allocation125_spill] sm:$0xff]  ;;  %v13034_v15 = vld [vmem:[%s13403_s15 + $0xe0] ss:$16 sps:$4 sm:$0xff]  }
 0x555   : > { %18275 = vst [vmem:[#allocation86_spill] sm:$0xff] %v15631_v39  ;;  %8554 = vmatprep.subr.bf16.mxu1 %v11674_v57  ;;  %12401 = vtanh.f32 %v6347_v56  ;;  %v5115_v10 = vpop.f32.mrf.mxu0  ;;  %v15635_v63 = vpack.c.bf16 %v12388_v5, %v12390_v12  ;;  %8362 = vmatpush2.bf16.msra.mxu0 %v11669_v21  ;;  %v11678_v57 = vld [vmem:[#allocation7 + $0x320] ss:$16 sps:$4 sm:$0xff]   ;;  %v11683_v12 = vld [vmem:[#allocation7 + $0x104] ss:$16 sps:$4 sm:$0xff]  }
 0x556   : > { %12403 = vtanh.f32 %v6356_v23  ;;  %v5307_v49 = vadd.f32 %v5306_v36, %v5114_v25  ;;  %v5116_v29 = vadd.f32 %v5115_v10, %v18278_v11  ;;  %v5310_v24 = vpop.f32.mrf.mxu1  ;;  %8363 = vmatprep.subr.bf16.mxu0 %v11677_v16  ;;  %v11686_v5 = vld [vmem:[#allocation7 + $0x304] ss:$16 sps:$4 sm:$0xff]   ;;  %v13035_v21 = vld [vmem:[%s13403_s15 + $0xe8] ss:$16 sps:$4 sm:$0xff]   ;;  %v11684_v39 = vld [vmem:[#allocation7 + $0x300] ss:$16 sps:$4 sm:$0xff]  }
 0x557   : > { %18277 = vst [vmem:[#allocation88_spill] sm:$0xff] %v15635_v63  ;;  %12405 = vtanh.f32 %v6348_v58  ;;  %v5117_v60 = vpop.f32.mrf.mxu0  ;;  %v6363_v58 = vadd.f32 %v15402_v59, %v5305_v40  ;;  %5812 = vmatmul.mubr.bf16.gmra.mxu0 %v13034_v15  ;;  %v13036_v11 = vld [vmem:[%s13403_s15 + $0x104] ss:$16 sps:$4 sm:$0xff]   ;;  %v11681_v15 = vld [vmem:[#allocation7 + $0x100] ss:$16 sps:$4 sm:$0xff]  }
 0x558   : > { %8555 = vmatpush2.bf16.msra.mxu1 %v11672_v35  ;;  %v5309_v0 = vadd.f32 %v5308_v30, %v5116_v29  ;;  %v5118_v56 = vadd.f32 %v5117_v60, %v18279_v31  ;;  %v5314_v23 = vpop.f32.mrf.mxu1  ;;  %v18280_v30 = vld [vmem:[#allocation127_spill] sm:$0xff]  ;;  %5821 = vmatprep.mubr.bf16.mxu0 %v13036_v11  ;;  %v6364_v60 = vadd.f32 %v15409_v37, %v5307_v49  ;;  %v11692_v11 = vld [vmem:[#allocation7 + $0x6e4] ss:$16 sps:$4 sm:$0xff]  }
 0x559   : > { %8556 = vmatprep.subr.bf16.mxu1 %v11680_v38  ;;  %v12392_v13 = vpop.eup %12391  ;;  %v5121_v36 = vpop.f32.mrf.mxu0  ;;  %v13037_v38 = vld [vmem:[%s13403_s15 + $0x10c] ss:$16 sps:$4 sm:$0xff]   ;;  %8364 = vmatpush2.bf16.msra.mxu0 %v11675_v47 }
 0x55a   : > { %v12394_v35 = vpop.eup %12393  ;;  %v6371_v25 = vadd.f32 %v15402_v59, %v5309_v0  ;;  %v5311_v10 = vadd.f32 %v5310_v24, %v5118_v56  ;;  %v5122_v16 = vadd.f32 %v5121_v36, %v18280_v30  ;;  %v5316_v31 = vpop.f32.mrf.mxu1  ;;  %v18282_v56 = vld [vmem:[#allocation129_spill] sm:$0xff]  ;;  %8365 = vmatprep.subr.bf16.mxu0 %v11683_v12  ;;  %v11689_v30 = vld [vmem:[#allocation7 + $0x4e4] ss:$16 sps:$4 sm:$0xff]  }
 0x55b   : > { %6005 = vmatmul.mubr.bf16.gmra.mxu1 %v13035_v21  ;;  %v12396_v29 = vpop.eup %12395  ;;  %v5123_v40 = vpop.f32.mrf.mxu0  ;;  %v15647_v21 = vpack.c.bf16 %v12392_v13, %v12394_v35  ;;  %v18284_v13 = vld [vmem:[#allocation131_spill] sm:$0xff] }
 0x55c   : > { %6014 = vmatprep.mubr.bf16.mxu1 %v13037_v38  ;;  %8557 = vmatpush2.bf16.msra.mxu1 %v11678_v57  ;;  %v12398_v63 = vpop.eup %12397  ;;  %12407 = vtanh.f32 %v6371_v25  ;;  %v6372_v24 = vadd.f32 %v15409_v37, %v5311_v10  ;;  %v5315_v0 = vadd.f32 %v5314_v23, %v5122_v16  ;;  %v5124_v36 = vadd.f32 %v5123_v40, %v18282_v56  ;;  %v5318_v38 = vpop.f32.mrf.mxu1 }
 0x55d   : > { %18281 = vst [vmem:[#allocation90_spill] sm:$0xff] %v15647_v21  ;;  %8558 = vmatprep.subr.bf16.mxu1 %v11686_v5  ;;  %12409 = vtanh.f32 %v6363_v58  ;;  %v5125_v49 = vpop.f32.mrf.mxu0  ;;  %v15651_v47 = vpack.c.bf16 %v12396_v29, %v12398_v63  ;;  %v6115_v10 = vsub.s32 4, %v14869_v42  ;;  %8366 = vmatpush2.bf16.msra.mxu0 %v11681_v15  ;;  %v18285_v5 = vld [vmem:[#allocation133_spill] sm:$0xff] }
 0x55e   : > { %12411 = vtanh.f32 %v6372_v24  ;;  %v5317_v57 = vadd.f32 %v5316_v31, %v5124_v36  ;;  %v5126_v35 = vadd.f32 %v5125_v49, %v18284_v13  ;;  %v5320_v23 = vpop.f32.mrf.mxu1  ;;  %8721 = vmatprep.subr.bf16.mxu0 %v11689_v30  ;;  %v6379_v16 = vadd.f32 %v15402_v59, %v5315_v0  ;;  %v13039_v31 = vld [vmem:[%s13403_s15 + $0x108] ss:$16 sps:$4 sm:$0xff]   ;;  %v18286_v36 = vld [vmem:[#allocation134_spill] sm:$0xff] }
 0x55f   : > { %18283 = vst [vmem:[#allocation92_spill] sm:$0xff] %v15651_v47  ;;  %12413 = vtanh.f32 %v6364_v60  ;;  %v5127_v25 = vpop.f32.mrf.mxu0  ;;  %v13038_v60 = vld [vmem:[%s13403_s15 + $0x100] ss:$16 sps:$4 sm:$0xff]   ;;  %v6119_v24 = vsub.s32 5, %v14869_v42  ;;  %v13040_v30 = vld [vmem:[%s13403_s15 + $0x124] ss:$16 sps:$4 sm:$0xff]  }
 0x560   : > { %8559 = vmatpush2.bf16.msra.mxu1 %v11684_v39  ;;  %v5319_v12 = vadd.f32 %v5318_v38, %v5126_v35  ;;  %v5128_v58 = vadd.f32 %v5127_v25, %v18285_v5  ;;  %v5550_v40 = vpop.f32.mrf.mxu1  ;;  %5822 = vmatmul.mubr.bf16.gmra.mxu0 %v13038_v60  ;;  %v6380_v0 = vadd.f32 %v15409_v37, %v5317_v57  ;;  %v13042_v13 = vld [vmem:[%s17625_s10] sm:$0xff] }
 0x561   : > { %8914 = vmatprep.subr.bf16.mxu1 %v11692_v11  ;;  %v12400_v63 = vpop.eup %12399  ;;  %v5357_v29 = vpop.f32.mrf.mxu0  ;;  %5831 = vmatprep.mubr.bf16.mxu0 %v13040_v30  ;;  %v13041_v11 = vld [vmem:[%s13403_s15 + $0x12c] ss:$16 sps:$4 sm:$0xff]   ;;  %v15668_v35 = vrot.slane %v13042_v13, %v6115_v10 }
 0x562   : > { %v12402_v15 = vpop.eup %12401  ;;  %v6387_v39 = vadd.f32 %v15402_v59, %v5319_v12  ;;  %v5321_v56 = vadd.f32 %v5320_v23, %v5128_v58  ;;  %v5358_v49 = vadd.f32 %v5357_v29, %v18286_v36  ;;  %v5552_v5 = vpop.f32.mrf.mxu1  ;;  %v18288_v58 = vld [vmem:[#allocation136_spill] sm:$0xff] }
 0x563   : > { %6015 = vmatmul.mubr.bf16.gmra.mxu1 %v13039_v31  ;;  %v12404_v38 = vpop.eup %12403  ;;  %v5359_v25 = vpop.f32.mrf.mxu0  ;;  %v15670_v60 = vpack.c.bf16 %v12400_v63, %v12402_v15  ;;  %v15674_v31 = vrot.slane %v13042_v13, %v6119_v24  ;;  %v18290_v63 = vld [vmem:[#allocation138_spill] sm:$0xff] }
 0x564   : > { %6024 = vmatprep.mubr.bf16.mxu1 %v13041_v11  ;;  %v12406_v59 = vpop.eup %12405  ;;  %12415 = vtanh.f32 %v6387_v39  ;;  %v6388_v23 = vadd.f32 %v15409_v37, %v5321_v56  ;;  %v5551_v12 = vadd.f32 %v5550_v40, %v5358_v49  ;;  %v5360_v29 = vadd.f32 %v5359_v25, %v18288_v58  ;;  %v5554_v36 = vpop.f32.mrf.mxu1  ;;  %v13043_v25 = vld [vmem:[%s13403_s15 + $0x120] ss:$16 sps:$4 sm:$0xff]  }
 0x565   : > { %18287 = vst [vmem:[#allocation94_spill] sm:$0xff] %v15670_v60  ;;  %12417 = vtanh.f32 %v6379_v16  ;;  %v5361_v57 = vpop.f32.mrf.mxu0  ;;  %v15676_v30 = vpack.c.bf16 %v12404_v38, %v12406_v59  ;;  %v18291_v16 = vld [vmem:[#allocation142_spill] sm:$0xff]  ;;  %v13068_v60 = vld [vmem:[%s13403_s15 + $0x1e8] ss:$16 sps:$4 sm:$0xff]  }
 0x566   : > { %12419 = vtanh.f32 %v6388_v23  ;;  %v5553_v10 = vadd.f32 %v5552_v5, %v5360_v29  ;;  %v5362_v15 = vadd.f32 %v5361_v57, %v18290_v63  ;;  %v6141_v39 = vadd.f32 %v15668_v35, %v5551_v12  ;;  %v5556_v40 = vpop.f32.mrf.mxu1  ;;  %v13044_v5 = vld [vmem:[%s13403_s15 + $0x128] ss:$16 sps:$4 sm:$0xff]   ;;  %v18292_v12 = vld [vmem:[#allocation144_spill] sm:$0xff]  ;;  %v13046_v57 = vld [vmem:[%s13403_s15 + $0x14c] ss:$16 sps:$4 sm:$0xff]  }
 0x567   : > { %18289 = vst [vmem:[#allocation96_spill] sm:$0xff] %v15676_v30  ;;  %12421 = vtanh.f32 %v6380_v0  ;;  %v5363_v37 = vpop.f32.mrf.mxu0  ;;  %v13045_v29 = vld [vmem:[%s13403_s15 + $0x144] ss:$16 sps:$4 sm:$0xff]  }
 0x568   : > { %v5555_v56 = vadd.f32 %v5554_v36, %v5362_v15  ;;  %v5364_v24 = vadd.f32 %v5363_v37, %v18291_v16  ;;  %v6142_v11 = vadd.f32 %v15674_v31, %v5553_v10  ;;  %v5560_v13 = vpop.f32.mrf.mxu1  ;;  %5832 = vmatmul.mubr.bf16.gmra.mxu0 %v13043_v25  ;;  %12423 = vtanh.f32 %v6141_v39 }
 0x569   : > { %v12408_v49 = vpop.eup %12407  ;;  %v5367_v38 = vpop.f32.mrf.mxu0  ;;  %5841 = vmatprep.mubr.bf16.mxu0 %v13045_v29 }
 0x56a   : > { %v12410_v59 = vpop.eup %12409  ;;  %v6149_v0 = vadd.f32 %v15668_v35, %v5555_v56  ;;  %v5557_v23 = vadd.f32 %v5556_v40, %v5364_v24  ;;  %v5368_v58 = vadd.f32 %v5367_v38, %v18292_v12  ;;  %v5562_v10 = vpop.f32.mrf.mxu1  ;;  %v18296_v12 = vld [vmem:[#allocation148_spill] sm:$0xff] }
 0x56b   : > { %6025 = vmatmul.mubr.bf16.gmra.mxu1 %v13044_v5  ;;  %v12412_v36 = vpop.eup %12411  ;;  %v5369_v63 = vpop.f32.mrf.mxu0  ;;  %v15688_v15 = vpack.c.bf16 %v12408_v49, %v12410_v59  ;;  %v18294_v5 = vld [vmem:[#allocation146_spill] sm:$0xff] }
 0x56c   : > { %6034 = vmatprep.mubr.bf16.mxu1 %v13046_v57  ;;  %v12414_v37 = vpop.eup %12413  ;;  %12425 = vtanh.f32 %v6149_v0  ;;  %v6150_v16 = vadd.f32 %v15674_v31, %v5557_v23  ;;  %v5561_v25 = vadd.f32 %v5560_v13, %v5368_v58  ;;  %v5370_v56 = vadd.f32 %v5369_v63, %v18294_v5  ;;  %v5564_v24 = vpop.f32.mrf.mxu1  ;;  %v18297_v57 = vld [vmem:[#allocation154_spill] sm:$0xff] }
 0x56d   : > { %18293 = vst [vmem:[#allocation98_spill] sm:$0xff] %v15688_v15  ;;  %12427 = vtanh.f32 %v6142_v11  ;;  %v5371_v40 = vpop.f32.mrf.mxu0  ;;  %v15692_v38 = vpack.c.bf16 %v12412_v36, %v12414_v37  ;;  %v13047_v5 = vld [vmem:[%s13403_s15 + $0x140] ss:$16 sps:$4 sm:$0xff]   ;;  %v13048_v36 = vld [vmem:[%s13403_s15 + $0x148] ss:$16 sps:$4 sm:$0xff]  }
 0x56e   : > { %12429 = vtanh.f32 %v6150_v16  ;;  %v5563_v39 = vadd.f32 %v5562_v10, %v5370_v56  ;;  %v5372_v29 = vadd.f32 %v5371_v40, %v18296_v12  ;;  %v5566_v59 = vpop.f32.mrf.mxu1  ;;  %v6157_v58 = vadd.f32 %v15668_v35, %v5561_v25  ;;  %v18298_v56 = vld [vmem:[#allocation156_spill] sm:$0xff] }
 0x56f   : > { %18295 = vst [vmem:[#allocation100_spill] sm:$0xff] %v15692_v38  ;;  %v5373_v49 = vpop.f32.mrf.mxu0  ;;  %v13049_v12 = vld [vmem:[%s13403_s15 + $0x164] ss:$16 sps:$4 sm:$0xff]  }
 0x570   : > { %v5565_v0 = vadd.f32 %v5564_v24, %v5372_v29  ;;  %v5374_v13 = vadd.f32 %v5373_v49, %v18297_v57  ;;  %v5570_v63 = vpop.f32.mrf.mxu1  ;;  %5842 = vmatmul.mubr.bf16.gmra.mxu0 %v13047_v5  ;;  %v13050_v24 = vld [vmem:[%s13403_s15 + $0x16c] ss:$16 sps:$4 sm:$0xff]   ;;  %v6158_v49 = vadd.f32 %v15674_v31, %v5563_v39 }
 0x571   : > { %v12416_v23 = vpop.eup %12415  ;;  %v5377_v11 = vpop.f32.mrf.mxu0  ;;  %5851 = vmatprep.mubr.bf16.mxu0 %v13049_v12  ;;  %v18302_v12 = vld [vmem:[#allocation160_spill] sm:$0xff] }
 0x572   : > { %v12418_v37 = vpop.eup %12417  ;;  %v6165_v10 = vadd.f32 %v15668_v35, %v5565_v0  ;;  %v5567_v16 = vadd.f32 %v5566_v59, %v5374_v13  ;;  %v5378_v40 = vadd.f32 %v5377_v11, %v18298_v56  ;;  %v5572_v57 = vpop.f32.mrf.mxu1  ;;  %v18300_v0 = vld [vmem:[#allocation158_spill] sm:$0xff] }
 0x573   : > { %6035 = vmatmul.mubr.bf16.gmra.mxu1 %v13048_v36  ;;  %v12420_v29 = vpop.eup %12419  ;;  %v5379_v25 = vpop.f32.mrf.mxu0  ;;  %v15704_v15 = vpack.c.bf16 %v12416_v23, %v12418_v37 }
 0x574   : > { %6044 = vmatprep.mubr.bf16.mxu1 %v13050_v24  ;;  %v12422_v5 = vpop.eup %12421  ;;  %12431 = vtanh.f32 %v6165_v10  ;;  %v6166_v36 = vadd.f32 %v15674_v31, %v5567_v16  ;;  %v5571_v38 = vadd.f32 %v5570_v63, %v5378_v40  ;;  %v5380_v59 = vadd.f32 %v5379_v25, %v18300_v0  ;;  %v5574_v11 = vpop.f32.mrf.mxu1  ;;  %v18303_v63 = vld [vmem:[#allocation166_spill] sm:$0xff] }
 0x575   : > { %18299 = vst [vmem:[#allocation102_spill] sm:$0xff] %v15704_v15  ;;  %12433 = vtanh.f32 %v6157_v58  ;;  %v5381_v13 = vpop.f32.mrf.mxu0  ;;  %v15708_v56 = vpack.c.bf16 %v12420_v29, %v12422_v5  ;;  %v12424_v10 = vpop.eup %12423  ;;  %v13051_v5 = vld [vmem:[%s13403_s15 + $0x160] ss:$16 sps:$4 sm:$0xff]  }
 0x576   : > { %12435 = vtanh.f32 %v6166_v36  ;;  %v5573_v39 = vadd.f32 %v5572_v57, %v5380_v59  ;;  %v5382_v24 = vadd.f32 %v5381_v13, %v18302_v12  ;;  %v5576_v37 = vpop.f32.mrf.mxu1  ;;  %v6173_v25 = vadd.f32 %v15668_v35, %v5571_v38  ;;  %v13052_v36 = vld [vmem:[%s13403_s15 + $0x168] ss:$16 sps:$4 sm:$0xff]   ;;  %v13053_v12 = vld [vmem:[%s13403_s15 + $0x184] ss:$16 sps:$4 sm:$0xff]  }
 0x577   : > { %18301 = vst [vmem:[#allocation104_spill] sm:$0xff] %v15708_v56  ;;  %12437 = vtanh.f32 %v6158_v49  ;;  %v5383_v23 = vpop.f32.mrf.mxu0  ;;  %v18305_v38 = vld [vmem:[#allocation168_spill] sm:$0xff] }
 0x578   : > { %v5575_v16 = vadd.f32 %v5574_v11, %v5382_v24  ;;  %v5384_v40 = vadd.f32 %v5383_v23, %v18303_v63  ;;  %v5580_v29 = vpop.f32.mrf.mxu1  ;;  %5852 = vmatmul.mubr.bf16.gmra.mxu0 %v13051_v5  ;;  %v13054_v11 = vld [vmem:[%s13403_s15 + $0x18c] ss:$16 sps:$4 sm:$0xff]   ;;  %v6174_v23 = vadd.f32 %v15674_v31, %v5573_v39  ;;  %v18308_v39 = vld [vmem:[#allocation172_spill] sm:$0xff] }
 0x579   : > { %v12426_v58 = vpop.eup %12425  ;;  %v5387_v0 = vpop.f32.mrf.mxu0  ;;  %5861 = vmatprep.mubr.bf16.mxu0 %v13053_v12 }
 0x57a   : > { %v12428_v57 = vpop.eup %12427  ;;  %v15715_v59 = vpack.c.bf16 %v12426_v58, %v12424_v10  ;;  %v6181_v49 = vadd.f32 %v15668_v35, %v5575_v16  ;;  %v5577_v13 = vadd.f32 %v5576_v37, %v5384_v40  ;;  %v5388_v63 = vadd.f32 %v5387_v0, %v18305_v38  ;;  %v5582_v56 = vpop.f32.mrf.mxu1 }
 0x57b   : > { %6045 = vmatmul.mubr.bf16.gmra.mxu1 %v13052_v36  ;;  %v12430_v24 = vpop.eup %12429  ;;  %v5389_v15 = vpop.f32.mrf.mxu0  ;;  %v18306_v36 = vld [vmem:[#allocation170_spill] sm:$0xff] }
 0x57c   : > { %18304 = vst [vmem:[#allocation106_spill] sm:$0xff] %v15715_v59  ;;  %6054 = vmatprep.mubr.bf16.mxu1 %v13054_v11  ;;  %12439 = vtanh.f32 %v6181_v49  ;;  %v6182_v5 = vadd.f32 %v15674_v31, %v5577_v13  ;;  %v5390_v10 = vadd.f32 %v5389_v15, %v18306_v36  ;;  %v15724_v58 = vpack.c.bf16 %v12430_v24, %v12428_v57  ;;  %v5584_v40 = vpop.f32.mrf.mxu1  ;;  %v18309_v13 = vld [vmem:[#allocation178_spill] sm:$0xff]  ;;  %v13056_v36 = vld [vmem:[%s13403_s15 + $0x188] ss:$16 sps:$4 sm:$0xff]  }
 0x57d   : > { %12441 = vtanh.f32 %v6173_v25  ;;  %v5581_v37 = vadd.f32 %v5580_v29, %v5388_v63  ;;  %v5391_v16 = vpop.f32.mrf.mxu0  ;;  %v13055_v63 = vld [vmem:[%s13403_s15 + $0x180] ss:$16 sps:$4 sm:$0xff]  }
 0x57e   : > { %18307 = vst [vmem:[#allocation108_spill] sm:$0xff] %v15724_v58  ;;  %12443 = vtanh.f32 %v6182_v5  ;;  %v5583_v12 = vadd.f32 %v5582_v56, %v5390_v10  ;;  %v5392_v11 = vadd.f32 %v5391_v16, %v18308_v39  ;;  %v5586_v49 = vpop.f32.mrf.mxu1  ;;  %v18310_v10 = vld [vmem:[#allocation180_spill] sm:$0xff] }
 0x57f   : > { %12445 = vtanh.f32 %v6174_v23  ;;  %v5393_v0 = vpop.f32.mrf.mxu0  ;;  %v6189_v25 = vadd.f32 %v15668_v35, %v5581_v37  ;;  %v13057_v39 = vld [vmem:[%s13403_s15 + $0x1a4] ss:$16 sps:$4 sm:$0xff]  }
 0x580   : > { %v5585_v38 = vadd.f32 %v5584_v40, %v5392_v11  ;;  %v5394_v15 = vadd.f32 %v5393_v0, %v18309_v13  ;;  %5862 = vmatmul.mubr.bf16.gmra.mxu0 %v13055_v63  ;;  %v13058_v40 = vld [vmem:[%s13403_s15 + $0x1ac] ss:$16 sps:$4 sm:$0xff]   ;;  %v6190_v0 = vadd.f32 %v15674_v31, %v5583_v12 }
 0x581   : > { %v12432_v57 = vpop.eup %12431  ;;  %v5397_v24 = vpop.f32.mrf.mxu0  ;;  %5871 = vmatprep.mubr.bf16.mxu0 %v13057_v39  ;;  %v18314_v39 = vld [vmem:[#allocation184_spill] sm:$0xff] }
 0x582   : > { %v5590_v29 = vpop.f32.mrf.mxu1  ;;  %v12434_v56 = vpop.eup %12433  ;;  %v6197_v5 = vadd.f32 %v15668_v35, %v5585_v38  ;;  %v5587_v23 = vadd.f32 %v5586_v49, %v5394_v15  ;;  %v5398_v16 = vadd.f32 %v5397_v24, %v18310_v10  ;;  %v18312_v38 = vld [vmem:[#allocation182_spill] sm:$0xff] }
 0x583   : > { %6055 = vmatmul.mubr.bf16.gmra.mxu1 %v13056_v36  ;;  %v12436_v11 = vpop.eup %12435  ;;  %v5399_v37 = vpop.f32.mrf.mxu0  ;;  %v15736_v59 = vpack.c.bf16 %v12432_v57, %v12434_v56 }
 0x584   : > { %6064 = vmatprep.mubr.bf16.mxu1 %v13058_v40  ;;  %v5592_v13 = vpop.f32.mrf.mxu1  ;;  %v12438_v63 = vpop.eup %12437  ;;  %12447 = vtanh.f32 %v6197_v5  ;;  %v6198_v36 = vadd.f32 %v15674_v31, %v5587_v23  ;;  %v5591_v58 = vadd.f32 %v5590_v29, %v5398_v16  ;;  %v5400_v49 = vadd.f32 %v5399_v37, %v18312_v38  ;;  %v18315_v23 = vld [vmem:[#allocation190_spill] sm:$0xff] }
 0x585   : > { %18311 = vst [vmem:[#allocation110_spill] sm:$0xff] %v15736_v59  ;;  %12449 = vtanh.f32 %v6189_v25  ;;  %v5401_v15 = vpop.f32.mrf.mxu0  ;;  %v15740_v10 = vpack.c.bf16 %v12436_v11, %v12438_v63  ;;  %v13059_v59 = vld [vmem:[%s13403_s15 + $0x1a0] ss:$16 sps:$4 sm:$0xff]   ;;  %v13060_v11 = vld [vmem:[%s13403_s15 + $0x1a8] ss:$16 sps:$4 sm:$0xff]  }
 0x586   : > { %v5594_v24 = vpop.f32.mrf.mxu1  ;;  %12451 = vtanh.f32 %v6198_v36  ;;  %v5593_v12 = vadd.f32 %v5592_v13, %v5400_v49  ;;  %v5402_v40 = vadd.f32 %v5401_v15, %v18314_v39  ;;  %v6205_v25 = vadd.f32 %v15668_v35, %v5591_v58  ;;  %v18316_v36 = vld [vmem:[#allocation192_spill] sm:$0xff] }
 0x587   : > { %18313 = vst [vmem:[#allocation112_spill] sm:$0xff] %v15740_v10  ;;  %12453 = vtanh.f32 %v6190_v0  ;;  %v5403_v57 = vpop.f32.mrf.mxu0  ;;  %v13061_v15 = vld [vmem:[%s13403_s15 + $0x1c4] ss:$16 sps:$4 sm:$0xff]  }
 0x588   : > { %v5596_v56 = vpop.f32.mrf.mxu1  ;;  %v5595_v5 = vadd.f32 %v5594_v24, %v5402_v40  ;;  %v5404_v29 = vadd.f32 %v5403_v57, %v18315_v23  ;;  %5872 = vmatmul.mubr.bf16.gmra.mxu0 %v13059_v59  ;;  %v13062_v24 = vld [vmem:[%s13403_s15 + $0x1cc] ss:$16 sps:$4 sm:$0xff]   ;;  %v6206_v40 = vadd.f32 %v15674_v31, %v5593_v12 }
 0x589   : > { %v12440_v16 = vpop.eup %12439  ;;  %v5407_v37 = vpop.f32.mrf.mxu0  ;;  %5881 = vmatprep.mubr.bf16.mxu0 %v13061_v15  ;;  %v18320_v15 = vld [vmem:[#allocation196_spill] sm:$0xff] }
 0x58a   : > { %v5600_v38 = vpop.f32.mrf.mxu1  ;;  %v12442_v13 = vpop.eup %12441  ;;  %v6213_v63 = vadd.f32 %v15668_v35, %v5595_v5  ;;  %v5597_v0 = vadd.f32 %v5596_v56, %v5404_v29  ;;  %v5408_v49 = vadd.f32 %v5407_v37, %v18316_v36  ;;  %v18318_v5 = vld [vmem:[#allocation194_spill] sm:$0xff] }
 0x58b   : > { %6065 = vmatmul.mubr.bf16.gmra.mxu1 %v13060_v11  ;;  %v12444_v39 = vpop.eup %12443  ;;  %v5409_v58 = vpop.f32.mrf.mxu0  ;;  %v15752_v23 = vpack.c.bf16 %v12440_v16, %v12442_v13 }
 0x58c   : > { %6074 = vmatprep.mubr.bf16.mxu1 %v13062_v24  ;;  %v5602_v57 = vpop.f32.mrf.mxu1  ;;  %v12446_v59 = vpop.eup %12445  ;;  %12455 = vtanh.f32 %v6213_v63  ;;  %v6214_v11 = vadd.f32 %v15674_v31, %v5597_v0  ;;  %v5601_v10 = vadd.f32 %v5600_v38, %v5408_v49  ;;  %v5410_v56 = vadd.f32 %v5409_v58, %v18318_v5  ;;  %v18321_v0 = vld [vmem:[#allocation200_spill] sm:$0xff] }
 0x58d   : > { %18317 = vst [vmem:[#allocation114_spill] sm:$0xff] %v15752_v23  ;;  %12457 = vtanh.f32 %v6205_v25  ;;  %v5411_v29 = vpop.f32.mrf.mxu0  ;;  %v15756_v36 = vpack.c.bf16 %v12444_v39, %v12446_v59  ;;  %v13063_v23 = vld [vmem:[%s13403_s15 + $0x1c0] ss:$16 sps:$4 sm:$0xff]   ;;  %v13064_v39 = vld [vmem:[%s13403_s15 + $0x1c8] ss:$16 sps:$4 sm:$0xff]  }
 0x58e   : > { %v5604_v37 = vpop.f32.mrf.mxu1  ;;  %12459 = vtanh.f32 %v6214_v11  ;;  %v5603_v12 = vadd.f32 %v5602_v57, %v5410_v56  ;;  %v5412_v24 = vadd.f32 %v5411_v29, %v18320_v15  ;;  %v6221_v25 = vadd.f32 %v15668_v35, %v5601_v10  ;;  %v18322_v11 = vld [vmem:[#allocation202_spill] sm:$0xff] }
 0x58f   : > { %18319 = vst [vmem:[#allocation116_spill] sm:$0xff] %v15756_v36  ;;  %12461 = vtanh.f32 %v6206_v40  ;;  %v5413_v16 = vpop.f32.mrf.mxu0  ;;  %v13065_v29 = vld [vmem:[%s13403_s15 + $0x1e4] ss:$16 sps:$4 sm:$0xff]  }
 0x590   : > { %v5606_v13 = vpop.f32.mrf.mxu1  ;;  %v5605_v63 = vadd.f32 %v5604_v37, %v5412_v24  ;;  %v5414_v38 = vadd.f32 %v5413_v16, %v18321_v0  ;;  %5882 = vmatmul.mubr.bf16.gmra.mxu0 %v13063_v23  ;;  %v13066_v37 = vld [vmem:[%s13403_s15 + $0x1ec] ss:$16 sps:$4 sm:$0xff]   ;;  %v6222_v24 = vadd.f32 %v15674_v31, %v5603_v12 }
 0x591   : > { %v12448_v49 = vpop.eup %12447  ;;  %v5417_v58 = vpop.f32.mrf.mxu0  ;;  %5891 = vmatprep.mubr.bf16.mxu0 %v13065_v29  ;;  %v18326_v29 = vld [vmem:[#allocation206_spill] sm:$0xff] }
 0x592   : > { %v12450_v57 = vpop.eup %12449  ;;  %v6229_v59 = vadd.f32 %v15668_v35, %v5605_v63  ;;  %v5607_v40 = vadd.f32 %v5606_v13, %v5414_v38  ;;  %v5418_v56 = vadd.f32 %v5417_v58, %v18322_v11  ;;  %v18324_v63 = vld [vmem:[#allocation204_spill] sm:$0xff] }
 0x593   : > { %v5610_v5 = vpop.f32.mrf.mxu1  ;;  %6075 = vmatmul.mubr.bf16.gmra.mxu1 %v13064_v39  ;;  %v12452_v15 = vpop.eup %12451  ;;  %v15768_v0 = vpack.c.bf16 %v12448_v49, %v12450_v57 }
 0x594   : > { %6084 = vmatprep.mubr.bf16.mxu1 %v13066_v37  ;;  %v5419_v10 = vpop.f32.mrf.mxu0  ;;  %v12454_v23 = vpop.eup %12453  ;;  %12463 = vtanh.f32 %v6229_v59  ;;  %v6230_v39 = vadd.f32 %v15674_v31, %v5607_v40  ;;  %v5611_v36 = vadd.f32 %v5610_v5, %v5418_v56 }
 0x595   : > { %v5612_v16 = vpop.f32.mrf.mxu1  ;;  %18323 = vst [vmem:[#allocation118_spill] sm:$0xff] %v15768_v0  ;;  %v5420_v13 = vadd.f32 %v5419_v10, %v18324_v63  ;;  %12465 = vtanh.f32 %v6221_v25  ;;  %v15772_v11 = vpack.c.bf16 %v12452_v15, %v12454_v23  ;;  %v18327_v0 = vld [vmem:[#allocation208_spill] sm:$0xff] }
 0x596   : > { %v5421_v38 = vpop.f32.mrf.mxu0  ;;  %12467 = vtanh.f32 %v6230_v39  ;;  %v6237_v56 = vadd.f32 %v15668_v35, %v5611_v36  ;;  %v13067_v63 = vld [vmem:[%s13403_s15 + $0x1e0] ss:$16 sps:$4 sm:$0xff]   ;;  %s17504_s15 = scalar_lea.vmem %s18811_s17, %s10502_s25 }
 0x597   : > { %v5614_v58 = vpop.f32.mrf.mxu1  ;;  %18325 = vst [vmem:[#allocation120_spill] sm:$0xff] %v15772_v11  ;;  %v5613_v12 = vadd.f32 %v5612_v16, %v5420_v13  ;;  %v5422_v37 = vadd.f32 %v5421_v38, %v18326_v29  ;;  %12469 = vtanh.f32 %v6222_v24  ;;  %v18328_v39 = vld [vmem:[#allocation210_spill] sm:$0xff] }
 0x598   : > { %v5423_v49 = vpop.f32.mrf.mxu0  ;;  %5892 = vmatmul.mubr.bf16.gmra.mxu0 %v13067_v63 }
 0x599   : > { %v5616_v57 = vpop.f32.mrf.mxu1  ;;  %v5615_v59 = vadd.f32 %v5614_v58, %v5422_v37  ;;  %v5424_v40 = vadd.f32 %v5423_v49, %v18327_v0  ;;  %v12456_v5 = vpop.eup %12455  ;;  %8367 = vmatprep.mubr.bf16.mxu0 %v14944_v50  ;;  %v6238_v13 = vadd.f32 %v15674_v31, %v5613_v12  ;;  %v18330_v49 = vld [vmem:[#allocation212_spill] sm:$0xff] }
 0x59a   : > { %v5427_v25 = vpop.f32.mrf.mxu0  ;;  %v12458_v15 = vpop.eup %12457  ;;  %v11690_v50 = vld [vmem:[#allocation7 + $0x6e0] ss:$16 sps:$4 sm:$0xff]  }
 0x59b   : > { %v5620_v10 = vpop.f32.mrf.mxu1  ;;  %6085 = vmatmul.mubr.bf16.gmra.mxu1 %v13068_v60  ;;  %v6245_v16 = vadd.f32 %v15668_v35, %v5615_v59  ;;  %v5617_v23 = vadd.f32 %v5616_v57, %v5424_v40  ;;  %v5428_v24 = vadd.f32 %v5427_v25, %v18328_v39  ;;  %v12460_v0 = vpop.eup %12459  ;;  %v15784_v58 = vpack.c.bf16 %v12456_v5, %v12458_v15  ;;  %v18332_v39 = vld [vmem:[#allocation214_spill] sm:$0xff] }
 0x59c   : > { %8560 = vmatprep.mubr.bf16.mxu1 %v15459_v54  ;;  %v5429_v36 = vpop.f32.mrf.mxu0  ;;  %v12462_v29 = vpop.eup %12461  ;;  %v11687_v54 = vld [vmem:[#allocation7 + $0x4e0] ss:$16 sps:$4 sm:$0xff]  }
 0x59d   : > { %v5622_v38 = vpop.f32.mrf.mxu1  ;;  %18329 = vst [vmem:[#allocation122_spill] sm:$0xff] %v15784_v58  ;;  %12471 = vtanh.f32 %v6245_v16  ;;  %v6246_v60 = vadd.f32 %v15674_v31, %v5617_v23  ;;  %v5621_v37 = vadd.f32 %v5620_v10, %v5428_v24  ;;  %v5430_v57 = vadd.f32 %v5429_v36, %v18330_v49  ;;  %v18333_v58 = vld [vmem:[#allocation216_spill] sm:$0xff] }
 0x59e   : > { %12473 = vtanh.f32 %v6237_v56  ;;  %v5431_v59 = vpop.f32.mrf.mxu0  ;;  %v15788_v25 = vpack.c.bf16 %v12460_v0, %v12462_v29  ;;  %v11695_v10 = vld [vmem:[#allocation7 + $0x4c4] ss:$16 sps:$4 sm:$0xff]  }
 0x59f   : > { %v5624_v40 = vpop.f32.mrf.mxu1  ;;  %12475 = vtanh.f32 %v6246_v60  ;;  %v5623_v63 = vadd.f32 %v5622_v38, %v5430_v57  ;;  %v5432_v12 = vadd.f32 %v5431_v59, %v18332_v39  ;;  %v11698_v24 = vld [vmem:[#allocation7 + $0x6c4] ss:$16 sps:$4 sm:$0xff]   ;;  %v6253_v56 = vadd.f32 %v15668_v35, %v5621_v37  ;;  %v11696_v39 = vld [vmem:[#allocation7 + $0x6c0] ss:$16 sps:$4 sm:$0xff]  }
 0x5a0   : > { %18331 = vst [vmem:[#allocation124_spill] sm:$0xff] %v15788_v25  ;;  %12477 = vtanh.f32 %v6238_v13  ;;  %v5433_v5 = vpop.f32.mrf.mxu0  ;;  %8368 = vmatmul.mubr.bf16.vlgmr.msra.gmra.mxu0 %v14933_v62  ;;  %v18404_v62 = vld [vmem:[#allocation137_spill] sm:$0xff] }
 0x5a1   : > { %v5626_v15 = vpop.f32.mrf.mxu1  ;;  %v5625_v16 = vadd.f32 %v5624_v40, %v5432_v12  ;;  %v5434_v23 = vadd.f32 %v5433_v5, %v18333_v58  ;;  %v12464_v36 = vpop.eup %12463  ;;  %8722 = vmatpush1.bf16.msra.mxu0 %v11687_v54  ;;  %8377 = vmatprep.mubr.bf16.mxu0 %v14958_v53  ;;  %v11693_v58 = vld [vmem:[#allocation7 + $0x4c0] ss:$16 sps:$4 sm:$0xff]   ;;  %v6254_v59 = vadd.f32 %v15674_v31, %v5623_v63  ;;  %v11701_v12 = vld [vmem:[#allocation7 + $0x4a4] ss:$16 sps:$4 sm:$0xff]  }
 0x5a2   : > { %v5437_v49 = vpop.f32.mrf.mxu0  ;;  %v12466_v38 = vpop.eup %12465  ;;  %8723 = vmatprep.subr.bf16.mxu0 %v11695_v10 }
 0x5a3   : > { %v5630_v0 = vpop.f32.mrf.mxu1  ;;  %8561 = vmatmul.mubr.bf16.vlgmr.msra.gmra.mxu1 %v15450_v41  ;;  %v6261_v13 = vadd.f32 %v15668_v35, %v5625_v16  ;;  %v5627_v29 = vadd.f32 %v5626_v15, %v5434_v23  ;;  %v5438_v60 = vadd.f32 %v5437_v49, %v14699_v20  ;;  %v12468_v57 = vpop.eup %12467  ;;  %v15800_v5 = vpack.c.bf16 %v12464_v36, %v12466_v38  ;;  %v18335_v15 = vld [vmem:[#allocation219_spill] sm:$0xff]  ;;  %v11704_v49 = vld [vmem:[#allocation7 + $0x6a4] ss:$16 sps:$4 sm:$0xff]   ;;  %v18337_v41 = vld [vmem:[#allocation221_spill] sm:$0xff] }
 0x5a4   : > { %8570 = vmatprep.mubr.bf16.mxu1 %v15475_v18  ;;  %v5439_v37 = vpop.f32.mrf.mxu0  ;;  %8915 = vmatpush1.bf16.msra.mxu1 %v11690_v50  ;;  %v12470_v16 = vpop.eup %12469 }
 0x5a5   : > { %v5632_v40 = vpop.f32.mrf.mxu1  ;;  %18334 = vst [vmem:[#allocation126_spill] sm:$0xff] %v15800_v5  ;;  %12479 = vtanh.f32 %v6261_v13  ;;  %v6262_v20 = vadd.f32 %v15674_v31, %v5627_v29  ;;  %v5631_v54 = vadd.f32 %v5630_v0, %v5438_v60  ;;  %v5440_v23 = vadd.f32 %v5439_v37, %v18335_v15  ;;  %8916 = vmatprep.subr.bf16.mxu1 %v11698_v24  ;;  %v11699_v0 = vld [vmem:[#allocation7 + $0x4a0] ss:$16 sps:$4 sm:$0xff]   ;;  %v18338_v24 = vld [vmem:[#allocation223_spill] sm:$0xff]  ;;  %v11710_v37 = vld [vmem:[#allocation7 + $0x684] ss:$16 sps:$4 sm:$0xff]  }
 0x5a6   : > { %12481 = vtanh.f32 %v6253_v56  ;;  %v5441_v63 = vpop.f32.mrf.mxu0  ;;  %v15804_v53 = vpack.c.bf16 %v12468_v57, %v12470_v16  ;;  %8724 = vmatpush1.bf16.msra.mxu0 %v11693_v58  ;;  %v11702_v29 = vld [vmem:[#allocation7 + $0x6a0] ss:$16 sps:$4 sm:$0xff]   ;;  %v11707_v56 = vld [vmem:[#allocation7 + $0x484] ss:$16 sps:$4 sm:$0xff]  }
 0x5a7   : > { %v5634_v18 = vpop.f32.mrf.mxu1  ;;  %12483 = vtanh.f32 %v6262_v20  ;;  %v5633_v50 = vadd.f32 %v5632_v40, %v5440_v23  ;;  %v5442_v36 = vadd.f32 %v5441_v63, %v18337_v41  ;;  %8725 = vmatprep.subr.bf16.mxu0 %v11701_v12  ;;  %v6269_v16 = vadd.f32 %v15668_v35, %v5631_v54  ;;  %v11708_v63 = vld [vmem:[#allocation7 + $0x680] ss:$16 sps:$4 sm:$0xff]  }
 0x5a8   : > { %18336 = vst [vmem:[#allocation128_spill] sm:$0xff] %v15804_v53  ;;  %12485 = vtanh.f32 %v6254_v59  ;;  %v5443_v38 = vpop.f32.mrf.mxu0  ;;  %8917 = vmatpush1.bf16.msra.mxu1 %v11696_v39  ;;  %8378 = vmatmul.mubr.bf16.gmra.mxu0 %v14954_v43  ;;  %v18339_v39 = vld [vmem:[#allocation225_spill] sm:$0xff] }
 0x5a9   : > { %v5636_v13 = vpop.f32.mrf.mxu1  ;;  %v5635_v10 = vadd.f32 %v5634_v18, %v5442_v36  ;;  %v5444_v60 = vadd.f32 %v5443_v38, %v18338_v24  ;;  %8918 = vmatprep.subr.bf16.mxu1 %v11704_v49  ;;  %8387 = vmatprep.mubr.bf16.mxu0 %v14974_v2  ;;  %v6270_v15 = vadd.f32 %v15674_v31, %v5633_v50  ;;  %v11705_v49 = vld [vmem:[#allocation7 + $0x480] ss:$16 sps:$4 sm:$0xff]   ;;  %v18341_v24 = vld [vmem:[#allocation227_spill] sm:$0xff] }
 0x5aa   : > { %v12472_v57 = vpop.eup %12471  ;;  %v5447_v40 = vpop.f32.mrf.mxu0  ;;  %8726 = vmatpush1.bf16.msra.mxu0 %v11699_v0 }
 0x5ab   : > { %v5640_v20 = vpop.f32.mrf.mxu1  ;;  %8571 = vmatmul.mubr.bf16.gmra.mxu1 %v15471_v51  ;;  %v12474_v41 = vpop.eup %12473  ;;  %v6277_v58 = vadd.f32 %v15668_v35, %v5635_v10  ;;  %v5637_v59 = vadd.f32 %v5636_v13, %v5444_v60  ;;  %v5448_v18 = vadd.f32 %v5447_v40, %v18339_v39  ;;  %8727 = vmatprep.subr.bf16.mxu0 %v11707_v56  ;;  %v11713_v40 = vld [vmem:[#allocation7 + $0x464] ss:$16 sps:$4 sm:$0xff]  }
 0x5ac   : > { %8580 = vmatprep.mubr.bf16.mxu1 %v15491_v55  ;;  %v12476_v12 = vpop.eup %12475  ;;  %v5449_v54 = vpop.f32.mrf.mxu0  ;;  %8919 = vmatpush1.bf16.msra.mxu1 %v11702_v29  ;;  %v15816_v36 = vpack.c.bf16 %v12472_v57, %v12474_v41  ;;  %v11716_v39 = vld [vmem:[#allocation7 + $0x664] ss:$16 sps:$4 sm:$0xff]  }
 0x5ad   : > { %v5642_v23 = vpop.f32.mrf.mxu1  ;;  %v12478_v38 = vpop.eup %12477  ;;  %12487 = vtanh.f32 %v6277_v58  ;;  %v6278_v13 = vadd.f32 %v15674_v31, %v5637_v59  ;;  %v5641_v10 = vadd.f32 %v5640_v20, %v5448_v18  ;;  %v5450_v60 = vadd.f32 %v5449_v54, %v18341_v24  ;;  %8920 = vmatprep.subr.bf16.mxu1 %v11710_v37  ;;  %v11711_v20 = vld [vmem:[#allocation7 + $0x460] ss:$16 sps:$4 sm:$0xff]   ;;  %v11722_v18 = vld [vmem:[#allocation7 + $0x644] ss:$16 sps:$4 sm:$0xff]  }
 0x5ae   : > { %18340 = vst [vmem:[#allocation130_spill] sm:$0xff] %v15816_v36  ;;  %12489 = vtanh.f32 %v6269_v16  ;;  %v5451_v50 = vpop.f32.mrf.mxu0  ;;  %v15820_v0 = vpack.c.bf16 %v12476_v12, %v12478_v38  ;;  %8728 = vmatpush1.bf16.msra.mxu0 %v11705_v49  ;;  %v11714_v59 = vld [vmem:[#allocation7 + $0x660] ss:$16 sps:$4 sm:$0xff]   ;;  %v11719_v16 = vld [vmem:[#allocation7 + $0x444] ss:$16 sps:$4 sm:$0xff]  }
 0x5af   : > { %v5644_v55 = vpop.f32.mrf.mxu1  ;;  %12491 = vtanh.f32 %v6278_v13  ;;  %v5643_v29 = vadd.f32 %v5642_v23, %v5450_v60  ;;  %v5452_v57 = vadd.f32 %v5451_v50, %v14749_v22  ;;  %8729 = vmatprep.subr.bf16.mxu0 %v11713_v40  ;;  %v6285_v54 = vadd.f32 %v15668_v35, %v5641_v10  ;;  %v11717_v24 = vld [vmem:[#allocation7 + $0x440] ss:$16 sps:$4 sm:$0xff]  }
 0x5b0   : > { %18342 = vst [vmem:[#allocation132_spill] sm:$0xff] %v15820_v0  ;;  %12493 = vtanh.f32 %v6270_v15  ;;  %v5453_v41 = vpop.f32.mrf.mxu0  ;;  %8921 = vmatpush1.bf16.msra.mxu1 %v11708_v63  ;;  %8388 = vmatmul.mubr.bf16.gmra.mxu0 %v14969_v14  ;;  %v11720_v60 = vld [vmem:[#allocation7 + $0x640] ss:$16 sps:$4 sm:$0xff]  }
 0x5b1   : > { %v5646_v58 = vpop.f32.mrf.mxu1  ;;  %v5645_v56 = vadd.f32 %v5644_v55, %v5452_v57  ;;  %v5454_v37 = vadd.f32 %v5453_v41, %v14753_v52  ;;  %8922 = vmatprep.subr.bf16.mxu1 %v11716_v39  ;;  %8397 = vmatprep.mubr.bf16.mxu0 %v14990_v7  ;;  %v6286_v63 = vadd.f32 %v15674_v31, %v5643_v29  ;;  %v11725_v41 = vld [vmem:[#allocation7 + $0x424] ss:$16 sps:$4 sm:$0xff]  }
 0x5b2   : > { %v12480_v12 = vpop.eup %12479  ;;  %v5457_v23 = vpop.f32.mrf.mxu0  ;;  %8730 = vmatpush1.bf16.msra.mxu0 %v11711_v20  ;;  %v18401_v14 = vld [vmem:[#allocation86_spill] sm:$0xff] }
 0x5b3   : > { %v5650_v38 = vpop.f32.mrf.mxu1  ;;  %8581 = vmatmul.mubr.bf16.gmra.mxu1 %v15487_v48  ;;  %v12482_v22 = vpop.eup %12481  ;;  %v6293_v15 = vadd.f32 %v15668_v35, %v5645_v56  ;;  %v5647_v49 = vadd.f32 %v5646_v58, %v5454_v37  ;;  %v5458_v55 = vadd.f32 %v5457_v23, %v14757_v33  ;;  %8731 = vmatprep.subr.bf16.mxu0 %v11719_v16  ;;  %v11728_v58 = vld [vmem:[#allocation7 + $0x624] ss:$16 sps:$4 sm:$0xff]  }
 0x5b4   : > { %8590 = vmatprep.mubr.bf16.mxu1 %v15507_v4  ;;  %v12484_v52 = vpop.eup %12483  ;;  %v5459_v13 = vpop.f32.mrf.mxu0  ;;  %8923 = vmatpush1.bf16.msra.mxu1 %v11714_v59  ;;  %v15832_v40 = vpack.c.bf16 %v12480_v12, %v12482_v22  ;;  %v11734_v22 = vld [vmem:[#allocation7 + $0x604] ss:$16 sps:$4 sm:$0xff]  }
 0x5b5   : > { %v5652_v10 = vpop.f32.mrf.mxu1  ;;  %v12486_v39 = vpop.eup %12485  ;;  %12495 = vtanh.f32 %v6293_v15  ;;  %v6294_v50 = vadd.f32 %v15674_v31, %v5647_v49  ;;  %v5651_v33 = vadd.f32 %v5650_v38, %v5458_v55  ;;  %v5460_v57 = vadd.f32 %v5459_v13, %v14765_v46  ;;  %8924 = vmatprep.subr.bf16.mxu1 %v11722_v18  ;;  %v11723_v38 = vld [vmem:[#allocation7 + $0x420] ss:$16 sps:$4 sm:$0xff]  }
 0x5b6   : > { %18343 = vst [vmem:[#allocation10_spill] sm:$0xff] %v15832_v40  ;;  %12497 = vtanh.f32 %v6285_v54  ;;  %v5461_v29 = vpop.f32.mrf.mxu0  ;;  %v15836_v20 = vpack.c.bf16 %v12484_v52, %v12486_v39  ;;  %8732 = vmatpush1.bf16.msra.mxu0 %v11717_v24  ;;  %v11726_v46 = vld [vmem:[#allocation7 + $0x620] ss:$16 sps:$4 sm:$0xff]   ;;  %v11731_v54 = vld [vmem:[#allocation7 + $0x404] ss:$16 sps:$4 sm:$0xff]  }
 0x5b7   : > { %v5654_v56 = vpop.f32.mrf.mxu1  ;;  %12499 = vtanh.f32 %v6294_v50  ;;  %v5653_v59 = vadd.f32 %v5652_v10, %v5460_v57  ;;  %v5462_v37 = vadd.f32 %v5461_v29, %v14769_v34  ;;  %8733 = vmatprep.subr.bf16.mxu0 %v11725_v41  ;;  %v6301_v49 = vadd.f32 %v15668_v35, %v5651_v33  ;;  %v11729_v50 = vld [vmem:[#allocation7 + $0x400] ss:$16 sps:$4 sm:$0xff]  }
 0x5b8   : > { %18344 = vst [vmem:[#allocation11_spill] sm:$0xff] %v15836_v20  ;;  %12501 = vtanh.f32 %v6286_v63  ;;  %v5463_v12 = vpop.f32.mrf.mxu0  ;;  %8925 = vmatpush1.bf16.msra.mxu1 %v11720_v60  ;;  %8398 = vmatmul.mubr.bf16.gmra.mxu0 %v14986_v17  ;;  %v11732_v33 = vld [vmem:[#allocation7 + $0x600] ss:$16 sps:$4 sm:$0xff]  }
 0x5b9   : > { %v5656_v23 = vpop.f32.mrf.mxu1  ;;  %v5655_v16 = vadd.f32 %v5654_v56, %v5462_v37  ;;  %v5464_v18 = vadd.f32 %v5463_v12, %v14773_v28  ;;  %8926 = vmatprep.subr.bf16.mxu1 %v11728_v58  ;;  %8407 = vmatprep.mubr.bf16.mxu0 %v15021_v3  ;;  %v6302_v24 = vadd.f32 %v15674_v31, %v5653_v59  ;;  %v11737_v56 = vld [vmem:[#allocation7 + $0x5e4] ss:$16 sps:$4 sm:$0xff]  }
 0x5ba   : > { %v12488_v15 = vpop.eup %12487  ;;  %v5467_v55 = vpop.f32.mrf.mxu0  ;;  %8734 = vmatpush1.bf16.msra.mxu0 %v11723_v38  ;;  %v11740_v37 = vld [vmem:[#allocation7 + $0x7e4] ss:$16 sps:$4 sm:$0xff]  }
 0x5bb   : > { %v5660_v52 = vpop.f32.mrf.mxu1  ;;  %8591 = vmatmul.mubr.bf16.gmra.mxu1 %v15503_v26  ;;  %v12490_v34 = vpop.eup %12489  ;;  %v6309_v63 = vadd.f32 %v15668_v35, %v5655_v16  ;;  %v5657_v13 = vadd.f32 %v5656_v23, %v5464_v18  ;;  %v5468_v10 = vadd.f32 %v5467_v55, %v14777_v19  ;;  %8735 = vmatprep.subr.bf16.mxu0 %v11731_v54  ;;  %v11746_v55 = vld [vmem:[#allocation7 + $0x7c4] ss:$16 sps:$4 sm:$0xff]  }
 0x5bc   : > { %8600 = vmatprep.mubr.bf16.mxu1 %v15523_v1  ;;  %v12492_v28 = vpop.eup %12491  ;;  %v5469_v60 = vpop.f32.mrf.mxu0  ;;  %8927 = vmatpush1.bf16.msra.mxu1 %v11726_v46  ;;  %v15848_v57 = vpack.c.bf16 %v12488_v15, %v12490_v34  ;;  %v11735_v15 = vld [vmem:[#allocation7 + $0x5e0] ss:$16 sps:$4 sm:$0xff]  }
 0x5bd   : > { %v5662_v39 = vpop.f32.mrf.mxu1  ;;  %v12494_v41 = vpop.eup %12493  ;;  %12503 = vtanh.f32 %v6309_v63  ;;  %v6310_v58 = vadd.f32 %v15674_v31, %v5657_v13  ;;  %v5661_v19 = vadd.f32 %v5660_v52, %v5468_v10  ;;  %v5470_v29 = vadd.f32 %v5469_v60, %v14785_v6  ;;  %8928 = vmatprep.subr.bf16.mxu1 %v11734_v22  ;;  %v11738_v6 = vld [vmem:[#allocation7 + $0x7e0] ss:$16 sps:$4 sm:$0xff]  }
 0x5be   : > { %18345 = vst [vmem:[#allocation12_spill] sm:$0xff] %v15848_v57  ;;  %12505 = vtanh.f32 %v6301_v49  ;;  %v5471_v59 = vpop.f32.mrf.mxu0  ;;  %v15852_v23 = vpack.c.bf16 %v12492_v28, %v12494_v41  ;;  %8736 = vmatpush1.bf16.msra.mxu0 %v11729_v50  ;;  %v11743_v49 = vld [vmem:[#allocation7 + $0x5c4] ss:$16 sps:$4 sm:$0xff]   ;;  %v11741_v41 = vld [vmem:[#allocation7 + $0x5c0] ss:$16 sps:$4 sm:$0xff]  }
 0x5bf   : > { %v5664_v12 = vpop.f32.mrf.mxu1  ;;  %12507 = vtanh.f32 %v6310_v58  ;;  %v5663_v38 = vadd.f32 %v5662_v39, %v5470_v29  ;;  %v5472_v46 = vadd.f32 %v5471_v59, %v14789_v61  ;;  %8737 = vmatprep.subr.bf16.mxu0 %v11737_v56  ;;  %v6317_v34 = vadd.f32 %v15668_v35, %v5661_v19  ;;  %v11744_v58 = vld [vmem:[#allocation7 + $0x7c0] ss:$16 sps:$4 sm:$0xff]   ;;  %v11791_v57 = vld [vmem:[#allocation7 + $0xcc] ss:$16 sps:$4 sm:$0xff]  }
 0x5c0   : > { %18346 = vst [vmem:[#allocation13_spill] sm:$0xff] %v15852_v23  ;;  %12509 = vtanh.f32 %v6302_v24  ;;  %v5473_v16 = vpop.f32.mrf.mxu0  ;;  %8929 = vmatpush1.bf16.msra.mxu1 %v11732_v33  ;;  %8408 = vmatmul.mubr.bf16.gmra.mxu0 %v15002_v45  ;;  %v18397_v45 = vld [vmem:[#allocation88_spill] sm:$0xff]  ;;  %v18400_v48 = vld [vmem:[#allocation174_spill] sm:$0xff] }
 0x5c1   : > { %v5666_v18 = vpop.f32.mrf.mxu1  ;;  %v5665_v54 = vadd.f32 %v5664_v12, %v5472_v46  ;;  %v5474_v22 = vadd.f32 %v5473_v16, %v14793_v8  ;;  %8930 = vmatprep.subr.bf16.mxu1 %v11740_v37  ;;  %v18347_v8 = vld [vmem:[#allocation24_spill] sm:$0xff]  ;;  %v6318_v39 = vadd.f32 %v15674_v31, %v5663_v38 }
 0x5c2   : > { %v12496_v52 = vpop.eup %12495  ;;  %v5477_v63 = vpop.f32.mrf.mxu0  ;;  %8417 = vmatprep.mubr.bf16.mxu0 %v18347_v8  ;;  %8738 = vmatpush2.bf16.msra.mxu0 %v11735_v15  ;;  %v18349_v37 = vld [vmem:[#allocation240_spill] sm:$0xff] }
 0x5c3   : > { %v5670_v13 = vpop.f32.mrf.mxu1  ;;  %8601 = vmatmul.mubr.bf16.gmra.mxu1 %v15519_v32  ;;  %v12498_v61 = vpop.eup %12497  ;;  %v6325_v10 = vadd.f32 %v15668_v35, %v5665_v54  ;;  %v5667_v28 = vadd.f32 %v5666_v18, %v5474_v22  ;;  %v5478_v24 = vadd.f32 %v5477_v63, %v14797_v9  ;;  %8739 = vmatprep.subr.bf16.mxu0 %v11743_v49  ;;  %v11749_v12 = vld [vmem:[#allocation7 + $0x5a4] ss:$16 sps:$4 sm:$0xff]   ;;  %v11747_v63 = vld [vmem:[#allocation7 + $0x5a0] ss:$16 sps:$4 sm:$0xff]  }
 0x5c4   : > { %8610 = vmatprep.mubr.bf16.mxu1 %v15539_v27  ;;  %v12500_v60 = vpop.eup %12499  ;;  %v5479_v50 = vpop.f32.mrf.mxu0  ;;  %8931 = vmatpush2.bf16.msra.mxu1 %v11738_v6  ;;  %v15864_v19 = vpack.c.bf16 %v12496_v52, %v12498_v61  ;;  %v11752_v46 = vld [vmem:[#allocation7 + $0x7a4] ss:$16 sps:$4 sm:$0xff]  }
 0x5c5   : > { %v5672_v33 = vpop.f32.mrf.mxu1  ;;  %v12502_v29 = vpop.eup %12501  ;;  %12511 = vtanh.f32 %v6325_v10  ;;  %v6326_v56 = vadd.f32 %v15674_v31, %v5667_v28  ;;  %v5671_v9 = vadd.f32 %v5670_v13, %v5478_v24  ;;  %v5480_v59 = vadd.f32 %v5479_v50, %v18349_v37  ;;  %8932 = vmatprep.subr.bf16.mxu1 %v11746_v55  ;;  %v18351_v6 = vld [vmem:[#allocation242_spill] sm:$0xff]  ;;  %v18352_v55 = vld [vmem:[#allocation244_spill] sm:$0xff] }
 0x5c6   : > { %18348 = vst [vmem:[#allocation15_spill] sm:$0xff] %v15864_v19  ;;  %12513 = vtanh.f32 %v6317_v34  ;;  %v5481_v38 = vpop.f32.mrf.mxu0  ;;  %v15868_v18 = vpack.c.bf16 %v12500_v60, %v12502_v29  ;;  %8740 = vmatpush2.bf16.msra.mxu0 %v11741_v41  ;;  %v11750_v13 = vld [vmem:[#allocation7 + $0x7a0] ss:$16 sps:$4 sm:$0xff]   ;;  %v11755_v34 = vld [vmem:[#allocation7 + $0x584] ss:$16 sps:$4 sm:$0xff]  }
 0x5c7   : > { %v5674_v16 = vpop.f32.mrf.mxu1  ;;  %12515 = vtanh.f32 %v6326_v56  ;;  %v5673_v15 = vadd.f32 %v5672_v33, %v5480_v59  ;;  %v5482_v54 = vadd.f32 %v5481_v38, %v18351_v6  ;;  %8741 = vmatprep.subr.bf16.mxu0 %v11749_v12  ;;  %v11758_v10 = vld [vmem:[#allocation7 + $0x784] ss:$16 sps:$4 sm:$0xff]   ;;  %v6333_v24 = vadd.f32 %v15668_v35, %v5671_v9  ;;  %v18353_v33 = vld [vmem:[#allocation153_spill] sm:$0xff]  ;;  %v11756_v6 = vld [vmem:[#allocation7 + $0x780] ss:$16 sps:$4 sm:$0xff]  }
 0x5c8   : > { %18350 = vst [vmem:[#allocation17_spill] sm:$0xff] %v15868_v18  ;;  %12517 = vtanh.f32 %v6318_v39  ;;  %v5483_v22 = vpop.f32.mrf.mxu0  ;;  %8933 = vmatpush2.bf16.msra.mxu1 %v11744_v58  ;;  %8418 = vmatmul.mubr.bf16.gmra.mxu0 %v18353_v33  ;;  %v18354_v29 = vld [vmem:[#allocation246_spill] sm:$0xff]  ;;  %v18355_v37 = vld [vmem:[#allocation28_spill] sm:$0xff] }
 0x5c9   : > { %v5676_v52 = vpop.f32.mrf.mxu1  ;;  %v5675_v49 = vadd.f32 %v5674_v16, %v5482_v54  ;;  %v5484_v61 = vadd.f32 %v5483_v22, %v18352_v55  ;;  %8934 = vmatprep.subr.bf16.mxu1 %v11752_v46  ;;  %8427 = vmatprep.mubr.bf16.mxu0 %v18355_v37  ;;  %v18356_v59 = vld [vmem:[#allocation68_spill] sm:$0xff]  ;;  %v6334_v46 = vadd.f32 %v15674_v31, %v5673_v15  ;;  %v18395_v32 = vld [vmem:[#allocation82_spill] sm:$0xff] }
 0x5ca   : > { %v12504_v28 = vpop.eup %12503  ;;  %v5487_v60 = vpop.f32.mrf.mxu0  ;;  %8742 = vmatpush2.bf16.msra.mxu0 %v11747_v63  ;;  %v11753_v16 = vld [vmem:[#allocation7 + $0x580] ss:$16 sps:$4 sm:$0xff]  }
 0x5cb   : > { %v5680_v50 = vpop.f32.mrf.mxu1  ;;  %8611 = vmatmul.mubr.bf16.gmra.mxu1 %v15535_v44  ;;  %v12506_v39 = vpop.eup %12505  ;;  %v6341_v41 = vadd.f32 %v15668_v35, %v5675_v49  ;;  %v5677_v58 = vadd.f32 %v5676_v52, %v5484_v61  ;;  %v5488_v56 = vadd.f32 %v5487_v60, %v18354_v29  ;;  %v18358_v55 = vld [vmem:[#allocation248_spill] sm:$0xff]  ;;  %8743 = vmatprep.subr.bf16.mxu0 %v11755_v34 }
 0x5cc   : > { %8620 = vmatprep.mubr.bf16.mxu1 %v18356_v59  ;;  %v12508_v12 = vpop.eup %12507  ;;  %v5489_v9 = vpop.f32.mrf.mxu0  ;;  %8935 = vmatpush2.bf16.msra.mxu1 %v11750_v13  ;;  %v15880_v54 = vpack.c.bf16 %v12504_v28, %v12506_v39  ;;  %v11761_v60 = vld [vmem:[#allocation7 + $0x564] ss:$16 sps:$4 sm:$0xff]  }
 0x5cd   : > { %v5682_v38 = vpop.f32.mrf.mxu1  ;;  %v12510_v22 = vpop.eup %12509  ;;  %12519 = vtanh.f32 %v6341_v41  ;;  %v6342_v52 = vadd.f32 %v15674_v31, %v5677_v58  ;;  %v5681_v49 = vadd.f32 %v5680_v50, %v5488_v56  ;;  %v5490_v61 = vadd.f32 %v5489_v9, %v18358_v55  ;;  %8936 = vmatprep.subr.bf16.mxu1 %v11758_v10  ;;  %v11764_v29 = vld [vmem:[#allocation7 + $0x764] ss:$16 sps:$4 sm:$0xff]   ;;  %v11759_v50 = vld [vmem:[#allocation7 + $0x560] ss:$16 sps:$4 sm:$0xff]  }
 0x5ce   : > { %18357 = vst [vmem:[#allocation19_spill] sm:$0xff] %v15880_v54  ;;  %12521 = vtanh.f32 %v6333_v24  ;;  %v5491_v15 = vpop.f32.mrf.mxu0  ;;  %v15884_v63 = vpack.c.bf16 %v12508_v12, %v12510_v22  ;;  %v18360_v28 = vld [vmem:[#allocation250_spill] sm:$0xff]  ;;  %8744 = vmatpush2.bf16.msra.mxu0 %v11753_v16  ;;  %v18361_v10 = vld [vmem:[#allocation252_spill] sm:$0xff] }
 0x5cf   : > { %v5684_v59 = vpop.f32.mrf.mxu1  ;;  %12523 = vtanh.f32 %v6342_v52  ;;  %v5683_v13 = vadd.f32 %v5682_v38, %v5490_v61  ;;  %v5492_v39 = vadd.f32 %v5491_v15, %v18360_v28  ;;  %v11762_v58 = vld [vmem:[#allocation7 + $0x760] ss:$16 sps:$4 sm:$0xff]   ;;  %8745 = vmatprep.subr.bf16.mxu0 %v11761_v60  ;;  %v11767_v24 = vld [vmem:[#allocation7 + $0x544] ss:$16 sps:$4 sm:$0xff]   ;;  %v6349_v22 = vadd.f32 %v15668_v35, %v5681_v49  ;;  %v18365_v28 = vld [vmem:[#allocation163_spill] sm:$0xff] }
 0x5d0   : > { %18359 = vst [vmem:[#allocation21_spill] sm:$0xff] %v15884_v63  ;;  %12525 = vtanh.f32 %v6334_v46  ;;  %v5493_v41 = vpop.f32.mrf.mxu0  ;;  %8937 = vmatpush2.bf16.msra.mxu1 %v11756_v6  ;;  %v11770_v9 = vld [vmem:[#allocation7 + $0x744] ss:$16 sps:$4 sm:$0xff]  }
 0x5d1   : > { %v5686_v37 = vpop.f32.mrf.mxu1  ;;  %v5685_v34 = vadd.f32 %v5684_v59, %v5492_v39  ;;  %v5494_v56 = vadd.f32 %v5493_v41, %v18361_v10  ;;  %8938 = vmatprep.subr.bf16.mxu1 %v11764_v29  ;;  %v18362_v55 = vld [vmem:[#allocation26_spill] sm:$0xff]  ;;  %v18366_v60 = vld [vmem:[#allocation72_spill] sm:$0xff]  ;;  %v6350_v39 = vadd.f32 %v15674_v31, %v5683_v13 }
 0x5d2   : > { %v12512_v12 = vpop.eup %12511  ;;  %v5497_v38 = vpop.f32.mrf.mxu0  ;;  %8428 = vmatmul.mubr.bf16.gmra.mxu0 %v18362_v55  ;;  %v18363_v46 = vld [vmem:[#allocation66_spill] sm:$0xff] }
 0x5d3   : > { %v5690_v52 = vpop.f32.mrf.mxu1  ;;  %8621 = vmatmul.mubr.bf16.gmra.mxu1 %v18363_v46  ;;  %v12514_v16 = vpop.eup %12513  ;;  %v6357_v6 = vadd.f32 %v15668_v35, %v5685_v34  ;;  %v5687_v61 = vadd.f32 %v5686_v37, %v5494_v56  ;;  %v18364_v59 = vld [vmem:[#allocation254_spill] sm:$0xff]  ;;  %8437 = vmatprep.mubr.bf16.mxu0 %v18365_v28  ;;  %v18368_v56 = vld [vmem:[#allocation256_spill] sm:$0xff] }
 0x5d4   : > { %v5498_v15 = vadd.f32 %v5497_v38, %v18364_v59  ;;  %8630 = vmatprep.mubr.bf16.mxu1 %v18366_v60  ;;  %v12516_v29 = vpop.eup %12515  ;;  %v5499_v49 = vpop.f32.mrf.mxu0  ;;  %8746 = vmatpush2.bf16.msra.mxu0 %v11759_v50  ;;  %v11765_v10 = vld [vmem:[#allocation7 + $0x540] ss:$16 sps:$4 sm:$0xff]   ;;  %v15896_v46 = vpack.c.bf16 %v12512_v12, %v12514_v16  ;;  %v11773_v59 = vld [vmem:[#allocation7 + $0x524] ss:$16 sps:$4 sm:$0xff]  }
 0x5d5   : > { %v5692_v41 = vpop.f32.mrf.mxu1  ;;  %8939 = vmatpush2.bf16.msra.mxu1 %v11762_v58  ;;  %v11768_v55 = vld [vmem:[#allocation7 + $0x740] ss:$16 sps:$4 sm:$0xff]   ;;  %v12518_v44 = vpop.eup %12517  ;;  %12527 = vtanh.f32 %v6357_v6  ;;  %v6358_v37 = vadd.f32 %v15674_v31, %v5687_v61  ;;  %v5500_v38 = vadd.f32 %v5499_v49, %v18368_v56  ;;  %8747 = vmatprep.subr.bf16.mxu0 %v11767_v24  ;;  %v11776_v60 = vld [vmem:[#allocation7 + $0x724] ss:$16 sps:$4 sm:$0xff]  }
 0x5d6   : > { %18367 = vst [vmem:[#allocation23_spill] sm:$0xff] %v15896_v46  ;;  %v5691_v34 = vadd.f32 %v5690_v52, %v5498_v15  ;;  %8940 = vmatprep.subr.bf16.mxu1 %v11770_v9  ;;  %12529 = vtanh.f32 %v6349_v22  ;;  %v5501_v13 = vpop.f32.mrf.mxu0  ;;  %v15900_v50 = vpack.c.bf16 %v12516_v29, %v12518_v44  ;;  %v18370_v12 = vld [vmem:[#allocation258_spill] sm:$0xff]  ;;  %v18371_v9 = vld [vmem:[#allocation260_spill] sm:$0xff] }
 0x5d7   : > { %v5694_v28 = vpop.f32.mrf.mxu1  ;;  %12531 = vtanh.f32 %v6358_v37  ;;  %v5693_v58 = vadd.f32 %v5692_v41, %v5500_v38  ;;  %v5502_v16 = vadd.f32 %v5501_v13, %v18370_v12  ;;  %v11771_v52 = vld [vmem:[#allocation7 + $0x520] ss:$16 sps:$4 sm:$0xff]   ;;  %v11779_v22 = vld [vmem:[#allocation7 + $0x504] ss:$16 sps:$4 sm:$0xff]   ;;  %v18375_v12 = vld [vmem:[#allocation165_spill] sm:$0xff] }
 0x5d8   : > { %18369 = vst [vmem:[#allocation25_spill] sm:$0xff] %v15900_v50  ;;  %12533 = vtanh.f32 %v6350_v39  ;;  %v5503_v6 = vpop.f32.mrf.mxu0  ;;  %8748 = vmatpush2.bf16.msra.mxu0 %v11765_v10  ;;  %v11774_v61 = vld [vmem:[#allocation7 + $0x720] ss:$16 sps:$4 sm:$0xff]   ;;  %v11782_v49 = vld [vmem:[#allocation7 + $0x704] ss:$16 sps:$4 sm:$0xff]   ;;  %v6365_v29 = vadd.f32 %v15668_v35, %v5691_v34 }
 0x5d9   : > { %v5696_v33 = vpop.f32.mrf.mxu1  ;;  %8941 = vmatpush2.bf16.msra.mxu1 %v11768_v55  ;;  %v5695_v24 = vadd.f32 %v5694_v28, %v5502_v16  ;;  %v5504_v15 = vadd.f32 %v5503_v6, %v18371_v9  ;;  %8749 = vmatprep.subr.bf16.mxu0 %v11773_v59  ;;  %v18372_v56 = vld [vmem:[#allocation162_spill] sm:$0xff]  ;;  %v6366_v16 = vadd.f32 %v15674_v31, %v5693_v58 }
 0x5da   : > { %8942 = vmatprep.subr.bf16.mxu1 %v11776_v60  ;;  %v12520_v44 = vpop.eup %12519  ;;  %v5507_v41 = vpop.f32.mrf.mxu0  ;;  %8438 = vmatmul.mubr.bf16.gmra.mxu0 %v18372_v56  ;;  %v18373_v39 = vld [vmem:[#allocation70_spill] sm:$0xff]  ;;  %v18376_v60 = vld [vmem:[#allocation76_spill] sm:$0xff] }
 0x5db   : > { %v5700_v37 = vpop.f32.mrf.mxu1  ;;  %8631 = vmatmul.mubr.bf16.gmra.mxu1 %v18373_v39  ;;  %v12522_v10 = vpop.eup %12521  ;;  %v6373_v55 = vadd.f32 %v15668_v35, %v5695_v24  ;;  %v5697_v38 = vadd.f32 %v5696_v33, %v5504_v15  ;;  %v18374_v28 = vld [vmem:[#allocation262_spill] sm:$0xff]  ;;  %8447 = vmatprep.mubr.bf16.mxu0 %v18375_v12  ;;  %v18378_v15 = vld [vmem:[#allocation264_spill] sm:$0xff] }
 0x5dc   : > { %v5508_v13 = vadd.f32 %v5507_v41, %v18374_v28  ;;  %8640 = vmatprep.mubr.bf16.mxu1 %v18376_v60  ;;  %v12524_v59 = vpop.eup %12523  ;;  %v5509_v34 = vpop.f32.mrf.mxu0  ;;  %8750 = vmatpush2.bf16.msra.mxu0 %v11771_v52  ;;  %v11777_v9 = vld [vmem:[#allocation7 + $0x500] ss:$16 sps:$4 sm:$0xff]   ;;  %v15912_v39 = vpack.c.bf16 %v12520_v44, %v12522_v10  ;;  %v11785_v28 = vld [vmem:[#allocation7 + $0xec] ss:$16 sps:$4 sm:$0xff]  }
 0x5dd   : > { %v5702_v6 = vpop.f32.mrf.mxu1  ;;  %8943 = vmatpush2.bf16.msra.mxu1 %v11774_v61  ;;  %v11780_v56 = vld [vmem:[#allocation7 + $0x700] ss:$16 sps:$4 sm:$0xff]   ;;  %v12526_v27 = vpop.eup %12525  ;;  %12535 = vtanh.f32 %v6373_v55  ;;  %v6374_v33 = vadd.f32 %v15674_v31, %v5697_v38  ;;  %v5510_v41 = vadd.f32 %v5509_v34, %v18378_v15  ;;  %8751 = vmatprep.subr.bf16.mxu0 %v11779_v22  ;;  %v11788_v60 = vld [vmem:[#allocation7 + $0x2ec] ss:$16 sps:$4 sm:$0xff]  }
 0x5de   : > { %18377 = vst [vmem:[#allocation27_spill] sm:$0xff] %v15912_v39  ;;  %v5701_v24 = vadd.f32 %v5700_v37, %v5508_v13  ;;  %8944 = vmatprep.subr.bf16.mxu1 %v11782_v49  ;;  %12537 = vtanh.f32 %v6365_v29  ;;  %v5511_v58 = vpop.f32.mrf.mxu0  ;;  %v15916_v52 = vpack.c.bf16 %v12524_v59, %v12526_v27  ;;  %v18380_v44 = vld [vmem:[#allocation266_spill] sm:$0xff]  ;;  %v18381_v38 = vld [vmem:[#allocation268_spill] sm:$0xff] }
 0x5df   : > { %v5704_v12 = vpop.f32.mrf.mxu1  ;;  %12539 = vtanh.f32 %v6374_v33  ;;  %v5703_v61 = vadd.f32 %v5702_v6, %v5510_v41  ;;  %v5512_v10 = vadd.f32 %v5511_v58, %v18380_v44  ;;  %v18382_v59 = vld [vmem:[#allocation164_spill] sm:$0xff]  ;;  %v18383_v34 = vld [vmem:[#allocation74_spill] sm:$0xff] }
 0x5e0   : > { %18379 = vst [vmem:[#allocation29_spill] sm:$0xff] %v15916_v52  ;;  %12541 = vtanh.f32 %v6366_v16  ;;  %v5513_v55 = vpop.f32.mrf.mxu0  ;;  %8752 = vmatpush2.bf16.msra.mxu0 %v11777_v9  ;;  %v6381_v29 = vadd.f32 %v15668_v35, %v5701_v24  ;;  %v18385_v9 = vld [vmem:[#allocation80_spill] sm:$0xff] }
 0x5e1   : > { %v5706_v8 = vpop.f32.mrf.mxu1  ;;  %8945 = vmatpush2.bf16.msra.mxu1 %v11780_v56  ;;  %v5705_v37 = vadd.f32 %v5704_v12, %v5512_v10  ;;  %v5514_v22 = vadd.f32 %v5513_v55, %v18381_v38  ;;  %9107 = vmatprep.subr.bf16.mxu0 %v11785_v28  ;;  %v18384_v12 = vld [vmem:[#allocation32_spill] sm:$0xff]  ;;  %v6382_v33 = vadd.f32 %v15674_v31, %v5703_v61 }
 0x5e2   : > { %9300 = vmatprep.subr.bf16.mxu1 %v11788_v60  ;;  %v12528_v49 = vpop.eup %12527  ;;  %v15921_v13 = vpop.f32.mrf.mxu0  ;;  %8448 = vmatmul.mubr.bf16.gmra.mxu0 %v18382_v59  ;;  %v18394_v59 = vld [vmem:[#allocation34_spill] sm:$0xff] }
 0x5e3   : > { %v15923_v27 = vpop.f32.mrf.mxu1  ;;  %8641 = vmatmul.mubr.bf16.gmra.mxu1 %v18383_v34  ;;  %v12530_v16 = vpop.eup %12529  ;;  %v6389_v6 = vadd.f32 %v15668_v35, %v5705_v37  ;;  %v5707_v56 = vadd.f32 %v5706_v8, %v5514_v22  ;;  %8457 = vmatprep.mubr.bf16.mxu0 %v18384_v12  ;;  %v18388_v22 = vld [vmem:[#allocation30_spill] sm:$0xff] }
 0x5e4   : > { %8650 = vmatprep.mubr.bf16.mxu1 %v18385_v9  ;;  %v12532_v60 = vpop.eup %12531  ;;  %v5745_v24 = vpop.f32.mrf.mxu0  ;;  %v15933_v41 = vpack.c.bf16 %v12528_v49, %v12530_v16  ;;  %v18389_v49 = vld [vmem:[#allocation78_spill] sm:$0xff]  ;;  %v18391_v16 = vld [vmem:[#allocation84_spill] sm:$0xff] }
 0x5e5   : > { %v15931_v15 = vpop.f32.mrf.mxu1  ;;  %v12534_v28 = vpop.eup %12533  ;;  %12543 = vtanh.f32 %v6389_v6  ;;  %v6390_v58 = vadd.f32 %v15674_v31, %v5707_v56 }
 0x5e6   : > { %18386 = vst [vmem:[#allocation31_spill] sm:$0xff] %v15933_v41  ;;  %12545 = vtanh.f32 %v6381_v29  ;;  %v15936_v44 = vpop.f32.mrf.mxu0  ;;  %v15940_v8 = vpack.c.bf16 %v12532_v60, %v12534_v28  ;;  %v18390_v29 = vld [vmem:[#allocation36_spill] sm:$0xff] }
 0x5e7   : > { %v15938_v35 = vpop.f32.mrf.mxu1  ;;  %12547 = vtanh.f32 %v6390_v58 }
 0x5e8   : > { %18387 = vst [vmem:[#allocation33_spill] sm:$0xff] %v15940_v8  ;;  %12549 = vtanh.f32 %v6382_v33  ;;  %v5749_v10 = vpop.f32.mrf.mxu0 }
 0x5e9   : > { %v5942_v61 = vpop.f32.mrf.mxu1 }
 0x5ea   : > { %v12536_v55 = vpop.eup %12535  ;;  %v15942_v37 = vpop.f32.mrf.mxu0  ;;  %8458 = vmatmul.mubr.bf16.gmra.mxu0 %v18388_v22 }
 0x5eb   : > { %v15944_v38 = vpop.f32.mrf.mxu1  ;;  %8651 = vmatmul.mubr.bf16.gmra.mxu1 %v18389_v49  ;;  %v12538_v31 = vpop.eup %12537  ;;  %8467 = vmatprep.mubr.bf16.mxu0 %v18390_v29 }
 0x5ec   : > { %8660 = vmatprep.mubr.bf16.mxu1 %v18391_v16  ;;  %v12540_v6 = vpop.eup %12539  ;;  %v15950_v56 = vpop.f32.mrf.mxu0  ;;  %v15954_v33 = vpack.c.bf16 %v12536_v55, %v12538_v31  ;;  %v18396_v31 = vld [vmem:[#allocation175_spill] sm:$0xff] }
 0x5ed   : > { %v15952_v60 = vpop.f32.mrf.mxu1  ;;  %v12542_v28 = vpop.eup %12541 }
 0x5ee   : > { %18392 = vst [vmem:[#allocation35_spill] sm:$0xff] %v15954_v33  ;;  %v15956_v58 = vpop.f32.mrf.mxu0  ;;  %v15960_v22 = vpack.c.bf16 %v12540_v6, %v12542_v28 }
 0x5ef   : > { %v15958_v9 = vpop.f32.mrf.mxu1 }
 0x5f0   : > { %18393 = vst [vmem:[#allocation37_spill] sm:$0xff] %v15960_v22  ;;  %v5759_v49 = vpop.f32.mrf.mxu0  ;;  %v18405_v22 = vld [vmem:[#allocation38_spill] sm:$0xff] }
 0x5f1   : > { %v5952_v12 = vpop.f32.mrf.mxu1 }
 0x5f2   : > { %v12544_v34 = vpop.eup %12543  ;;  %v15962_v29 = vpop.f32.mrf.mxu0  ;;  %8468 = vmatmul.mubr.bf16.gmra.mxu0 %v18394_v59 }
 0x5f3   : > { %v15964_v16 = vpop.f32.mrf.mxu1  ;;  %8661 = vmatmul.mubr.bf16.gmra.mxu1 %v18395_v32  ;;  %v12546_v55 = vpop.eup %12545  ;;  %8477 = vmatprep.mubr.bf16.mxu0 %v18396_v31 }
 0x5f4   : > { %8670 = vmatprep.mubr.bf16.mxu1 %v18397_v45  ;;  %v12548_v1 = vpop.eup %12547  ;;  %v15970_v3 = vpop.f32.mrf.mxu0  ;;  %v15974_v28 = vpack.c.bf16 %v12544_v34, %v12546_v55  ;;  %v18402_v34 = vld [vmem:[#allocation176_spill] sm:$0xff] }
 0x5f5   : > { %v15972_v6 = vpop.f32.mrf.mxu1  ;;  %v12550_v26 = vpop.eup %12549 }
 0x5f6   : > { %18398 = vst [vmem:[#allocation39_spill] sm:$0xff] %v15974_v28  ;;  %v15976_v17 = vpop.f32.mrf.mxu0  ;;  %v15980_v59 = vpack.c.bf16 %v12548_v1, %v12550_v26  ;;  %v18403_v26 = vld [vmem:[#allocation143_spill] sm:$0xff]  ;;  %v5746_v28 = vadd.f32 %v5745_v24, %v18404_v62  ;;  %v13069_v62 = vld [vmem:[%s17625_s10] sm:$0xff] }
 0x5f7   : > { %v15978_v4 = vpop.f32.mrf.mxu1  ;;  %v5750_v1 = vadd.f32 %v5749_v10, %v18403_v26  ;;  %v18406_v26 = vld [vmem:[#allocation44_spill] sm:$0xff] }
 0x5f8   : > { %18399 = vst [vmem:[#allocation41_spill] sm:$0xff] %v15980_v59  ;;  %v5769_v32 = vpop.f32.mrf.mxu0  ;;  %v5939_v10 = vadd.f32 %v15931_v15, %v5746_v28  ;;  %v6123_v28 = vsub.s32 6, %v14869_v42 }
 0x5f9   : > { %v15982_v7 = vpop.f32.mrf.mxu1 }
 0x5fa   : > { %v15984_v31 = vpop.f32.mrf.mxu0  ;;  %8478 = vmatmul.mubr.bf16.gmra.mxu0 %v18400_v48  ;;  %v6127_v48 = vsub.s32 7, %v14869_v42 }
 0x5fb   : > { %v15986_v45 = vpop.f32.mrf.mxu1  ;;  %8671 = vmatmul.mubr.bf16.gmra.mxu1 %v18401_v14  ;;  %8487 = vmatprep.mubr.bf16.mxu0 %v18402_v34  ;;  %v5943_v34 = vadd.f32 %v5942_v61, %v5750_v1  ;;  %v18407_v61 = vld [vmem:[#allocation139_spill] sm:$0xff] }
 0x5fc   : > { %8680 = vmatprep.mubr.bf16.mxu1 %v15651_v47  ;;  %v15992_v55 = vpop.f32.mrf.mxu0  ;;  %v16017_v24 = vrot.slane %v13069_v62, %v6127_v48  ;;  %v5748_v1 = vadd.f32 %v15936_v44, %v18407_v61  ;;  %v18409_v48 = vld [vmem:[#allocation155_spill] sm:$0xff] }
 0x5fd   : > { %v15994_v2 = vpop.f32.mrf.mxu1  ;;  %v5760_v39 = vadd.f32 %v5759_v49, %v18409_v48  ;;  %v18410_v61 = vld [vmem:[#allocation147_spill] sm:$0xff] }
 0x5fe   : > { %v15997_v51 = vpop.f32.mrf.mxu0  ;;  %v6152_v8 = vadd.f32 %v16017_v24, %v5943_v34  ;;  %v5941_v44 = vadd.f32 %v15938_v35, %v5748_v1  ;;  %v5756_v46 = vadd.f32 %v15950_v56, %v18410_v61  ;;  %v18412_v35 = vld [vmem:[#allocation94_spill] sm:$0xff]  ;;  %v18413_v56 = vld [vmem:[#allocation187_spill] sm:$0xff]  ;;  %v18414_v1 = vld [vmem:[#allocation100_spill] sm:$0xff] }
 0x5ff   : > { %v15999_v43 = vpop.f32.mrf.mxu1  ;;  %v5953_v49 = vadd.f32 %v5952_v12, %v5760_v39 }
 0x600   : > { %v16003_v59 = vpop.f32.mrf.mxu0  ;;  %12551 = vtanh.f32 %v6152_v8 }
 0x601   : > { %v16005_v14 = vpop.f32.mrf.mxu1 }
 0x602   : > { %v16007_v47 = vpop.f32.mrf.mxu0  ;;  %8488 = vmatmul.mubr.bf16.gmra.mxu0 %v18405_v22 }
 0x603   : > { %v16009_v33 = vpop.f32.mrf.mxu1  ;;  %8681 = vmatmul.mubr.bf16.gmra.mxu1 %v15647_v21  ;;  %8497 = vmatprep.mubr.bf16.mxu0 %v18406_v26  ;;  %v18408_v21 = vld [vmem:[#allocation135_spill] sm:$0xff] }
 0x604   : > { %8690 = vmatprep.mubr.bf16.mxu1 %v15676_v30  ;;  %v16023_v41 = vpop.f32.mrf.mxu0  ;;  %v5744_v15 = vadd.f32 %v15921_v13, %v18408_v21  ;;  %v6144_v30 = vadd.f32 %v16017_v24, %v5939_v10  ;;  %v16045_v13 = vrot.slane %v13069_v62, %v6123_v28  ;;  %v18411_v10 = vld [vmem:[#allocation42_spill] sm:$0xff]  ;;  %v18415_v62 = vld [vmem:[#allocation149_spill] sm:$0xff]  ;;  %v18416_v28 = vld [vmem:[#allocation167_spill] sm:$0xff] }
 0x605   : > { %v16025_v22 = vpop.f32.mrf.mxu1  ;;  %v5758_v39 = vadd.f32 %v15956_v58, %v18415_v62 }
 0x606   : > { %v16032_v52 = vpop.f32.mrf.mxu0  ;;  %v5937_v42 = vadd.f32 %v15923_v27, %v5744_v15  ;;  %12553 = vtanh.f32 %v6144_v30  ;;  %v6151_v61 = vadd.f32 %v16045_v13, %v5941_v44  ;;  %v5949_v27 = vadd.f32 %v15952_v60, %v5756_v46  ;;  %v18417_v30 = vld [vmem:[#allocation145_spill] sm:$0xff]  ;;  %v18418_v46 = vld [vmem:[#allocation159_spill] sm:$0xff] }
 0x607   : > { %v16034_v26 = vpop.f32.mrf.mxu1  ;;  %v5766_v60 = vadd.f32 %v15970_v3, %v18418_v46  ;;  %v5951_v62 = vadd.f32 %v15958_v9, %v5758_v39  ;;  %v18419_v3 = vld [vmem:[#allocation186_spill] sm:$0xff]  ;;  %v18422_v39 = vld [vmem:[#allocation104_spill] sm:$0xff]  ;;  %v18424_v46 = vld [vmem:[#allocation179_spill] sm:$0xff] }
 0x608   : > { %v16040_v50 = vpop.f32.mrf.mxu0  ;;  %v6143_v15 = vadd.f32 %v16045_v13, %v5937_v42  ;;  %12555 = vtanh.f32 %v6151_v61  ;;  %v6160_v58 = vadd.f32 %v16017_v24, %v5949_v27  ;;  %v18420_v61 = vld [vmem:[#allocation98_spill] sm:$0xff]  ;;  %v18421_v27 = vld [vmem:[#allocation188_spill] sm:$0xff] }
 0x609   : > { %v16042_v21 = vpop.f32.mrf.mxu1  ;;  %v5959_v9 = vadd.f32 %v15972_v6, %v5766_v60 }
 0x60a   : > { %v16047_v34 = vpop.f32.mrf.mxu0  ;;  %8498 = vmatmul.mubr.bf16.gmra.mxu0 %v18411_v10  ;;  %12557 = vtanh.f32 %v6143_v15 }
 0x60b   : > { %v16049_v48 = vpop.f32.mrf.mxu1  ;;  %8691 = vmatmul.mubr.bf16.gmra.mxu1 %v18412_v35  ;;  %8507 = vmatprep.mubr.bf16.mxu0 %v18413_v56  ;;  %v5770_v35 = vadd.f32 %v5769_v32, %v18416_v28  ;;  %v5754_v56 = vadd.f32 %v15942_v37, %v18417_v30 }
 0x60c   : > { %8700 = vmatprep.mubr.bf16.mxu1 %v18414_v1  ;;  %v16059_v12 = vpop.f32.mrf.mxu0  ;;  %v6168_v1 = vadd.f32 %v16017_v24, %v5953_v49 }
 0x60d   : > { %v16061_v8 = vpop.f32.mrf.mxu1  ;;  %v5963_v37 = vadd.f32 %v15982_v7, %v5770_v35  ;;  %v5947_v49 = vadd.f32 %v15944_v38, %v5754_v56  ;;  %v6167_v7 = vadd.f32 %v16045_v13, %v5951_v62  ;;  %v18423_v35 = vld [vmem:[#allocation161_spill] sm:$0xff]  ;;  %v12552_v6 = vpop.eup %12551 }
 0x60e   : > { %v16068_v10 = vpop.f32.mrf.mxu0  ;;  %12559 = vtanh.f32 %v6168_v1  ;;  %v5768_v38 = vadd.f32 %v15976_v17, %v18423_v35  ;;  %v6176_v17 = vadd.f32 %v16017_v24, %v5959_v9  ;;  %v18426_v35 = vld [vmem:[#allocation171_spill] sm:$0xff] }
 0x60f   : > { %v16070_v44 = vpop.f32.mrf.mxu1  ;;  %12561 = vtanh.f32 %v6160_v58  ;;  %v6184_v15 = vadd.f32 %v16017_v24, %v5963_v37  ;;  %v6159_v60 = vadd.f32 %v16045_v13, %v5947_v49 }
 0x610   : > { %v16076_v42 = vpop.f32.mrf.mxu0  ;;  %12563 = vtanh.f32 %v6167_v7  ;;  %v5961_v37 = vadd.f32 %v15978_v4, %v5768_v38  ;;  %v18429_v7 = vld [vmem:[#allocation102_spill] sm:$0xff]  ;;  %v18430_v38 = vld [vmem:[#allocation108_spill] sm:$0xff] }
 0x611   : > { %v16078_v32 = vpop.f32.mrf.mxu1  ;;  %12565 = vtanh.f32 %v6184_v15 }
 0x612   : > { %v16082_v28 = vpop.f32.mrf.mxu0  ;;  %8508 = vmatmul.mubr.bf16.gmra.mxu0 %v18419_v3  ;;  %v5776_v3 = vadd.f32 %v15992_v55, %v18426_v35  ;;  %12567 = vtanh.f32 %v6159_v60  ;;  %v18428_v55 = vld [vmem:[#allocation46_spill] sm:$0xff]  ;;  %v18433_v35 = vld [vmem:[#allocation169_spill] sm:$0xff] }
 0x613   : > { %v16084_v30 = vpop.f32.mrf.mxu1  ;;  %8701 = vmatmul.mubr.bf16.gmra.mxu1 %v18420_v61  ;;  %8517 = vmatprep.mubr.bf16.mxu0 %v18421_v27  ;;  %v5780_v61 = vadd.f32 %v16003_v59, %v18424_v46  ;;  %v18425_v27 = vld [vmem:[#allocation157_spill] sm:$0xff]  ;;  %v12554_v54 = vpop.eup %12553  ;;  %12569 = vtanh.f32 %v6176_v17 }
 0x614   : > { %8710 = vmatprep.mubr.bf16.mxu1 %v18422_v39  ;;  %v16094_v56 = vpop.f32.mrf.mxu0  ;;  %v5764_v58 = vadd.f32 %v15962_v29, %v18425_v27  ;;  %v16117_v49 = vpack.c.bf16 %v12552_v6, %v12554_v54  ;;  %v5969_v4 = vadd.f32 %v15994_v2, %v5776_v3  ;;  %v18431_v54 = vld [vmem:[#allocation173_spill] sm:$0xff] }
 0x615   : > { %v16096_v1 = vpop.f32.mrf.mxu1  ;;  %v5973_v29 = vadd.f32 %v16005_v14, %v5780_v61  ;;  %v6183_v14 = vadd.f32 %v16045_v13, %v5961_v37  ;;  %v12556_v6 = vpop.eup %12555 }
 0x616   : > { %v16104_v39 = vpop.f32.mrf.mxu0  ;;  %18427 = vst [vmem:[#allocation43_spill] sm:$0xff] %v16117_v49  ;;  %v5957_v27 = vadd.f32 %v15964_v16, %v5764_v58  ;;  %v5778_v16 = vadd.f32 %v15997_v51, %v18431_v54  ;;  %v18432_v58 = vld [vmem:[#allocation191_spill] sm:$0xff]  ;;  %v6192_v54 = vadd.f32 %v16017_v24, %v5969_v4 }
 0x617   : > { %v16106_v62 = vpop.f32.mrf.mxu1  ;;  %v6200_v60 = vadd.f32 %v16017_v24, %v5973_v29  ;;  %v5790_v17 = vadd.f32 %v16040_v50, %v18432_v58  ;;  %v12558_v2 = vpop.eup %12557  ;;  %v11783_v29 = vld [vmem:[#allocation7 + $0xe8] ss:$16 sps:$4 sm:$0xff]   ;;  %12571 = vtanh.f32 %v6183_v14  ;;  %v11794_v4 = vld [vmem:[#allocation7 + $0x2cc] ss:$16 sps:$4 sm:$0xff]   ;;  %v18436_v14 = vld [vmem:[#allocation106_spill] sm:$0xff] }
 0x618   : > { %v16112_v59 = vpop.f32.mrf.mxu0  ;;  %v6175_v3 = vadd.f32 %v16045_v13, %v5957_v27  ;;  %v16149_v19 = vpack.c.bf16 %v12556_v6, %v12558_v2  ;;  %v5971_v50 = vadd.f32 %v15999_v43, %v5778_v16 }
 0x619   : > { %v16114_v46 = vpop.f32.mrf.mxu1  ;;  %12573 = vtanh.f32 %v6200_v60  ;;  %v5983_v18 = vadd.f32 %v16042_v21, %v5790_v17  ;;  %v18438_v21 = vld [vmem:[#allocation112_spill] sm:$0xff]  ;;  %v11789_v60 = vld [vmem:[#allocation7 + $0xc8] ss:$16 sps:$4 sm:$0xff]  }
 0x61a   : > { %v16120_v9 = vpop.f32.mrf.mxu0  ;;  %8518 = vmatmul.mubr.bf16.gmra.mxu0 %v18428_v55  ;;  %18435 = vst [vmem:[#allocation45_spill] sm:$0xff] %v16149_v19  ;;  %12575 = vtanh.f32 %v6175_v3  ;;  %v6199_v17 = vadd.f32 %v16045_v13, %v5971_v50  ;;  %v11800_v50 = vld [vmem:[#allocation7 + $0x2ac] ss:$16 sps:$4 sm:$0xff]  }
 0x61b   : > { %v16122_v63 = vpop.f32.mrf.mxu1  ;;  %8711 = vmatmul.mubr.bf16.gmra.mxu1 %v18429_v7  ;;  %8753 = vmatprep.mubr.bf16.mxu0 %v18430_v38  ;;  %v12560_v51 = vpop.eup %12559  ;;  %v18434_v7 = vld [vmem:[#allocation183_spill] sm:$0xff]  ;;  %12577 = vtanh.f32 %v6192_v54 }
 0x61c   : > { %8946 = vmatprep.mubr.bf16.mxu1 %v16117_v49  ;;  %v16132_v61 = vpop.f32.mrf.mxu0  ;;  %v5774_v49 = vadd.f32 %v15984_v31, %v18433_v35  ;;  %v5786_v55 = vadd.f32 %v16023_v41, %v18434_v7  ;;  %v11786_v31 = vld [vmem:[#allocation7 + $0x2e8] ss:$16 sps:$4 sm:$0xff]   ;;  %v12562_v35 = vpop.eup %12561  ;;  %v11797_v54 = vld [vmem:[#allocation7 + $0xac] ss:$16 sps:$4 sm:$0xff]   ;;  %12579 = vtanh.f32 %v6199_v17 }
 0x61d   : > { %v16134_v15 = vpop.f32.mrf.mxu1  ;;  %v16164_v43 = vpack.c.bf16 %v12560_v51, %v12562_v35  ;;  %v11792_v51 = vld [vmem:[#allocation7 + $0x2c8] ss:$16 sps:$4 sm:$0xff]   ;;  %v12564_v35 = vpop.eup %12563 }
 0x61e   : > { %v16142_v37 = vpop.f32.mrf.mxu0  ;;  %v5967_v41 = vadd.f32 %v15986_v45, %v5774_v49  ;;  %v5979_v16 = vadd.f32 %v16025_v22, %v5786_v55  ;;  %v18439_v45 = vld [vmem:[#allocation185_spill] sm:$0xff]  ;;  %v6216_v22 = vadd.f32 %v16017_v24, %v5983_v18  ;;  %v18442_v18 = vld [vmem:[#allocation195_spill] sm:$0xff] }
 0x61f   : > { %v16144_v38 = vpop.f32.mrf.mxu1  ;;  %18437 = vst [vmem:[#allocation47_spill] sm:$0xff] %v16164_v43  ;;  %v5788_v49 = vadd.f32 %v16032_v52, %v18439_v45  ;;  %v18440_v55 = vld [vmem:[#allocation201_spill] sm:$0xff]  ;;  %v5796_v40 = vadd.f32 %v16059_v12, %v18442_v18 }
 0x620   : > { %v16152_v27 = vpop.f32.mrf.mxu0  ;;  %v6191_v52 = vadd.f32 %v16045_v13, %v5967_v41  ;;  %v18441_v45 = vld [vmem:[#allocation181_spill] sm:$0xff]  ;;  %v6208_v23 = vadd.f32 %v16017_v24, %v5979_v16  ;;  %12581 = vtanh.f32 %v6216_v22 }
 0x621   : > { %v16154_v58 = vpop.f32.mrf.mxu1  ;;  %v11803_v12 = vld [vmem:[#allocation7 + $0x8c] ss:$16 sps:$4 sm:$0xff]   ;;  %v11801_v22 = vld [vmem:[#allocation7 + $0x88] ss:$16 sps:$4 sm:$0xff]  }
 0x622   : > { %v16158_v7 = vpop.f32.mrf.mxu0  ;;  %8754 = vmatmul.mubr.bf16.vlgmr.msra.gmra.mxu0 %v18436_v14  ;;  %12583 = vtanh.f32 %v6191_v52  ;;  %v11809_v52 = vld [vmem:[#allocation7 + $0x6c] ss:$16 sps:$4 sm:$0xff]  }
 0x623   : > { %v16160_v6 = vpop.f32.mrf.mxu1  ;;  %8947 = vmatmul.mubr.bf16.vlgmr.msra.gmra.mxu1 %v16149_v19  ;;  %9108 = vmatpush1.bf16.msra.mxu0 %v11783_v29  ;;  %v5800_v29 = vadd.f32 %v16076_v42, %v18440_v55  ;;  %v5981_v42 = vadd.f32 %v16034_v26, %v5788_v49  ;;  %v11795_v55 = vld [vmem:[#allocation7 + $0xa8] ss:$16 sps:$4 sm:$0xff]   ;;  %12585 = vtanh.f32 %v6208_v23  ;;  %v11812_v18 = vld [vmem:[#allocation7 + $0x26c] ss:$16 sps:$4 sm:$0xff]  }
 0x624   : > { %8763 = vmatprep.mubr.bf16.mxu0 %v18438_v21  ;;  %8956 = vmatprep.mubr.bf16.mxu1 %v16164_v43  ;;  %v16172_v2 = vpop.f32.mrf.mxu0  ;;  %v12566_v21 = vpop.eup %12565  ;;  %v5784_v43 = vadd.f32 %v16007_v47, %v18441_v45  ;;  %v11798_v45 = vld [vmem:[#allocation7 + $0x2a8] ss:$16 sps:$4 sm:$0xff]  }
 0x625   : > { %v16174_v3 = vpop.f32.mrf.mxu1  ;;  %9301 = vmatpush1.bf16.msra.mxu1 %v11786_v31  ;;  %9109 = vmatprep.subr.bf16.mxu0 %v11791_v57  ;;  %v12568_v14 = vpop.eup %12567  ;;  %v5993_v16 = vadd.f32 %v16078_v32, %v5800_v29  ;;  %v18446_v32 = vld [vmem:[#allocation116_spill] sm:$0xff]  ;;  %v11804_v29 = vld [vmem:[#allocation7 + $0x288] ss:$16 sps:$4 sm:$0xff]  }
 0x626   : > { %9302 = vmatprep.subr.bf16.mxu1 %v11794_v4  ;;  %v16182_v19 = vpop.f32.mrf.mxu0  ;;  %v12570_v57 = vpop.eup %12569  ;;  %v16194_v47 = vpack.c.bf16 %v12564_v35, %v12568_v14  ;;  %v5977_v26 = vadd.f32 %v16009_v33, %v5784_v43  ;;  %v18445_v14 = vld [vmem:[#allocation110_spill] sm:$0xff] }
 0x627   : > { %v16184_v31 = vpop.f32.mrf.mxu1  ;;  %9110 = vmatpush1.bf16.msra.mxu0 %v11789_v60  ;;  %v16197_v20 = vpack.c.bf16 %v12566_v21, %v12570_v57  ;;  %v11806_v60 = vld [vmem:[#allocation7 + $0x28c] ss:$16 sps:$4 sm:$0xff]   ;;  %v6215_v21 = vadd.f32 %v16045_v13, %v5981_v42  ;;  %v12572_v23 = vpop.eup %12571 }
 0x628   : > { %v16190_v4 = vpop.f32.mrf.mxu0  ;;  %18443 = vst [vmem:[#allocation49_spill] sm:$0xff] %v16194_v47  ;;  %9111 = vmatprep.subr.bf16.mxu0 %v11797_v54  ;;  %v18447_v54 = vld [vmem:[#allocation197_spill] sm:$0xff]  ;;  %v12574_v57 = vpop.eup %12573 }
 0x629   : > { %v16192_v41 = vpop.f32.mrf.mxu1  ;;  %9303 = vmatpush1.bf16.msra.mxu1 %v11792_v51  ;;  %18444 = vst [vmem:[#allocation51_spill] sm:$0xff] %v16197_v20  ;;  %v5989_v51 = vadd.f32 %v16061_v8, %v5796_v40  ;;  %v5798_v33 = vadd.f32 %v16068_v10, %v18447_v54  ;;  %v6232_v40 = vadd.f32 %v16017_v24, %v5993_v16  ;;  %v18448_v8 = vld [vmem:[#allocation209_spill] sm:$0xff]  ;;  %12587 = vtanh.f32 %v6215_v21 }
 0x62a   : > { %9304 = vmatprep.subr.bf16.mxu1 %v11800_v50  ;;  %v16200_v17 = vpop.f32.mrf.mxu0  ;;  %8764 = vmatmul.mubr.bf16.gmra.mxu0 %v18445_v14  ;;  %v5810_v50 = vadd.f32 %v16112_v59, %v18448_v8  ;;  %v6207_v10 = vadd.f32 %v16045_v13, %v5977_v26  ;;  %v18449_v42 = vld [vmem:[#allocation193_spill] sm:$0xff] }
 0x62b   : > { %v16202_v49 = vpop.f32.mrf.mxu1  ;;  %8957 = vmatmul.mubr.bf16.gmra.mxu1 %v16194_v47  ;;  %8773 = vmatprep.mubr.bf16.mxu0 %v18446_v32  ;;  %v5794_v54 = vadd.f32 %v16047_v34, %v18449_v42  ;;  %v6224_v16 = vadd.f32 %v16017_v24, %v5989_v51  ;;  %v18450_v32 = vld [vmem:[#allocation205_spill] sm:$0xff]  ;;  %12589 = vtanh.f32 %v6232_v40 }
 0x62c   : > { %8966 = vmatprep.mubr.bf16.mxu1 %v16197_v20  ;;  %v16212_v43 = vpop.f32.mrf.mxu0  ;;  %9112 = vmatpush1.bf16.msra.mxu0 %v11795_v55  ;;  %v12576_v20 = vpop.eup %12575  ;;  %v5806_v59 = vadd.f32 %v16094_v56, %v18450_v32  ;;  %v11807_v34 = vld [vmem:[#allocation7 + $0x68] ss:$16 sps:$4 sm:$0xff]   ;;  %v6003_v51 = vadd.f32 %v16114_v46, %v5810_v50  ;;  %v11815_v56 = vld [vmem:[#allocation7 + $0x4c] ss:$16 sps:$4 sm:$0xff]   ;;  %12591 = vtanh.f32 %v6207_v10 }
 0x62d   : > { %v16214_v35 = vpop.f32.mrf.mxu1  ;;  %9305 = vmatpush1.bf16.msra.mxu1 %v11798_v45  ;;  %9113 = vmatprep.subr.bf16.mxu0 %v11803_v12  ;;  %v12578_v12 = vpop.eup %12577  ;;  %v16234_v47 = vpack.c.bf16 %v12572_v23, %v12576_v20  ;;  %v11810_v42 = vld [vmem:[#allocation7 + $0x268] ss:$16 sps:$4 sm:$0xff]   ;;  %v11818_v32 = vld [vmem:[#allocation7 + $0x24c] ss:$16 sps:$4 sm:$0xff]   ;;  %12593 = vtanh.f32 %v6224_v16 }
 0x62e   : > { %9306 = vmatprep.subr.bf16.mxu1 %v11806_v60  ;;  %v16222_v55 = vpop.f32.mrf.mxu0  ;;  %v5991_v60 = vadd.f32 %v16070_v44, %v5798_v33  ;;  %v16237_v14 = vpack.c.bf16 %v12574_v57, %v12578_v12  ;;  %v5987_v44 = vadd.f32 %v16049_v48, %v5794_v54  ;;  %v18453_v33 = vld [vmem:[#allocation114_spill] sm:$0xff]  ;;  %v5999_v46 = vadd.f32 %v16096_v1, %v5806_v59  ;;  %v11813_v50 = vld [vmem:[#allocation7 + $0x48] ss:$16 sps:$4 sm:$0xff]   ;;  %v11821_v54 = vld [vmem:[#allocation7 + $0x2c] ss:$16 sps:$4 sm:$0xff]  }
 0x62f   : > { %v16224_v45 = vpop.f32.mrf.mxu1  ;;  %18451 = vst [vmem:[#allocation53_spill] sm:$0xff] %v16234_v47  ;;  %v6248_v1 = vadd.f32 %v16017_v24, %v6003_v51  ;;  %v18455_v57 = vld [vmem:[#allocation217_spill] sm:$0xff]  ;;  %v18456_v12 = vld [vmem:[#allocation203_spill] sm:$0xff] }
 0x630   : > { %v16230_v8 = vpop.f32.mrf.mxu0  ;;  %9114 = vmatpush1.bf16.msra.mxu0 %v11801_v22  ;;  %18452 = vst [vmem:[#allocation55_spill] sm:$0xff] %v16237_v14  ;;  %v6231_v22 = vadd.f32 %v16045_v13, %v5991_v60  ;;  %v5820_v10 = vadd.f32 %v16152_v27, %v18455_v57  ;;  %v11824_v16 = vld [vmem:[#allocation7 + $0x22c] ss:$16 sps:$4 sm:$0xff]   ;;  %v5804_v60 = vadd.f32 %v16082_v28, %v18456_v12  ;;  %v11819_v28 = vld [vmem:[#allocation7 + $0x28] ss:$16 sps:$4 sm:$0xff]  }
 0x631   : > { %v16232_v26 = vpop.f32.mrf.mxu1  ;;  %9307 = vmatpush1.bf16.msra.mxu1 %v11804_v29  ;;  %9115 = vmatprep.subr.bf16.mxu0 %v11809_v52  ;;  %v18454_v29 = vld [vmem:[#allocation207_spill] sm:$0xff]  ;;  %v6240_v51 = vadd.f32 %v16017_v24, %v5999_v46 }
 0x632   : > { %9308 = vmatprep.subr.bf16.mxu1 %v11812_v18  ;;  %v16240_v21 = vpop.f32.mrf.mxu0  ;;  %8774 = vmatmul.mubr.bf16.gmra.mxu0 %v18453_v33  ;;  %v5808_v48 = vadd.f32 %v16104_v39, %v18454_v29  ;;  %v11816_v52 = vld [vmem:[#allocation7 + $0x248] ss:$16 sps:$4 sm:$0xff]   ;;  %v12580_v18 = vpop.eup %12579  ;;  %v6223_v39 = vadd.f32 %v16045_v13, %v5987_v44  ;;  %12595 = vtanh.f32 %v6231_v22  ;;  %v6013_v46 = vadd.f32 %v16154_v58, %v5820_v10 }
 0x633   : > { %v16242_v20 = vpop.f32.mrf.mxu1  ;;  %8967 = vmatmul.mubr.bf16.gmra.mxu1 %v16234_v47  ;;  %8783 = vmatprep.mubr.bf16.mxu0 %v15772_v11  ;;  %v12582_v59 = vpop.eup %12581  ;;  %v11822_v12 = vld [vmem:[#allocation7 + $0x228] ss:$16 sps:$4 sm:$0xff]   ;;  %12597 = vtanh.f32 %v6248_v1 }
 0x634   : > { %8976 = vmatprep.mubr.bf16.mxu1 %v16237_v14  ;;  %v16252_v23 = vpop.f32.mrf.mxu0  ;;  %9116 = vmatpush1.bf16.msra.mxu0 %v11807_v34  ;;  %v12584_v29 = vpop.eup %12583  ;;  %v18457_v14 = vld [vmem:[#allocation213_spill] sm:$0xff]  ;;  %12599 = vtanh.f32 %v6223_v39  ;;  %v18462_v39 = vld [vmem:[#allocation224_spill] sm:$0xff] }
 0x635   : > { %v16254_v40 = vpop.f32.mrf.mxu1  ;;  %9309 = vmatpush1.bf16.msra.mxu1 %v11810_v42  ;;  %9117 = vmatprep.subr.bf16.mxu0 %v11815_v56  ;;  %v5816_v27 = vadd.f32 %v16132_v61, %v18457_v14  ;;  %v12586_v56 = vpop.eup %12585  ;;  %v16274_v11 = vpack.c.bf16 %v12580_v18, %v12584_v29  ;;  %v11827_v61 = vld [vmem:[#allocation7 + $0xc] ss:$16 sps:$4 sm:$0xff]   ;;  %12601 = vtanh.f32 %v6240_v51 }
 0x636   : > { %9310 = vmatprep.subr.bf16.mxu1 %v11818_v32  ;;  %v16262_v34 = vpop.f32.mrf.mxu0  ;;  %v6001_v32 = vadd.f32 %v16106_v62, %v5808_v48  ;;  %v16277_v47 = vpack.c.bf16 %v12582_v59, %v12586_v56  ;;  %v11830_v14 = vld [vmem:[#allocation7 + $0x20c] ss:$16 sps:$4 sm:$0xff]   ;;  %v5997_v62 = vadd.f32 %v16084_v30, %v5804_v60  ;;  %v12588_v59 = vpop.eup %12587  ;;  %v5830_v60 = vadd.f32 %v16190_v4, %v18462_v39 }
 0x637   : > { %v16264_v42 = vpop.f32.mrf.mxu1  ;;  %18458 = vst [vmem:[#allocation57_spill] sm:$0xff] %v16274_v11  ;;  %v6009_v58 = vadd.f32 %v16134_v15, %v5816_v27  ;;  %v18461_v18 = vld [vmem:[#allocation215_spill] sm:$0xff]  ;;  %v6264_v15 = vadd.f32 %v16017_v24, %v6013_v46 }
 0x638   : > { %v16270_v57 = vpop.f32.mrf.mxu0  ;;  %9118 = vmatpush1.bf16.msra.mxu0 %v11813_v50  ;;  %18459 = vst [vmem:[#allocation59_spill] sm:$0xff] %v16277_v47  ;;  %v18460_v50 = vld [vmem:[#allocation118_spill] sm:$0xff]  ;;  %v5818_v30 = vadd.f32 %v16142_v37, %v18461_v18  ;;  %v11833_v29 = vld [vmem:[#allocation7 + $0x1ec] ss:$16 sps:$4 sm:$0xff]   ;;  %v12590_v27 = vpop.eup %12589  ;;  %v6239_v37 = vadd.f32 %v16045_v13, %v5997_v62 }
 0x639   : > { %v16272_v44 = vpop.f32.mrf.mxu1  ;;  %9311 = vmatpush1.bf16.msra.mxu1 %v11816_v52  ;;  %9119 = vmatprep.subr.bf16.mxu0 %v11821_v54  ;;  %v6247_v52 = vadd.f32 %v16045_v13, %v6001_v32  ;;  %v11825_v54 = vld [vmem:[#allocation7 + $0x8] ss:$16 sps:$4 sm:$0xff]   ;;  %v11836_v51 = vld [vmem:[#allocation7 + $0x3ec] ss:$16 sps:$4 sm:$0xff]   ;;  %v12592_v18 = vpop.eup %12591  ;;  %v6256_v46 = vadd.f32 %v16017_v24, %v6009_v58  ;;  %v6023_v58 = vadd.f32 %v16192_v41, %v5830_v60 }
 0x63a   : > { %9312 = vmatprep.subr.bf16.mxu1 %v11824_v16  ;;  %v16280_v22 = vpop.f32.mrf.mxu0  ;;  %8784 = vmatmul.mubr.bf16.gmra.mxu0 %v18460_v50  ;;  %v11828_v16 = vld [vmem:[#allocation7 + $0x208] ss:$16 sps:$4 sm:$0xff]  }
 0x63b   : > { %v16282_v48 = vpop.f32.mrf.mxu1  ;;  %8977 = vmatmul.mubr.bf16.gmra.mxu1 %v16274_v11  ;;  %8793 = vmatprep.mubr.bf16.mxu0 %v15788_v25  ;;  %v18463_v56 = vld [vmem:[#allocation211_spill] sm:$0xff]  ;;  %12603 = vtanh.f32 %v6247_v52  ;;  %v16314_v25 = vpack.c.bf16 %v12588_v59, %v12592_v18  ;;  %v18468_v59 = vld [vmem:[#allocation222_spill] sm:$0xff] }
 0x63c   : > { %8986 = vmatprep.mubr.bf16.mxu1 %v16277_v47  ;;  %v16292_v1 = vpop.f32.mrf.mxu0  ;;  %9120 = vmatpush1.bf16.msra.mxu0 %v11819_v28  ;;  %v5814_v32 = vadd.f32 %v16120_v9, %v18463_v56  ;;  %v18464_v47 = vld [vmem:[#allocation220_spill] sm:$0xff]  ;;  %v11831_v9 = vld [vmem:[#allocation7 + $0x1e8] ss:$16 sps:$4 sm:$0xff]   ;;  %12605 = vtanh.f32 %v6264_v15  ;;  %v11845_v18 = vld [vmem:[#allocation7 + $0x1ac] ss:$16 sps:$4 sm:$0xff]  }
 0x63d   : > { %v16294_v10 = vpop.f32.mrf.mxu1  ;;  %9313 = vmatpush1.bf16.msra.mxu1 %v11822_v12  ;;  %9121 = vmatprep.subr.bf16.mxu0 %v11827_v61  ;;  %v5826_v4 = vadd.f32 %v16172_v2, %v18464_v47  ;;  %v12594_v61 = vpop.eup %12593  ;;  %18465 = vst [vmem:[#allocation61_spill] sm:$0xff] %v16314_v25  ;;  %v11834_v56 = vld [vmem:[#allocation7 + $0x3e8] ss:$16 sps:$4 sm:$0xff]   ;;  %v11839_v2 = vld [vmem:[#allocation7 + $0x1cc] ss:$16 sps:$4 sm:$0xff]   ;;  %12607 = vtanh.f32 %v6239_v37  ;;  %v18469_v37 = vld [vmem:[#allocation230_spill] sm:$0xff] }
 0x63e   : > { %9314 = vmatprep.subr.bf16.mxu1 %v11830_v14  ;;  %v16302_v28 = vpop.f32.mrf.mxu0  ;;  %v6011_v14 = vadd.f32 %v16144_v38, %v5818_v30  ;;  %v16317_v11 = vpack.c.bf16 %v12590_v27, %v12594_v61  ;;  %v11842_v47 = vld [vmem:[#allocation7 + $0x3cc] ss:$16 sps:$4 sm:$0xff]   ;;  %v6007_v38 = vadd.f32 %v16122_v63, %v5814_v32  ;;  %12609 = vtanh.f32 %v6256_v46  ;;  %v18470_v61 = vld [vmem:[#allocation218_spill] sm:$0xff] }
 0x63f   : > { %v16304_v12 = vpop.f32.mrf.mxu1  ;;  %v6019_v41 = vadd.f32 %v16174_v3, %v5826_v4  ;;  %v5828_v63 = vadd.f32 %v16182_v19, %v18468_v59  ;;  %v12596_v27 = vpop.eup %12595  ;;  %v6280_v3 = vadd.f32 %v16017_v24, %v6023_v58  ;;  %v5840_v32 = vadd.f32 %v16230_v8, %v18469_v37  ;;  %v11848_v46 = vld [vmem:[#allocation7 + $0x3ac] ss:$16 sps:$4 sm:$0xff]  }
 0x640   : > { %v16310_v39 = vpop.f32.mrf.mxu0  ;;  %9122 = vmatpush1.bf16.msra.mxu0 %v11825_v54  ;;  %18466 = vst [vmem:[#allocation63_spill] sm:$0xff] %v16317_v11  ;;  %v18467_v54 = vld [vmem:[#allocation122_spill] sm:$0xff]  ;;  %v12598_v4 = vpop.eup %12597  ;;  %v6255_v19 = vadd.f32 %v16045_v13, %v6007_v38 }
 0x641   : > { %v16312_v62 = vpop.f32.mrf.mxu1  ;;  %9315 = vmatpush1.bf16.msra.mxu1 %v11828_v16  ;;  %9123 = vmatprep.subr.bf16.mxu0 %v11833_v29  ;;  %v6263_v16 = vadd.f32 %v16045_v13, %v6011_v14  ;;  %v11837_v29 = vld [vmem:[#allocation7 + $0x1c8] ss:$16 sps:$4 sm:$0xff]   ;;  %v5824_v14 = vadd.f32 %v16158_v7, %v18470_v61  ;;  %v12600_v59 = vpop.eup %12599  ;;  %v6272_v58 = vadd.f32 %v16017_v24, %v6019_v41 }
 0x642   : > { %9316 = vmatprep.subr.bf16.mxu1 %v11836_v51  ;;  %v16320_v52 = vpop.f32.mrf.mxu0  ;;  %8794 = vmatmul.mubr.bf16.gmra.mxu0 %v18467_v54  ;;  %v11840_v51 = vld [vmem:[#allocation7 + $0x3c8] ss:$16 sps:$4 sm:$0xff]   ;;  %v6033_v41 = vadd.f32 %v16232_v26, %v5840_v32 }
 0x643   : > { %v16322_v30 = vpop.f32.mrf.mxu1  ;;  %8987 = vmatmul.mubr.bf16.gmra.mxu1 %v16314_v25  ;;  %8803 = vmatprep.mubr.bf16.mxu0 %v15804_v53  ;;  %12611 = vtanh.f32 %v6263_v16  ;;  %v16354_v53 = vpack.c.bf16 %v12596_v27, %v12600_v59  ;;  %v11843_v7 = vld [vmem:[#allocation7 + $0x1a8] ss:$16 sps:$4 sm:$0xff]   ;;  %v11860_v59 = vld [vmem:[#allocation7 + $0x36c] ss:$16 sps:$4 sm:$0xff]  }
 0x644   : > { %8996 = vmatprep.mubr.bf16.mxu1 %v16317_v11  ;;  %v16332_v15 = vpop.f32.mrf.mxu0  ;;  %9124 = vmatpush2.bf16.msra.mxu0 %v11831_v9  ;;  %v18471_v11 = vld [vmem:[#allocation228_spill] sm:$0xff]  ;;  %v11846_v61 = vld [vmem:[#allocation7 + $0x3a8] ss:$16 sps:$4 sm:$0xff]   ;;  %12613 = vtanh.f32 %v6280_v3 }
 0x645   : > { %v16334_v60 = vpop.f32.mrf.mxu1  ;;  %9317 = vmatpush2.bf16.msra.mxu1 %v11834_v56  ;;  %9125 = vmatprep.subr.bf16.mxu0 %v11839_v2  ;;  %v5836_v8 = vadd.f32 %v16212_v43, %v18471_v11  ;;  %v12602_v2 = vpop.eup %12601  ;;  %18472 = vst [vmem:[#allocation65_spill] sm:$0xff] %v16354_v53  ;;  %v11851_v11 = vld [vmem:[#allocation7 + $0x18c] ss:$16 sps:$4 sm:$0xff]   ;;  %12615 = vtanh.f32 %v6255_v19  ;;  %v11849_v32 = vld [vmem:[#allocation7 + $0x188] ss:$16 sps:$4 sm:$0xff]  }
 0x646   : > { %9318 = vmatprep.subr.bf16.mxu1 %v11842_v47  ;;  %v16342_v9 = vpop.f32.mrf.mxu0  ;;  %v6021_v47 = vadd.f32 %v16184_v31, %v5828_v63  ;;  %v16357_v25 = vpack.c.bf16 %v12598_v4, %v12602_v2  ;;  %v11854_v43 = vld [vmem:[#allocation7 + $0x38c] ss:$16 sps:$4 sm:$0xff]   ;;  %v6017_v31 = vadd.f32 %v16160_v6, %v5824_v14  ;;  %12617 = vtanh.f32 %v6272_v58  ;;  %v18475_v4 = vld [vmem:[#allocation234_spill] sm:$0xff] }
 0x647   : > { %v16344_v56 = vpop.f32.mrf.mxu1  ;;  %v6029_v26 = vadd.f32 %v16214_v35, %v5836_v8  ;;  %v6296_v35 = vadd.f32 %v16017_v24, %v6033_v41  ;;  %v5850_v19 = vadd.f32 %v16270_v57, %v18475_v4  ;;  %v11857_v14 = vld [vmem:[#allocation7 + $0x16c] ss:$16 sps:$4 sm:$0xff]   ;;  %v18476_v8 = vld [vmem:[#allocation226_spill] sm:$0xff] }
 0x648   : > { %v16350_v37 = vpop.f32.mrf.mxu0  ;;  %9126 = vmatpush2.bf16.msra.mxu0 %v11837_v29  ;;  %18473 = vst [vmem:[#allocation67_spill] sm:$0xff] %v16357_v25  ;;  %v6279_v29 = vadd.f32 %v16045_v13, %v6021_v47  ;;  %v5834_v2 = vadd.f32 %v16200_v17, %v18476_v8  ;;  %v11855_v17 = vld [vmem:[#allocation7 + $0x168] ss:$16 sps:$4 sm:$0xff]  }
 0x649   : > { %v16352_v38 = vpop.f32.mrf.mxu1  ;;  %9319 = vmatpush2.bf16.msra.mxu1 %v11840_v51  ;;  %9127 = vmatprep.subr.bf16.mxu0 %v11845_v18  ;;  %v18474_v51 = vld [vmem:[#allocation229_spill] sm:$0xff]  ;;  %v6288_v41 = vadd.f32 %v16017_v24, %v6029_v26  ;;  %v6043_v26 = vadd.f32 %v16272_v44, %v5850_v19  ;;  %v18482_v19 = vld [vmem:[#allocation238_spill] sm:$0xff] }
 0x64a   : > { %9320 = vmatprep.subr.bf16.mxu1 %v11848_v46  ;;  %v16360_v16 = vpop.f32.mrf.mxu0  ;;  %8804 = vmatmul.mubr.bf16.gmra.mxu0 %v15800_v5  ;;  %v5838_v6 = vadd.f32 %v16222_v55, %v18474_v51  ;;  %v11852_v18 = vld [vmem:[#allocation7 + $0x388] ss:$16 sps:$4 sm:$0xff]   ;;  %v12604_v46 = vpop.eup %12603  ;;  %v6271_v55 = vadd.f32 %v16045_v13, %v6017_v31  ;;  %v18477_v51 = vld [vmem:[#allocation232_spill] sm:$0xff]  ;;  %12619 = vtanh.f32 %v6279_v29  ;;  %v11866_v29 = vld [vmem:[#allocation7 + $0x34c] ss:$16 sps:$4 sm:$0xff]  }
 0x64b   : > { %v16362_v63 = vpop.f32.mrf.mxu1  ;;  %8997 = vmatmul.mubr.bf16.gmra.mxu1 %v16354_v53  ;;  %8813 = vmatprep.mubr.bf16.mxu0 %v15820_v0  ;;  %v12606_v58 = vpop.eup %12605  ;;  %v5846_v57 = vadd.f32 %v16252_v23, %v18477_v51  ;;  %v11858_v8 = vld [vmem:[#allocation7 + $0x368] ss:$16 sps:$4 sm:$0xff]   ;;  %12621 = vtanh.f32 %v6296_v35  ;;  %v11863_v23 = vld [vmem:[#allocation7 + $0x14c] ss:$16 sps:$4 sm:$0xff]  }
 0x64c   : > { %9006 = vmatprep.mubr.bf16.mxu1 %v16357_v25  ;;  %v16372_v27 = vpop.f32.mrf.mxu0  ;;  %9128 = vmatpush2.bf16.msra.mxu0 %v11843_v7  ;;  %12623 = vtanh.f32 %v6271_v55  ;;  %v18481_v35 = vld [vmem:[#allocation11_spill] sm:$0xff] }
 0x64d   : > { %v16374_v3 = vpop.f32.mrf.mxu1  ;;  %9321 = vmatpush2.bf16.msra.mxu1 %v11846_v61  ;;  %9129 = vmatprep.subr.bf16.mxu0 %v11851_v11  ;;  %v12608_v61 = vpop.eup %12607  ;;  %12625 = vtanh.f32 %v6288_v41  ;;  %v6039_v44 = vadd.f32 %v16254_v40, %v5846_v57  ;;  %v11861_v55 = vld [vmem:[#allocation7 + $0x148] ss:$16 sps:$4 sm:$0xff]   ;;  %v6312_v41 = vadd.f32 %v16017_v24, %v6043_v26  ;;  %v11869_v51 = vld [vmem:[#allocation7 + $0x12c] ss:$16 sps:$4 sm:$0xff]  }
 0x64e   : > { %9322 = vmatprep.subr.bf16.mxu1 %v11854_v43  ;;  %v16382_v47 = vpop.f32.mrf.mxu0  ;;  %v12610_v11 = vpop.eup %12609  ;;  %v6031_v43 = vadd.f32 %v16224_v45, %v5838_v6  ;;  %v16394_v25 = vpack.c.bf16 %v12604_v46, %v12608_v61  ;;  %v6027_v45 = vadd.f32 %v16202_v49, %v5834_v2  ;;  %v11864_v40 = vld [vmem:[#allocation7 + $0x348] ss:$16 sps:$4 sm:$0xff]   ;;  %v11872_v57 = vld [vmem:[#allocation7 + $0x32c] ss:$16 sps:$4 sm:$0xff]  }
 0x64f   : > { %v16384_v7 = vpop.f32.mrf.mxu1  ;;  %v16397_v0 = vpack.c.bf16 %v12606_v58, %v12610_v11  ;;  %v18483_v61 = vld [vmem:[#allocation231_spill] sm:$0xff] }
 0x650   : > { %v16390_v4 = vpop.f32.mrf.mxu0  ;;  %18478 = vst [vmem:[#allocation69_spill] sm:$0xff] %v16394_v25  ;;  %9130 = vmatpush2.bf16.msra.mxu0 %v11849_v32  ;;  %v18480_v32 = vld [vmem:[#allocation233_spill] sm:$0xff]  ;;  %v6295_v49 = vadd.f32 %v16045_v13, %v6031_v43  ;;  %v12612_v2 = vpop.eup %12611  ;;  %v18484_v43 = vld [vmem:[#allocation236_spill] sm:$0xff] }
 0x651   : > { %v16392_v31 = vpop.f32.mrf.mxu1  ;;  %9323 = vmatpush2.bf16.msra.mxu1 %v11852_v18  ;;  %18479 = vst [vmem:[#allocation71_spill] sm:$0xff] %v16397_v0  ;;  %9131 = vmatprep.subr.bf16.mxu0 %v11857_v14  ;;  %v5848_v18 = vadd.f32 %v16262_v34, %v18480_v32  ;;  %v5860_v14 = vadd.f32 %v16310_v39, %v18482_v19  ;;  %v12614_v11 = vpop.eup %12613 }
 0x652   : > { %9324 = vmatprep.subr.bf16.mxu1 %v11860_v59  ;;  %v16400_v6 = vpop.f32.mrf.mxu0  ;;  %8814 = vmatmul.mubr.bf16.gmra.mxu0 %v15816_v36  ;;  %v5844_v34 = vadd.f32 %v16240_v21, %v18483_v61  ;;  %v6287_v39 = vadd.f32 %v16045_v13, %v6027_v45  ;;  %v5856_v32 = vadd.f32 %v16292_v1, %v18484_v43  ;;  %v12616_v19 = vpop.eup %12615  ;;  %12627 = vtanh.f32 %v6295_v49  ;;  %v11867_v1 = vld [vmem:[#allocation7 + $0x128] ss:$16 sps:$4 sm:$0xff]  }
 0x653   : > { %v16402_v46 = vpop.f32.mrf.mxu1  ;;  %9007 = vmatmul.mubr.bf16.gmra.mxu1 %v16394_v25  ;;  %8823 = vmatprep.mubr.bf16.mxu0 %v18481_v35  ;;  %v6041_v21 = vadd.f32 %v16264_v42, %v5848_v18  ;;  %v12618_v26 = vpop.eup %12617  ;;  %v16435_v45 = vpack.c.bf16 %v12612_v2, %v12616_v19  ;;  %v11870_v43 = vld [vmem:[#allocation7 + $0x328] ss:$16 sps:$4 sm:$0xff]   ;;  %12629 = vtanh.f32 %v6312_v41  ;;  %v11875_v42 = vld [vmem:[#allocation7 + $0x10c] ss:$16 sps:$4 sm:$0xff]  }
 0x654   : > { %9016 = vmatprep.mubr.bf16.mxu1 %v16397_v0  ;;  %v16414_v59 = vpop.f32.mrf.mxu0  ;;  %9132 = vmatpush2.bf16.msra.mxu0 %v11855_v17  ;;  %v6304_v0 = vadd.f32 %v16017_v24, %v6039_v44  ;;  %v6037_v35 = vadd.f32 %v16242_v20, %v5844_v34  ;;  %v16438_v44 = vpack.c.bf16 %v12614_v11, %v12618_v26  ;;  %v11878_v18 = vld [vmem:[#allocation7 + $0x30c] ss:$16 sps:$4 sm:$0xff]   ;;  %12631 = vtanh.f32 %v6287_v39 }
 0x655   : > { %v16416_v58 = vpop.f32.mrf.mxu1  ;;  %9325 = vmatpush2.bf16.msra.mxu1 %v11858_v8  ;;  %9133 = vmatprep.subr.bf16.mxu0 %v11863_v23  ;;  %v6053_v23 = vadd.f32 %v16312_v62, %v5860_v14  ;;  %18485 = vst [vmem:[#allocation73_spill] sm:$0xff] %v16435_v45  ;;  %v18487_v62 = vld [vmem:[#allocation235_spill] sm:$0xff]  ;;  %v6049_v14 = vadd.f32 %v16294_v10, %v5856_v32  ;;  %v18489_v34 = vld [vmem:[#allocation237_spill] sm:$0xff] }
 0x656   : > { %9326 = vmatprep.subr.bf16.mxu1 %v11866_v29  ;;  %v16424_v17 = vpop.f32.mrf.mxu0  ;;  %18486 = vst [vmem:[#allocation75_spill] sm:$0xff] %v16438_v44  ;;  %v5854_v49 = vadd.f32 %v16280_v22, %v18487_v62  ;;  %12633 = vtanh.f32 %v6304_v0  ;;  %v6311_v20 = vadd.f32 %v16045_v13, %v6041_v21  ;;  %v5858_v41 = vadd.f32 %v16302_v28, %v18489_v34  ;;  %v18491_v10 = vld [vmem:[#allocation245_spill] sm:$0xff] }
 0x657   : > { %v16426_v8 = vpop.f32.mrf.mxu1  ;;  %v6328_v22 = vadd.f32 %v16017_v24, %v6053_v23  ;;  %v7033_v0 = vld [vmem:[%s18492_s13] sm:$0xf]  ;;  %v11873_v28 = vld [vmem:[#allocation7 + $0x108] ss:$16 sps:$4 sm:$0xff]   ;;  %v12620_v19 = vpop.eup %12619  ;;  %v6303_v21 = vadd.f32 %v16045_v13, %v6037_v35  ;;  %v6320_v34 = vadd.f32 %v16017_v24, %v6049_v14 }
 0x658   : > { %v16431_v29 = vpop.f32.mrf.mxu0  ;;  %9134 = vmatpush2.bf16.msra.mxu0 %v11861_v55  ;;  %v11876_v32 = vld [vmem:[#allocation7 + $0x308] ss:$16 sps:$4 sm:$0xff]   ;;  %v11881_v26 = vld [vmem:[#allocation7 + $0x4ec] ss:$16 sps:$4 sm:$0xff]   ;;  %v6047_v62 = vadd.f32 %v16282_v48, %v5854_v49  ;;  %12635 = vtanh.f32 %v6311_v20  ;;  %v6051_v35 = vadd.f32 %v16304_v12, %v5858_v41 }
 0x659   : > { %v16433_v61 = vpop.f32.mrf.mxu1  ;;  %9327 = vmatpush2.bf16.msra.mxu1 %v11864_v40  ;;  %9135 = vmatprep.subr.bf16.mxu0 %v11869_v51  ;;  %v18488_v40 = vld [vmem:[#allocation10_spill] sm:$0xff]  ;;  %v18490_v51 = vld [vmem:[#allocation13_spill] sm:$0xff]  ;;  %12637 = vtanh.f32 %v6328_v22  ;;  %v18497_v20 = vld [vmem:[#allocation271_spill] sm:$0xff] }
 0x65a   : > { %9328 = vmatprep.subr.bf16.mxu1 %v11872_v57  ;;  %v16443_v2 = vpop.f32.mrf.mxu0  ;;  %8824 = vmatmul.mubr.bf16.gmra.mxu0 %v18488_v40  ;;  %v5870_v57 = vadd.f32 %v16350_v37, %v18491_v10  ;;  %v11884_v23 = vld [vmem:[#allocation7 + $0x6ec] ss:$16 sps:$4 sm:$0xff]   ;;  %v12622_v37 = vpop.eup %12621  ;;  %12639 = vtanh.f32 %v6303_v21  ;;  %v16487_v12 = vrot.slane %v7033_v0, %v18497_v20  ;;  %v6319_v41 = vadd.f32 %v16045_v13, %v6047_v62  ;;  %v18498_v40 = vld [vmem:[#allocation12_spill] sm:$0xff] }
 0x65b   : > { %v16445_v55 = vpop.f32.mrf.mxu1  ;;  %9017 = vmatmul.mubr.bf16.gmra.mxu1 %v16435_v45  ;;  %8833 = vmatprep.mubr.bf16.mxu0 %v18490_v51  ;;  %v18493_v10 = vld [vmem:[#allocation241_spill] sm:$0xff]  ;;  %12641 = vtanh.f32 %v6320_v34 }
 0x65c   : > { %9026 = vmatprep.mubr.bf16.mxu1 %v16438_v44  ;;  %v16457_v11 = vpop.f32.mrf.mxu0  ;;  %9136 = vmatpush2.bf16.msra.mxu0 %v11867_v1  ;;  %v5866_v44 = vadd.f32 %v16332_v15, %v18493_v10  ;;  %v6063_v48 = vadd.f32 %v16352_v38, %v5870_v57  ;;  %12643 = vtanh.f32 %v6319_v41 }
 0x65d   : > { %v16459_v39 = vpop.f32.mrf.mxu1  ;;  %9329 = vmatpush2.bf16.msra.mxu1 %v11870_v43  ;;  %9137 = vmatprep.subr.bf16.mxu0 %v11875_v42  ;;  %v12624_v43 = vpop.eup %12623  ;;  %v18494_v42 = vld [vmem:[#allocation270_spill] sm:$0xff] }
 0x65e   : > { %9330 = vmatprep.subr.bf16.mxu1 %v11878_v18  ;;  %v16469_v51 = vpop.f32.mrf.mxu0  ;;  %v16475_v18 = vrot.slane %v7033_v0, %v18494_v42  ;;  %v12626_v45 = vpop.eup %12625  ;;  %v16482_v15 = vpack.c.bf16 %v12620_v19, %v12624_v43  ;;  %v6059_v38 = vadd.f32 %v16334_v60, %v5866_v44  ;;  %v18500_v0 = vld [vmem:[#allocation243_spill] sm:$0xff]  ;;  %v6344_v21 = vadd.f32 %v16017_v24, %v6063_v48 }
 0x65f   : > { %v16471_v1 = vpop.f32.mrf.mxu1  ;;  %v16484_v10 = vpack.c.bf16 %v12622_v37, %v12626_v45  ;;  %v5868_v19 = vadd.f32 %v16342_v9, %v18500_v0 }
 0x660   : > { %v16478_v49 = vpop.f32.mrf.mxu0  ;;  %18495 = vst [vmem:[#allocation77_spill] sm:$0xff] %v16482_v15  ;;  %9138 = vmatpush2.bf16.msra.mxu0 %v11873_v28  ;;  %v6327_v28 = vadd.f32 %v16045_v13, %v6051_v35  ;;  %v18502_v35 = vld [vmem:[#allocation239_spill] sm:$0xff] }
 0x661   : > { %v16480_v14 = vpop.f32.mrf.mxu1  ;;  %9331 = vmatpush2.bf16.msra.mxu1 %v11876_v32  ;;  %18496 = vst [vmem:[#allocation79_spill] sm:$0xff] %v16484_v10  ;;  %9493 = vmatprep.subr.bf16.mxu0 %v11881_v26  ;;  %v18499_v32 = vld [vmem:[#allocation17_spill] sm:$0xff]  ;;  %v12628_v26 = vpop.eup %12627 }
 0x662   : > { %9686 = vmatprep.subr.bf16.mxu1 %v11884_v23  ;;  %v8369_v22 = vpop.f32.mrf.mxu0  ;;  %8834 = vmatmul.mubr.bf16.gmra.mxu0 %v18498_v40  ;;  %v18501_v23 = vld [vmem:[#allocation253_spill] sm:$0xff]  ;;  %v12630_v43 = vpop.eup %12629  ;;  %12645 = vtanh.f32 %v6327_v28 }
 0x663   : > { %v8562_v57 = vpop.f32.mrf.mxu1  ;;  %9027 = vmatmul.mubr.bf16.gmra.mxu1 %v16482_v15  ;;  %v8370_v45 = vadd.f32 %v8369_v22, %v16475_v18  ;;  %8843 = vmatprep.mubr.bf16.mxu0 %v18499_v32  ;;  %v5880_v37 = vadd.f32 %v16390_v4, %v18501_v23  ;;  %v5864_v22 = vadd.f32 %v16320_v52, %v18502_v35  ;;  %v12632_v48 = vpop.eup %12631  ;;  %v18503_v32 = vld [vmem:[#allocation249_spill] sm:$0xff]  ;;  %12647 = vtanh.f32 %v6344_v21 }
 0x664   : > { %9036 = vmatprep.mubr.bf16.mxu1 %v16484_v10  ;;  %v8371_v60 = vpop.f32.mrf.mxu0  ;;  %v6336_v10 = vadd.f32 %v16017_v24, %v6059_v38  ;;  %v5876_v15 = vadd.f32 %v16372_v27, %v18503_v32  ;;  %v16514_v52 = vpack.c.bf16 %v12628_v26, %v12632_v48  ;;  %v18507_v21 = vld [vmem:[#allocation21_spill] sm:$0xff] }
 0x665   : > { %v8564_v44 = vpop.f32.mrf.mxu1  ;;  %v16502_v62 = vadd.f32 %v8562_v57, %v8370_v45  ;;  %v8372_v34 = vadd.f32 %v8371_v60, %v16487_v12  ;;  %v12634_v57 = vpop.eup %12633  ;;  %v6061_v45 = vadd.f32 %v16344_v56, %v5868_v19  ;;  %v6073_v38 = vadd.f32 %v16392_v31, %v5880_v37 }
 0x666   : > { %v8373_v9 = vpop.f32.mrf.mxu0  ;;  %18504 = vst [vmem:[#allocation81_spill] sm:$0xff] %v16514_v52  ;;  %v16520_v35 = vpack.c.bf16 %v12630_v43, %v12634_v57  ;;  %v6057_v27 = vadd.f32 %v16322_v30, %v5864_v22  ;;  %12649 = vtanh.f32 %v6336_v10  ;;  %v6069_v56 = vadd.f32 %v16374_v3, %v5876_v15  ;;  %v12636_v26 = vpop.eup %12635  ;;  %v18508_v10 = vld [vmem:[#allocation251_spill] sm:$0xff]  ;;  %v18509_v3 = vld [vmem:[#allocation261_spill] sm:$0xff] }
 0x667   : > { %v8566_v0 = vpop.f32.mrf.mxu1  ;;  %v16510_v40 = vadd.f32 %v8564_v44, %v8372_v34  ;;  %v8374_v4 = vadd.f32 %v8373_v9, %v16475_v18  ;;  %v18506_v34 = vld [vmem:[#allocation15_spill] sm:$0xff]  ;;  %v6343_v30 = vadd.f32 %v16045_v13, %v6061_v45  ;;  %v5878_v37 = vadd.f32 %v16382_v47, %v18508_v10  ;;  %v12638_v9 = vpop.eup %12637 }
 0x668   : > { %v8375_v41 = vpop.f32.mrf.mxu0  ;;  %18505 = vst [vmem:[#allocation83_spill] sm:$0xff] %v16520_v35  ;;  %v5890_v15 = vadd.f32 %v16431_v29, %v18509_v3  ;;  %v12640_v57 = vpop.eup %12639  ;;  %v6352_v10 = vadd.f32 %v16017_v24, %v6069_v56 }
 0x669   : > { %v8568_v60 = vpop.f32.mrf.mxu1  ;;  %v16517_v23 = vadd.f32 %v8566_v0, %v8374_v4  ;;  %v8376_v28 = vadd.f32 %v8375_v41, %v16487_v12  ;;  %v6360_v0 = vadd.f32 %v16017_v24, %v6073_v38  ;;  %v6335_v41 = vadd.f32 %v16045_v13, %v6057_v27 }
 0x66a   : > { %v8379_v32 = vpop.f32.mrf.mxu0  ;;  %8844 = vmatmul.mubr.bf16.gmra.mxu0 %v18506_v34  ;;  %12651 = vtanh.f32 %v6343_v30  ;;  %v6083_v3 = vadd.f32 %v16433_v61, %v5890_v15  ;;  %v18516_v15 = vld [vmem:[#allocation259_spill] sm:$0xff] }
 0x66b   : > { %v8572_v44 = vpop.f32.mrf.mxu1  ;;  %9037 = vmatmul.mubr.bf16.gmra.mxu1 %v16514_v52  ;;  %v16526_v19 = vadd.f32 %v8568_v60, %v8376_v28  ;;  %v8380_v31 = vadd.f32 %v8379_v32, %v16475_v18  ;;  %8853 = vmatprep.mubr.bf16.mxu0 %v18507_v21  ;;  %v18510_v60 = vld [vmem:[#allocation247_spill] sm:$0xff]  ;;  %v12642_v32 = vpop.eup %12641  ;;  %12653 = vtanh.f32 %v6360_v0 }
 0x66c   : > { %9046 = vmatprep.mubr.bf16.mxu1 %v16520_v35  ;;  %v8381_v43 = vpop.f32.mrf.mxu0  ;;  %v5874_v45 = vadd.f32 %v16360_v16, %v18510_v60  ;;  %v18511_v35 = vld [vmem:[#allocation257_spill] sm:$0xff]  ;;  %v16552_v16 = vpack.c.bf16 %v12638_v9, %v12642_v32  ;;  %12655 = vtanh.f32 %v6335_v41 }
 0x66d   : > { %v8574_v22 = vpop.f32.mrf.mxu1  ;;  %v16537_v48 = vadd.f32 %v8572_v44, %v8380_v31  ;;  %v8382_v4 = vadd.f32 %v8381_v43, %v16487_v12  ;;  %v5886_v38 = vadd.f32 %v16414_v59, %v18511_v35  ;;  %v6071_v44 = vadd.f32 %v16384_v7, %v5878_v37  ;;  %v12644_v7 = vpop.eup %12643  ;;  %v18515_v9 = vld [vmem:[#allocation25_spill] sm:$0xff] }
 0x66e   : > { %v8383_v28 = vpop.f32.mrf.mxu0  ;;  %v16550_v43 = vpack.c.bf16 %v12636_v26, %v12640_v57  ;;  %18513 = vst [vmem:[#allocation87_spill] sm:$0xff] %v16552_v16  ;;  %v6067_v35 = vadd.f32 %v16362_v63, %v5874_v45  ;;  %12657 = vtanh.f32 %v6352_v10  ;;  %v5888_v57 = vadd.f32 %v16424_v17, %v18516_v15  ;;  %v11894_v52 = vld [vmem:[#allocation7 + $0x6a8] ss:$16 sps:$4 sm:$0xff]  }
 0x66f   : > { %v8576_v47 = vpop.f32.mrf.mxu1  ;;  %v16546_v21 = vadd.f32 %v8574_v22, %v8382_v4  ;;  %v8384_v29 = vadd.f32 %v8383_v28, %v16475_v18  ;;  %v18514_v4 = vld [vmem:[#allocation19_spill] sm:$0xff]  ;;  %v6079_v26 = vadd.f32 %v16416_v58, %v5886_v38  ;;  %v12646_v0 = vpop.eup %12645  ;;  %v6359_v63 = vadd.f32 %v16045_v13, %v6071_v44  ;;  %v18517_v58 = vld [vmem:[#allocation269_spill] sm:$0xff] }
 0x670   : > { %v8385_v31 = vpop.f32.mrf.mxu0  ;;  %18512 = vst [vmem:[#allocation85_spill] sm:$0xff] %v16550_v43  ;;  %v12648_v45 = vpop.eup %12647  ;;  %v6376_v28 = vadd.f32 %v16017_v24, %v6083_v3  ;;  %v6351_v38 = vadd.f32 %v16045_v13, %v6067_v35 }
 0x671   : > { %v8578_v27 = vpop.f32.mrf.mxu1  ;;  %v16555_v56 = vadd.f32 %v8576_v47, %v8384_v29  ;;  %v8386_v59 = vadd.f32 %v8385_v31, %v16487_v12  ;;  %v5900_v47 = vadd.f32 %v16478_v49, %v18517_v58  ;;  %v18518_v29 = vld [vmem:[#allocation255_spill] sm:$0xff]  ;;  %12659 = vtanh.f32 %v6359_v63 }
 0x672   : > { %v8389_v22 = vpop.f32.mrf.mxu0  ;;  %8854 = vmatmul.mubr.bf16.gmra.mxu0 %v18514_v4  ;;  %v5884_v44 = vadd.f32 %v16400_v6, %v18518_v29  ;;  %12661 = vtanh.f32 %v6376_v28  ;;  %v18522_v29 = vld [vmem:[#allocation23_spill] sm:$0xff] }
 0x673   : > { %v8582_v30 = vpop.f32.mrf.mxu1  ;;  %9047 = vmatmul.mubr.bf16.gmra.mxu1 %v16550_v43  ;;  %v16562_v37 = vadd.f32 %v8578_v27, %v8386_v59  ;;  %v8390_v61 = vadd.f32 %v8389_v22, %v16475_v18  ;;  %8863 = vmatprep.mubr.bf16.mxu0 %v18515_v9  ;;  %v12650_v17 = vpop.eup %12649  ;;  %v6368_v59 = vadd.f32 %v16017_v24, %v6079_v26  ;;  %v18519_v22 = vld [vmem:[#allocation265_spill] sm:$0xff]  ;;  %12663 = vtanh.f32 %v6351_v38 }
 0x674   : > { %9056 = vmatprep.mubr.bf16.mxu1 %v16552_v16  ;;  %v8391_v41 = vpop.f32.mrf.mxu0  ;;  %v5896_v3 = vadd.f32 %v16457_v11, %v18519_v22  ;;  %v16588_v6 = vpack.c.bf16 %v12648_v45, %v12650_v17  ;;  %v6093_v58 = vadd.f32 %v16480_v14, %v5900_v47  ;;  %v11885_v16 = vld [vmem:[#allocation7 + $0x4c8] ss:$16 sps:$4 sm:$0xff]   ;;  %v11893_v43 = vld [vmem:[#allocation7 + $0x4ac] ss:$16 sps:$4 sm:$0xff]  }
 0x675   : > { %v8584_v60 = vpop.f32.mrf.mxu1  ;;  %v16573_v32 = vadd.f32 %v8582_v30, %v8390_v61  ;;  %v8392_v10 = vadd.f32 %v8391_v41, %v16487_v12  ;;  %v6081_v30 = vadd.f32 %v16426_v8, %v5888_v57  ;;  %v16586_v41 = vpack.c.bf16 %v12646_v0, %v12644_v7  ;;  %v18523_v0 = vld [vmem:[#allocation29_spill] sm:$0xff] }
 0x676   : > { %v8393_v31 = vpop.f32.mrf.mxu0  ;;  %18521 = vst [vmem:[#allocation91_spill] sm:$0xff] %v16588_v6  ;;  %12665 = vtanh.f32 %v6368_v59  ;;  %v6089_v8 = vadd.f32 %v16459_v39, %v5896_v3  ;;  %v18525_v59 = vld [vmem:[#allocation263_spill] sm:$0xff] }
 0x677   : > { %v8586_v27 = vpop.f32.mrf.mxu1  ;;  %v16582_v15 = vadd.f32 %v8584_v60, %v8392_v10  ;;  %v8394_v49 = vadd.f32 %v8393_v31, %v16475_v18  ;;  %18520 = vst [vmem:[#allocation89_spill] sm:$0xff] %v16586_v41  ;;  %v6077_v60 = vadd.f32 %v16402_v46, %v5884_v44  ;;  %v6375_v57 = vadd.f32 %v16045_v13, %v6081_v30  ;;  %v18524_v46 = vld [vmem:[#allocation267_spill] sm:$0xff]  ;;  %v12652_v38 = vpop.eup %12651 }
 0x678   : > { %v8395_v61 = vpop.f32.mrf.mxu0  ;;  %v5898_v45 = vadd.f32 %v16469_v51, %v18524_v46  ;;  %v6392_v44 = vadd.f32 %v16017_v24, %v6093_v58  ;;  %v5894_v22 = vadd.f32 %v16443_v2, %v18525_v59  ;;  %v6384_v51 = vadd.f32 %v16017_v24, %v6089_v8  ;;  %v11888_v9 = vld [vmem:[#allocation7 + $0x6c8] ss:$16 sps:$4 sm:$0xff]  }
 0x679   : > { %v8588_v35 = vpop.f32.mrf.mxu1  ;;  %v16591_v26 = vadd.f32 %v8586_v27, %v8394_v49  ;;  %v8396_v11 = vadd.f32 %v8395_v61, %v16487_v12  ;;  %v12654_v27 = vpop.eup %12653  ;;  %v6367_v17 = vadd.f32 %v16045_v13, %v6077_v60  ;;  %12667 = vtanh.f32 %v6375_v57 }
 0x67a   : > { %v8399_v10 = vpop.f32.mrf.mxu0  ;;  %8864 = vmatmul.mubr.bf16.gmra.mxu0 %v18522_v29  ;;  %v12656_v30 = vpop.eup %12655  ;;  %12669 = vtanh.f32 %v6392_v44  ;;  %v6087_v24 = vadd.f32 %v16445_v55, %v5894_v22  ;;  %v18542_v29 = vld [vmem:[#allocation14_spill] sm:$0xff] }
 0x67b   : > { %v8592_v63 = vpop.f32.mrf.mxu1  ;;  %9057 = vmatmul.mubr.bf16.gmra.mxu1 %v16586_v41  ;;  %v16598_v7 = vadd.f32 %v8588_v35, %v8396_v11  ;;  %v8400_v14 = vadd.f32 %v8399_v10, %v16475_v18  ;;  %8873 = vmatprep.mubr.bf16.mxu0 %v18523_v0  ;;  %v12658_v58 = vpop.eup %12657  ;;  %v6091_v11 = vadd.f32 %v16471_v1, %v5898_v45  ;;  %12671 = vtanh.f32 %v6367_v17  ;;  %v18529_v45 = vld [vmem:[#allocation33_spill] sm:$0xff] }
 0x67c   : > { %9066 = vmatprep.mubr.bf16.mxu1 %v16588_v6  ;;  %v8401_v28 = vpop.f32.mrf.mxu0  ;;  %v16623_v46 = vpack.c.bf16 %v12654_v27, %v12658_v58  ;;  %12673 = vtanh.f32 %v6384_v51  ;;  %v6383_v22 = vadd.f32 %v16045_v13, %v6087_v24  ;;  %v11890_v41 = vld [vmem:[#allocation7 + $0x6cc] ss:$16 sps:$4 sm:$0xff]  }
 0x67d   : > { %v8594_v47 = vpop.f32.mrf.mxu1  ;;  %v16607_v31 = vadd.f32 %v8592_v63, %v8400_v14  ;;  %v8402_v39 = vadd.f32 %v8401_v28, %v16487_v12  ;;  %v16618_v14 = vpack.c.bf16 %v12652_v38, %v12656_v30  ;;  %v6391_v38 = vadd.f32 %v16045_v13, %v6091_v11 }
 0x67e   : > { %v8403_v3 = vpop.f32.mrf.mxu0  ;;  %18527 = vst [vmem:[#allocation95_spill] sm:$0xff] %v16623_v46  ;;  %v12660_v55 = vpop.eup %12659 }
 0x67f   : > { %v8596_v49 = vpop.f32.mrf.mxu1  ;;  %v16614_v61 = vadd.f32 %v8594_v47, %v8402_v39  ;;  %v8404_v35 = vadd.f32 %v8403_v3, %v16475_v18  ;;  %18526 = vst [vmem:[#allocation93_spill] sm:$0xff] %v16618_v14  ;;  %v18528_v47 = vld [vmem:[#allocation27_spill] sm:$0xff]  ;;  %v12662_v59 = vpop.eup %12661  ;;  %12675 = vtanh.f32 %v6391_v38 }
 0x680   : > { %v8405_v10 = vpop.f32.mrf.mxu0  ;;  %v12664_v30 = vpop.eup %12663  ;;  %12677 = vtanh.f32 %v6383_v22 }
 0x681   : > { %v8598_v63 = vpop.f32.mrf.mxu1  ;;  %v16620_v60 = vadd.f32 %v8596_v49, %v8404_v35  ;;  %v8406_v2 = vadd.f32 %v8405_v10, %v16487_v12 }
 0x682   : > { %v8409_v8 = vpop.f32.mrf.mxu0  ;;  %8874 = vmatmul.mubr.bf16.gmra.mxu0 %v18528_v47 }
 0x683   : > { %v8602_v28 = vpop.f32.mrf.mxu1  ;;  %9067 = vmatmul.mubr.bf16.gmra.mxu1 %v16618_v14  ;;  %v16628_v1 = vadd.f32 %v8598_v63, %v8406_v2  ;;  %v8410_v57 = vadd.f32 %v8409_v8, %v16475_v18  ;;  %8883 = vmatprep.mubr.bf16.mxu0 %v18529_v45  ;;  %v12666_v58 = vpop.eup %12665  ;;  %v16641_v63 = vpack.c.bf16 %v12660_v55, %v12664_v30 }
 0x684   : > { %9076 = vmatprep.mubr.bf16.mxu1 %v16623_v46  ;;  %v8411_v44 = vpop.f32.mrf.mxu0  ;;  %v18536_v46 = vld [vmem:[#allocation35_spill] sm:$0xff] }
 0x685   : > { %v8604_v39 = vpop.f32.mrf.mxu1  ;;  %v16634_v27 = vadd.f32 %v8602_v28, %v8410_v57  ;;  %v8412_v17 = vadd.f32 %v8411_v44, %v16487_v12  ;;  %18530 = vst [vmem:[#allocation97_spill] sm:$0xff] %v16641_v63  ;;  %v16646_v28 = vpack.c.bf16 %v12662_v59, %v12666_v58  ;;  %v18532_v57 = vld [vmem:[#allocation31_spill] sm:$0xff] }
 0x686   : > { %v8413_v3 = vpop.f32.mrf.mxu0 }
 0x687   : > { %v8606_v49 = vpop.f32.mrf.mxu1  ;;  %v16638_v51 = vadd.f32 %v8604_v39, %v8412_v17  ;;  %v8414_v35 = vadd.f32 %v8413_v3, %v16475_v18  ;;  %18531 = vst [vmem:[#allocation99_spill] sm:$0xff] %v16646_v28  ;;  %v18533_v39 = vld [vmem:[#allocation37_spill] sm:$0xff]  ;;  %v12668_v3 = vpop.eup %12667 }
 0x688   : > { %v8415_v11 = vpop.f32.mrf.mxu0 }
 0x689   : > { %v8608_v10 = vpop.f32.mrf.mxu1  ;;  %v16643_v2 = vadd.f32 %v8606_v49, %v8414_v35  ;;  %v8416_v8 = vadd.f32 %v8415_v11, %v16487_v12  ;;  %v12670_v49 = vpop.eup %12669 }
 0x68a   : > { %v8419_v13 = vpop.f32.mrf.mxu0  ;;  %8884 = vmatmul.mubr.bf16.gmra.mxu0 %v18532_v57  ;;  %v12672_v58 = vpop.eup %12671 }
 0x68b   : > { %v8612_v24 = vpop.f32.mrf.mxu1  ;;  %9077 = vmatmul.mubr.bf16.gmra.mxu1 %v16641_v63  ;;  %v16650_v44 = vadd.f32 %v8608_v10, %v8416_v8  ;;  %v8420_v38 = vadd.f32 %v8419_v13, %v16475_v18  ;;  %8893 = vmatprep.mubr.bf16.mxu0 %v18533_v39  ;;  %v12674_v8 = vpop.eup %12673  ;;  %v16661_v63 = vpack.c.bf16 %v12668_v3, %v12672_v58 }
 0x68c   : > { %9086 = vmatprep.mubr.bf16.mxu1 %v16646_v28  ;;  %v8421_v55 = vpop.f32.mrf.mxu0  ;;  %v12676_v58 = vpop.eup %12675 }
 0x68d   : > { %v8614_v17 = vpop.f32.mrf.mxu1  ;;  %v16655_v59 = vadd.f32 %v8612_v24, %v8420_v38  ;;  %v8422_v22 = vadd.f32 %v8421_v55, %v16487_v12  ;;  %18534 = vst [vmem:[#allocation101_spill] sm:$0xff] %v16661_v63  ;;  %v16666_v38 = vpack.c.bf16 %v12670_v49, %v12674_v8 }
 0x68e   : > { %v8423_v30 = vpop.f32.mrf.mxu0 }
 0x68f   : > { %v8616_v35 = vpop.f32.mrf.mxu1  ;;  %v16658_v11 = vadd.f32 %v8614_v17, %v8422_v22  ;;  %v8424_v10 = vadd.f32 %v8423_v30, %v16475_v18  ;;  %18535 = vst [vmem:[#allocation103_spill] sm:$0xff] %v16666_v38  ;;  %v18537_v30 = vld [vmem:[#allocation41_spill] sm:$0xff] }
 0x690   : > { %v8425_v13 = vpop.f32.mrf.mxu0 }
 0x691   : > { %v8618_v39 = vpop.f32.mrf.mxu1  ;;  %v16663_v28 = vadd.f32 %v8616_v35, %v8424_v10  ;;  %v8426_v24 = vadd.f32 %v8425_v13, %v16487_v12 }
 0x692   : > { %v8429_v55 = vpop.f32.mrf.mxu0  ;;  %8894 = vmatmul.mubr.bf16.gmra.mxu0 %v18536_v46  ;;  %v12678_v46 = vpop.eup %12677 }
 0x693   : > { %v8622_v57 = vpop.f32.mrf.mxu1  ;;  %9087 = vmatmul.mubr.bf16.gmra.mxu1 %v16661_v63  ;;  %v16670_v17 = vadd.f32 %v8618_v39, %v8426_v24  ;;  %v8430_v22 = vadd.f32 %v8429_v55, %v16475_v18  ;;  %8903 = vmatprep.mubr.bf16.mxu0 %v18537_v30  ;;  %v16681_v63 = vpack.c.bf16 %v12676_v58, %v12678_v46 }
 0x694   : > { %9096 = vmatprep.mubr.bf16.mxu1 %v16666_v38  ;;  %v8431_v3 = vpop.f32.mrf.mxu0 }
 0x695   : > { %v8624_v35 = vpop.f32.mrf.mxu1  ;;  %v16675_v10 = vadd.f32 %v8622_v57, %v8430_v22  ;;  %v8432_v49 = vadd.f32 %v8431_v3, %v16487_v12  ;;  %18538 = vst [vmem:[#allocation105_spill] sm:$0xff] %v16681_v63  ;;  %v18539_v22 = vld [vmem:[#allocation39_spill] sm:$0xff] }
 0x696   : > { %v8433_v8 = vpop.f32.mrf.mxu0 }
 0x697   : > { %v8626_v13 = vpop.f32.mrf.mxu1  ;;  %v16678_v45 = vadd.f32 %v8624_v35, %v8432_v49  ;;  %v8434_v39 = vadd.f32 %v8433_v8, %v16475_v18  ;;  %v18540_v49 = vld [vmem:[#allocation140_spill] sm:$0xff] }
 0x698   : > { %v8435_v24 = vpop.f32.mrf.mxu0  ;;  %v18541_v8 = vld [vmem:[#allocation48_spill] sm:$0xff] }
 0x699   : > { %v8628_v55 = vpop.f32.mrf.mxu1  ;;  %v16683_v30 = vadd.f32 %v8626_v13, %v8434_v39  ;;  %v8436_v38 = vadd.f32 %v8435_v24, %v16487_v12 }
 0x69a   : > { %v8439_v14 = vpop.f32.mrf.mxu0  ;;  %8904 = vmatmul.mubr.bf16.gmra.mxu0 %v18539_v22 }
 0x69b   : > { %v8632_v57 = vpop.f32.mrf.mxu1  ;;  %9097 = vmatmul.mubr.bf16.gmra.mxu1 %v16681_v63  ;;  %v16688_v3 = vadd.f32 %v8628_v55, %v8436_v38  ;;  %v8440_v35 = vadd.f32 %v8439_v14, %v16475_v18  ;;  %9139 = vmatprep.mubr.bf16.mxu0 %v18540_v49  ;;  %v11879_v38 = vld [vmem:[#allocation7 + $0x4e8] ss:$16 sps:$4 sm:$0xff]  }
 0x69c   : > { %9332 = vmatprep.mubr.bf16.mxu1 %v18541_v8  ;;  %v8441_v46 = vpop.f32.mrf.mxu0  ;;  %v11882_v14 = vld [vmem:[#allocation7 + $0x6e8] ss:$16 sps:$4 sm:$0xff]   ;;  %v11887_v8 = vld [vmem:[#allocation7 + $0x4cc] ss:$16 sps:$4 sm:$0xff]  }
 0x69d   : > { %v8634_v58 = vpop.f32.mrf.mxu1  ;;  %v16693_v13 = vadd.f32 %v8632_v57, %v8440_v35  ;;  %v8442_v39 = vadd.f32 %v8441_v46, %v16487_v12  ;;  %v18543_v46 = vld [vmem:[#allocation189_spill] sm:$0xff] }
 0x69e   : > { %v8443_v24 = vpop.f32.mrf.mxu0 }
 0x69f   : > { %v8636_v47 = vpop.f32.mrf.mxu1  ;;  %v16696_v6 = vadd.f32 %v8634_v58, %v8442_v39  ;;  %v8444_v63 = vadd.f32 %v8443_v24, %v16475_v18  ;;  %v18544_v24 = vld [vmem:[#allocation16_spill] sm:$0xff] }
 0x6a0   : > { %v8445_v55 = vpop.f32.mrf.mxu0 }
 0x6a1   : > { %v8638_v22 = vpop.f32.mrf.mxu1  ;;  %v16699_v0 = vadd.f32 %v8636_v47, %v8444_v63  ;;  %v8446_v49 = vadd.f32 %v8445_v55, %v16487_v12  ;;  %v18545_v47 = vld [vmem:[#allocation52_spill] sm:$0xff] }
 0x6a2   : > { %v8449_v57 = vpop.f32.mrf.mxu0  ;;  %9140 = vmatmul.mubr.bf16.vlgmr.msra.gmra.mxu0 %v18542_v29 }
 0x6a3   : > { %v8642_v35 = vpop.f32.mrf.mxu1  ;;  %9333 = vmatmul.mubr.bf16.vlgmr.msra.gmra.mxu1 %v18543_v46  ;;  %v16704_v58 = vadd.f32 %v8638_v22, %v8446_v49  ;;  %v8450_v39 = vadd.f32 %v8449_v57, %v16475_v18  ;;  %9494 = vmatpush1.bf16.msra.mxu0 %v11879_v38  ;;  %v11896_v22 = vld [vmem:[#allocation7 + $0x6ac] ss:$16 sps:$4 sm:$0xff]  }
 0x6a4   : > { %9149 = vmatprep.mubr.bf16.mxu0 %v18544_v24  ;;  %9342 = vmatprep.mubr.bf16.mxu1 %v18545_v47  ;;  %v8451_v63 = vpop.f32.mrf.mxu0 }
 0x6a5   : > { %v8644_v55 = vpop.f32.mrf.mxu1  ;;  %9687 = vmatpush1.bf16.msra.mxu1 %v11882_v14  ;;  %v16709_v4 = vadd.f32 %v8642_v35, %v8450_v39  ;;  %v8452_v29 = vadd.f32 %v8451_v63, %v16487_v12  ;;  %9495 = vmatprep.subr.bf16.mxu0 %v11887_v8  ;;  %v11891_v14 = vld [vmem:[#allocation7 + $0x4a8] ss:$16 sps:$4 sm:$0xff]   ;;  %v11902_v8 = vld [vmem:[#allocation7 + $0x68c] ss:$16 sps:$4 sm:$0xff]  }
 0x6a6   : > { %9688 = vmatprep.subr.bf16.mxu1 %v11890_v41  ;;  %v8453_v49 = vpop.f32.mrf.mxu0  ;;  %v11899_v41 = vld [vmem:[#allocation7 + $0x48c] ss:$16 sps:$4 sm:$0xff]  }
 0x6a7   : > { %v8646_v57 = vpop.f32.mrf.mxu1  ;;  %v16712_v38 = vadd.f32 %v8644_v55, %v8452_v29  ;;  %v8454_v46 = vadd.f32 %v8453_v49, %v16475_v18  ;;  %9496 = vmatpush1.bf16.msra.mxu0 %v11885_v16  ;;  %v18546_v55 = vld [vmem:[#allocation141_spill] sm:$0xff]  ;;  %v18547_v29 = vld [vmem:[#allocation50_spill] sm:$0xff]  ;;  %v18548_v49 = vld [vmem:[#allocation20_spill] sm:$0xff] }
 0x6a8   : > { %v8455_v24 = vpop.f32.mrf.mxu0  ;;  %9497 = vmatprep.subr.bf16.mxu0 %v11893_v43  ;;  %v18549_v43 = vld [vmem:[#allocation199_spill] sm:$0xff] }
 0x6a9   : > { %v8648_v47 = vpop.f32.mrf.mxu1  ;;  %9689 = vmatpush1.bf16.msra.mxu1 %v11888_v9  ;;  %v16715_v35 = vadd.f32 %v8646_v57, %v8454_v46  ;;  %v8456_v39 = vadd.f32 %v8455_v24, %v16487_v12  ;;  %v11900_v24 = vld [vmem:[#allocation7 + $0x688] ss:$16 sps:$4 sm:$0xff]  }
 0x6aa   : > { %9690 = vmatprep.subr.bf16.mxu1 %v11896_v22  ;;  %v8459_v63 = vpop.f32.mrf.mxu0  ;;  %9150 = vmatmul.mubr.bf16.gmra.mxu0 %v18546_v55  ;;  %v11897_v22 = vld [vmem:[#allocation7 + $0x488] ss:$16 sps:$4 sm:$0xff]  }
 0x6ab   : > { %v8652_v34 = vpop.f32.mrf.mxu1  ;;  %9343 = vmatmul.mubr.bf16.gmra.mxu1 %v18547_v29  ;;  %v16720_v16 = vadd.f32 %v8648_v47, %v8456_v39  ;;  %v8460_v9 = vadd.f32 %v8459_v63, %v16475_v18  ;;  %9159 = vmatprep.mubr.bf16.mxu0 %v18548_v49  ;;  %v11905_v47 = vld [vmem:[#allocation7 + $0x46c] ss:$16 sps:$4 sm:$0xff]  }
 0x6ac   : > { %9352 = vmatprep.mubr.bf16.mxu1 %v18549_v43  ;;  %v8461_v57 = vpop.f32.mrf.mxu0  ;;  %9498 = vmatpush1.bf16.msra.mxu0 %v11891_v14  ;;  %v11908_v39 = vld [vmem:[#allocation7 + $0x66c] ss:$16 sps:$4 sm:$0xff]   ;;  %v11906_v14 = vld [vmem:[#allocation7 + $0x668] ss:$16 sps:$4 sm:$0xff]  }
 0x6ad   : > { %v8654_v46 = vpop.f32.mrf.mxu1  ;;  %9691 = vmatpush1.bf16.msra.mxu1 %v11894_v52  ;;  %v16725_v25 = vadd.f32 %v8652_v34, %v8460_v9  ;;  %v8462_v55 = vadd.f32 %v8461_v57, %v16487_v12  ;;  %9499 = vmatprep.subr.bf16.mxu0 %v11899_v41  ;;  %v11903_v52 = vld [vmem:[#allocation7 + $0x468] ss:$16 sps:$4 sm:$0xff]   ;;  %v11911_v41 = vld [vmem:[#allocation7 + $0x44c] ss:$16 sps:$4 sm:$0xff]  }
 0x6ae   : > { %9692 = vmatprep.subr.bf16.mxu1 %v11902_v8  ;;  %v8463_v29 = vpop.f32.mrf.mxu0  ;;  %v11914_v8 = vld [vmem:[#allocation7 + $0x64c] ss:$16 sps:$4 sm:$0xff]  }
 0x6af   : > { %v8656_v63 = vpop.f32.mrf.mxu1  ;;  %v16728_v36 = vadd.f32 %v8654_v46, %v8462_v55  ;;  %v8464_v49 = vadd.f32 %v8463_v29, %v16475_v18  ;;  %v18550_v46 = vld [vmem:[#allocation18_spill] sm:$0xff] }
 0x6b0   : > { %v8465_v43 = vpop.f32.mrf.mxu0  ;;  %9500 = vmatpush1.bf16.msra.mxu0 %v11897_v22  ;;  %v18551_v55 = vld [vmem:[#allocation198_spill] sm:$0xff] }
 0x6b1   : > { %v8658_v53 = vpop.f32.mrf.mxu1  ;;  %9693 = vmatpush1.bf16.msra.mxu1 %v11900_v24  ;;  %v16731_v34 = vadd.f32 %v8656_v63, %v8464_v49  ;;  %v8466_v9 = vadd.f32 %v8465_v43, %v16487_v12  ;;  %9501 = vmatprep.subr.bf16.mxu0 %v11905_v47  ;;  %v18552_v24 = vld [vmem:[#allocation151_spill] sm:$0xff]  ;;  %v18553_v63 = vld [vmem:[#allocation56_spill] sm:$0xff] }
 0x6b2   : > { %9694 = vmatprep.subr.bf16.mxu1 %v11908_v39  ;;  %v8469_v57 = vpop.f32.mrf.mxu0  ;;  %9160 = vmatmul.mubr.bf16.gmra.mxu0 %v18550_v46  ;;  %v11909_v47 = vld [vmem:[#allocation7 + $0x448] ss:$16 sps:$4 sm:$0xff]  }
 0x6b3   : > { %v8662_v5 = vpop.f32.mrf.mxu1  ;;  %9353 = vmatmul.mubr.bf16.gmra.mxu1 %v18551_v55  ;;  %v16736_v29 = vadd.f32 %v8658_v53, %v8466_v9  ;;  %v8470_v22 = vadd.f32 %v8469_v57, %v16475_v18  ;;  %9169 = vmatprep.mubr.bf16.mxu0 %v18552_v24  ;;  %v11912_v39 = vld [vmem:[#allocation7 + $0x648] ss:$16 sps:$4 sm:$0xff]   ;;  %v11917_v53 = vld [vmem:[#allocation7 + $0x42c] ss:$16 sps:$4 sm:$0xff]  }
 0x6b4   : > { %9362 = vmatprep.mubr.bf16.mxu1 %v18553_v63  ;;  %v8471_v49 = vpop.f32.mrf.mxu0  ;;  %9502 = vmatpush1.bf16.msra.mxu0 %v11903_v52  ;;  %v11920_v9 = vld [vmem:[#allocation7 + $0x62c] ss:$16 sps:$4 sm:$0xff]   ;;  %v11915_v52 = vld [vmem:[#allocation7 + $0x428] ss:$16 sps:$4 sm:$0xff]  }
 0x6b5   : > { %v8664_v43 = vpop.f32.mrf.mxu1  ;;  %9695 = vmatpush1.bf16.msra.mxu1 %v11906_v14  ;;  %v16741_v54 = vadd.f32 %v8662_v5, %v8470_v22  ;;  %v8472_v46 = vadd.f32 %v8471_v49, %v16487_v12  ;;  %9503 = vmatprep.subr.bf16.mxu0 %v11911_v41  ;;  %v11918_v14 = vld [vmem:[#allocation7 + $0x628] ss:$16 sps:$4 sm:$0xff]   ;;  %v11923_v41 = vld [vmem:[#allocation7 + $0x40c] ss:$16 sps:$4 sm:$0xff]  }
 0x6b6   : > { %9696 = vmatprep.subr.bf16.mxu1 %v11914_v8  ;;  %v8473_v55 = vpop.f32.mrf.mxu0  ;;  %v11926_v8 = vld [vmem:[#allocation7 + $0x60c] ss:$16 sps:$4 sm:$0xff]  }
 0x6b7   : > { %18554 = vst [vmem:[#allocation107_spill] sm:$0xff] %v16741_v54  ;;  %v8666_v57 = vpop.f32.mrf.mxu1  ;;  %v16744_v50 = vadd.f32 %v8664_v43, %v8472_v46  ;;  %v8474_v24 = vadd.f32 %v8473_v55, %v16475_v18  ;;  %v18557_v43 = vld [vmem:[#allocation150_spill] sm:$0xff] }
 0x6b8   : > { %v8475_v63 = vpop.f32.mrf.mxu0  ;;  %9504 = vmatpush1.bf16.msra.mxu0 %v11909_v47  ;;  %v18558_v46 = vld [vmem:[#allocation54_spill] sm:$0xff] }
 0x6b9   : > { %18555 = vst [vmem:[#allocation109_spill] sm:$0xff] %v16744_v50  ;;  %v8668_v33 = vpop.f32.mrf.mxu1  ;;  %9697 = vmatpush1.bf16.msra.mxu1 %v11912_v39  ;;  %v16747_v5 = vadd.f32 %v8666_v57, %v8474_v24  ;;  %v8476_v22 = vadd.f32 %v8475_v63, %v16487_v12  ;;  %9505 = vmatprep.subr.bf16.mxu0 %v11917_v53  ;;  %v18560_v39 = vld [vmem:[#allocation152_spill] sm:$0xff]  ;;  %v11921_v53 = vld [vmem:[#allocation7 + $0x408] ss:$16 sps:$4 sm:$0xff]  }
 0x6ba   : > { %9698 = vmatprep.subr.bf16.mxu1 %v11920_v9  ;;  %v8479_v49 = vpop.f32.mrf.mxu0  ;;  %9170 = vmatmul.mubr.bf16.gmra.mxu0 %v18557_v43  ;;  %v18561_v57 = vld [vmem:[#allocation60_spill] sm:$0xff]  ;;  %v11924_v9 = vld [vmem:[#allocation7 + $0x608] ss:$16 sps:$4 sm:$0xff]  }
 0x6bb   : > { %18556 = vst [vmem:[#allocation111_spill] sm:$0xff] %v16747_v5  ;;  %v8672_v54 = vpop.f32.mrf.mxu1  ;;  %9363 = vmatmul.mubr.bf16.gmra.mxu1 %v18558_v46  ;;  %v16752_v55 = vadd.f32 %v8668_v33, %v8476_v22  ;;  %v8480_v47 = vadd.f32 %v8479_v49, %v16475_v18  ;;  %9179 = vmatprep.mubr.bf16.mxu0 %v18560_v39  ;;  %v11929_v33 = vld [vmem:[#allocation7 + $0x5ec] ss:$16 sps:$4 sm:$0xff]  }
 0x6bc   : > { %9372 = vmatprep.mubr.bf16.mxu1 %v18561_v57  ;;  %v8481_v24 = vpop.f32.mrf.mxu0  ;;  %9506 = vmatpush1.bf16.msra.mxu0 %v11915_v52  ;;  %v11932_v22 = vld [vmem:[#allocation7 + $0x7ec] ss:$16 sps:$4 sm:$0xff]   ;;  %v11927_v52 = vld [vmem:[#allocation7 + $0x5e8] ss:$16 sps:$4 sm:$0xff]  }
 0x6bd   : > { %18559 = vst [vmem:[#allocation113_spill] sm:$0xff] %v16752_v55  ;;  %v8674_v63 = vpop.f32.mrf.mxu1  ;;  %9699 = vmatpush1.bf16.msra.mxu1 %v11918_v14  ;;  %v16757_v5 = vadd.f32 %v8672_v54, %v8480_v47  ;;  %v8482_v43 = vadd.f32 %v8481_v24, %v16487_v12  ;;  %9507 = vmatprep.subr.bf16.mxu0 %v11923_v41  ;;  %v11930_v14 = vld [vmem:[#allocation7 + $0x7e8] ss:$16 sps:$4 sm:$0xff]   ;;  %v11935_v41 = vld [vmem:[#allocation7 + $0x5cc] ss:$16 sps:$4 sm:$0xff]  }
 0x6be   : > { %9700 = vmatprep.subr.bf16.mxu1 %v11926_v8  ;;  %v8483_v46 = vpop.f32.mrf.mxu0  ;;  %v11938_v8 = vld [vmem:[#allocation7 + $0x7cc] ss:$16 sps:$4 sm:$0xff]  }
 0x6bf   : > { %18562 = vst [vmem:[#allocation115_spill] sm:$0xff] %v16757_v5  ;;  %v8676_v49 = vpop.f32.mrf.mxu1  ;;  %v16760_v55 = vadd.f32 %v8674_v63, %v8482_v43  ;;  %v8484_v39 = vadd.f32 %v8483_v46, %v16475_v18  ;;  %v18565_v63 = vld [vmem:[#allocation22_spill] sm:$0xff] }
 0x6c0   : > { %v8485_v57 = vpop.f32.mrf.mxu0  ;;  %9508 = vmatpush1.bf16.msra.mxu0 %v11921_v53  ;;  %v18566_v43 = vld [vmem:[#allocation58_spill] sm:$0xff] }
 0x6c1   : > { %18563 = vst [vmem:[#allocation117_spill] sm:$0xff] %v16760_v55  ;;  %v8678_v50 = vpop.f32.mrf.mxu1  ;;  %9701 = vmatpush1.bf16.msra.mxu1 %v11924_v9  ;;  %v16763_v54 = vadd.f32 %v8676_v49, %v8484_v39  ;;  %v8486_v47 = vadd.f32 %v8485_v57, %v16487_v12  ;;  %9509 = vmatprep.subr.bf16.mxu0 %v11929_v33  ;;  %v18568_v9 = vld [vmem:[#allocation24_spill] sm:$0xff]  ;;  %v11933_v33 = vld [vmem:[#allocation7 + $0x5c8] ss:$16 sps:$4 sm:$0xff]  }
 0x6c2   : > { %9702 = vmatprep.subr.bf16.mxu1 %v11932_v22  ;;  %v8489_v24 = vpop.f32.mrf.mxu0  ;;  %9180 = vmatmul.mubr.bf16.gmra.mxu0 %v18565_v63  ;;  %v18569_v49 = vld [vmem:[#allocation64_spill] sm:$0xff]  ;;  %v11936_v22 = vld [vmem:[#allocation7 + $0x7c8] ss:$16 sps:$4 sm:$0xff]  }
 0x6c3   : > { %18564 = vst [vmem:[#allocation119_spill] sm:$0xff] %v16763_v54  ;;  %v8682_v5 = vpop.f32.mrf.mxu1  ;;  %9373 = vmatmul.mubr.bf16.gmra.mxu1 %v18566_v43  ;;  %v16768_v46 = vadd.f32 %v8678_v50, %v8486_v47  ;;  %v8490_v53 = vadd.f32 %v8489_v24, %v16475_v18  ;;  %9189 = vmatprep.mubr.bf16.mxu0 %v18568_v9  ;;  %v11941_v50 = vld [vmem:[#allocation7 + $0x5ac] ss:$16 sps:$4 sm:$0xff]  }
 0x6c4   : > { %9382 = vmatprep.mubr.bf16.mxu1 %v18569_v49  ;;  %v8491_v39 = vpop.f32.mrf.mxu0  ;;  %9510 = vmatpush2.bf16.msra.mxu0 %v11927_v52  ;;  %v11944_v47 = vld [vmem:[#allocation7 + $0x7ac] ss:$16 sps:$4 sm:$0xff]   ;;  %v11939_v52 = vld [vmem:[#allocation7 + $0x5a8] ss:$16 sps:$4 sm:$0xff]  }
 0x6c5   : > { %18567 = vst [vmem:[#allocation121_spill] sm:$0xff] %v16768_v46  ;;  %v8684_v57 = vpop.f32.mrf.mxu1  ;;  %9703 = vmatpush2.bf16.msra.mxu1 %v11930_v14  ;;  %v16773_v54 = vadd.f32 %v8682_v5, %v8490_v53  ;;  %v8492_v63 = vadd.f32 %v8491_v39, %v16487_v12  ;;  %9511 = vmatprep.subr.bf16.mxu0 %v11935_v41  ;;  %v11942_v14 = vld [vmem:[#allocation7 + $0x7a8] ss:$16 sps:$4 sm:$0xff]   ;;  %v11947_v41 = vld [vmem:[#allocation7 + $0x58c] ss:$16 sps:$4 sm:$0xff]  }
 0x6c6   : > { %9704 = vmatprep.subr.bf16.mxu1 %v11938_v8  ;;  %v8493_v43 = vpop.f32.mrf.mxu0  ;;  %v11950_v8 = vld [vmem:[#allocation7 + $0x78c] ss:$16 sps:$4 sm:$0xff]  }
 0x6c7   : > { %18570 = vst [vmem:[#allocation123_spill] sm:$0xff] %v16773_v54  ;;  %v8686_v24 = vpop.f32.mrf.mxu1  ;;  %v16776_v46 = vadd.f32 %v8684_v57, %v8492_v63  ;;  %v8494_v9 = vadd.f32 %v8493_v43, %v16475_v18  ;;  %v18573_v57 = vld [vmem:[#allocation153_spill] sm:$0xff]  ;;  %v18574_v63 = vld [vmem:[#allocation62_spill] sm:$0xff] }
 0x6c8   : > { %v8495_v49 = vpop.f32.mrf.mxu0  ;;  %9512 = vmatpush2.bf16.msra.mxu0 %v11933_v33 }
 0x6c9   : > { %18571 = vst [vmem:[#allocation125_spill] sm:$0xff] %v16776_v46  ;;  %v8688_v55 = vpop.f32.mrf.mxu1  ;;  %9705 = vmatpush2.bf16.msra.mxu1 %v11936_v22  ;;  %v16779_v5 = vadd.f32 %v8686_v24, %v8494_v9  ;;  %v8496_v53 = vadd.f32 %v8495_v49, %v16487_v12  ;;  %9513 = vmatprep.subr.bf16.mxu0 %v11941_v50  ;;  %v18576_v22 = vld [vmem:[#allocation28_spill] sm:$0xff]  ;;  %v11945_v50 = vld [vmem:[#allocation7 + $0x588] ss:$16 sps:$4 sm:$0xff]  }
 0x6ca   : > { %9706 = vmatprep.subr.bf16.mxu1 %v11944_v47  ;;  %v8499_v39 = vpop.f32.mrf.mxu0  ;;  %9190 = vmatmul.mubr.bf16.gmra.mxu0 %v18573_v57  ;;  %v18577_v24 = vld [vmem:[#allocation68_spill] sm:$0xff]  ;;  %v11948_v47 = vld [vmem:[#allocation7 + $0x788] ss:$16 sps:$4 sm:$0xff]  }
 0x6cb   : > { %18572 = vst [vmem:[#allocation127_spill] sm:$0xff] %v16779_v5  ;;  %v8692_v54 = vpop.f32.mrf.mxu1  ;;  %9383 = vmatmul.mubr.bf16.gmra.mxu1 %v18574_v63  ;;  %v16784_v43 = vadd.f32 %v8688_v55, %v8496_v53  ;;  %v8500_v33 = vadd.f32 %v8499_v39, %v16475_v18  ;;  %9199 = vmatprep.mubr.bf16.mxu0 %v18576_v22  ;;  %v11953_v55 = vld [vmem:[#allocation7 + $0x56c] ss:$16 sps:$4 sm:$0xff]  }
 0x6cc   : > { %9392 = vmatprep.mubr.bf16.mxu1 %v18577_v24  ;;  %v8501_v9 = vpop.f32.mrf.mxu0  ;;  %9514 = vmatpush2.bf16.msra.mxu0 %v11939_v52  ;;  %v11956_v53 = vld [vmem:[#allocation7 + $0x76c] ss:$16 sps:$4 sm:$0xff]   ;;  %v11951_v52 = vld [vmem:[#allocation7 + $0x568] ss:$16 sps:$4 sm:$0xff]  }
 0x6cd   : > { %18575 = vst [vmem:[#allocation129_spill] sm:$0xff] %v16784_v43  ;;  %v8694_v49 = vpop.f32.mrf.mxu1  ;;  %9707 = vmatpush2.bf16.msra.mxu1 %v11942_v14  ;;  %v16789_v5 = vadd.f32 %v8692_v54, %v8500_v33  ;;  %v8502_v57 = vadd.f32 %v8501_v9, %v16487_v12  ;;  %9515 = vmatprep.subr.bf16.mxu0 %v11947_v41  ;;  %v11954_v14 = vld [vmem:[#allocation7 + $0x768] ss:$16 sps:$4 sm:$0xff]   ;;  %v11959_v41 = vld [vmem:[#allocation7 + $0x54c] ss:$16 sps:$4 sm:$0xff]  }
 0x6ce   : > { %9708 = vmatprep.subr.bf16.mxu1 %v11950_v8  ;;  %v8503_v63 = vpop.f32.mrf.mxu0  ;;  %v11962_v8 = vld [vmem:[#allocation7 + $0x74c] ss:$16 sps:$4 sm:$0xff]  }
 0x6cf   : > { %18578 = vst [vmem:[#allocation131_spill] sm:$0xff] %v16789_v5  ;;  %v8696_v39 = vpop.f32.mrf.mxu1  ;;  %v16792_v43 = vadd.f32 %v8694_v49, %v8502_v57  ;;  %v8504_v22 = vadd.f32 %v8503_v63, %v16475_v18  ;;  %v18581_v49 = vld [vmem:[#allocation26_spill] sm:$0xff] }
 0x6d0   : > { %v8505_v24 = vpop.f32.mrf.mxu0  ;;  %9516 = vmatpush2.bf16.msra.mxu0 %v11945_v50  ;;  %v18582_v57 = vld [vmem:[#allocation66_spill] sm:$0xff] }
 0x6d1   : > { %18579 = vst [vmem:[#allocation133_spill] sm:$0xff] %v16792_v43  ;;  %v8698_v46 = vpop.f32.mrf.mxu1  ;;  %9709 = vmatpush2.bf16.msra.mxu1 %v11948_v47  ;;  %v16795_v54 = vadd.f32 %v8696_v39, %v8504_v22  ;;  %v8506_v33 = vadd.f32 %v8505_v24, %v16487_v12  ;;  %9517 = vmatprep.subr.bf16.mxu0 %v11953_v55  ;;  %v18584_v47 = vld [vmem:[#allocation163_spill] sm:$0xff]  ;;  %v18585_v39 = vld [vmem:[#allocation72_spill] sm:$0xff] }
 0x6d2   : > { %9710 = vmatprep.subr.bf16.mxu1 %v11956_v53  ;;  %v8509_v9 = vpop.f32.mrf.mxu0  ;;  %9200 = vmatmul.mubr.bf16.gmra.mxu0 %v18581_v49  ;;  %v11957_v55 = vld [vmem:[#allocation7 + $0x548] ss:$16 sps:$4 sm:$0xff]  }
 0x6d3   : > { %18580 = vst [vmem:[#allocation134_spill] sm:$0xff] %v16795_v54  ;;  %v8702_v5 = vpop.f32.mrf.mxu1  ;;  %9393 = vmatmul.mubr.bf16.gmra.mxu1 %v18582_v57  ;;  %v16800_v63 = vadd.f32 %v8698_v46, %v8506_v33  ;;  %v8510_v50 = vadd.f32 %v8509_v9, %v16475_v18  ;;  %9209 = vmatprep.mubr.bf16.mxu0 %v18584_v47  ;;  %v11960_v53 = vld [vmem:[#allocation7 + $0x748] ss:$16 sps:$4 sm:$0xff]   ;;  %v11965_v46 = vld [vmem:[#allocation7 + $0x52c] ss:$16 sps:$4 sm:$0xff]  }
 0x6d4   : > { %9402 = vmatprep.mubr.bf16.mxu1 %v18585_v39  ;;  %v8511_v22 = vpop.f32.mrf.mxu0  ;;  %9518 = vmatpush2.bf16.msra.mxu0 %v11951_v52  ;;  %v11968_v33 = vld [vmem:[#allocation7 + $0x72c] ss:$16 sps:$4 sm:$0xff]   ;;  %v11963_v52 = vld [vmem:[#allocation7 + $0x528] ss:$16 sps:$4 sm:$0xff]  }
 0x6d5   : > { %18583 = vst [vmem:[#allocation136_spill] sm:$0xff] %v16800_v63  ;;  %v8704_v24 = vpop.f32.mrf.mxu1  ;;  %9711 = vmatpush2.bf16.msra.mxu1 %v11954_v14  ;;  %v16805_v54 = vadd.f32 %v8702_v5, %v8510_v50  ;;  %v8512_v49 = vadd.f32 %v8511_v22, %v16487_v12  ;;  %9519 = vmatprep.subr.bf16.mxu0 %v11959_v41  ;;  %v11966_v14 = vld [vmem:[#allocation7 + $0x728] ss:$16 sps:$4 sm:$0xff]   ;;  %v11971_v41 = vld [vmem:[#allocation7 + $0x50c] ss:$16 sps:$4 sm:$0xff]  }
 0x6d6   : > { %9712 = vmatprep.subr.bf16.mxu1 %v11962_v8  ;;  %v8513_v57 = vpop.f32.mrf.mxu0  ;;  %v11974_v8 = vld [vmem:[#allocation7 + $0x70c] ss:$16 sps:$4 sm:$0xff]  }
 0x6d7   : > { %18586 = vst [vmem:[#allocation138_spill] sm:$0xff] %v16805_v54  ;;  %v8706_v9 = vpop.f32.mrf.mxu1  ;;  %v16808_v63 = vadd.f32 %v8704_v24, %v8512_v49  ;;  %v8514_v47 = vadd.f32 %v8513_v57, %v16475_v18  ;;  %v18588_v24 = vld [vmem:[#allocation162_spill] sm:$0xff] }
 0x6d8   : > { %v8515_v39 = vpop.f32.mrf.mxu0  ;;  %9520 = vmatpush2.bf16.msra.mxu0 %v11957_v55  ;;  %v18589_v49 = vld [vmem:[#allocation70_spill] sm:$0xff] }
 0x6d9   : > { %v8708_v43 = vpop.f32.mrf.mxu1  ;;  %9713 = vmatpush2.bf16.msra.mxu1 %v11960_v53  ;;  %v16811_v5 = vadd.f32 %v8706_v9, %v8514_v47  ;;  %v8516_v50 = vadd.f32 %v8515_v39, %v16487_v12  ;;  %9521 = vmatprep.subr.bf16.mxu0 %v11965_v46  ;;  %v18590_v53 = vld [vmem:[#allocation165_spill] sm:$0xff]  ;;  %v18591_v9 = vld [vmem:[#allocation76_spill] sm:$0xff] }
 0x6da   : > { %9714 = vmatprep.subr.bf16.mxu1 %v11968_v33  ;;  %v8519_v22 = vpop.f32.mrf.mxu0  ;;  %9210 = vmatmul.mubr.bf16.gmra.mxu0 %v18588_v24  ;;  %v11969_v46 = vld [vmem:[#allocation7 + $0x508] ss:$16 sps:$4 sm:$0xff]  }
 0x6db   : > { %18587 = vst [vmem:[#allocation142_spill] sm:$0xff] %v16811_v5  ;;  %v8712_v54 = vpop.f32.mrf.mxu1  ;;  %9403 = vmatmul.mubr.bf16.gmra.mxu1 %v18589_v49  ;;  %v16816_v57 = vadd.f32 %v8708_v43, %v8516_v50  ;;  %v8520_v55 = vadd.f32 %v8519_v22, %v16475_v18  ;;  %9219 = vmatprep.mubr.bf16.mxu0 %v18590_v53  ;;  %v11972_v33 = vld [vmem:[#allocation7 + $0x708] ss:$16 sps:$4 sm:$0xff]  }
 0x6dc   : > { %9412 = vmatprep.mubr.bf16.mxu1 %v18591_v9  ;;  %v8521_v47 = vpop.f32.mrf.mxu0  ;;  %9522 = vmatpush2.bf16.msra.mxu0 %v11963_v52 }
 0x6dd   : > { %v8714_v39 = vpop.f32.mrf.mxu1  ;;  %9715 = vmatpush2.bf16.msra.mxu1 %v11966_v14  ;;  %v16821_v5 = vadd.f32 %v8712_v54, %v8520_v55  ;;  %v8522_v24 = vadd.f32 %v8521_v47, %v16487_v12  ;;  %9523 = vmatprep.subr.bf16.mxu0 %v11971_v41  ;;  %v18594_v41 = vld [vmem:[#allocation74_spill] sm:$0xff] }
 0x6de   : > { %9716 = vmatprep.subr.bf16.mxu1 %v11974_v8  ;;  %v8523_v43 = vpop.f32.mrf.mxu0 }
 0x6df   : > { %18592 = vst [vmem:[#allocation144_spill] sm:$0xff] %v16821_v5  ;;  %v8716_v50 = vpop.f32.mrf.mxu1  ;;  %v16824_v49 = vadd.f32 %v8714_v39, %v8522_v24  ;;  %v8524_v22 = vadd.f32 %v8523_v43, %v16475_v18  ;;  %v18593_v5 = vld [vmem:[#allocation164_spill] sm:$0xff] }
 0x6e0   : > { %v8525_v53 = vpop.f32.mrf.mxu0  ;;  %9524 = vmatpush2.bf16.msra.mxu0 %v11969_v46  ;;  %v18595_v39 = vld [vmem:[#allocation32_spill] sm:$0xff] }
 0x6e1   : > { %v8718_v9 = vpop.f32.mrf.mxu1  ;;  %9717 = vmatpush2.bf16.msra.mxu1 %v11972_v33  ;;  %v16827_v52 = vadd.f32 %v8716_v50, %v8524_v22  ;;  %v8526_v14 = vadd.f32 %v8525_v53, %v16487_v12  ;;  %v18596_v18 = vld [vmem:[#allocation80_spill] sm:$0xff] }
 0x6e2   : > { %v8755_v54 = vpop.f32.mrf.mxu0  ;;  %9220 = vmatmul.mubr.bf16.gmra.mxu0 %v18593_v5 }
 0x6e3   : > { %v8948_v55 = vpop.f32.mrf.mxu1  ;;  %9413 = vmatmul.mubr.bf16.gmra.mxu1 %v18594_v41  ;;  %v16832_v8 = vadd.f32 %v8718_v9, %v8526_v14  ;;  %v8756_v47 = vadd.f32 %v8755_v54, %v16502_v62  ;;  %9229 = vmatprep.mubr.bf16.mxu0 %v18595_v39  ;;  %v18597_v39 = vld [vmem:[#allocation30_spill] sm:$0xff] }
 0x6e4   : > { %9422 = vmatprep.mubr.bf16.mxu1 %v18596_v18  ;;  %v8757_v46 = vpop.f32.mrf.mxu0  ;;  %v18598_v18 = vld [vmem:[#allocation78_spill] sm:$0xff] }
 0x6e5   : > { %v8950_v33 = vpop.f32.mrf.mxu1  ;;  %v8949_v24 = vadd.f32 %v8948_v55, %v8756_v47  ;;  %v8758_v43 = vadd.f32 %v8757_v46, %v16510_v40  ;;  %v18599_v47 = vld [vmem:[#allocation36_spill] sm:$0xff] }
 0x6e6   : > { %v8759_v12 = vpop.f32.mrf.mxu0  ;;  %v18600_v46 = vld [vmem:[#allocation84_spill] sm:$0xff] }
 0x6e7   : > { %v8952_v50 = vpop.f32.mrf.mxu1  ;;  %12679 = vtanh.f32 %v8949_v24  ;;  %v8951_v22 = vadd.f32 %v8950_v33, %v8758_v43  ;;  %v8760_v5 = vadd.f32 %v8759_v12, %v16517_v23 }
 0x6e8   : > { %v8761_v53 = vpop.f32.mrf.mxu0 }
 0x6e9   : > { %v8954_v9 = vpop.f32.mrf.mxu1  ;;  %12681 = vtanh.f32 %v8951_v22  ;;  %v8953_v14 = vadd.f32 %v8952_v50, %v8760_v5  ;;  %v8762_v62 = vadd.f32 %v8761_v53, %v16526_v19 }
 0x6ea   : > { %v8765_v54 = vpop.f32.mrf.mxu0  ;;  %9230 = vmatmul.mubr.bf16.gmra.mxu0 %v18597_v39 }
 0x6eb   : > { %v8958_v41 = vpop.f32.mrf.mxu1  ;;  %9423 = vmatmul.mubr.bf16.gmra.mxu1 %v18598_v18  ;;  %12683 = vtanh.f32 %v8953_v14  ;;  %v8955_v40 = vadd.f32 %v8954_v9, %v8762_v62  ;;  %v8766_v55 = vadd.f32 %v8765_v54, %v16537_v48  ;;  %9239 = vmatprep.mubr.bf16.mxu0 %v18599_v47  ;;  %v10007_v48 = vld [vmem:[%s18601_s27] sm:$0xf] }
 0x6ec   : > { %9432 = vmatprep.mubr.bf16.mxu1 %v18600_v46  ;;  %v8767_v23 = vpop.f32.mrf.mxu0  ;;  %v16854_v39 = vrot.slane %v10007_v48, %v18494_v42  ;;  %v16860_v47 = vrot.slane %v10007_v48, %v18497_v20 }
 0x6ed   : > { %v8960_v33 = vpop.f32.mrf.mxu1  ;;  %12685 = vtanh.f32 %v8955_v40  ;;  %v8959_v24 = vadd.f32 %v8958_v41, %v8766_v55  ;;  %v8768_v19 = vadd.f32 %v8767_v23, %v16546_v21  ;;  %v18602_v41 = vld [vmem:[#allocation34_spill] sm:$0xff]  ;;  %v18604_v40 = vld [vmem:[#allocation175_spill] sm:$0xff]  ;;  %v18605_v55 = vld [vmem:[#allocation88_spill] sm:$0xff] }
 0x6ee   : > { %v8769_v43 = vpop.f32.mrf.mxu0  ;;  %v18603_v21 = vld [vmem:[#allocation82_spill] sm:$0xff] }
 0x6ef   : > { %v8962_v12 = vpop.f32.mrf.mxu1  ;;  %12687 = vtanh.f32 %v8959_v24  ;;  %v8961_v50 = vadd.f32 %v8960_v33, %v8768_v19  ;;  %v8770_v22 = vadd.f32 %v8769_v43, %v16555_v56 }
 0x6f0   : > { %v8771_v5 = vpop.f32.mrf.mxu0 }
 0x6f1   : > { %v8964_v53 = vpop.f32.mrf.mxu1  ;;  %12689 = vtanh.f32 %v8961_v50  ;;  %v8963_v9 = vadd.f32 %v8962_v12, %v8770_v22  ;;  %v8772_v14 = vadd.f32 %v8771_v5, %v16562_v37 }
 0x6f2   : > { %v8775_v62 = vpop.f32.mrf.mxu0  ;;  %9240 = vmatmul.mubr.bf16.gmra.mxu0 %v18602_v41  ;;  %v18606_v41 = vld [vmem:[#allocation174_spill] sm:$0xff] }
 0x6f3   : > { %v8968_v54 = vpop.f32.mrf.mxu1  ;;  %9433 = vmatmul.mubr.bf16.gmra.mxu1 %v18603_v21  ;;  %12691 = vtanh.f32 %v8963_v9  ;;  %v8965_v56 = vadd.f32 %v8964_v53, %v8772_v14  ;;  %v8776_v18 = vadd.f32 %v8775_v62, %v16573_v32  ;;  %9249 = vmatprep.mubr.bf16.mxu0 %v18604_v40  ;;  %v18607_v21 = vld [vmem:[#allocation86_spill] sm:$0xff]  ;;  %v18608_v40 = vld [vmem:[#allocation176_spill] sm:$0xff] }
 0x6f4   : > { %9442 = vmatprep.mubr.bf16.mxu1 %v18605_v55  ;;  %v12680_v37 = vpop.eup %12679  ;;  %v8777_v46 = vpop.f32.mrf.mxu0  ;;  %v18609_v55 = vld [vmem:[#allocation92_spill] sm:$0xff] }
 0x6f5   : > { %v8970_v23 = vpop.f32.mrf.mxu1  ;;  %12693 = vtanh.f32 %v8965_v56  ;;  %v8969_v33 = vadd.f32 %v8968_v54, %v8776_v18  ;;  %v8778_v24 = vadd.f32 %v8777_v46, %v16582_v15  ;;  %v10029_v12 = vmul.f32 %v12680_v37, %v16854_v39 }
 0x6f6   : > { %v12682_v42 = vpop.eup %12681  ;;  %v8779_v19 = vpop.f32.mrf.mxu0 }
 0x6f7   : > { %v8972_v43 = vpop.f32.mrf.mxu1  ;;  %12695 = vtanh.f32 %v8969_v33  ;;  %v8971_v32 = vadd.f32 %v8970_v23, %v8778_v24  ;;  %v8780_v50 = vadd.f32 %v8779_v19, %v16591_v26  ;;  %v10030_v22 = vmul.f32 %v12682_v42, %v16860_v47 }
 0x6f8   : > { %v12684_v20 = vpop.eup %12683  ;;  %v8781_v48 = vpop.f32.mrf.mxu0 }
 0x6f9   : > { %v8974_v5 = vpop.f32.mrf.mxu1  ;;  %12697 = vtanh.f32 %v8971_v32  ;;  %v8973_v53 = vadd.f32 %v8972_v43, %v8780_v50  ;;  %v8782_v9 = vadd.f32 %v8781_v48, %v16598_v7  ;;  %v16867_v14 = vadd.f32 %v10030_v22, %v10029_v12 }
 0x6fa   : > { %v12686_v15 = vpop.eup %12685  ;;  %v8785_v62 = vpop.f32.mrf.mxu0  ;;  %9250 = vmatmul.mubr.bf16.gmra.mxu0 %v18606_v41  ;;  %v10033_v26 = vmul.f32 %v12684_v20, %v16854_v39  ;;  %v18610_v41 = vld [vmem:[#allocation38_spill] sm:$0xff] }
 0x6fb   : > { %v8978_v54 = vpop.f32.mrf.mxu1  ;;  %9443 = vmatmul.mubr.bf16.gmra.mxu1 %v18607_v21  ;;  %12699 = vtanh.f32 %v8973_v53  ;;  %v8975_v56 = vadd.f32 %v8974_v5, %v8782_v9  ;;  %v8786_v18 = vadd.f32 %v8785_v62, %v16607_v31  ;;  %9259 = vmatprep.mubr.bf16.mxu0 %v18608_v40  ;;  %v10034_v7 = vmul.f32 %v12686_v15, %v16860_v47  ;;  %v18611_v21 = vld [vmem:[#allocation90_spill] sm:$0xff]  ;;  %v18613_v40 = vld [vmem:[#allocation96_spill] sm:$0xff] }
 0x6fc   : > { %9452 = vmatprep.mubr.bf16.mxu1 %v18609_v55  ;;  %v12688_v37 = vpop.eup %12687  ;;  %v8787_v46 = vpop.f32.mrf.mxu0 }
 0x6fd   : > { %v8980_v23 = vpop.f32.mrf.mxu1  ;;  %12701 = vtanh.f32 %v8975_v56  ;;  %v8979_v33 = vadd.f32 %v8978_v54, %v8786_v18  ;;  %v8788_v24 = vadd.f32 %v8787_v46, %v16614_v61  ;;  %v16877_v42 = vadd.f32 %v10034_v7, %v10033_v26  ;;  %v18612_v18 = vld [vmem:[#allocation44_spill] sm:$0xff] }
 0x6fe   : > { %v12690_v19 = vpop.eup %12689  ;;  %v8789_v43 = vpop.f32.mrf.mxu0  ;;  %v10037_v31 = vmul.f32 %v12688_v37, %v16854_v39 }
 0x6ff   : > { %v8982_v12 = vpop.f32.mrf.mxu1  ;;  %12703 = vtanh.f32 %v8979_v33  ;;  %v8981_v32 = vadd.f32 %v8980_v23, %v8788_v24  ;;  %v8790_v50 = vadd.f32 %v8789_v43, %v16620_v60  ;;  %v10038_v22 = vmul.f32 %v12690_v19, %v16860_v47 }
 0x700   : > { %v12692_v20 = vpop.eup %12691  ;;  %v8791_v48 = vpop.f32.mrf.mxu0 }
 0x701   : > { %v8984_v5 = vpop.f32.mrf.mxu1  ;;  %12705 = vtanh.f32 %v8981_v32  ;;  %v8983_v53 = vadd.f32 %v8982_v12, %v8790_v50  ;;  %v8792_v61 = vadd.f32 %v8791_v48, %v16628_v1  ;;  %v16883_v9 = vadd.f32 %v10038_v22, %v10037_v31 }
 0x702   : > { %v12694_v15 = vpop.eup %12693  ;;  %v8795_v62 = vpop.f32.mrf.mxu0  ;;  %9260 = vmatmul.mubr.bf16.gmra.mxu0 %v18610_v41  ;;  %v10041_v60 = vmul.f32 %v12692_v20, %v16854_v39 }
 0x703   : > { %v8988_v54 = vpop.f32.mrf.mxu1  ;;  %9453 = vmatmul.mubr.bf16.gmra.mxu1 %v18611_v21  ;;  %12707 = vtanh.f32 %v8983_v53  ;;  %v8985_v26 = vadd.f32 %v8984_v5, %v8792_v61  ;;  %v8796_v56 = vadd.f32 %v8795_v62, %v16634_v27  ;;  %9269 = vmatprep.mubr.bf16.mxu0 %v18612_v18  ;;  %v10042_v1 = vmul.f32 %v12694_v15, %v16860_v47  ;;  %v18614_v62 = vld [vmem:[#allocation42_spill] sm:$0xff] }
 0x704   : > { %9462 = vmatprep.mubr.bf16.mxu1 %v18613_v40  ;;  %v12696_v55 = vpop.eup %12695  ;;  %v8797_v7 = vpop.f32.mrf.mxu0 }
 0x705   : > { %v8990_v37 = vpop.f32.mrf.mxu1  ;;  %12709 = vtanh.f32 %v8985_v26  ;;  %v8989_v46 = vadd.f32 %v8988_v54, %v8796_v56  ;;  %v8798_v23 = vadd.f32 %v8797_v7, %v16638_v51  ;;  %v16893_v33 = vadd.f32 %v10042_v1, %v10041_v60  ;;  %v18615_v54 = vld [vmem:[#allocation94_spill] sm:$0xff]  ;;  %v18616_v60 = vld [vmem:[#allocation187_spill] sm:$0xff]  ;;  %v18617_v26 = vld [vmem:[#allocation100_spill] sm:$0xff] }
 0x706   : > { %v12698_v24 = vpop.eup %12697  ;;  %v8799_v19 = vpop.f32.mrf.mxu0  ;;  %v10045_v27 = vmul.f32 %v12696_v55, %v16854_v39 }
 0x707   : > { %v8992_v43 = vpop.f32.mrf.mxu1  ;;  %12711 = vtanh.f32 %v8989_v46  ;;  %v8991_v12 = vadd.f32 %v8990_v37, %v8798_v23  ;;  %v8800_v31 = vadd.f32 %v8799_v19, %v16643_v2  ;;  %v10046_v32 = vmul.f32 %v12698_v24, %v16860_v47 }
 0x708   : > { %v12700_v50 = vpop.eup %12699  ;;  %v8801_v22 = vpop.f32.mrf.mxu0 }
 0x709   : > { %v8994_v20 = vpop.f32.mrf.mxu1  ;;  %12713 = vtanh.f32 %v8991_v12  ;;  %v8993_v48 = vadd.f32 %v8992_v43, %v8800_v31  ;;  %v8802_v51 = vadd.f32 %v8801_v22, %v16650_v44  ;;  %v16899_v5 = vadd.f32 %v10046_v32, %v10045_v27 }
 0x70a   : > { %v12702_v53 = vpop.eup %12701  ;;  %v8805_v61 = vpop.f32.mrf.mxu0  ;;  %9270 = vmatmul.mubr.bf16.gmra.mxu0 %v18614_v62  ;;  %v10049_v2 = vmul.f32 %v12700_v50, %v16854_v39  ;;  %v18620_v62 = vld [vmem:[#allocation188_spill] sm:$0xff] }
 0x70b   : > { %v8998_v15 = vpop.f32.mrf.mxu1  ;;  %9463 = vmatmul.mubr.bf16.gmra.mxu1 %v18615_v54  ;;  %12715 = vtanh.f32 %v8993_v48  ;;  %v8995_v41 = vadd.f32 %v8994_v20, %v8802_v51  ;;  %v8806_v21 = vadd.f32 %v8805_v61, %v16655_v59  ;;  %9279 = vmatprep.mubr.bf16.mxu0 %v18616_v60  ;;  %v10050_v44 = vmul.f32 %v12702_v53, %v16860_v47  ;;  %v18618_v51 = vld [vmem:[#allocation186_spill] sm:$0xff]  ;;  %v18621_v54 = vld [vmem:[#allocation104_spill] sm:$0xff] }
 0x70c   : > { %9472 = vmatprep.mubr.bf16.mxu1 %v18617_v26  ;;  %v12704_v56 = vpop.eup %12703  ;;  %v8807_v18 = vpop.f32.mrf.mxu0  ;;  %v18619_v53 = vld [vmem:[#allocation98_spill] sm:$0xff] }
 0x70d   : > { %v9000_v40 = vpop.f32.mrf.mxu1  ;;  %12717 = vtanh.f32 %v8995_v41  ;;  %v8999_v1 = vadd.f32 %v8998_v15, %v8806_v21  ;;  %v8808_v55 = vadd.f32 %v8807_v18, %v16658_v11  ;;  %v16909_v7 = vadd.f32 %v10050_v44, %v10049_v2 }
 0x70e   : > { %v12706_v37 = vpop.eup %12705  ;;  %v8809_v46 = vpop.f32.mrf.mxu0  ;;  %v10053_v59 = vmul.f32 %v12704_v56, %v16854_v39 }
 0x70f   : > { %v9002_v23 = vpop.f32.mrf.mxu1  ;;  %12719 = vtanh.f32 %v8999_v1  ;;  %v9001_v24 = vadd.f32 %v9000_v40, %v8808_v55  ;;  %v8810_v19 = vadd.f32 %v8809_v46, %v16663_v28  ;;  %v10054_v43 = vmul.f32 %v12706_v37, %v16860_v47 }
 0x710   : > { %v12708_v27 = vpop.eup %12707  ;;  %v8811_v12 = vpop.f32.mrf.mxu0 }
 0x711   : > { %v9004_v31 = vpop.f32.mrf.mxu1  ;;  %12721 = vtanh.f32 %v9001_v24  ;;  %v9003_v32 = vadd.f32 %v9002_v23, %v8810_v19  ;;  %v8812_v11 = vadd.f32 %v8811_v12, %v16670_v17  ;;  %v16915_v50 = vadd.f32 %v10054_v43, %v10053_v59 }
 0x712   : > { %v12710_v22 = vpop.eup %12709  ;;  %v8815_v20 = vpop.f32.mrf.mxu0  ;;  %9280 = vmatmul.mubr.bf16.gmra.mxu0 %v18618_v51  ;;  %v10057_v28 = vmul.f32 %v12708_v27, %v16854_v39 }
 0x713   : > { %v9008_v48 = vpop.f32.mrf.mxu1  ;;  %9473 = vmatmul.mubr.bf16.gmra.mxu1 %v18619_v53  ;;  %12723 = vtanh.f32 %v9003_v32  ;;  %v9005_v61 = vadd.f32 %v9004_v31, %v8812_v11  ;;  %v8816_v15 = vadd.f32 %v8815_v20, %v16675_v10  ;;  %9289 = vmatprep.mubr.bf16.mxu0 %v18620_v62  ;;  %v10058_v17 = vmul.f32 %v12710_v22, %v16860_v47  ;;  %v18622_v31 = vld [vmem:[#allocation46_spill] sm:$0xff]  ;;  %v18624_v20 = vld [vmem:[#allocation108_spill] sm:$0xff] }
 0x714   : > { %9482 = vmatprep.mubr.bf16.mxu1 %v18621_v54  ;;  %v12712_v2 = vpop.eup %12711  ;;  %v8817_v41 = vpop.f32.mrf.mxu0  ;;  %v18623_v32 = vld [vmem:[#allocation102_spill] sm:$0xff] }
 0x715   : > { %v9010_v21 = vpop.f32.mrf.mxu1  ;;  %12725 = vtanh.f32 %v9005_v61  ;;  %v9009_v60 = vadd.f32 %v9008_v48, %v8816_v15  ;;  %v8818_v26 = vadd.f32 %v8817_v41, %v16678_v45  ;;  %v16925_v44 = vadd.f32 %v10058_v17, %v10057_v28  ;;  %v18625_v48 = vld [vmem:[#allocation43_spill] sm:$0xff] }
 0x716   : > { %v12714_v56 = vpop.eup %12713  ;;  %v8819_v18 = vpop.f32.mrf.mxu0  ;;  %v10061_v10 = vmul.f32 %v12712_v2, %v16854_v39 }
 0x717   : > { %v9012_v40 = vpop.f32.mrf.mxu1  ;;  %12727 = vtanh.f32 %v9009_v60  ;;  %v9011_v1 = vadd.f32 %v9010_v21, %v8818_v26  ;;  %v8820_v55 = vadd.f32 %v8819_v18, %v16683_v30  ;;  %v10062_v37 = vmul.f32 %v12714_v56, %v16860_v47 }
 0x718   : > { %v12716_v46 = vpop.eup %12715  ;;  %v8821_v23 = vpop.f32.mrf.mxu0 }
 0x719   : > { %v9014_v59 = vpop.f32.mrf.mxu1  ;;  %12729 = vtanh.f32 %v9011_v1  ;;  %v9013_v24 = vadd.f32 %v9012_v40, %v8820_v55  ;;  %v8822_v45 = vadd.f32 %v8821_v23, %v16688_v3  ;;  %v16931_v19 = vadd.f32 %v10062_v37, %v10061_v10  ;;  %v18627_v23 = vld [vmem:[#allocation45_spill] sm:$0xff] }
 0x71a   : > { %v12718_v43 = vpop.eup %12717  ;;  %v8825_v27 = vpop.f32.mrf.mxu0  ;;  %9290 = vmatmul.mubr.bf16.gmra.mxu0 %v18622_v31  ;;  %v10065_v30 = vmul.f32 %v12716_v46, %v16854_v39  ;;  %v18626_v46 = vld [vmem:[#allocation106_spill] sm:$0xff] }
 0x71b   : > { %v9018_v12 = vpop.f32.mrf.mxu1  ;;  %9483 = vmatmul.mubr.bf16.gmra.mxu1 %v18623_v32  ;;  %12731 = vtanh.f32 %v9013_v24  ;;  %v9015_v11 = vadd.f32 %v9014_v59, %v8822_v45  ;;  %v8826_v22 = vadd.f32 %v8825_v27, %v16693_v13  ;;  %9525 = vmatprep.mubr.bf16.mxu0 %v18624_v20  ;;  %v10066_v3 = vmul.f32 %v12718_v43, %v16860_v47  ;;  %v18628_v45 = vld [vmem:[#allocation112_spill] sm:$0xff]  ;;  %v18629_v43 = vld [vmem:[#allocation47_spill] sm:$0xff] }
 0x71c   : > { %9718 = vmatprep.mubr.bf16.mxu1 %v18625_v48  ;;  %v12720_v51 = vpop.eup %12719  ;;  %v8827_v53 = vpop.f32.mrf.mxu0 }
 0x71d   : > { %v9020_v28 = vpop.f32.mrf.mxu1  ;;  %12733 = vtanh.f32 %v9015_v11  ;;  %v9019_v61 = vadd.f32 %v9018_v12, %v8826_v22  ;;  %v8828_v15 = vadd.f32 %v8827_v53, %v16696_v6  ;;  %v16941_v62 = vadd.f32 %v10066_v3, %v10065_v30 }
 0x71e   : > { %v12722_v54 = vpop.eup %12721  ;;  %v8829_v17 = vpop.f32.mrf.mxu0  ;;  %v10069_v13 = vmul.f32 %v12720_v51, %v16854_v39 }
 0x71f   : > { %v9022_v2 = vpop.f32.mrf.mxu1  ;;  %12735 = vtanh.f32 %v9019_v61  ;;  %v9021_v41 = vadd.f32 %v9020_v28, %v8828_v15  ;;  %v8830_v21 = vadd.f32 %v8829_v17, %v16699_v0  ;;  %v10070_v60 = vmul.f32 %v12722_v54, %v16860_v47 }
 0x720   : > { %v12724_v26 = vpop.eup %12723  ;;  %v8831_v56 = vpop.f32.mrf.mxu0 }
 0x721   : > { %v9024_v18 = vpop.f32.mrf.mxu1  ;;  %12737 = vtanh.f32 %v9021_v41  ;;  %v9023_v40 = vadd.f32 %v9022_v2, %v8830_v21  ;;  %v8832_v6 = vadd.f32 %v8831_v56, %v16704_v58  ;;  %v16947_v10 = vadd.f32 %v10070_v60, %v10069_v13  ;;  %v18632_v21 = vld [vmem:[#allocation110_spill] sm:$0xff]  ;;  %v18633_v60 = vld [vmem:[#allocation49_spill] sm:$0xff] }
 0x722   : > { %v12726_v1 = vpop.eup %12725  ;;  %v8835_v55 = vpop.f32.mrf.mxu0  ;;  %9526 = vmatmul.mubr.bf16.vlgmr.msra.gmra.mxu0 %v18626_v46  ;;  %v10073_v0 = vmul.f32 %v12724_v26, %v16854_v39 }
 0x723   : > { %v9028_v37 = vpop.f32.mrf.mxu1  ;;  %9719 = vmatmul.mubr.bf16.vlgmr.msra.gmra.mxu1 %v18627_v23  ;;  %12739 = vtanh.f32 %v9023_v40  ;;  %v9025_v59 = vadd.f32 %v9024_v18, %v8832_v6  ;;  %v8836_v24 = vadd.f32 %v8835_v55, %v16709_v4  ;;  %9535 = vmatprep.mubr.bf16.mxu0 %v18628_v45  ;;  %v10074_v58 = vmul.f32 %v12726_v1, %v16860_v47  ;;  %v18634_v18 = vld [vmem:[#allocation116_spill] sm:$0xff]  ;;  %v18635_v40 = vld [vmem:[#allocation51_spill] sm:$0xff] }
 0x724   : > { %9728 = vmatprep.mubr.bf16.mxu1 %v18629_v43  ;;  %v12728_v27 = vpop.eup %12727  ;;  %v8837_v12 = vpop.f32.mrf.mxu0 }
 0x725   : > { %v9030_v31 = vpop.f32.mrf.mxu1  ;;  %12741 = vtanh.f32 %v9025_v59  ;;  %v9029_v32 = vadd.f32 %v9028_v37, %v8836_v24  ;;  %v8838_v30 = vadd.f32 %v8837_v12, %v16712_v38  ;;  %v16957_v11 = vadd.f32 %v10074_v58, %v10073_v0 }
 0x726   : > { %v12730_v22 = vpop.eup %12729  ;;  %v8839_v20 = vpop.f32.mrf.mxu0  ;;  %v10077_v4 = vmul.f32 %v12728_v27, %v16854_v39 }
 0x727   : > { %18630 = vst [vmem:[#allocation146_spill] sm:$0xff] %v16957_v11  ;;  %v9032_v48 = vpop.f32.mrf.mxu1  ;;  %12743 = vtanh.f32 %v9029_v32  ;;  %v9031_v3 = vadd.f32 %v9030_v31, %v8838_v30  ;;  %v8840_v51 = vadd.f32 %v8839_v20, %v16715_v35  ;;  %v10078_v53 = vmul.f32 %v12730_v22, %v16860_v47 }
 0x728   : > { %v12732_v28 = vpop.eup %12731  ;;  %v8841_v61 = vpop.f32.mrf.mxu0 }
 0x729   : > { %v9034_v15 = vpop.f32.mrf.mxu1  ;;  %12745 = vtanh.f32 %v9031_v3  ;;  %v9033_v54 = vadd.f32 %v9032_v48, %v8840_v51  ;;  %v8842_v38 = vadd.f32 %v8841_v61, %v16720_v16  ;;  %v16963_v17 = vadd.f32 %v10078_v53, %v10077_v4  ;;  %v18638_v4 = vld [vmem:[#allocation114_spill] sm:$0xff]  ;;  %v18639_v3 = vld [vmem:[#allocation53_spill] sm:$0xff]  ;;  %v18640_v53 = vld [vmem:[#allocation107_spill] sm:$0xff] }
 0x72a   : > { %v12734_v2 = vpop.eup %12733  ;;  %v8845_v13 = vpop.f32.mrf.mxu0  ;;  %9536 = vmatmul.mubr.bf16.gmra.mxu0 %v18632_v21  ;;  %v10081_v35 = vmul.f32 %v12732_v28, %v16854_v39  ;;  %v18641_v61 = vld [vmem:[#allocation120_spill] sm:$0xff] }
 0x72b   : > { %18631 = vst [vmem:[#allocation148_spill] sm:$0xff] %v16963_v17  ;;  %v9038_v41 = vpop.f32.mrf.mxu1  ;;  %9729 = vmatmul.mubr.bf16.gmra.mxu1 %v18633_v60  ;;  %12747 = vtanh.f32 %v9033_v54  ;;  %v9035_v26 = vadd.f32 %v9034_v15, %v8842_v38  ;;  %v8846_v56 = vadd.f32 %v8845_v13, %v16725_v25  ;;  %9545 = vmatprep.mubr.bf16.mxu0 %v18634_v18  ;;  %v18642_v15 = vld [vmem:[#allocation55_spill] sm:$0xff] }
 0x72c   : > { %9738 = vmatprep.mubr.bf16.mxu1 %v18635_v40  ;;  %v10082_v16 = vmul.f32 %v12734_v2, %v16860_v47  ;;  %v12736_v6 = vpop.eup %12735  ;;  %v8847_v1 = vpop.f32.mrf.mxu0 }
 0x72d   : > { %v9040_v55 = vpop.f32.mrf.mxu1  ;;  %12749 = vtanh.f32 %v9035_v26  ;;  %v9039_v37 = vadd.f32 %v9038_v41, %v8846_v56  ;;  %v8848_v46 = vadd.f32 %v8847_v1, %v16728_v36  ;;  %v10085_v25 = vmul.f32 %v12736_v6, %v16854_v39  ;;  %v18643_v41 = vld [vmem:[#allocation109_spill] sm:$0xff] }
 0x72e   : > { %v16973_v23 = vadd.f32 %v10082_v16, %v10081_v35  ;;  %v12738_v0 = vpop.eup %12737  ;;  %v8849_v59 = vpop.f32.mrf.mxu0  ;;  %v18645_v16 = vld [vmem:[#allocation111_spill] sm:$0xff] }
 0x72f   : > { %v9042_v24 = vpop.f32.mrf.mxu1  ;;  %12751 = vtanh.f32 %v9039_v37  ;;  %v9041_v45 = vadd.f32 %v9040_v55, %v8848_v46  ;;  %v8850_v43 = vadd.f32 %v8849_v59, %v16731_v34  ;;  %v10086_v58 = vmul.f32 %v12738_v0, %v16860_v47  ;;  %v18646_v59 = vld [vmem:[#allocation113_spill] sm:$0xff] }
 0x730   : > { %18636 = vst [vmem:[#allocation154_spill] sm:$0xff] %v16973_v23  ;;  %v12740_v27 = vpop.eup %12739  ;;  %v8851_v12 = vpop.f32.mrf.mxu0 }
 0x731   : > { %v9044_v31 = vpop.f32.mrf.mxu1  ;;  %12753 = vtanh.f32 %v9041_v45  ;;  %v9043_v32 = vadd.f32 %v9042_v24, %v8850_v43  ;;  %v8852_v36 = vadd.f32 %v8851_v12, %v16736_v29  ;;  %v16979_v30 = vadd.f32 %v10086_v58, %v10085_v25  ;;  %v18649_v12 = vld [vmem:[#allocation57_spill] sm:$0xff] }
 0x732   : > { %v12742_v22 = vpop.eup %12741  ;;  %v8855_v20 = vpop.f32.mrf.mxu0  ;;  %9546 = vmatmul.mubr.bf16.gmra.mxu0 %v18638_v4  ;;  %v10089_v34 = vmul.f32 %v12740_v27, %v16854_v39  ;;  %v18648_v27 = vld [vmem:[#allocation118_spill] sm:$0xff] }
 0x733   : > { %18637 = vst [vmem:[#allocation156_spill] sm:$0xff] %v16979_v30  ;;  %v9048_v48 = vpop.f32.mrf.mxu1  ;;  %9739 = vmatmul.mubr.bf16.gmra.mxu1 %v18639_v3  ;;  %12755 = vtanh.f32 %v9043_v32  ;;  %v9045_v51 = vadd.f32 %v9044_v31, %v8852_v36  ;;  %v8856_v28 = vadd.f32 %v8855_v20, %v18640_v53  ;;  %9555 = vmatprep.mubr.bf16.mxu0 %v18641_v61  ;;  %v18650_v36 = vld [vmem:[#allocation115_spill] sm:$0xff]  ;;  %v18651_v20 = vld [vmem:[#allocation124_spill] sm:$0xff] }
 0x734   : > { %9748 = vmatprep.mubr.bf16.mxu1 %v18642_v15  ;;  %v10090_v29 = vmul.f32 %v12742_v22, %v16860_v47  ;;  %v12744_v54 = vpop.eup %12743  ;;  %v8857_v38 = vpop.f32.mrf.mxu0 }
 0x735   : > { %v9050_v2 = vpop.f32.mrf.mxu1  ;;  %12757 = vtanh.f32 %v9045_v51  ;;  %v9049_v13 = vadd.f32 %v9048_v48, %v8856_v28  ;;  %v8858_v21 = vadd.f32 %v8857_v38, %v18643_v41  ;;  %v10093_v18 = vmul.f32 %v12744_v54, %v16854_v39  ;;  %v18652_v48 = vld [vmem:[#allocation59_spill] sm:$0xff]  ;;  %v18653_v28 = vld [vmem:[#allocation117_spill] sm:$0xff] }
 0x736   : > { %v16989_v60 = vadd.f32 %v10090_v29, %v10089_v34  ;;  %v12746_v35 = vpop.eup %12745  ;;  %v8859_v26 = vpop.f32.mrf.mxu0  ;;  %v18655_v41 = vld [vmem:[#allocation119_spill] sm:$0xff] }
 0x737   : > { %v9052_v56 = vpop.f32.mrf.mxu1  ;;  %12759 = vtanh.f32 %v9049_v13  ;;  %v9051_v40 = vadd.f32 %v9050_v2, %v8858_v21  ;;  %v8860_v6 = vadd.f32 %v8859_v26, %v18645_v16  ;;  %v10094_v1 = vmul.f32 %v12746_v35, %v16860_v47  ;;  %v18656_v16 = vld [vmem:[#allocation121_spill] sm:$0xff] }
 0x738   : > { %18644 = vst [vmem:[#allocation158_spill] sm:$0xff] %v16989_v60  ;;  %v12748_v55 = vpop.eup %12747  ;;  %v8861_v37 = vpop.f32.mrf.mxu0 }
 0x739   : > { %v9054_v46 = vpop.f32.mrf.mxu1  ;;  %12761 = vtanh.f32 %v9051_v40  ;;  %v9053_v0 = vadd.f32 %v9052_v56, %v8860_v6  ;;  %v8862_v24 = vadd.f32 %v8861_v37, %v18646_v59  ;;  %v16995_v25 = vadd.f32 %v10094_v1, %v10093_v18  ;;  %v18659_v59 = vld [vmem:[#allocation61_spill] sm:$0xff] }
 0x73a   : > { %v12750_v45 = vpop.eup %12749  ;;  %v8865_v43 = vpop.f32.mrf.mxu0  ;;  %9556 = vmatmul.mubr.bf16.gmra.mxu0 %v18648_v27  ;;  %v10097_v31 = vmul.f32 %v12748_v55, %v16854_v39  ;;  %v18661_v27 = vld [vmem:[#allocation128_spill] sm:$0xff] }
 0x73b   : > { %18647 = vst [vmem:[#allocation160_spill] sm:$0xff] %v16995_v25  ;;  %v9058_v58 = vpop.f32.mrf.mxu1  ;;  %9749 = vmatmul.mubr.bf16.gmra.mxu1 %v18649_v12  ;;  %12763 = vtanh.f32 %v9053_v0  ;;  %v9055_v32 = vadd.f32 %v9054_v46, %v8862_v24  ;;  %v8866_v22 = vadd.f32 %v8865_v43, %v18650_v36  ;;  %9565 = vmatprep.mubr.bf16.mxu0 %v18651_v20  ;;  %v18658_v0 = vld [vmem:[#allocation122_spill] sm:$0xff]  ;;  %v18660_v43 = vld [vmem:[#allocation123_spill] sm:$0xff] }
 0x73c   : > { %9758 = vmatprep.mubr.bf16.mxu1 %v18652_v48  ;;  %v10098_v4 = vmul.f32 %v12750_v45, %v16860_v47  ;;  %v12752_v3 = vpop.eup %12751  ;;  %v8867_v34 = vpop.f32.mrf.mxu0  ;;  %v18662_v12 = vld [vmem:[#allocation63_spill] sm:$0xff]  ;;  %v18663_v48 = vld [vmem:[#allocation125_spill] sm:$0xff] }
 0x73d   : > { %v9060_v51 = vpop.f32.mrf.mxu1  ;;  %12765 = vtanh.f32 %v9055_v32  ;;  %v9059_v53 = vadd.f32 %v9058_v58, %v8866_v22  ;;  %v8868_v61 = vadd.f32 %v8867_v34, %v18653_v28  ;;  %v10101_v2 = vmul.f32 %v12752_v3, %v16854_v39 }
 0x73e   : > { %v17005_v15 = vadd.f32 %v10098_v4, %v10097_v31  ;;  %v12754_v29 = vpop.eup %12753  ;;  %v8869_v54 = vpop.f32.mrf.mxu0 }
 0x73f   : > { %v9062_v38 = vpop.f32.mrf.mxu1  ;;  %12767 = vtanh.f32 %v9059_v53  ;;  %v9061_v13 = vadd.f32 %v9060_v51, %v8868_v61  ;;  %v8870_v21 = vadd.f32 %v8869_v54, %v18655_v41  ;;  %v10102_v35 = vmul.f32 %v12754_v29, %v16860_v47  ;;  %v18665_v29 = vld [vmem:[#allocation127_spill] sm:$0xff] }
 0x740   : > { %18654 = vst [vmem:[#allocation166_spill] sm:$0xff] %v17005_v15  ;;  %v12756_v26 = vpop.eup %12755  ;;  %v8871_v56 = vpop.f32.mrf.mxu0 }
 0x741   : > { %v9064_v18 = vpop.f32.mrf.mxu1  ;;  %12769 = vtanh.f32 %v9061_v13  ;;  %v9063_v40 = vadd.f32 %v9062_v38, %v8870_v21  ;;  %v8872_v6 = vadd.f32 %v8871_v56, %v18656_v16  ;;  %v17011_v1 = vadd.f32 %v10102_v35, %v10101_v2  ;;  %v18666_v35 = vld [vmem:[#allocation129_spill] sm:$0xff] }
 0x742   : > { %v12758_v55 = vpop.eup %12757  ;;  %v8875_v37 = vpop.f32.mrf.mxu0  ;;  %9566 = vmatmul.mubr.bf16.gmra.mxu0 %v18658_v0  ;;  %v10105_v24 = vmul.f32 %v12756_v26, %v16854_v39  ;;  %v18670_v0 = vld [vmem:[#allocation131_spill] sm:$0xff] }
 0x743   : > { %18657 = vst [vmem:[#allocation168_spill] sm:$0xff] %v17011_v1  ;;  %v9068_v46 = vpop.f32.mrf.mxu1  ;;  %9759 = vmatmul.mubr.bf16.gmra.mxu1 %v18659_v59  ;;  %12771 = vtanh.f32 %v9063_v40  ;;  %v9065_v45 = vadd.f32 %v9064_v18, %v8872_v6  ;;  %v8876_v58 = vadd.f32 %v8875_v37, %v18660_v43  ;;  %9575 = vmatprep.mubr.bf16.mxu0 %v18661_v27  ;;  %v18668_v6 = vld [vmem:[#allocation126_spill] sm:$0xff] }
 0x744   : > { %9768 = vmatprep.mubr.bf16.mxu1 %v18662_v12  ;;  %v10106_v31 = vmul.f32 %v12758_v55, %v16860_v47  ;;  %v12760_v32 = vpop.eup %12759  ;;  %v8877_v36 = vpop.f32.mrf.mxu0  ;;  %v18669_v55 = vld [vmem:[#allocation65_spill] sm:$0xff] }
 0x745   : > { %v9070_v22 = vpop.f32.mrf.mxu1  ;;  %12773 = vtanh.f32 %v9065_v45  ;;  %v9069_v20 = vadd.f32 %v9068_v46, %v8876_v58  ;;  %v8878_v4 = vadd.f32 %v8877_v36, %v18663_v48  ;;  %v10109_v28 = vmul.f32 %v12760_v32, %v16854_v39  ;;  %v18672_v45 = vld [vmem:[#allocation67_spill] sm:$0xff]  ;;  %v18673_v32 = vld [vmem:[#allocation133_spill] sm:$0xff] }
 0x746   : > { %v17021_v3 = vadd.f32 %v10106_v31, %v10105_v24  ;;  %v12762_v34 = vpop.eup %12761  ;;  %v8879_v51 = vpop.f32.mrf.mxu0  ;;  %v18671_v24 = vld [vmem:[#allocation132_spill] sm:$0xff] }
 0x747   : > { %v9072_v53 = vpop.f32.mrf.mxu1  ;;  %12775 = vtanh.f32 %v9069_v20  ;;  %v9071_v61 = vadd.f32 %v9070_v22, %v8878_v4  ;;  %v8880_v54 = vadd.f32 %v8879_v51, %v18665_v29  ;;  %v10110_v38 = vmul.f32 %v12762_v34, %v16860_v47 }
 0x748   : > { %18664 = vst [vmem:[#allocation170_spill] sm:$0xff] %v17021_v3  ;;  %v12764_v2 = vpop.eup %12763  ;;  %v8881_v13 = vpop.f32.mrf.mxu0  ;;  %v18728_v3 = vld [vmem:[#allocation39_spill] sm:$0xff] }
 0x749   : > { %v9074_v41 = vpop.f32.mrf.mxu1  ;;  %12777 = vtanh.f32 %v9071_v61  ;;  %v9073_v21 = vadd.f32 %v9072_v53, %v8880_v54  ;;  %v8882_v26 = vadd.f32 %v8881_v13, %v18666_v35  ;;  %v17027_v56 = vadd.f32 %v10110_v38, %v10109_v28  ;;  %v18675_v53 = vld [vmem:[#allocation134_spill] sm:$0xff]  ;;  %v18676_v13 = vld [vmem:[#allocation136_spill] sm:$0xff] }
 0x74a   : > { %v12766_v18 = vpop.eup %12765  ;;  %v8885_v40 = vpop.f32.mrf.mxu0  ;;  %9576 = vmatmul.mubr.bf16.gmra.mxu0 %v18668_v6  ;;  %v10113_v37 = vmul.f32 %v12764_v2, %v16854_v39 }
 0x74b   : > { %18667 = vst [vmem:[#allocation172_spill] sm:$0xff] %v17027_v56  ;;  %v9078_v16 = vpop.f32.mrf.mxu1  ;;  %9769 = vmatmul.mubr.bf16.gmra.mxu1 %v18669_v55  ;;  %12779 = vtanh.f32 %v9073_v21  ;;  %v9075_v46 = vadd.f32 %v9074_v41, %v8882_v26  ;;  %v8886_v59 = vadd.f32 %v8885_v40, %v18670_v0  ;;  %9585 = vmatprep.mubr.bf16.mxu0 %v18671_v24  ;;  %v18678_v40 = vld [vmem:[#allocation130_spill] sm:$0xff]  ;;  %v18681_v0 = vld [vmem:[#allocation11_spill] sm:$0xff] }
 0x74c   : > { %9778 = vmatprep.mubr.bf16.mxu1 %v18672_v45  ;;  %v10114_v43 = vmul.f32 %v12766_v18, %v16860_v47  ;;  %v12768_v58 = vpop.eup %12767  ;;  %v8887_v27 = vpop.f32.mrf.mxu0 }
 0x74d   : > { %v9080_v12 = vpop.f32.mrf.mxu1  ;;  %12781 = vtanh.f32 %v9075_v46  ;;  %v9079_v31 = vadd.f32 %v9078_v16, %v8886_v59  ;;  %v8888_v36 = vadd.f32 %v8887_v27, %v18673_v32  ;;  %v10117_v34 = vmul.f32 %v12768_v58, %v16854_v39  ;;  %v18679_v16 = vld [vmem:[#allocation69_spill] sm:$0xff]  ;;  %v18682_v59 = vld [vmem:[#allocation71_spill] sm:$0xff] }
 0x74e   : > { %v17037_v22 = vadd.f32 %v10114_v43, %v10113_v37  ;;  %v12770_v20 = vpop.eup %12769  ;;  %v8889_v48 = vpop.f32.mrf.mxu0  ;;  %v18680_v37 = vld [vmem:[#allocation138_spill] sm:$0xff] }
 0x74f   : > { %v9082_v4 = vpop.f32.mrf.mxu1  ;;  %12783 = vtanh.f32 %v9079_v31  ;;  %v9081_v51 = vadd.f32 %v9080_v12, %v8888_v36  ;;  %v8890_v28 = vadd.f32 %v8889_v48, %v18675_v53  ;;  %v10118_v61 = vmul.f32 %v12770_v20, %v16860_v47 }
 0x750   : > { %18674 = vst [vmem:[#allocation178_spill] sm:$0xff] %v17037_v22  ;;  %v12772_v29 = vpop.eup %12771  ;;  %v8891_v54 = vpop.f32.mrf.mxu0 }
 0x751   : > { %v9084_v38 = vpop.f32.mrf.mxu1  ;;  %12785 = vtanh.f32 %v9081_v51  ;;  %v9083_v2 = vadd.f32 %v9082_v4, %v8890_v28  ;;  %v8892_v41 = vadd.f32 %v8891_v54, %v18676_v13  ;;  %v17043_v21 = vadd.f32 %v10118_v61, %v10117_v34  ;;  %v18684_v34 = vld [vmem:[#allocation142_spill] sm:$0xff] }
 0x752   : > { %v12774_v35 = vpop.eup %12773  ;;  %v8895_v26 = vpop.f32.mrf.mxu0  ;;  %9586 = vmatmul.mubr.bf16.gmra.mxu0 %v18678_v40  ;;  %v10121_v6 = vmul.f32 %v12772_v29, %v16854_v39 }
 0x753   : > { %18677 = vst [vmem:[#allocation180_spill] sm:$0xff] %v17043_v21  ;;  %v9088_v18 = vpop.f32.mrf.mxu1  ;;  %9779 = vmatmul.mubr.bf16.gmra.mxu1 %v18679_v16  ;;  %12787 = vtanh.f32 %v9083_v2  ;;  %v9085_v55 = vadd.f32 %v9084_v38, %v8892_v41  ;;  %v8896_v46 = vadd.f32 %v8895_v26, %v18680_v37  ;;  %9595 = vmatprep.mubr.bf16.mxu0 %v18681_v0  ;;  %v18687_v26 = vld [vmem:[#allocation73_spill] sm:$0xff]  ;;  %v18688_v16 = vld [vmem:[#allocation144_spill] sm:$0xff]  ;;  %v18690_v37 = vld [vmem:[#allocation75_spill] sm:$0xff] }
 0x754   : > { %9788 = vmatprep.mubr.bf16.mxu1 %v18682_v59  ;;  %v10122_v24 = vmul.f32 %v12774_v35, %v16860_v47  ;;  %v12776_v45 = vpop.eup %12775  ;;  %v8897_v43 = vpop.f32.mrf.mxu0  ;;  %v18686_v35 = vld [vmem:[#allocation10_spill] sm:$0xff] }
 0x755   : > { %v9090_v58 = vpop.f32.mrf.mxu1  ;;  %12789 = vtanh.f32 %v9085_v55  ;;  %v9089_v27 = vadd.f32 %v9088_v18, %v8896_v46  ;;  %v8898_v12 = vadd.f32 %v8897_v43, %v16808_v63  ;;  %v10125_v48 = vmul.f32 %v12776_v45, %v16854_v39  ;;  %v18689_v55 = vld [vmem:[#allocation13_spill] sm:$0xff] }
 0x756   : > { %v17053_v31 = vadd.f32 %v10122_v24, %v10121_v6  ;;  %v12778_v32 = vpop.eup %12777  ;;  %v8899_v36 = vpop.f32.mrf.mxu0 }
 0x757   : > { %v9092_v20 = vpop.f32.mrf.mxu1  ;;  %12791 = vtanh.f32 %v9089_v27  ;;  %v9091_v4 = vadd.f32 %v9090_v58, %v8898_v12  ;;  %v8900_v51 = vadd.f32 %v8899_v36, %v18684_v34  ;;  %v10126_v53 = vmul.f32 %v12778_v32, %v16860_v47  ;;  %v13070_v32 = vld [vmem:[%s18492_s13] sm:$0xf] }
 0x758   : > { %18683 = vst [vmem:[#allocation182_spill] sm:$0xff] %v17053_v31  ;;  %v12780_v28 = vpop.eup %12779  ;;  %v8901_v61 = vpop.f32.mrf.mxu0  ;;  %v18692_v36 = vld [vmem:[#allocation177_spill] sm:$0xff]  ;;  %v18724_v31 = vld [vmem:[#allocation35_spill] sm:$0xff] }
 0x759   : > { %v9094_v29 = vpop.f32.mrf.mxu1  ;;  %12793 = vtanh.f32 %v9091_v4  ;;  %v9093_v54 = vadd.f32 %v9092_v20, %v8900_v51  ;;  %v8902_v63 = vadd.f32 %v8901_v61, %v16816_v57  ;;  %v17059_v38 = vadd.f32 %v10126_v53, %v10125_v48  ;;  %v18693_v61 = vld [vmem:[#allocation40_spill] sm:$0xff] }
 0x75a   : > { %v12782_v2 = vpop.eup %12781  ;;  %v8905_v13 = vpop.f32.mrf.mxu0  ;;  %9596 = vmatmul.mubr.bf16.gmra.mxu0 %v18686_v35  ;;  %v10129_v18 = vmul.f32 %v12780_v28, %v16854_v39  ;;  %v17075_v20 = vrot.slane %v13070_v32, %v18692_v36 }
 0x75b   : > { %18685 = vst [vmem:[#allocation184_spill] sm:$0xff] %v17059_v38  ;;  %v9098_v41 = vpop.f32.mrf.mxu1  ;;  %9789 = vmatmul.mubr.bf16.gmra.mxu1 %v18687_v26  ;;  %12795 = vtanh.f32 %v9093_v54  ;;  %v9095_v40 = vadd.f32 %v9094_v29, %v8902_v63  ;;  %v8906_v6 = vadd.f32 %v8905_v13, %v18688_v16  ;;  %9605 = vmatprep.mubr.bf16.mxu0 %v18689_v55  ;;  %v18695_v26 = vld [vmem:[#allocation12_spill] sm:$0xff]  ;;  %v18698_v55 = vld [vmem:[#allocation79_spill] sm:$0xff] }
 0x75c   : > { %9798 = vmatprep.mubr.bf16.mxu1 %v18690_v37  ;;  %v10130_v57 = vmul.f32 %v12782_v2, %v16860_v47  ;;  %v12784_v46 = vpop.eup %12783  ;;  %v8907_v0 = vpop.f32.mrf.mxu0  ;;  %v17081_v29 = vrot.slane %v13070_v32, %v18693_v61 }
 0x75d   : > { %v9100_v59 = vpop.f32.mrf.mxu1  ;;  %12797 = vtanh.f32 %v9095_v40  ;;  %v9099_v24 = vadd.f32 %v9098_v41, %v8906_v6  ;;  %v8908_v45 = vadd.f32 %v8907_v0, %v16824_v49  ;;  %v10133_v48 = vmul.f32 %v12784_v46, %v16854_v39  ;;  %v18697_v6 = vld [vmem:[#allocation17_spill] sm:$0xff] }
 0x75e   : > { %v17069_v43 = vadd.f32 %v10130_v57, %v10129_v18  ;;  %v12786_v58 = vpop.eup %12785  ;;  %v8909_v27 = vpop.f32.mrf.mxu0 }
 0x75f   : > { %v9102_v12 = vpop.f32.mrf.mxu1  ;;  %12799 = vtanh.f32 %v9099_v24  ;;  %v9101_v4 = vadd.f32 %v9100_v59, %v8908_v45  ;;  %v8910_v34 = vadd.f32 %v8909_v27, %v16827_v52  ;;  %v10134_v49 = vmul.f32 %v12786_v58, %v16860_v47  ;;  %v18696_v52 = vld [vmem:[#allocation77_spill] sm:$0xff] }
 0x760   : > { %18691 = vst [vmem:[#allocation190_spill] sm:$0xff] %v17069_v43  ;;  %v12788_v51 = vpop.eup %12787  ;;  %v8911_v53 = vpop.f32.mrf.mxu0 }
 0x761   : > { %v9104_v28 = vpop.f32.mrf.mxu1  ;;  %12801 = vtanh.f32 %v9101_v4  ;;  %v9103_v54 = vadd.f32 %v9102_v12, %v8910_v34  ;;  %v8912_v63 = vadd.f32 %v8911_v53, %v16832_v8  ;;  %v17084_v2 = vadd.f32 %v10134_v49, %v10133_v48 }
 0x762   : > { %v12790_v13 = vpop.eup %12789  ;;  %v9141_v41 = vpop.f32.mrf.mxu0  ;;  %9606 = vmatmul.mubr.bf16.gmra.mxu0 %v18695_v26  ;;  %v10137_v18 = vmul.f32 %v12788_v51, %v16854_v39  ;;  %v18702_v26 = vld [vmem:[#allocation81_spill] sm:$0xff] }
 0x763   : > { %18694 = vst [vmem:[#allocation192_spill] sm:$0xff] %v17084_v2  ;;  %v9334_v35 = vpop.f32.mrf.mxu1  ;;  %9799 = vmatmul.mubr.bf16.gmra.mxu1 %v18696_v52  ;;  %12803 = vtanh.f32 %v9103_v54  ;;  %v9105_v40 = vadd.f32 %v9104_v28, %v8912_v63  ;;  %v9142_v16 = vadd.f32 %v9141_v41, %v17075_v20  ;;  %9615 = vmatprep.mubr.bf16.mxu0 %v18697_v6  ;;  %v18704_v6 = vld [vmem:[#allocation83_spill] sm:$0xff] }
 0x764   : > { %9808 = vmatprep.mubr.bf16.mxu1 %v18698_v55  ;;  %v10138_v8 = vmul.f32 %v12790_v13, %v16860_v47  ;;  %v12792_v37 = vpop.eup %12791  ;;  %v9143_v57 = vpop.f32.mrf.mxu0 }
 0x765   : > { %v9336_v46 = vpop.f32.mrf.mxu1  ;;  %12805 = vtanh.f32 %v9105_v40  ;;  %v17093_v0 = vadd.f32 %v9334_v35, %v9142_v16  ;;  %v9144_v59 = vadd.f32 %v9143_v57, %v17081_v29  ;;  %v10141_v48 = vmul.f32 %v12792_v37, %v16854_v39  ;;  %v18701_v35 = vld [vmem:[#allocation15_spill] sm:$0xff]  ;;  %v18703_v16 = vld [vmem:[#allocation21_spill] sm:$0xff] }
 0x766   : > { %v17096_v24 = vadd.f32 %v10138_v8, %v10137_v18  ;;  %v12794_v45 = vpop.eup %12793  ;;  %v9145_v58 = vpop.f32.mrf.mxu0 }
 0x767   : > { %v9338_v27 = vpop.f32.mrf.mxu1  ;;  %v17098_v12 = vadd.f32 %v9336_v46, %v9144_v59  ;;  %v9146_v32 = vadd.f32 %v9145_v58, %v17075_v20  ;;  %v10142_v4 = vmul.f32 %v12794_v45, %v16860_v47 }
 0x768   : > { %18699 = vst [vmem:[#allocation194_spill] sm:$0xff] %v17096_v24  ;;  %v12796_v34 = vpop.eup %12795  ;;  %v9147_v49 = vpop.f32.mrf.mxu0  ;;  %v18720_v24 = vld [vmem:[#allocation31_spill] sm:$0xff] }
 0x769   : > { %v9340_v51 = vpop.f32.mrf.mxu1  ;;  %v17103_v53 = vadd.f32 %v9338_v27, %v9146_v32  ;;  %v9148_v28 = vadd.f32 %v9147_v49, %v17081_v29  ;;  %v17106_v54 = vadd.f32 %v10142_v4, %v10141_v48  ;;  %v10145_v52 = vmul.f32 %v12796_v34, %v16854_v39 }
 0x76a   : > { %v12798_v63 = vpop.eup %12797  ;;  %v9151_v13 = vpop.f32.mrf.mxu0  ;;  %9616 = vmatmul.mubr.bf16.gmra.mxu0 %v18701_v35 }
 0x76b   : > { %18700 = vst [vmem:[#allocation196_spill] sm:$0xff] %v17106_v54  ;;  %v9344_v41 = vpop.f32.mrf.mxu1  ;;  %9809 = vmatmul.mubr.bf16.gmra.mxu1 %v18702_v26  ;;  %v17111_v18 = vadd.f32 %v9340_v51, %v9148_v28  ;;  %v9152_v40 = vadd.f32 %v9151_v13, %v17075_v20  ;;  %9625 = vmatprep.mubr.bf16.mxu0 %v18703_v16  ;;  %v18707_v16 = vld [vmem:[#allocation19_spill] sm:$0xff] }
 0x76c   : > { %9818 = vmatprep.mubr.bf16.mxu1 %v18704_v6  ;;  %v10146_v55 = vmul.f32 %v12798_v63, %v16860_v47  ;;  %v12800_v8 = vpop.eup %12799  ;;  %v9153_v37 = vpop.f32.mrf.mxu0  ;;  %v18708_v6 = vld [vmem:[#allocation85_spill] sm:$0xff] }
 0x76d   : > { %v9346_v57 = vpop.f32.mrf.mxu1  ;;  %v17117_v46 = vadd.f32 %v9344_v41, %v9152_v40  ;;  %v9154_v59 = vadd.f32 %v9153_v37, %v17081_v29  ;;  %v10149_v34 = vmul.f32 %v12800_v8, %v16854_v39 }
 0x76e   : > { %v17120_v45 = vadd.f32 %v10146_v55, %v10145_v52  ;;  %v12802_v58 = vpop.eup %12801  ;;  %v9155_v27 = vpop.f32.mrf.mxu0 }
 0x76f   : > { %v9348_v32 = vpop.f32.mrf.mxu1  ;;  %v17122_v48 = vadd.f32 %v9346_v57, %v9154_v59  ;;  %v9156_v4 = vadd.f32 %v9155_v27, %v17075_v20  ;;  %v10150_v49 = vmul.f32 %v12802_v58, %v16860_v47  ;;  %v18709_v57 = vld [vmem:[#allocation25_spill] sm:$0xff]  ;;  %v18710_v59 = vld [vmem:[#allocation87_spill] sm:$0xff] }
 0x770   : > { %18705 = vst [vmem:[#allocation200_spill] sm:$0xff] %v17120_v45  ;;  %v12804_v51 = vpop.eup %12803  ;;  %v9157_v28 = vpop.f32.mrf.mxu0 }
 0x771   : > { %v9350_v63 = vpop.f32.mrf.mxu1  ;;  %v17127_v13 = vadd.f32 %v9348_v32, %v9156_v4  ;;  %v9158_v41 = vadd.f32 %v9157_v28, %v17081_v29  ;;  %v17130_v35 = vadd.f32 %v10150_v49, %v10149_v34  ;;  %v10153_v55 = vmul.f32 %v12804_v51, %v16854_v39 }
 0x772   : > { %v12806_v26 = vpop.eup %12805  ;;  %v9161_v52 = vpop.f32.mrf.mxu0  ;;  %9626 = vmatmul.mubr.bf16.gmra.mxu0 %v18707_v16 }
 0x773   : > { %18706 = vst [vmem:[#allocation202_spill] sm:$0xff] %v17130_v35  ;;  %v9354_v40 = vpop.f32.mrf.mxu1  ;;  %9819 = vmatmul.mubr.bf16.gmra.mxu1 %v18708_v6  ;;  %v17135_v8 = vadd.f32 %v9350_v63, %v9158_v41  ;;  %v9162_v37 = vadd.f32 %v9161_v52, %v17075_v20  ;;  %9635 = vmatprep.mubr.bf16.mxu0 %v18709_v57 }
 0x774   : > { %9828 = vmatprep.mubr.bf16.mxu1 %v18710_v59  ;;  %v10154_v58 = vmul.f32 %v12806_v26, %v16860_v47  ;;  %v9163_v27 = vpop.f32.mrf.mxu0  ;;  %v18714_v59 = vld [vmem:[#allocation29_spill] sm:$0xff] }
 0x775   : > { %v9356_v32 = vpop.f32.mrf.mxu1  ;;  %v17141_v4 = vadd.f32 %v9354_v40, %v9162_v37  ;;  %v9164_v34 = vadd.f32 %v9163_v27, %v17081_v29  ;;  %v18712_v40 = vld [vmem:[#allocation23_spill] sm:$0xff]  ;;  %v18713_v37 = vld [vmem:[#allocation89_spill] sm:$0xff] }
 0x776   : > { %v17144_v49 = vadd.f32 %v10154_v58, %v10153_v55  ;;  %v9165_v28 = vpop.f32.mrf.mxu0  ;;  %v18715_v58 = vld [vmem:[#allocation91_spill] sm:$0xff] }
 0x777   : > { %v9358_v39 = vpop.f32.mrf.mxu1  ;;  %v17146_v51 = vadd.f32 %v9356_v32, %v9164_v34  ;;  %v9166_v63 = vadd.f32 %v9165_v28, %v17075_v20 }
 0x778   : > { %18711 = vst [vmem:[#allocation204_spill] sm:$0xff] %v17144_v49  ;;  %v9167_v41 = vpop.f32.mrf.mxu0  ;;  %v18716_v49 = vld [vmem:[#allocation27_spill] sm:$0xff] }
 0x779   : > { %v9360_v52 = vpop.f32.mrf.mxu1  ;;  %v17149_v16 = vadd.f32 %v9358_v39, %v9166_v63  ;;  %v9168_v47 = vadd.f32 %v9167_v41, %v17081_v29 }
 0x77a   : > { %v9171_v26 = vpop.f32.mrf.mxu0  ;;  %9636 = vmatmul.mubr.bf16.gmra.mxu0 %v18712_v40 }
 0x77b   : > { %v9364_v6 = vpop.f32.mrf.mxu1  ;;  %9829 = vmatmul.mubr.bf16.gmra.mxu1 %v18713_v37  ;;  %v17154_v55 = vadd.f32 %v9360_v52, %v9168_v47  ;;  %v9172_v57 = vadd.f32 %v9171_v26, %v17075_v20  ;;  %9645 = vmatprep.mubr.bf16.mxu0 %v18714_v59 }
 0x77c   : > { %9838 = vmatprep.mubr.bf16.mxu1 %v18715_v58  ;;  %v9173_v27 = vpop.f32.mrf.mxu0 }
 0x77d   : > { %v9366_v32 = vpop.f32.mrf.mxu1  ;;  %v17159_v34 = vadd.f32 %v9364_v6, %v9172_v57  ;;  %v9174_v28 = vadd.f32 %v9173_v27, %v17081_v29  ;;  %v18717_v6 = vld [vmem:[#allocation93_spill] sm:$0xff] }
 0x77e   : > { %v9175_v39 = vpop.f32.mrf.mxu0 }
 0x77f   : > { %v9368_v63 = vpop.f32.mrf.mxu1  ;;  %v17162_v41 = vadd.f32 %v9366_v32, %v9174_v28  ;;  %v9176_v40 = vadd.f32 %v9175_v39, %v17075_v20  ;;  %v18718_v32 = vld [vmem:[#allocation33_spill] sm:$0xff]  ;;  %v18719_v28 = vld [vmem:[#allocation95_spill] sm:$0xff] }
 0x780   : > { %v9177_v52 = vpop.f32.mrf.mxu0 }
 0x781   : > { %v9370_v47 = vpop.f32.mrf.mxu1  ;;  %v17165_v37 = vadd.f32 %v9368_v63, %v9176_v40  ;;  %v9178_v26 = vadd.f32 %v9177_v52, %v17081_v29 }
 0x782   : > { %v9181_v59 = vpop.f32.mrf.mxu0  ;;  %9646 = vmatmul.mubr.bf16.gmra.mxu0 %v18716_v49 }
 0x783   : > { %v9374_v58 = vpop.f32.mrf.mxu1  ;;  %9839 = vmatmul.mubr.bf16.gmra.mxu1 %v18717_v6  ;;  %v17170_v57 = vadd.f32 %v9370_v47, %v9178_v26  ;;  %v9182_v27 = vadd.f32 %v9181_v59, %v17075_v20  ;;  %9655 = vmatprep.mubr.bf16.mxu0 %v18718_v32 }
 0x784   : > { %9848 = vmatprep.mubr.bf16.mxu1 %v18719_v28  ;;  %v9183_v39 = vpop.f32.mrf.mxu0 }
 0x785   : > { %v9376_v35 = vpop.f32.mrf.mxu1  ;;  %v17175_v63 = vadd.f32 %v9374_v58, %v9182_v27  ;;  %v9184_v40 = vadd.f32 %v9183_v39, %v17081_v29  ;;  %v18721_v58 = vld [vmem:[#allocation97_spill] sm:$0xff] }
 0x786   : > { %v9185_v52 = vpop.f32.mrf.mxu0 }
 0x787   : > { %v9378_v45 = vpop.f32.mrf.mxu1  ;;  %v17178_v54 = vadd.f32 %v9376_v35, %v9184_v40  ;;  %v9186_v49 = vadd.f32 %v9185_v52, %v17075_v20  ;;  %v18722_v35 = vld [vmem:[#allocation37_spill] sm:$0xff]  ;;  %v18723_v40 = vld [vmem:[#allocation99_spill] sm:$0xff] }
 0x788   : > { %v9187_v47 = vpop.f32.mrf.mxu0 }
 0x789   : > { %v9380_v26 = vpop.f32.mrf.mxu1  ;;  %v17181_v6 = vadd.f32 %v9378_v45, %v9186_v49  ;;  %v9188_v59 = vadd.f32 %v9187_v47, %v17081_v29 }
 0x78a   : > { %v9191_v32 = vpop.f32.mrf.mxu0  ;;  %9656 = vmatmul.mubr.bf16.gmra.mxu0 %v18720_v24 }
 0x78b   : > { %v9384_v28 = vpop.f32.mrf.mxu1  ;;  %9849 = vmatmul.mubr.bf16.gmra.mxu1 %v18721_v58  ;;  %v17186_v27 = vadd.f32 %v9380_v26, %v9188_v59  ;;  %v9192_v39 = vadd.f32 %v9191_v32, %v17075_v20  ;;  %9665 = vmatprep.mubr.bf16.mxu0 %v18722_v35 }
 0x78c   : > { %9858 = vmatprep.mubr.bf16.mxu1 %v18723_v40  ;;  %v9193_v52 = vpop.f32.mrf.mxu0 }
 0x78d   : > { %v9386_v2 = vpop.f32.mrf.mxu1  ;;  %v17191_v45 = vadd.f32 %v9384_v28, %v9192_v39  ;;  %v9194_v49 = vadd.f32 %v9193_v52, %v17081_v29  ;;  %v18725_v28 = vld [vmem:[#allocation101_spill] sm:$0xff] }
 0x78e   : > { %v9195_v47 = vpop.f32.mrf.mxu0 }
 0x78f   : > { %v9388_v43 = vpop.f32.mrf.mxu1  ;;  %v17194_v38 = vadd.f32 %v9386_v2, %v9194_v49  ;;  %v9196_v24 = vadd.f32 %v9195_v47, %v17075_v20  ;;  %v18726_v2 = vld [vmem:[#allocation41_spill] sm:$0xff]  ;;  %v18727_v49 = vld [vmem:[#allocation103_spill] sm:$0xff] }
 0x790   : > { %v9197_v26 = vpop.f32.mrf.mxu0 }
 0x791   : > { %v9390_v59 = vpop.f32.mrf.mxu1  ;;  %v17197_v58 = vadd.f32 %v9388_v43, %v9196_v24  ;;  %v9198_v32 = vadd.f32 %v9197_v26, %v17081_v29 }
 0x792   : > { %v9201_v35 = vpop.f32.mrf.mxu0  ;;  %9666 = vmatmul.mubr.bf16.gmra.mxu0 %v18724_v31 }
 0x793   : > { %v9394_v40 = vpop.f32.mrf.mxu1  ;;  %9859 = vmatmul.mubr.bf16.gmra.mxu1 %v18725_v28  ;;  %v17202_v39 = vadd.f32 %v9390_v59, %v9198_v32  ;;  %v9202_v52 = vadd.f32 %v9201_v35, %v17075_v20  ;;  %9675 = vmatprep.mubr.bf16.mxu0 %v18726_v2 }
 0x794   : > { %9868 = vmatprep.mubr.bf16.mxu1 %v18727_v49  ;;  %v9203_v47 = vpop.f32.mrf.mxu0 }
 0x795   : > { %v9396_v21 = vpop.f32.mrf.mxu1  ;;  %v17207_v43 = vadd.f32 %v9394_v40, %v9202_v52  ;;  %v9204_v24 = vadd.f32 %v9203_v47, %v17081_v29  ;;  %v18729_v40 = vld [vmem:[#allocation105_spill] sm:$0xff] }
 0x796   : > { %v9205_v26 = vpop.f32.mrf.mxu0 }
 0x797   : > { %v9398_v22 = vpop.f32.mrf.mxu1  ;;  %v17210_v56 = vadd.f32 %v9396_v21, %v9204_v24  ;;  %v9206_v31 = vadd.f32 %v9205_v26, %v17075_v20 }
 0x798   : > { %v9207_v59 = vpop.f32.mrf.mxu0 }
 0x799   : > { %v9400_v32 = vpop.f32.mrf.mxu1  ;;  %v17213_v28 = vadd.f32 %v9398_v22, %v9206_v31  ;;  %v9208_v35 = vadd.f32 %v9207_v59, %v17081_v29 }
 0x79a   : > { %v9211_v2 = vpop.f32.mrf.mxu0  ;;  %9676 = vmatmul.mubr.bf16.gmra.mxu0 %v18728_v3 }
 0x79b   : > { %v9404_v49 = vpop.f32.mrf.mxu1  ;;  %9869 = vmatmul.mubr.bf16.gmra.mxu1 %v18729_v40  ;;  %v17218_v52 = vadd.f32 %v9400_v32, %v9208_v35  ;;  %v9212_v47 = vadd.f32 %v9211_v2, %v17075_v20 }
 0x79c   : > { %v9213_v21 = vpop.f32.mrf.mxu0 }
 0x79d   : > { %v9406_v24 = vpop.f32.mrf.mxu1  ;;  %v17221_v1 = vadd.f32 %v9404_v49, %v9212_v47  ;;  %v9214_v26 = vadd.f32 %v9213_v21, %v17081_v29 }
 0x79e   : > { %v9215_v22 = vpop.f32.mrf.mxu0 }
 0x79f   : > { %v9408_v31 = vpop.f32.mrf.mxu1  ;;  %v17224_v15 = vadd.f32 %v9406_v24, %v9214_v26  ;;  %v9216_v59 = vadd.f32 %v9215_v22, %v17075_v20 }
 0x7a0   : > { %v9217_v25 = vpop.f32.mrf.mxu0 }
 0x7a1   : > { %v9410_v3 = vpop.f32.mrf.mxu1  ;;  %v17227_v60 = vadd.f32 %v9408_v31, %v9216_v59  ;;  %v9218_v32 = vadd.f32 %v9217_v25, %v17081_v29 }
 0x7a2   : > { %v9221_v35 = vpop.f32.mrf.mxu0 }
 0x7a3   : > { %v9414_v2 = vpop.f32.mrf.mxu1  ;;  %v17230_v40 = vadd.f32 %v9410_v3, %v9218_v32  ;;  %v9222_v49 = vadd.f32 %v9221_v35, %v17075_v20 }
 0x7a4   : > { %v9223_v47 = vpop.f32.mrf.mxu0 }
 0x7a5   : > { %v9416_v21 = vpop.f32.mrf.mxu1  ;;  %v17233_v30 = vadd.f32 %v9414_v2, %v9222_v49  ;;  %v9224_v24 = vadd.f32 %v9223_v47, %v17081_v29 }
 0x7a6   : > { %v9225_v26 = vpop.f32.mrf.mxu0 }
 0x7a7   : > { %18730 = vst [vmem:[#allocation206_spill] sm:$0xff] %v17233_v30  ;;  %v9418_v22 = vpop.f32.mrf.mxu1  ;;  %v17236_v23 = vadd.f32 %v9416_v21, %v9224_v24  ;;  %v9226_v31 = vadd.f32 %v9225_v26, %v17075_v20 }
 0x7a8   : > { %v9227_v59 = vpop.f32.mrf.mxu0 }
 0x7a9   : > { %18731 = vst [vmem:[#allocation208_spill] sm:$0xff] %v17236_v23  ;;  %v9420_v25 = vpop.f32.mrf.mxu1  ;;  %v17239_v17 = vadd.f32 %v9418_v22, %v9226_v31  ;;  %v9228_v3 = vadd.f32 %v9227_v59, %v17081_v29 }
 0x7aa   : > { %v9231_v32 = vpop.f32.mrf.mxu0 }
 0x7ab   : > { %18732 = vst [vmem:[#allocation210_spill] sm:$0xff] %v17239_v17  ;;  %v9424_v35 = vpop.f32.mrf.mxu1  ;;  %v17242_v11 = vadd.f32 %v9420_v25, %v9228_v3  ;;  %v9232_v2 = vadd.f32 %v9231_v32, %v17075_v20 }
 0x7ac   : > { %v9233_v49 = vpop.f32.mrf.mxu0 }
 0x7ad   : > { %18733 = vst [vmem:[#allocation212_spill] sm:$0xff] %v17242_v11  ;;  %v9426_v47 = vpop.f32.mrf.mxu1  ;;  %v17245_v30 = vadd.f32 %v9424_v35, %v9232_v2  ;;  %v9234_v21 = vadd.f32 %v9233_v49, %v17081_v29 }
 0x7ae   : > { %v9235_v24 = vpop.f32.mrf.mxu0 }
 0x7af   : > { %18734 = vst [vmem:[#allocation214_spill] sm:$0xff] %v17245_v30  ;;  %v9428_v26 = vpop.f32.mrf.mxu1  ;;  %v17248_v23 = vadd.f32 %v9426_v47, %v9234_v21  ;;  %v9236_v22 = vadd.f32 %v9235_v24, %v17075_v20 }
 0x7b0   : > { %v9237_v31 = vpop.f32.mrf.mxu0 }
 0x7b1   : > { %18735 = vst [vmem:[#allocation216_spill] sm:$0xff] %v17248_v23  ;;  %v9430_v59 = vpop.f32.mrf.mxu1  ;;  %v17251_v17 = vadd.f32 %v9428_v26, %v9236_v22  ;;  %v9238_v25 = vadd.f32 %v9237_v31, %v17081_v29 }
 0x7b2   : > { %v9241_v3 = vpop.f32.mrf.mxu0 }
 0x7b3   : > { %18736 = vst [vmem:[#allocation219_spill] sm:$0xff] %v17251_v17  ;;  %v9434_v32 = vpop.f32.mrf.mxu1  ;;  %v17254_v11 = vadd.f32 %v9430_v59, %v9238_v25  ;;  %v9242_v35 = vadd.f32 %v9241_v3, %v17075_v20 }
 0x7b4   : > { %v9243_v2 = vpop.f32.mrf.mxu0 }
 0x7b5   : > { %18737 = vst [vmem:[#allocation221_spill] sm:$0xff] %v17254_v11  ;;  %v9436_v49 = vpop.f32.mrf.mxu1  ;;  %v17257_v30 = vadd.f32 %v9434_v32, %v9242_v35  ;;  %v9244_v47 = vadd.f32 %v9243_v2, %v17081_v29 }
 0x7b6   : > { %v9245_v21 = vpop.f32.mrf.mxu0 }
 0x7b7   : > { %18738 = vst [vmem:[#allocation223_spill] sm:$0xff] %v17257_v30  ;;  %v9438_v24 = vpop.f32.mrf.mxu1  ;;  %v17260_v23 = vadd.f32 %v9436_v49, %v9244_v47  ;;  %v9246_v26 = vadd.f32 %v9245_v21, %v17075_v20 }
 0x7b8   : > { %v9247_v22 = vpop.f32.mrf.mxu0 }
 0x7b9   : > { %18739 = vst [vmem:[#allocation225_spill] sm:$0xff] %v17260_v23  ;;  %v9440_v31 = vpop.f32.mrf.mxu1  ;;  %v17263_v17 = vadd.f32 %v9438_v24, %v9246_v26  ;;  %v9248_v59 = vadd.f32 %v9247_v22, %v17081_v29 }
 0x7ba   : > { %v9251_v25 = vpop.f32.mrf.mxu0 }
 0x7bb   : > { %18740 = vst [vmem:[#allocation227_spill] sm:$0xff] %v17263_v17  ;;  %v9444_v3 = vpop.f32.mrf.mxu1  ;;  %v17266_v11 = vadd.f32 %v9440_v31, %v9248_v59  ;;  %v9252_v32 = vadd.f32 %v9251_v25, %v17075_v20 }
 0x7bc   : > { %v9253_v35 = vpop.f32.mrf.mxu0 }
 0x7bd   : > { %18741 = vst [vmem:[#allocation240_spill] sm:$0xff] %v17266_v11  ;;  %v9446_v2 = vpop.f32.mrf.mxu1  ;;  %v17269_v30 = vadd.f32 %v9444_v3, %v9252_v32  ;;  %v9254_v49 = vadd.f32 %v9253_v35, %v17081_v29 }
 0x7be   : > { %v9255_v47 = vpop.f32.mrf.mxu0 }
 0x7bf   : > { %18742 = vst [vmem:[#allocation242_spill] sm:$0xff] %v17269_v30  ;;  %v9448_v21 = vpop.f32.mrf.mxu1  ;;  %v17272_v23 = vadd.f32 %v9446_v2, %v9254_v49  ;;  %v9256_v24 = vadd.f32 %v9255_v47, %v17075_v20 }
 0x7c0   : > { %v9257_v26 = vpop.f32.mrf.mxu0 }
 0x7c1   : > { %18743 = vst [vmem:[#allocation244_spill] sm:$0xff] %v17272_v23  ;;  %v9450_v22 = vpop.f32.mrf.mxu1  ;;  %v17275_v17 = vadd.f32 %v9448_v21, %v9256_v24  ;;  %v9258_v31 = vadd.f32 %v9257_v26, %v17081_v29 }
 0x7c2   : > { %v9261_v59 = vpop.f32.mrf.mxu0 }
 0x7c3   : > { %18744 = vst [vmem:[#allocation246_spill] sm:$0xff] %v17275_v17  ;;  %v9454_v25 = vpop.f32.mrf.mxu1  ;;  %v17278_v11 = vadd.f32 %v9450_v22, %v9258_v31  ;;  %v9262_v3 = vadd.f32 %v9261_v59, %v17075_v20 }
 0x7c4   : > { %v9263_v32 = vpop.f32.mrf.mxu0 }
 0x7c5   : > { %18745 = vst [vmem:[#allocation248_spill] sm:$0xff] %v17278_v11  ;;  %v9456_v35 = vpop.f32.mrf.mxu1  ;;  %v17281_v30 = vadd.f32 %v9454_v25, %v9262_v3  ;;  %v9264_v2 = vadd.f32 %v9263_v32, %v17081_v29 }
 0x7c6   : > { %v9265_v49 = vpop.f32.mrf.mxu0 }
 0x7c7   : > { %18746 = vst [vmem:[#allocation250_spill] sm:$0xff] %v17281_v30  ;;  %v9458_v47 = vpop.f32.mrf.mxu1  ;;  %v17284_v23 = vadd.f32 %v9456_v35, %v9264_v2  ;;  %v9266_v21 = vadd.f32 %v9265_v49, %v17075_v20 }
 0x7c8   : > { %v9267_v24 = vpop.f32.mrf.mxu0 }
 0x7c9   : > { %18747 = vst [vmem:[#allocation252_spill] sm:$0xff] %v17284_v23  ;;  %v9460_v26 = vpop.f32.mrf.mxu1  ;;  %v17287_v17 = vadd.f32 %v9458_v47, %v9266_v21  ;;  %v9268_v22 = vadd.f32 %v9267_v24, %v17081_v29 }
 0x7ca   : > { %v9271_v31 = vpop.f32.mrf.mxu0 }
 0x7cb   : > { %18748 = vst [vmem:[#allocation254_spill] sm:$0xff] %v17287_v17  ;;  %v9464_v59 = vpop.f32.mrf.mxu1  ;;  %v17290_v11 = vadd.f32 %v9460_v26, %v9268_v22  ;;  %v9272_v25 = vadd.f32 %v9271_v31, %v17075_v20 }
 0x7cc   : > { %v9273_v3 = vpop.f32.mrf.mxu0 }
 0x7cd   : > { %18749 = vst [vmem:[#allocation256_spill] sm:$0xff] %v17290_v11  ;;  %v9466_v32 = vpop.f32.mrf.mxu1  ;;  %v17293_v30 = vadd.f32 %v9464_v59, %v9272_v25  ;;  %v9274_v35 = vadd.f32 %v9273_v3, %v17081_v29 }
 0x7ce   : > { %v9275_v2 = vpop.f32.mrf.mxu0 }
 0x7cf   : > { %18750 = vst [vmem:[#allocation258_spill] sm:$0xff] %v17293_v30  ;;  %v9468_v49 = vpop.f32.mrf.mxu1  ;;  %v17296_v23 = vadd.f32 %v9466_v32, %v9274_v35  ;;  %v9276_v47 = vadd.f32 %v9275_v2, %v17075_v20 }
 0x7d0   : > { %v9277_v21 = vpop.f32.mrf.mxu0 }
 0x7d1   : > { %18751 = vst [vmem:[#allocation260_spill] sm:$0xff] %v17296_v23  ;;  %v9470_v24 = vpop.f32.mrf.mxu1  ;;  %v17299_v17 = vadd.f32 %v9468_v49, %v9276_v47  ;;  %v9278_v26 = vadd.f32 %v9277_v21, %v17081_v29 }
 0x7d2   : > { %v9281_v22 = vpop.f32.mrf.mxu0 }
 0x7d3   : > { %18752 = vst [vmem:[#allocation262_spill] sm:$0xff] %v17299_v17  ;;  %v9474_v31 = vpop.f32.mrf.mxu1  ;;  %v17302_v11 = vadd.f32 %v9470_v24, %v9278_v26  ;;  %v9282_v59 = vadd.f32 %v9281_v22, %v17075_v20 }
 0x7d4   : > { %v9283_v25 = vpop.f32.mrf.mxu0 }
 0x7d5   : > { %18753 = vst [vmem:[#allocation264_spill] sm:$0xff] %v17302_v11  ;;  %v9476_v3 = vpop.f32.mrf.mxu1  ;;  %v17305_v30 = vadd.f32 %v9474_v31, %v9282_v59  ;;  %v9284_v32 = vadd.f32 %v9283_v25, %v17081_v29 }
 0x7d6   : > { %v9285_v35 = vpop.f32.mrf.mxu0 }
 0x7d7   : > { %18754 = vst [vmem:[#allocation266_spill] sm:$0xff] %v17305_v30  ;;  %v9478_v2 = vpop.f32.mrf.mxu1  ;;  %v17308_v23 = vadd.f32 %v9476_v3, %v9284_v32  ;;  %v9286_v49 = vadd.f32 %v9285_v35, %v17075_v20 }
 0x7d8   : > { %v9287_v47 = vpop.f32.mrf.mxu0 }
 0x7d9   : > { %18755 = vst [vmem:[#allocation268_spill] sm:$0xff] %v17308_v23  ;;  %v9480_v21 = vpop.f32.mrf.mxu1  ;;  %v17311_v17 = vadd.f32 %v9478_v2, %v9286_v49  ;;  %v9288_v24 = vadd.f32 %v9287_v47, %v17081_v29 }
 0x7da   : > { %v9291_v26 = vpop.f32.mrf.mxu0 }
 0x7db   : > { %18756 = vst [vmem:[#allocation143_spill] sm:$0xff] %v17311_v17  ;;  %v9484_v22 = vpop.f32.mrf.mxu1  ;;  %v17314_v11 = vadd.f32 %v9480_v21, %v9288_v24  ;;  %v9292_v31 = vadd.f32 %v9291_v26, %v17075_v20 }
 0x7dc   : > { %v9293_v59 = vpop.f32.mrf.mxu0 }
 0x7dd   : > { %18757 = vst [vmem:[#allocation137_spill] sm:$0xff] %v17314_v11  ;;  %v9486_v25 = vpop.f32.mrf.mxu1  ;;  %v17317_v30 = vadd.f32 %v9484_v22, %v9292_v31  ;;  %v9294_v3 = vadd.f32 %v9293_v59, %v17081_v29 }
 0x7de   : > { %v9295_v32 = vpop.f32.mrf.mxu0 }
 0x7df   : > { %18758 = vst [vmem:[#allocation139_spill] sm:$0xff] %v17317_v30  ;;  %v9488_v35 = vpop.f32.mrf.mxu1  ;;  %v17320_v23 = vadd.f32 %v9486_v25, %v9294_v3  ;;  %v9296_v2 = vadd.f32 %v9295_v32, %v17075_v20 }
 0x7e0   : > { %v9297_v49 = vpop.f32.mrf.mxu0 }
 0x7e1   : > { %18759 = vst [vmem:[#allocation135_spill] sm:$0xff] %v17320_v23  ;;  %v9490_v47 = vpop.f32.mrf.mxu1  ;;  %v17323_v17 = vadd.f32 %v9488_v35, %v9296_v2  ;;  %v9298_v21 = vadd.f32 %v9297_v49, %v17081_v29 }
 0x7e2   : > { %v9527_v24 = vpop.f32.mrf.mxu0 }
 0x7e3   : > { %v9720_v26 = vpop.f32.mrf.mxu1  ;;  %v17326_v11 = vadd.f32 %v9490_v47, %v9298_v21  ;;  %v9528_v22 = vadd.f32 %v9527_v24, %v17093_v0 }
 0x7e4   : > { %v9529_v31 = vpop.f32.mrf.mxu0 }
 0x7e5   : > { %v9722_v59 = vpop.f32.mrf.mxu1  ;;  %v9721_v30 = vadd.f32 %v9720_v26, %v9528_v22  ;;  %v9530_v25 = vadd.f32 %v9529_v31, %v17098_v12 }
 0x7e6   : > { %v9531_v3 = vpop.f32.mrf.mxu0 }
 0x7e7   : > { %v9724_v23 = vpop.f32.mrf.mxu1  ;;  %12807 = vtanh.f32 %v9721_v30  ;;  %v9723_v20 = vadd.f32 %v9722_v59, %v9530_v25  ;;  %v9532_v32 = vadd.f32 %v9531_v3, %v17103_v53 }
 0x7e8   : > { %v9533_v35 = vpop.f32.mrf.mxu0 }
 0x7e9   : > { %v9726_v2 = vpop.f32.mrf.mxu1  ;;  %12809 = vtanh.f32 %v9723_v20  ;;  %v9725_v29 = vadd.f32 %v9724_v23, %v9532_v32  ;;  %v9534_v49 = vadd.f32 %v9533_v35, %v17111_v18 }
 0x7ea   : > { %v9537_v47 = vpop.f32.mrf.mxu0 }
 0x7eb   : > { %v9730_v21 = vpop.f32.mrf.mxu1  ;;  %12811 = vtanh.f32 %v9725_v29  ;;  %v9727_v0 = vadd.f32 %v9726_v2, %v9534_v49  ;;  %v9538_v24 = vadd.f32 %v9537_v47, %v17117_v46  ;;  %v13071_v46 = vld [vmem:[%s18601_s27] sm:$0xf] }
 0x7ec   : > { %v9539_v26 = vpop.f32.mrf.mxu0  ;;  %v17340_v32 = vrot.slane %v13071_v46, %v18692_v36 }
 0x7ed   : > { %v9732_v12 = vpop.f32.mrf.mxu1  ;;  %12813 = vtanh.f32 %v9727_v0  ;;  %v9731_v22 = vadd.f32 %v9730_v21, %v9538_v24  ;;  %v9540_v30 = vadd.f32 %v9539_v26, %v17122_v48 }
 0x7ee   : > { %v9541_v31 = vpop.f32.mrf.mxu0 }
 0x7ef   : > { %v9734_v53 = vpop.f32.mrf.mxu1  ;;  %12815 = vtanh.f32 %v9731_v22  ;;  %v9733_v59 = vadd.f32 %v9732_v12, %v9540_v30  ;;  %v9542_v23 = vadd.f32 %v9541_v31, %v17127_v13  ;;  %v17344_v13 = vrot.slane %v13071_v46, %v18693_v61 }
 0x7f0   : > { %v9543_v25 = vpop.f32.mrf.mxu0 }
 0x7f1   : > { %v9736_v18 = vpop.f32.mrf.mxu1  ;;  %12817 = vtanh.f32 %v9733_v59  ;;  %v9735_v3 = vadd.f32 %v9734_v53, %v9542_v23  ;;  %v9544_v20 = vadd.f32 %v9543_v25, %v17135_v8 }
 0x7f2   : > { %v9547_v48 = vpop.f32.mrf.mxu0 }
 0x7f3   : > { %v9740_v35 = vpop.f32.mrf.mxu1  ;;  %12819 = vtanh.f32 %v9735_v3  ;;  %v9737_v2 = vadd.f32 %v9736_v18, %v9544_v20  ;;  %v9548_v29 = vadd.f32 %v9547_v48, %v17141_v4 }
 0x7f4   : > { %v12808_v49 = vpop.eup %12807  ;;  %v9549_v47 = vpop.f32.mrf.mxu0 }
 0x7f5   : > { %v9742_v21 = vpop.f32.mrf.mxu1  ;;  %12821 = vtanh.f32 %v9737_v2  ;;  %v9741_v8 = vadd.f32 %v9740_v35, %v9548_v29  ;;  %v9550_v0 = vadd.f32 %v9549_v47, %v17146_v51  ;;  %v10031_v24 = vmul.f32 %v12808_v49, %v17340_v32 }
 0x7f6   : > { %v12810_v36 = vpop.eup %12809  ;;  %v9551_v26 = vpop.f32.mrf.mxu0 }
 0x7f7   : > { %v9744_v12 = vpop.f32.mrf.mxu1  ;;  %12823 = vtanh.f32 %v9741_v8  ;;  %v9743_v22 = vadd.f32 %v9742_v21, %v9550_v0  ;;  %v9552_v30 = vadd.f32 %v9551_v26, %v17149_v16  ;;  %v10032_v4 = vmul.f32 %v12810_v36, %v17344_v13 }
 0x7f8   : > { %v12812_v61 = vpop.eup %12811  ;;  %v9553_v31 = vpop.f32.mrf.mxu0  ;;  %v10158_v59 = vadd.f32 %v16867_v14, %v10031_v24 }
 0x7f9   : > { %v9746_v53 = vpop.f32.mrf.mxu1  ;;  %12825 = vtanh.f32 %v9743_v22  ;;  %v9745_v23 = vadd.f32 %v9744_v12, %v9552_v30  ;;  %v9554_v51 = vadd.f32 %v9553_v31, %v17154_v55  ;;  %v10035_v25 = vmul.f32 %v12812_v61, %v17340_v32 }
 0x7fa   : > { %v12814_v18 = vpop.eup %12813  ;;  %v9557_v3 = vpop.f32.mrf.mxu0  ;;  %v10159_v46 = vadd.f32 %v10158_v59, %v10032_v4 }
 0x7fb   : > { %v9750_v20 = vpop.f32.mrf.mxu1  ;;  %12827 = vtanh.f32 %v9745_v23  ;;  %v9747_v48 = vadd.f32 %v9746_v53, %v9554_v51  ;;  %v9558_v16 = vadd.f32 %v9557_v3, %v17159_v34  ;;  %v10036_v35 = vmul.f32 %v12814_v18, %v17344_v13 }
 0x7fc   : > { %v12816_v2 = vpop.eup %12815  ;;  %10160 = vadd.xlane.f32.xlu0 %v10159_v46  ;;  %v9559_v29 = vpop.f32.mrf.mxu0  ;;  %v10163_v49 = vadd.f32 %v16877_v42, %v10035_v25 }
 0x7fd   : > { %v9752_v14 = vpop.f32.mrf.mxu1  ;;  %12829 = vtanh.f32 %v9747_v48  ;;  %v9751_v55 = vadd.f32 %v9750_v20, %v9558_v16  ;;  %v9560_v47 = vadd.f32 %v9559_v29, %v17162_v41  ;;  %v10039_v21 = vmul.f32 %v12816_v2, %v17340_v32 }
 0x7fe   : > { %v12818_v8 = vpop.eup %12817  ;;  %v9561_v0 = vpop.f32.mrf.mxu0  ;;  %v10164_v36 = vadd.f32 %v10163_v49, %v10036_v35 }
 0x7ff   : > { %v9754_v24 = vpop.f32.mrf.mxu1  ;;  %12831 = vtanh.f32 %v9751_v55  ;;  %v9753_v34 = vadd.f32 %v9752_v14, %v9560_v47  ;;  %v9562_v26 = vadd.f32 %v9561_v0, %v17165_v37  ;;  %v10040_v12 = vmul.f32 %v12818_v8, %v17344_v13 }
 0x800   : > { %v12820_v22 = vpop.eup %12819  ;;  %10165 = vadd.xlane.f32.xlu1 %v10164_v36  ;;  %v9563_v30 = vpop.f32.mrf.mxu0  ;;  %v10168_v4 = vadd.f32 %v16883_v9, %v10039_v21 }
 0x801   : > { %v9756_v42 = vpop.f32.mrf.mxu1  ;;  %12833 = vtanh.f32 %v9753_v34  ;;  %v9755_v41 = vadd.f32 %v9754_v24, %v9562_v26  ;;  %v9564_v61 = vadd.f32 %v9563_v30, %v17170_v57  ;;  %v10043_v31 = vmul.f32 %v12820_v22, %v17340_v32 }
 0x802   : > { %v12822_v53 = vpop.eup %12821  ;;  %v9567_v59 = vpop.f32.mrf.mxu0  ;;  %v10169_v51 = vadd.f32 %v10168_v4, %v10040_v12 }
 0x803   : > { %v9760_v23 = vpop.f32.mrf.mxu1  ;;  %12835 = vtanh.f32 %v9755_v41  ;;  %v9757_v37 = vadd.f32 %v9756_v42, %v9564_v61  ;;  %v9568_v25 = vadd.f32 %v9567_v59, %v17175_v63  ;;  %v10044_v18 = vmul.f32 %v12822_v53, %v17344_v13 }
 0x804   : > { %v12824_v3 = vpop.eup %12823  ;;  %10170 = vadd.xlane.f32.xlu0 %v10169_v51  ;;  %v9569_v20 = vpop.f32.mrf.mxu0  ;;  %v10173_v46 = vadd.f32 %v16893_v33, %v10043_v31 }
 0x805   : > { %v9762_v9 = vpop.f32.mrf.mxu1  ;;  %12837 = vtanh.f32 %v9757_v37  ;;  %v9761_v57 = vadd.f32 %v9760_v23, %v9568_v25  ;;  %v9570_v48 = vadd.f32 %v9569_v20, %v17178_v54  ;;  %v10047_v16 = vmul.f32 %v12824_v3, %v17340_v32 }
 0x806   : > { %v12826_v35 = vpop.eup %12825  ;;  %v9571_v2 = vpop.f32.mrf.mxu0  ;;  %v10174_v14 = vadd.f32 %v10173_v46, %v10044_v18 }
 0x807   : > { %v9764_v29 = vpop.f32.mrf.mxu1  ;;  %12839 = vtanh.f32 %v9761_v57  ;;  %v9763_v63 = vadd.f32 %v9762_v9, %v9570_v48  ;;  %v9572_v49 = vadd.f32 %v9571_v2, %v17181_v6  ;;  %v10048_v55 = vmul.f32 %v12826_v35, %v17344_v13 }
 0x808   : > { %v12828_v47 = vpop.eup %12827  ;;  %10175 = vadd.xlane.f32.xlu0 %v10174_v14  ;;  %v9573_v21 = vpop.f32.mrf.mxu0  ;;  %v10178_v8 = vadd.f32 %v16899_v5, %v10047_v16 }
 0x809   : > { %v9766_v33 = vpop.f32.mrf.mxu1  ;;  %12841 = vtanh.f32 %v9763_v63  ;;  %v9765_v54 = vadd.f32 %v9764_v29, %v9572_v49  ;;  %v9574_v0 = vadd.f32 %v9573_v21, %v17186_v27  ;;  %v10051_v24 = vmul.f32 %v12828_v47, %v17340_v32 }
 0x80a   : > { %v12830_v36 = vpop.eup %12829  ;;  %v9577_v34 = vpop.f32.mrf.mxu0  ;;  %v10179_v12 = vadd.f32 %v10178_v8, %v10048_v55 }
 0x80b   : > { %v9770_v26 = vpop.f32.mrf.mxu1  ;;  %12843 = vtanh.f32 %v9765_v54  ;;  %v9767_v6 = vadd.f32 %v9766_v33, %v9574_v0  ;;  %v9578_v22 = vadd.f32 %v9577_v34, %v17191_v45  ;;  %v10052_v30 = vmul.f32 %v12830_v36, %v17344_v13 }
 0x80c   : > { %v12832_v42 = vpop.eup %12831  ;;  %10180 = vadd.xlane.f32.xlu1 %v10179_v12  ;;  %v9579_v4 = vpop.f32.mrf.mxu0  ;;  %v10183_v41 = vadd.f32 %v16909_v7, %v10051_v24 }
 0x80d   : > { %v9772_v5 = vpop.f32.mrf.mxu1  ;;  %12845 = vtanh.f32 %v9767_v6  ;;  %v9771_v27 = vadd.f32 %v9770_v26, %v9578_v22  ;;  %v9580_v61 = vadd.f32 %v9579_v4, %v17194_v38  ;;  %v10055_v31 = vmul.f32 %v12832_v42, %v17340_v32 }
 0x80e   : > { %v12834_v53 = vpop.eup %12833  ;;  %v9581_v59 = vpop.f32.mrf.mxu0  ;;  %v10184_v51 = vadd.f32 %v10183_v41, %v10052_v30 }
 0x80f   : > { %v9774_v23 = vpop.f32.mrf.mxu1  ;;  %12847 = vtanh.f32 %v9771_v27  ;;  %v9773_v45 = vadd.f32 %v9772_v5, %v9580_v61  ;;  %v9582_v37 = vadd.f32 %v9581_v59, %v17197_v58  ;;  %v10056_v25 = vmul.f32 %v12834_v53, %v17344_v13 }
 0x810   : > { %v12836_v18 = vpop.eup %12835  ;;  %10185 = vadd.xlane.f32.xlu0 %v10184_v51  ;;  %v9583_v3 = vpop.f32.mrf.mxu0  ;;  %v10188_v20 = vadd.f32 %v16915_v50, %v10055_v31 }
 0x811   : > { %v9776_v7 = vpop.f32.mrf.mxu1  ;;  %12849 = vtanh.f32 %v9773_v45  ;;  %v9775_v38 = vadd.f32 %v9774_v23, %v9582_v37  ;;  %v9584_v9 = vadd.f32 %v9583_v3, %v17202_v39  ;;  %v10059_v46 = vmul.f32 %v12836_v18, %v17340_v32 }
 0x812   : > { %v12838_v57 = vpop.eup %12837  ;;  %v9587_v48 = vpop.f32.mrf.mxu0  ;;  %v10189_v35 = vadd.f32 %v10188_v20, %v10056_v25 }
 0x813   : > { %v9780_v16 = vpop.f32.mrf.mxu1  ;;  %12851 = vtanh.f32 %v9775_v38  ;;  %v9777_v58 = vadd.f32 %v9776_v7, %v9584_v9  ;;  %v9588_v2 = vadd.f32 %v9587_v48, %v17207_v43  ;;  %v10060_v29 = vmul.f32 %v12838_v57, %v17344_v13 }
 0x814   : > { %v12840_v14 = vpop.eup %12839  ;;  %10190 = vadd.xlane.f32.xlu1 %v10189_v35  ;;  %v9589_v63 = vpop.f32.mrf.mxu0  ;;  %v10193_v49 = vadd.f32 %v16925_v44, %v10059_v46  ;;  %v18760_v35 = vld [vmem:[#allocation206_spill] sm:$0xff] }
 0x815   : > { %v9782_v50 = vpop.f32.mrf.mxu1  ;;  %12853 = vtanh.f32 %v9777_v58  ;;  %v9781_v39 = vadd.f32 %v9780_v16, %v9588_v2  ;;  %v9590_v55 = vadd.f32 %v9589_v63, %v17210_v56  ;;  %v10063_v47 = vmul.f32 %v12840_v14, %v17340_v32  ;;  %v18761_v63 = vld [vmem:[#allocation146_spill] sm:$0xff] }
 0x816   : > { %v12842_v21 = vpop.eup %12841  ;;  %v9591_v33 = vpop.f32.mrf.mxu0  ;;  %v10194_v54 = vadd.f32 %v10193_v49, %v10060_v29  ;;  %v18762_v49 = vld [vmem:[#allocation208_spill] sm:$0xff] }
 0x817   : > { %v9784_v8 = vpop.f32.mrf.mxu1  ;;  %12855 = vtanh.f32 %v9781_v39  ;;  %v9783_v43 = vadd.f32 %v9782_v50, %v9590_v55  ;;  %v9592_v0 = vadd.f32 %v9591_v33, %v17213_v28  ;;  %v10064_v24 = vmul.f32 %v12842_v21, %v17344_v13 }
 0x818   : > { %v12844_v36 = vpop.eup %12843  ;;  %10195 = vadd.xlane.f32.xlu0 %v10194_v54  ;;  %v9593_v34 = vpop.f32.mrf.mxu0  ;;  %v10198_v26 = vadd.f32 %v16931_v19, %v10063_v47 }
 0x819   : > { %v9786_v44 = vpop.f32.mrf.mxu1  ;;  %12857 = vtanh.f32 %v9783_v43  ;;  %v9785_v56 = vadd.f32 %v9784_v8, %v9592_v0  ;;  %v9594_v12 = vadd.f32 %v9593_v34, %v17218_v52  ;;  %v10067_v6 = vmul.f32 %v12844_v36, %v17340_v32  ;;  %v18763_v43 = vld [vmem:[#allocation210_spill] sm:$0xff] }
 0x81a   : > { %v12846_v22 = vpop.eup %12845  ;;  %v9597_v30 = vpop.f32.mrf.mxu0  ;;  %v10199_v4 = vadd.f32 %v10198_v26, %v10064_v24  ;;  %v18764_v26 = vld [vmem:[#allocation148_spill] sm:$0xff] }
 0x81b   : > { %v9790_v42 = vpop.f32.mrf.mxu1  ;;  %12859 = vtanh.f32 %v9785_v56  ;;  %v9787_v28 = vadd.f32 %v9786_v44, %v9594_v12  ;;  %v9598_v5 = vadd.f32 %v9597_v30, %v17221_v1  ;;  %v10068_v41 = vmul.f32 %v12846_v22, %v17344_v13 }
 0x81c   : > { %v12848_v27 = vpop.eup %12847  ;;  %10200 = vadd.xlane.f32.xlu1 %v10199_v4  ;;  %v9599_v61 = vpop.f32.mrf.mxu0  ;;  %v10203_v31 = vadd.f32 %v16941_v62, %v10067_v6  ;;  %v18765_v6 = vld [vmem:[#allocation212_spill] sm:$0xff] }
 0x81d   : > { %v9792_v19 = vpop.f32.mrf.mxu1  ;;  %12861 = vtanh.f32 %v9787_v28  ;;  %v9791_v52 = vadd.f32 %v9790_v42, %v9598_v5  ;;  %v9600_v53 = vadd.f32 %v9599_v61, %v17224_v15  ;;  %v10071_v59 = vmul.f32 %v12848_v27, %v17340_v32  ;;  %v18766_v27 = vld [vmem:[#allocation214_spill] sm:$0xff] }
 0x81e   : > { %v12850_v23 = vpop.eup %12849  ;;  %v9601_v51 = vpop.f32.mrf.mxu0  ;;  %v10204_v37 = vadd.f32 %v10203_v31, %v10068_v41 }
 0x81f   : > { %v9794_v45 = vpop.f32.mrf.mxu1  ;;  %12863 = vtanh.f32 %v9791_v52  ;;  %v9793_v1 = vadd.f32 %v9792_v19, %v9600_v53  ;;  %v9602_v25 = vadd.f32 %v9601_v51, %v17227_v60  ;;  %v10072_v18 = vmul.f32 %v12850_v23, %v17344_v13 }
 0x820   : > { %v12852_v3 = vpop.eup %12851  ;;  %10205 = vadd.xlane.f32.xlu0 %v10204_v37  ;;  %v9603_v7 = vpop.f32.mrf.mxu0  ;;  %v10208_v20 = vadd.f32 %v16947_v10, %v10071_v59  ;;  %v18767_v59 = vld [vmem:[#allocation154_spill] sm:$0xff] }
 0x821   : > { %v9796_v62 = vpop.f32.mrf.mxu1  ;;  %12865 = vtanh.f32 %v9793_v1  ;;  %v9795_v15 = vadd.f32 %v9794_v45, %v9602_v25  ;;  %v9604_v38 = vadd.f32 %v9603_v7, %v17230_v40  ;;  %v10075_v9 = vmul.f32 %v12852_v3, %v17340_v32  ;;  %v18768_v45 = vld [vmem:[#allocation216_spill] sm:$0xff] }
 0x822   : > { %v12854_v46 = vpop.eup %12853  ;;  %v9607_v57 = vpop.f32.mrf.mxu0  ;;  %v10209_v16 = vadd.f32 %v10208_v20, %v10072_v18  ;;  %v18769_v20 = vld [vmem:[#allocation219_spill] sm:$0xff] }
 0x823   : > { %v9800_v48 = vpop.f32.mrf.mxu1  ;;  %12867 = vtanh.f32 %v9795_v15  ;;  %v9797_v60 = vadd.f32 %v9796_v62, %v9604_v38  ;;  %v9608_v58 = vadd.f32 %v9607_v57, %v18760_v35  ;;  %v10076_v2 = vmul.f32 %v12854_v46, %v17344_v13  ;;  %v18771_v35 = vld [vmem:[#allocation221_spill] sm:$0xff] }
 0x824   : > { %v12856_v29 = vpop.eup %12855  ;;  %10210 = vadd.xlane.f32.xlu1 %v10209_v16  ;;  %v9609_v14 = vpop.f32.mrf.mxu0  ;;  %v10213_v50 = vadd.f32 %v18761_v63, %v10075_v9 }
 0x825   : > { %v9802_v10 = vpop.f32.mrf.mxu1  ;;  %12869 = vtanh.f32 %v9797_v60  ;;  %v9801_v40 = vadd.f32 %v9800_v48, %v9608_v58  ;;  %v9610_v39 = vadd.f32 %v9609_v14, %v18762_v49  ;;  %v10079_v55 = vmul.f32 %v12856_v29, %v17340_v32  ;;  %v18770_v48 = vld [vmem:[#allocation156_spill] sm:$0xff] }
 0x826   : > { %v12858_v47 = vpop.eup %12857  ;;  %v9611_v21 = vpop.f32.mrf.mxu0  ;;  %v10214_v8 = vadd.f32 %v10213_v50, %v10076_v2 }
 0x827   : > { %v9804_v33 = vpop.f32.mrf.mxu1  ;;  %12871 = vtanh.f32 %v9801_v40  ;;  %v9803_v54 = vadd.f32 %v9802_v10, %v9610_v39  ;;  %v9612_v0 = vadd.f32 %v9611_v21, %v18763_v43  ;;  %v10080_v24 = vmul.f32 %v12858_v47, %v17344_v13  ;;  %v18772_v40 = vld [vmem:[#allocation223_spill] sm:$0xff]  ;;  %v18774_v43 = vld [vmem:[#allocation225_spill] sm:$0xff] }
 0x828   : > { %v12860_v36 = vpop.eup %12859  ;;  %10215 = vadd.xlane.f32.xlu0 %v10214_v8  ;;  %v9613_v34 = vpop.f32.mrf.mxu0  ;;  %v10218_v56 = vadd.f32 %v18764_v26, %v10079_v55 }
 0x829   : > { %v9806_v44 = vpop.f32.mrf.mxu1  ;;  %12873 = vtanh.f32 %v9803_v54  ;;  %v9805_v12 = vadd.f32 %v9804_v33, %v9612_v0  ;;  %v9614_v22 = vadd.f32 %v9613_v34, %v18765_v6  ;;  %v10083_v30 = vmul.f32 %v12860_v36, %v17340_v32  ;;  %v18773_v33 = vld [vmem:[#allocation158_spill] sm:$0xff] }
 0x82a   : > { %v12862_v42 = vpop.eup %12861  ;;  %v9617_v4 = vpop.f32.mrf.mxu0  ;;  %v10219_v5 = vadd.f32 %v10218_v56, %v10080_v24 }
 0x82b   : > { %v9810_v28 = vpop.f32.mrf.mxu1  ;;  %12875 = vtanh.f32 %v9805_v12  ;;  %v9807_v41 = vadd.f32 %v9806_v44, %v9614_v22  ;;  %v9618_v61 = vadd.f32 %v9617_v4, %v18766_v27  ;;  %v10084_v19 = vmul.f32 %v12862_v42, %v17344_v13  ;;  %v18775_v12 = vld [vmem:[#allocation227_spill] sm:$0xff]  ;;  %v18777_v27 = vld [vmem:[#allocation240_spill] sm:$0xff] }
 0x82c   : > { %v12864_v31 = vpop.eup %12863  ;;  %10220 = vadd.xlane.f32.xlu1 %v10219_v5  ;;  %v9619_v52 = vpop.f32.mrf.mxu0  ;;  %v10223_v23 = vadd.f32 %v18767_v59, %v10083_v30 }
 0x82d   : > { %v9812_v53 = vpop.f32.mrf.mxu1  ;;  %12877 = vtanh.f32 %v9807_v41  ;;  %v9811_v51 = vadd.f32 %v9810_v28, %v9618_v61  ;;  %v9620_v37 = vadd.f32 %v9619_v52, %v18768_v45  ;;  %v10087_v1 = vmul.f32 %v12864_v31, %v17340_v32  ;;  %v18776_v28 = vld [vmem:[#allocation160_spill] sm:$0xff] }
 0x82e   : > { %v12866_v25 = vpop.eup %12865  ;;  %v9621_v18 = vpop.f32.mrf.mxu0  ;;  %v10224_v7 = vadd.f32 %v10223_v23, %v10084_v19 }
 0x82f   : > { %v9814_v3 = vpop.f32.mrf.mxu1  ;;  %12879 = vtanh.f32 %v9811_v51  ;;  %v9813_v62 = vadd.f32 %v9812_v53, %v9620_v37  ;;  %v9622_v15 = vadd.f32 %v9621_v18, %v18769_v20  ;;  %v10088_v38 = vmul.f32 %v12866_v25, %v17344_v13  ;;  %v18778_v51 = vld [vmem:[#allocation242_spill] sm:$0xff]  ;;  %v18780_v20 = vld [vmem:[#allocation244_spill] sm:$0xff] }
 0x830   : > { %v12868_v9 = vpop.eup %12867  ;;  %10225 = vadd.xlane.f32.xlu0 %v10224_v7  ;;  %v9623_v46 = vpop.f32.mrf.mxu0  ;;  %v10228_v16 = vadd.f32 %v18770_v48, %v10087_v1 }
 0x831   : > { %v9816_v57 = vpop.f32.mrf.mxu1  ;;  %12881 = vtanh.f32 %v9813_v62  ;;  %v9815_v60 = vadd.f32 %v9814_v3, %v9622_v15  ;;  %v9624_v58 = vadd.f32 %v9623_v46, %v18771_v35  ;;  %v10091_v2 = vmul.f32 %v12868_v9, %v17340_v32  ;;  %v18779_v3 = vld [vmem:[#allocation166_spill] sm:$0xff] }
 0x832   : > { %v12870_v29 = vpop.eup %12869  ;;  %v9627_v14 = vpop.f32.mrf.mxu0  ;;  %v10229_v63 = vadd.f32 %v10228_v16, %v10088_v38 }
 0x833   : > { %v9820_v10 = vpop.f32.mrf.mxu1  ;;  %12883 = vtanh.f32 %v9815_v60  ;;  %v9817_v50 = vadd.f32 %v9816_v57, %v9624_v58  ;;  %v9628_v49 = vadd.f32 %v9627_v14, %v18772_v40  ;;  %v10092_v39 = vmul.f32 %v12870_v29, %v17344_v13  ;;  %v18781_v60 = vld [vmem:[#allocation246_spill] sm:$0xff]  ;;  %v18783_v40 = vld [vmem:[#allocation248_spill] sm:$0xff] }
 0x834   : > { %v12872_v55 = vpop.eup %12871  ;;  %10230 = vadd.xlane.f32.xlu1 %v10229_v63  ;;  %v9629_v47 = vpop.f32.mrf.mxu0  ;;  %v10233_v8 = vadd.f32 %v18773_v33, %v10091_v2 }
 0x835   : > { %v9822_v21 = vpop.f32.mrf.mxu1  ;;  %12885 = vtanh.f32 %v9817_v50  ;;  %v9821_v54 = vadd.f32 %v9820_v10, %v9628_v49  ;;  %v9630_v0 = vadd.f32 %v9629_v47, %v18774_v43  ;;  %v10095_v24 = vmul.f32 %v12872_v55, %v17340_v32  ;;  %v18782_v10 = vld [vmem:[#allocation168_spill] sm:$0xff] }
 0x836   : > { %v12874_v36 = vpop.eup %12873  ;;  %v9631_v34 = vpop.f32.mrf.mxu0  ;;  %v10234_v26 = vadd.f32 %v10233_v8, %v10092_v39 }
 0x837   : > { %v9824_v44 = vpop.f32.mrf.mxu1  ;;  %12887 = vtanh.f32 %v9821_v54  ;;  %v9823_v56 = vadd.f32 %v9822_v21, %v9630_v0  ;;  %v9632_v6 = vadd.f32 %v9631_v34, %v18775_v12  ;;  %v10096_v22 = vmul.f32 %v12874_v36, %v17344_v13  ;;  %v18784_v54 = vld [vmem:[#allocation250_spill] sm:$0xff]  ;;  %v18786_v12 = vld [vmem:[#allocation252_spill] sm:$0xff] }
 0x838   : > { %v12876_v30 = vpop.eup %12875  ;;  %10235 = vadd.xlane.f32.xlu0 %v10234_v26  ;;  %v9633_v42 = vpop.f32.mrf.mxu0  ;;  %v10238_v5 = vadd.f32 %v18776_v28, %v10095_v24 }
 0x839   : > { %v9826_v4 = vpop.f32.mrf.mxu1  ;;  %12889 = vtanh.f32 %v9823_v56  ;;  %v9825_v41 = vadd.f32 %v9824_v44, %v9632_v6  ;;  %v9634_v61 = vadd.f32 %v9633_v42, %v18777_v27  ;;  %v10099_v19 = vmul.f32 %v12876_v30, %v17340_v32  ;;  %v18785_v44 = vld [vmem:[#allocation170_spill] sm:$0xff] }
 0x83a   : > { %v12878_v31 = vpop.eup %12877  ;;  %v9637_v52 = vpop.f32.mrf.mxu0  ;;  %v10239_v59 = vadd.f32 %v10238_v5, %v10096_v22 }
 0x83b   : > { %v9830_v53 = vpop.f32.mrf.mxu1  ;;  %12891 = vtanh.f32 %v9825_v41  ;;  %v9827_v23 = vadd.f32 %v9826_v4, %v9634_v61  ;;  %v9638_v45 = vadd.f32 %v9637_v52, %v18778_v51  ;;  %v10100_v37 = vmul.f32 %v12878_v31, %v17344_v13  ;;  %v18787_v41 = vld [vmem:[#allocation254_spill] sm:$0xff]  ;;  %v18789_v51 = vld [vmem:[#allocation256_spill] sm:$0xff] }
 0x83c   : > { %v12880_v1 = vpop.eup %12879  ;;  %10240 = vadd.xlane.f32.xlu1 %v10239_v59  ;;  %v9639_v25 = vpop.f32.mrf.mxu0  ;;  %v10243_v7 = vadd.f32 %v18779_v3, %v10099_v19 }
 0x83d   : > { %v9832_v18 = vpop.f32.mrf.mxu1  ;;  %12893 = vtanh.f32 %v9827_v23  ;;  %v9831_v62 = vadd.f32 %v9830_v53, %v9638_v45  ;;  %v9640_v15 = vadd.f32 %v9639_v25, %v18780_v20  ;;  %v10103_v38 = vmul.f32 %v12880_v1, %v17340_v32  ;;  %v18788_v53 = vld [vmem:[#allocation172_spill] sm:$0xff] }
 0x83e   : > { %v12882_v9 = vpop.eup %12881  ;;  %v9641_v46 = vpop.f32.mrf.mxu0  ;;  %v10244_v48 = vadd.f32 %v10243_v7, %v10100_v37 }
 0x83f   : > { %v9834_v57 = vpop.f32.mrf.mxu1  ;;  %12895 = vtanh.f32 %v9831_v62  ;;  %v9833_v16 = vadd.f32 %v9832_v18, %v9640_v15  ;;  %v9642_v35 = vadd.f32 %v9641_v46, %v18781_v60  ;;  %v10104_v58 = vmul.f32 %v12882_v9, %v17344_v13  ;;  %v18790_v62 = vld [vmem:[#allocation258_spill] sm:$0xff]  ;;  %v18792_v60 = vld [vmem:[#allocation260_spill] sm:$0xff] }
 0x840   : > { %v12884_v2 = vpop.eup %12883  ;;  %10245 = vadd.xlane.f32.xlu0 %v10244_v48  ;;  %v9643_v29 = vpop.f32.mrf.mxu0  ;;  %v10248_v63 = vadd.f32 %v18782_v10, %v10103_v38 }
 0x841   : > { %v9836_v14 = vpop.f32.mrf.mxu1  ;;  %12897 = vtanh.f32 %v9833_v16  ;;  %v9835_v50 = vadd.f32 %v9834_v57, %v9642_v35  ;;  %v9644_v49 = vadd.f32 %v9643_v29, %v18783_v40  ;;  %v10107_v39 = vmul.f32 %v12884_v2, %v17340_v32  ;;  %v18791_v57 = vld [vmem:[#allocation178_spill] sm:$0xff] }
 0x842   : > { %v12886_v55 = vpop.eup %12885  ;;  %v9647_v47 = vpop.f32.mrf.mxu0  ;;  %v10249_v33 = vadd.f32 %v10248_v63, %v10104_v58 }
 0x843   : > { %v9840_v21 = vpop.f32.mrf.mxu1  ;;  %12899 = vtanh.f32 %v9835_v50  ;;  %v9837_v8 = vadd.f32 %v9836_v14, %v9644_v49  ;;  %v9648_v43 = vadd.f32 %v9647_v47, %v18784_v54  ;;  %v10108_v0 = vmul.f32 %v12886_v55, %v17344_v13  ;;  %v18793_v50 = vld [vmem:[#allocation262_spill] sm:$0xff]  ;;  %v18795_v54 = vld [vmem:[#allocation264_spill] sm:$0xff] }
 0x844   : > { %v12888_v24 = vpop.eup %12887  ;;  %10250 = vadd.xlane.f32.xlu1 %v10249_v33  ;;  %v9649_v36 = vpop.f32.mrf.mxu0  ;;  %v10253_v26 = vadd.f32 %v18785_v44, %v10107_v39 }
 0x845   : > { %v9842_v34 = vpop.f32.mrf.mxu1  ;;  %12901 = vtanh.f32 %v9837_v8  ;;  %v9841_v56 = vadd.f32 %v9840_v21, %v9648_v43  ;;  %v9650_v6 = vadd.f32 %v9649_v36, %v18786_v12  ;;  %v10111_v22 = vmul.f32 %v12888_v24, %v17340_v32  ;;  %v18794_v21 = vld [vmem:[#allocation180_spill] sm:$0xff] }
 0x846   : > { %v12890_v30 = vpop.eup %12889  ;;  %v9651_v42 = vpop.f32.mrf.mxu0  ;;  %v10254_v28 = vadd.f32 %v10253_v26, %v10108_v0 }
 0x847   : > { %v9844_v4 = vpop.f32.mrf.mxu1  ;;  %12903 = vtanh.f32 %v9841_v56  ;;  %v9843_v5 = vadd.f32 %v9842_v34, %v9650_v6  ;;  %v9652_v27 = vadd.f32 %v9651_v42, %v18787_v41  ;;  %v10112_v61 = vmul.f32 %v12890_v30, %v17344_v13  ;;  %v18796_v56 = vld [vmem:[#allocation266_spill] sm:$0xff]  ;;  %v18798_v41 = vld [vmem:[#allocation268_spill] sm:$0xff] }
 0x848   : > { %v12892_v19 = vpop.eup %12891  ;;  %10255 = vadd.xlane.f32.xlu0 %v10254_v28  ;;  %v9653_v31 = vpop.f32.mrf.mxu0  ;;  %v10258_v59 = vadd.f32 %v18788_v53, %v10111_v22 }
 0x849   : > { %v9846_v52 = vpop.f32.mrf.mxu1  ;;  %12905 = vtanh.f32 %v9843_v5  ;;  %v9845_v23 = vadd.f32 %v9844_v4, %v9652_v27  ;;  %v9654_v45 = vadd.f32 %v9653_v31, %v18789_v51  ;;  %v10115_v37 = vmul.f32 %v12892_v19, %v17340_v32  ;;  %v18797_v4 = vld [vmem:[#allocation182_spill] sm:$0xff] }
 0x84a   : > { %v12894_v1 = vpop.eup %12893  ;;  %v9657_v25 = vpop.f32.mrf.mxu0  ;;  %v10259_v3 = vadd.f32 %v10258_v59, %v10112_v61 }
 0x84b   : > { %v9850_v18 = vpop.f32.mrf.mxu1  ;;  %12907 = vtanh.f32 %v9845_v23  ;;  %v9847_v7 = vadd.f32 %v9846_v52, %v9654_v45  ;;  %v9658_v20 = vadd.f32 %v9657_v25, %v18790_v62  ;;  %v10116_v15 = vmul.f32 %v12894_v1, %v17344_v13  ;;  %v18799_v23 = vld [vmem:[#allocation143_spill] sm:$0xff]  ;;  %v18801_v62 = vld [vmem:[#allocation137_spill] sm:$0xff] }
 0x84c   : > { %v12896_v38 = vpop.eup %12895  ;;  %10260 = vadd.xlane.f32.xlu1 %v10259_v3  ;;  %v9659_v9 = vpop.f32.mrf.mxu0  ;;  %v10263_v48 = vadd.f32 %v18791_v57, %v10115_v37 }
 0x84d   : > { %v9852_v46 = vpop.f32.mrf.mxu1  ;;  %12909 = vtanh.f32 %v9847_v7  ;;  %v9851_v16 = vadd.f32 %v9850_v18, %v9658_v20  ;;  %v9660_v35 = vadd.f32 %v9659_v9, %v18792_v60  ;;  %v10119_v58 = vmul.f32 %v12896_v38, %v17340_v32  ;;  %v18800_v18 = vld [vmem:[#allocation184_spill] sm:$0xff] }
 0x84e   : > { %v12898_v2 = vpop.eup %12897  ;;  %v9661_v29 = vpop.f32.mrf.mxu0  ;;  %v10264_v10 = vadd.f32 %v10263_v48, %v10116_v15 }
 0x84f   : > { %v9854_v14 = vpop.f32.mrf.mxu1  ;;  %12911 = vtanh.f32 %v9851_v16  ;;  %v9853_v63 = vadd.f32 %v9852_v46, %v9660_v35  ;;  %v9662_v40 = vadd.f32 %v9661_v29, %v18793_v50  ;;  %v10120_v49 = vmul.f32 %v12898_v2, %v17344_v13  ;;  %v18802_v16 = vld [vmem:[#allocation139_spill] sm:$0xff] }
 0x850   : > { %v12900_v39 = vpop.eup %12899  ;;  %10265 = vadd.xlane.f32.xlu0 %v10264_v10  ;;  %v9663_v55 = vpop.f32.mrf.mxu0  ;;  %v10268_v33 = vadd.f32 %v18794_v21, %v10119_v58  ;;  %v18804_v50 = vld [vmem:[#allocation135_spill] sm:$0xff] }
 0x851   : > { %v9856_v47 = vpop.f32.mrf.mxu1  ;;  %12913 = vtanh.f32 %v9853_v63  ;;  %v9855_v8 = vadd.f32 %v9854_v14, %v9662_v40  ;;  %v9664_v43 = vadd.f32 %v9663_v55, %v18795_v54  ;;  %v10123_v0 = vmul.f32 %v12900_v39, %v17340_v32  ;;  %v18803_v14 = vld [vmem:[#allocation190_spill] sm:$0xff] }
 0x852   : > { %v12902_v24 = vpop.eup %12901  ;;  %v9667_v36 = vpop.f32.mrf.mxu0  ;;  %v10269_v44 = vadd.f32 %v10268_v33, %v10120_v49 }
 0x853   : > { %v9860_v34 = vpop.f32.mrf.mxu1  ;;  %12915 = vtanh.f32 %v9855_v8  ;;  %v9857_v26 = vadd.f32 %v9856_v47, %v9664_v43  ;;  %v9668_v12 = vadd.f32 %v9667_v36, %v18796_v56  ;;  %v10124_v6 = vmul.f32 %v12902_v24, %v17344_v13  ;;  %v18805_v24 = vld [vmem:[#allocation192_spill] sm:$0xff] }
 0x854   : > { %v12904_v22 = vpop.eup %12903  ;;  %10270 = vadd.xlane.f32.xlu1 %v10269_v44  ;;  %v9669_v30 = vpop.f32.mrf.mxu0  ;;  %v10273_v28 = vadd.f32 %v18797_v4, %v10123_v0 }
 0x855   : > { %v9862_v42 = vpop.f32.mrf.mxu1  ;;  %12917 = vtanh.f32 %v9857_v26  ;;  %v9861_v5 = vadd.f32 %v9860_v34, %v9668_v12  ;;  %v9670_v27 = vadd.f32 %v9669_v30, %v18798_v41  ;;  %v10127_v61 = vmul.f32 %v12904_v22, %v17340_v32  ;;  %v18806_v30 = vld [vmem:[#allocation194_spill] sm:$0xff] }
 0x856   : > { %v12906_v19 = vpop.eup %12905  ;;  %v9671_v31 = vpop.f32.mrf.mxu0  ;;  %v10274_v53 = vadd.f32 %v10273_v28, %v10124_v6 }
 0x857   : > { %v9864_v52 = vpop.f32.mrf.mxu1  ;;  %12919 = vtanh.f32 %v9861_v5  ;;  %v9863_v59 = vadd.f32 %v9862_v42, %v9670_v27  ;;  %v9672_v51 = vadd.f32 %v9671_v31, %v18799_v23  ;;  %v10128_v45 = vmul.f32 %v12906_v19, %v17344_v13  ;;  %v18807_v27 = vld [vmem:[#allocation196_spill] sm:$0xff] }
 0x858   : > { %v12908_v37 = vpop.eup %12907  ;;  %10275 = vadd.xlane.f32.xlu0 %v10274_v53  ;;  %v9673_v1 = vpop.f32.mrf.mxu0  ;;  %v10278_v3 = vadd.f32 %v18800_v18, %v10127_v61  ;;  %v18808_v23 = vld [vmem:[#allocation200_spill] sm:$0xff] }
 0x859   : > { %v9866_v25 = vpop.f32.mrf.mxu1  ;;  %12921 = vtanh.f32 %v9863_v59  ;;  %v9865_v7 = vadd.f32 %v9864_v52, %v9672_v51  ;;  %v9674_v20 = vadd.f32 %v9673_v1, %v18801_v62  ;;  %v10131_v15 = vmul.f32 %v12908_v37, %v17340_v32 }
 0x85a   : > { %v12910_v38 = vpop.eup %12909  ;;  %v9677_v9 = vpop.f32.mrf.mxu0  ;;  %v10279_v57 = vadd.f32 %v10278_v3, %v10128_v45  ;;  %v18809_v3 = vld [vmem:[#allocation202_spill] sm:$0xff] }
 0x85b   : > { %v9870_v46 = vpop.f32.mrf.mxu1  ;;  %12923 = vtanh.f32 %v9865_v7  ;;  %v9867_v48 = vadd.f32 %v9866_v25, %v9674_v20  ;;  %v9678_v60 = vadd.f32 %v9677_v9, %v18802_v16  ;;  %v10132_v35 = vmul.f32 %v12910_v38, %v17344_v13  ;;  %v17497_v16 = vld [vmem:[#allocation2] ss:$0 sm:$0xff] }
 0x85c   : > { %v12912_v58 = vpop.eup %12911  ;;  %10280 = vadd.xlane.f32.xlu1 %v10279_v57  ;;  %v9679_v2 = vpop.f32.mrf.mxu0  ;;  %v10283_v10 = vadd.f32 %v18803_v14, %v10131_v15 }
 0x85d   : > { %v9872_v29 = vpop.f32.mrf.mxu1  ;;  %12925 = vtanh.f32 %v9867_v48  ;;  %v9871_v63 = vadd.f32 %v9870_v46, %v9678_v60  ;;  %v9680_v40 = vadd.f32 %v9679_v2, %v18804_v50  ;;  %v10135_v49 = vmul.f32 %v12912_v58, %v17340_v32  ;;  %v18810_v46 = vld [vmem:[#allocation204_spill] sm:$0xff] }
 0x85e   : > { %v12914_v39 = vpop.eup %12913  ;;  %v9681_v55 = vpop.f32.mrf.mxu0  ;;  %v10284_v21 = vadd.f32 %v10283_v10, %v10132_v35 }
 0x85f   : > { %v9874_v47 = vpop.f32.mrf.mxu1  ;;  %12927 = vtanh.f32 %v9871_v63  ;;  %v9873_v33 = vadd.f32 %v9872_v29, %v9680_v40  ;;  %v9682_v8 = vadd.f32 %v9681_v55, %v17323_v17  ;;  %v10136_v54 = vmul.f32 %v12914_v39, %v17344_v13 }
 0x860   : > { %v12916_v43 = vpop.eup %12915  ;;  %10285 = vadd.xlane.f32.xlu0 %v10284_v21  ;;  %v9683_v0 = vpop.f32.mrf.mxu0  ;;  %v10288_v36 = vadd.f32 %v18805_v24, %v10135_v49 }
 0x861   : > { %12929 = vtanh.f32 %v9873_v33  ;;  %v9875_v34 = vadd.f32 %v9874_v47, %v9682_v8  ;;  %v9684_v44 = vadd.f32 %v9683_v0, %v17326_v11  ;;  %v10139_v26 = vmul.f32 %v12916_v43, %v17340_v32  ;;  %v9876_v12 = vpop.f32.mrf.mxu1 }
 0x862   : > { %v12918_v56 = vpop.eup %12917  ;;  %v10289_v6 = vadd.f32 %v10288_v36, %v10136_v54 }
 0x863   : > { %12931 = vtanh.f32 %v9875_v34  ;;  %v9877_v22 = vadd.f32 %v9876_v12, %v9684_v44  ;;  %v10140_v17 = vmul.f32 %v12918_v56, %v17344_v13  ;;  %v10293_v42 = vadd.f32 %v18806_v30, %v10139_v26 }
 0x864   : > { %v12920_v4 = vpop.eup %12919  ;;  %10290 = vadd.xlane.f32.xlu1 %v10289_v6 }
 0x865   : > { %12933 = vtanh.f32 %v9877_v22  ;;  %v10294_v28 = vadd.f32 %v10293_v42, %v10140_v17  ;;  %v10143_v5 = vmul.f32 %v12920_v4, %v17340_v32 }
 0x866   : > { %v12922_v41 = vpop.eup %12921 }
 0x867   : > { %10295 = vadd.xlane.f32.xlu0 %v10294_v28  ;;  %v10144_v11 = vmul.f32 %v12922_v41, %v17344_v13  ;;  %v10298_v61 = vadd.f32 %v18807_v27, %v10143_v5 }
 0x868   : > { %v12924_v19 = vpop.eup %12923 }
 0x869   : > { %v10299_v31 = vadd.f32 %v10298_v61, %v10144_v11  ;;  %v10147_v52 = vmul.f32 %v12924_v19, %v17340_v32 }
 0x86a   : > { %v12926_v53 = vpop.eup %12925 }
 0x86b   : > { %10300 = vadd.xlane.f32.xlu1 %v10299_v31  ;;  %v10148_v59 = vmul.f32 %v12926_v53, %v17344_v13  ;;  %v10303_v51 = vadd.f32 %v18808_v23, %v10147_v52 }
 0x86c   : > { %v12928_v45 = vpop.eup %12927 }
 0x86d   : > { %v10304_v37 = vadd.f32 %v10303_v51, %v10148_v59  ;;  %v10151_v1 = vmul.f32 %v12928_v45, %v17340_v32 }
 0x86e   : > { %v12930_v25 = vpop.eup %12929 }
 0x86f   : > { %10305 = vadd.xlane.f32.xlu0 %v10304_v37  ;;  %v10152_v18 = vmul.f32 %v12930_v25, %v17344_v13  ;;  %v10308_v7 = vadd.f32 %v18809_v3, %v10151_v1 }
 0x870   : > { %v12932_v62 = vpop.eup %12931 }
 0x871   : > { %v10309_v20 = vadd.f32 %v10308_v7, %v10152_v18  ;;  %v10155_v15 = vmul.f32 %v12932_v62, %v17340_v32 }
 0x872   : > { %v12934_v38 = vpop.eup %12933 }
 0x873   : > { %10310 = vadd.xlane.f32.xlu1 %v10309_v20  ;;  %v10156_v9 = vmul.f32 %v12934_v38, %v17344_v13  ;;  %v10313_v57 = vadd.f32 %v18810_v46, %v10155_v15 }
 0x875   : > { %v10314_v48 = vadd.f32 %v10313_v57, %v10156_v9 }
 0x877   : > { %10315 = vadd.xlane.f32.xlu0 %v10314_v48 }
 0x885   : > { %v10161_v32 = vpop.xlane.xlu0 %10160 }
 0x886   : > { %v10324_v13 = vadd.f32 %v17497_v16, %v10161_v32 }
 0x888   : > { %10357 = vst.msk [vmem:[%s17504_s15] sm:$0xff] %vm10356_vm3, %v10324_v13 }
 0x889   : > { %v10166_v60 = vpop.xlane.xlu1 %10165 }
 0x88a   : > { %v10325_v35 = vadd.f32 %v17497_v16, %v10166_v60 }
 0x88c   : > { %10358 = vst.msk [vmem:[%s17504_s15 + $0x8] sm:$0xff] %vm10356_vm3, %v10325_v35 }
 0x88d   : > { %v10171_v58 = vpop.xlane.xlu0 %10170 }
 0x88e   : > { %v10326_v2 = vadd.f32 %v17497_v16, %v10171_v58 }
 0x890   : > { %10359 = vst.msk [vmem:[%s17504_s15 + $0x10] sm:$0xff] %vm10356_vm3, %v10326_v2 }
 0x891   : > { %v10176_v29 = vpop.xlane.xlu0 %10175 }
 0x892   : > { %v10327_v14 = vadd.f32 %v17497_v16, %v10176_v29 }
 0x894   : > { %10360 = vst.msk [vmem:[%s17504_s15 + $0x18] sm:$0xff] %vm10356_vm3, %v10327_v14 }
 0x895   : > { %v10181_v10 = vpop.xlane.xlu1 %10180 }
 0x896   : > { %v10328_v63 = vadd.f32 %v17497_v16, %v10181_v10 }
 0x898   : > { %10361 = vst.msk [vmem:[%s17504_s15 + $0x20] sm:$0xff] %vm10356_vm3, %v10328_v63 }
 0x899   : > { %v10186_v50 = vpop.xlane.xlu0 %10185 }
 0x89a   : > { %v10329_v40 = vadd.f32 %v17497_v16, %v10186_v50 }
 0x89c   : > { %10362 = vst.msk [vmem:[%s17504_s15 + $0x28] sm:$0xff] %vm10356_vm3, %v10329_v40 }
 0x89d   : > { %v10191_v49 = vpop.xlane.xlu1 %10190 }
 0x89e   : > { %v10330_v39 = vadd.f32 %v17497_v16, %v10191_v49 }
 0x8a0   : > { %10363 = vst.msk [vmem:[%s17504_s15 + $0x30] sm:$0xff] %vm10356_vm3, %v10330_v39 }
 0x8a1   : > { %v10196_v55 = vpop.xlane.xlu0 %10195 }
 0x8a2   : > { %v10331_v47 = vadd.f32 %v17497_v16, %v10196_v55 }
 0x8a4   : > { %10364 = vst.msk [vmem:[%s17504_s15 + $0x38] sm:$0xff] %vm10356_vm3, %v10331_v47 }
 0x8a5   : > { %v10201_v21 = vpop.xlane.xlu1 %10200 }
 0x8a6   : > { %v10332_v33 = vadd.f32 %v17497_v16, %v10201_v21 }
 0x8a8   : > { %10365 = vst.msk [vmem:[%s17504_s15 + $0x40] sm:$0xff] %vm10356_vm3, %v10332_v33 }
 0x8a9   : > { %v10206_v8 = vpop.xlane.xlu0 %10205 }
 0x8aa   : > { %v10333_v54 = vadd.f32 %v17497_v16, %v10206_v8 }
 0x8ac   : > { %10366 = vst.msk [vmem:[%s17504_s15 + $0x48] sm:$0xff] %vm10356_vm3, %v10333_v54 }
 0x8ad   : > { %v10211_v43 = vpop.xlane.xlu1 %10210 }
 0x8ae   : > { %v10334_v0 = vadd.f32 %v17497_v16, %v10211_v43 }
 0x8b0   : > { %10367 = vst.msk [vmem:[%s17504_s15 + $0x50] sm:$0xff] %vm10356_vm3, %v10334_v0 }
 0x8b1   : > { %v10216_v24 = vpop.xlane.xlu0 %10215 }
 0x8b2   : > { %v10335_v36 = vadd.f32 %v17497_v16, %v10216_v24 }
 0x8b4   : > { %10368 = vst.msk [vmem:[%s17504_s15 + $0x58] sm:$0xff] %vm10356_vm3, %v10335_v36 }
 0x8b5   : > { %v10221_v34 = vpop.xlane.xlu1 %10220 }
 0x8b6   : > { %v10336_v44 = vadd.f32 %v17497_v16, %v10221_v34 }
 0x8b8   : > { %10369 = vst.msk [vmem:[%s17504_s15 + $0x60] sm:$0xff] %vm10356_vm3, %v10336_v44 }
 0x8b9   : > { %v10226_v26 = vpop.xlane.xlu0 %10225 }
 0x8ba   : > { %v10337_v56 = vadd.f32 %v17497_v16, %v10226_v26 }
 0x8bc   : > { %10370 = vst.msk [vmem:[%s17504_s15 + $0x68] sm:$0xff] %vm10356_vm3, %v10337_v56 }
 0x8bd   : > { %v10231_v12 = vpop.xlane.xlu1 %10230 }
 0x8be   : > { %v10338_v6 = vadd.f32 %v17497_v16, %v10231_v12 }
 0x8c0   : > { %10371 = vst.msk [vmem:[%s17504_s15 + $0x70] sm:$0xff] %vm10356_vm3, %v10338_v6 }
 0x8c1   : > { %v10236_v22 = vpop.xlane.xlu0 %10235 }
 0x8c2   : > { %v10339_v17 = vadd.f32 %v17497_v16, %v10236_v22 }
 0x8c4   : > { %10372 = vst.msk [vmem:[%s17504_s15 + $0x78] sm:$0xff] %vm10356_vm3, %v10339_v17 }
 0x8c5   : > { %v10241_v30 = vpop.xlane.xlu1 %10240 }
 0x8c6   : > { %v10340_v42 = vadd.f32 %v17497_v16, %v10241_v30 }
 0x8c8   : > { %10373 = vst.msk [vmem:[%s17504_s15 + $0x80] sm:$0xff] %vm10356_vm3, %v10340_v42 }
 0x8c9   : > { %v10246_v4 = vpop.xlane.xlu0 %10245 }
 0x8ca   : > { %v10341_v28 = vadd.f32 %v17497_v16, %v10246_v4 }
 0x8cc   : > { %10374 = vst.msk [vmem:[%s17504_s15 + $0x88] sm:$0xff] %vm10356_vm3, %v10341_v28 }
 0x8cd   : > { %v10251_v5 = vpop.xlane.xlu1 %10250 }
 0x8ce   : > { %v10342_v41 = vadd.f32 %v17497_v16, %v10251_v5 }
 0x8d0   : > { %10375 = vst.msk [vmem:[%s17504_s15 + $0x90] sm:$0xff] %vm10356_vm3, %v10342_v41 }
 0x8d1   : > { %v10256_v11 = vpop.xlane.xlu0 %10255 }
 0x8d2   : > { %v10343_v27 = vadd.f32 %v17497_v16, %v10256_v11 }
 0x8d4   : > { %10376 = vst.msk [vmem:[%s17504_s15 + $0x98] sm:$0xff] %vm10356_vm3, %v10343_v27 }
 0x8d5   : > { %v10261_v61 = vpop.xlane.xlu1 %10260 }
 0x8d6   : > { %v10344_v19 = vadd.f32 %v17497_v16, %v10261_v61 }
 0x8d8   : > { %10377 = vst.msk [vmem:[%s17504_s15 + $0xa0] sm:$0xff] %vm10356_vm3, %v10344_v19 }
 0x8d9   : > { %v10266_v31 = vpop.xlane.xlu0 %10265 }
 0x8da   : > { %v10345_v52 = vadd.f32 %v17497_v16, %v10266_v31 }
 0x8dc   : > { %10378 = vst.msk [vmem:[%s17504_s15 + $0xa8] sm:$0xff] %vm10356_vm3, %v10345_v52 }
 0x8dd   : > { %v10271_v53 = vpop.xlane.xlu1 %10270 }
 0x8de   : > { %v10346_v59 = vadd.f32 %v17497_v16, %v10271_v53 }
 0x8e0   : > { %10379 = vst.msk [vmem:[%s17504_s15 + $0xb0] sm:$0xff] %vm10356_vm3, %v10346_v59 }
 0x8e1   : > { %v10276_v23 = vpop.xlane.xlu0 %10275 }
 0x8e2   : > { %v10347_v51 = vadd.f32 %v17497_v16, %v10276_v23 }
 0x8e4   : > { %10380 = vst.msk [vmem:[%s17504_s15 + $0xb8] sm:$0xff] %vm10356_vm3, %v10347_v51 }
 0x8e5   : > { %v10281_v45 = vpop.xlane.xlu1 %10280 }
 0x8e6   : > { %v10348_v37 = vadd.f32 %v17497_v16, %v10281_v45 }
 0x8e8   : > { %10381 = vst.msk [vmem:[%s17504_s15 + $0xc0] sm:$0xff] %vm10356_vm3, %v10348_v37 }
 0x8e9   : > { %v10286_v1 = vpop.xlane.xlu0 %10285 }
 0x8ea   : > { %v10349_v25 = vadd.f32 %v17497_v16, %v10286_v1 }
 0x8ec   : > { %10382 = vst.msk [vmem:[%s17504_s15 + $0xc8] sm:$0xff] %vm10356_vm3, %v10349_v25 }
 0x8ed   : > { %v10291_v18 = vpop.xlane.xlu1 %10290 }
 0x8ee   : > { %v10350_v3 = vadd.f32 %v17497_v16, %v10291_v18 }
 0x8f0   : > { %10383 = vst.msk [vmem:[%s17504_s15 + $0xd0] sm:$0xff] %vm10356_vm3, %v10350_v3  ;;  %v10296_v7 = vpop.xlane.xlu0 %10295 }
 0x8f1   : > { %v10351_v62 = vadd.f32 %v17497_v16, %v10296_v7 }
 0x8f3   : > { %10384 = vst.msk [vmem:[%s17504_s15 + $0xd8] sm:$0xff] %vm10356_vm3, %v10351_v62 }
 0x8f4   : > { %v10301_v20 = vpop.xlane.xlu1 %10300 }
 0x8f5   : > { %v10352_v15 = vadd.f32 %v17497_v16, %v10301_v20 }
 0x8f7   : > { %10385 = vst.msk [vmem:[%s17504_s15 + $0xe0] sm:$0xff] %vm10356_vm3, %v10352_v15 }
 0x8f8   : > { %v10306_v38 = vpop.xlane.xlu0 %10305 }
 0x8f9   : > { %v10353_v9 = vadd.f32 %v17497_v16, %v10306_v38 }
 0x8fb   : > { %10386 = vst.msk [vmem:[%s17504_s15 + $0xe8] sm:$0xff] %vm10356_vm3, %v10353_v9 }
 0x8fc   : > { %v10311_v46 = vpop.xlane.xlu1 %10310 }
 0x8fd   : > { %v10354_v57 = vadd.f32 %v17497_v16, %v10311_v46 }
 0x8ff   : > { %10387 = vst.msk [vmem:[%s17504_s15 + $0xf0] sm:$0xff] %vm10356_vm3, %v10354_v57 }
 0x900   : > { %v10316_v48 = vpop.xlane.xlu0 %10315 }
 0x901   : > { %v10355_v32 = vadd.f32 %v17497_v16, %v10316_v48 }
 0x903   : > { %10388 = vst.msk [vmem:[%s17504_s15 + $0xf8] sm:$0xff] %vm10356_vm3, %v10355_v32 }
 0x904 PF: > { %s18812_s18 = smov %s13351_s20  ;;  %p28_p10 = scmp.ge.s32.totalorder %s13351_s20, 4  }
 0x905   : > { %s18813_s20 = smov %s13182_s21  ;;  %s18814_s21 = smov %s13186_s22 }
 0x906   : > { %s18815_s22 = smov %s13360_s14  ;;  %s18816_s23 = smov %s18812_s18 }
 0x907   :  { %30 = sbr.rel (!%p28_p10) target bundleno = 10 (0xa), region = 131 }
 0x90c   :  { %10411 = vsyncpa [#allocation4], 1 }
 0x90d   :  { %10413 = vsyncpa [#allocation4 + $0x1], 1 }
 0x90e   :  { %10414 = vsyncpa [#allocation6], 1 }

</bundles_post_ra>
